<compile_context>
chip_gen: v7x
topology: tpu7x:2x2x1
jax: 0.10.0
libtpu: 0.0.40
codegen_flags: <defaults>
</compile_context>

<pallas_src>
import numpy as np
import jax
import jax.numpy as jnp
from jax.experimental import pallas as pl
from jax.experimental.pallas import tpu as pltpu

S = 43  # 42 icosahedron vertices + center point


def _round_up(x: int, m: int) -> int:
    return ((x + m - 1) // m) * m


def _default_num_row_tiles() -> int:
    """One row tile per TensorCore: v5e/v6e have 1 TC, v7x has 2."""
    try:
        kind = jax.devices()[0].device_kind.lower()
    except Exception:
        return 1
    return 2 if "v7" in kind else 1


def _sample_hypothesis_kernel(mesh_ref, delta_ref, comp_ref, out_ref):
    # mesh_ref:  (tile_n, 3)    f32 VMEM   mesh vertex coordinates
    # delta_ref: (1, S*3)       f32 VMEM   sample_delta flattened row-major
    # comp_ref:  (1, S*3)       i32 VMEM   lane -> coordinate index (k % 3)
    # out_ref:   (tile_n, S*3)  f32 VMEM   lane-dense output slab
    mesh = mesh_ref[...]
    comp = comp_ref[...]
    x = mesh[:, 0:1]            # (tile_n, 1): lane-broadcasts in the selects
    y = mesh[:, 1:2]
    z = mesh[:, 2:3]
    # Replicate (x, y, z) across the S sample slots along the lane dimension
    # with exact selects (comp is 0,1,2,0,1,2,... along lanes).
    tiled = jnp.where(comp == 0, x, jnp.where(comp == 1, y, z))   # (tile_n, S*3)
    out_ref[...] = tiled + delta_ref[...]          # delta broadcasts over sublanes


def sample_hypothesis_slab(mesh_coords: jax.Array, sample_delta: jax.Array,
                           *, num_row_tiles: int | None = None) -> jax.Array:
    """Fast path: mesh (N, 3), delta (S, 3) -> (N, S*3) lane-dense slab with
    slab[n, s*3 + c] == mesh_coords[n, c] + sample_delta[s, c]."""
    n = mesh_coords.shape[0]
    s = sample_delta.shape[0]
    sd = 3 * s
    if num_row_tiles is None:
        num_row_tiles = _default_num_row_tiles()

    mesh = mesh_coords.astype(jnp.float32)                         # (N, 3)
    delta_flat = sample_delta.astype(jnp.float32).reshape(1, sd)    # (1, S*3)
    # Host-side constant: which of (x, y, z) each output lane carries.
    comp = jnp.asarray((np.arange(sd, dtype=np.int32) % 3).reshape(1, sd))

    if num_row_tiles <= 1 or n <= 8:
        tile_n = n                                   # single full-extent block
    else:
        # Non-full row tiles must be a multiple of 8 (f32 sublane tiling).
        tile_n = min(n, _round_up(pl.cdiv(n, num_row_tiles), 8))
    grid = (pl.cdiv(n, tile_n),)

    return pl.pallas_call(
        _sample_hypothesis_kernel,
        out_shape=jax.ShapeDtypeStruct((n, sd), jnp.float32),
        grid=grid,
        in_specs=[
            pl.BlockSpec((tile_n, 3), lambda i: (i, 0)),
            pl.BlockSpec((1, sd), lambda i: (0, 0)),
            pl.BlockSpec((1, sd), lambda i: (0, 0)),
        ],
        out_specs=pl.BlockSpec((tile_n, sd), lambda i: (i, 0)),
        compiler_params=pltpu.CompilerParams(
            dimension_semantics=("parallel",),
            vmem_limit_bytes=32 * 1024 * 1024,
        ),
    )(mesh, delta_flat, comp)


def sample_hypothesis(mesh_coords: jax.Array, sample_delta: jax.Array,
                      *, num_row_tiles: int | None = None) -> jax.Array:
    """Module-exact interface: mesh (N, 3), delta (S, 3) -> (N*S, 3).

    NOTE: the final reshape is NOT free on TPU (tiled HBM layouts make it a
    relayout copy with the minor dim padded 3 -> 128 lanes).  Prefer consuming
    the slab from sample_hypothesis_slab() (slab[n, s*3 + c]) or fusing this
    broadcast-add into the consumer; this wrapper exists only to match the
    PyTorch module's output exactly.
    """
    n = mesh_coords.shape[0]
    s = sample_delta.shape[0]
    slab = sample_hypothesis_slab(mesh_coords, sample_delta,
                                  num_row_tiles=num_row_tiles)
    return slab.reshape(n * s, 3)


def make_sample_coord(radius: float = 0.05) -> np.ndarray:
    """Deterministic (43, 3) sample coordinates: 42 points on a sphere of the
    given radius (Fibonacci lattice, stand-in for subdivided icosahedron
    vertices) plus the center (0, 0, 0)."""
    n_pts = 42
    i = np.arange(n_pts, dtype=np.float64)
    golden = (1.0 + np.sqrt(5.0)) / 2.0
    z = 1.0 - 2.0 * (i + 0.5) / n_pts
    r = np.sqrt(np.maximum(0.0, 1.0 - z * z))
    theta = 2.0 * np.pi * i / golden
    pts = np.stack([r * np.cos(theta), r * np.sin(theta), z], axis=1) * radius
    coords = np.concatenate([pts, np.zeros((1, 3))], axis=0)  # (43, 3)
    return coords.astype(np.float32)


def reference(mesh_coords: jax.Array, sample_delta: jax.Array) -> jax.Array:
    center = jnp.tile(mesh_coords[:, None, :], (1, sample_delta.shape[0], 1))
    return (center + sample_delta[None, :, :]).reshape(-1, 3)


if __name__ == "__main__":
    # Module spec: N = 2466 mesh vertices, S = 43 samples per vertex.
    N = 2466

    sample_coord = make_sample_coord()                 # (43, 3) deterministic
    sample_delta = jnp.asarray(sample_coord, jnp.float32)

    key = jax.random.PRNGKey(0)
    mesh_coords = jax.random.normal(key, (N, 3), dtype=jnp.float32)

    # Fast path: lane-dense slab (what consumers should use).
    slab = jax.block_until_ready(sample_hypothesis_slab(mesh_coords, sample_delta))
    assert slab.shape == (N, S * 3), slab.shape
    assert slab.dtype == jnp.float32, slab.dtype

    # Module-exact path: (N*S, 3).
    out = jax.block_until_ready(sample_hypothesis(mesh_coords, sample_delta))
    assert out.shape == (N * S, 3), out.shape
    assert out.dtype == jnp.float32, out.dtype

    ref = reference(mesh_coords, sample_delta)
    np.testing.assert_allclose(np.asarray(out), np.asarray(ref),
                               rtol=1e-6, atol=1e-6)
    np.testing.assert_allclose(np.asarray(slab).reshape(N * S, 3),
                               np.asarray(ref), rtol=1e-6, atol=1e-6)

    print("KERNEL_OK")
</pallas_src>

<mosaic_0001>
module attributes {stable_mosaic.version = 11 : i64} {
  func.func @_sample_hypothesis_kernel(%arg0: i32, %arg1: memref<2466x3xf32, #tpu.memory_space<vmem>>, %arg2: memref<1x129xf32, #tpu.memory_space<vmem>>, %arg3: memref<1x129xi32, #tpu.memory_space<vmem>>, %arg4: memref<2466x129xf32, #tpu.memory_space<vmem>>) attributes {dimension_semantics = [#tpu.dimension_semantics<parallel>], iteration_bounds = array<i64: 1>, scalar_prefetch = 0 : i64, scratch_operands = 0 : i64, tpu.core_type = #tpu.core_type<tc>, window_params = [{transform_indices = @transform_0, window_bounds = array<i64: 2466, 3>}, {pipeline_mode = #tpu.pipeline_mode<synchronous>, transform_indices = @transform_1, window_bounds = array<i64: 1, 129>}, {pipeline_mode = #tpu.pipeline_mode<synchronous>, transform_indices = @transform_2, window_bounds = array<i64: 1, 129>}, {transform_indices = @transform_3, window_bounds = array<i64: 2466, 129>}]} {
    %c0 = arith.constant 0 : index
    %c0_0 = arith.constant 0 : index
    %0 = vector.load %arg1[%c0, %c0_0] : memref<2466x3xf32, #tpu.memory_space<vmem>>, vector<2466x3xf32>
    %c0_1 = arith.constant 0 : index
    %c0_2 = arith.constant 0 : index
    %1 = vector.load %arg3[%c0_1, %c0_2] : memref<1x129xi32, #tpu.memory_space<vmem>>, vector<1x129xi32>
    %2 = vector.extract_strided_slice %0 {offsets = [0, 0], sizes = [2466, 1], strides = [1, 1]} : vector<2466x3xf32> to vector<2466x1xf32>
    %3 = vector.extract_strided_slice %0 {offsets = [0, 1], sizes = [2466, 1], strides = [1, 1]} : vector<2466x3xf32> to vector<2466x1xf32>
    %4 = vector.extract_strided_slice %0 {offsets = [0, 2], sizes = [2466, 1], strides = [1, 1]} : vector<2466x3xf32> to vector<2466x1xf32>
    %c0_i32 = arith.constant 0 : i32
    %5 = vector.broadcast %c0_i32 : i32 to vector<1x129xi32>
    %6 = arith.cmpi eq, %1, %5 : vector<1x129xi32>
    %c1_i32 = arith.constant 1 : i32
    %7 = vector.broadcast %c1_i32 : i32 to vector<1x129xi32>
    %8 = arith.cmpi eq, %1, %7 : vector<1x129xi32>
    %9 = vector.shape_cast %8 : vector<1x129xi1> to vector<1x129xi1>
    %10 = vector.broadcast %9 : vector<1x129xi1> to vector<2466x129xi1>
    %11 = vector.shape_cast %3 : vector<2466x1xf32> to vector<2466x1xf32>
    %12 = vector.broadcast %11 : vector<2466x1xf32> to vector<2466x129xf32>
    %13 = vector.shape_cast %4 : vector<2466x1xf32> to vector<2466x1xf32>
    %14 = vector.broadcast %13 : vector<2466x1xf32> to vector<2466x129xf32>
    %15 = arith.select %10, %12, %14 : vector<2466x129xi1>, vector<2466x129xf32>
    %16 = vector.shape_cast %6 : vector<1x129xi1> to vector<1x129xi1>
    %17 = vector.broadcast %16 : vector<1x129xi1> to vector<2466x129xi1>
    %18 = vector.shape_cast %2 : vector<2466x1xf32> to vector<2466x1xf32>
    %19 = vector.broadcast %18 : vector<2466x1xf32> to vector<2466x129xf32>
    %20 = arith.select %17, %19, %15 : vector<2466x129xi1>, vector<2466x129xf32>
    %c0_3 = arith.constant 0 : index
    %c0_4 = arith.constant 0 : index
    %21 = vector.load %arg2[%c0_3, %c0_4] : memref<1x129xf32, #tpu.memory_space<vmem>>, vector<1x129xf32>
    %22 = vector.broadcast %21 : vector<1x129xf32> to vector<2466x129xf32>
    %23 = arith.addf %20, %22 : vector<2466x129xf32>
    %c0_5 = arith.constant 0 : index
    %c0_6 = arith.constant 0 : index
    %24 = vector.load %arg4[%c0_5, %c0_6] : memref<2466x129xf32, #tpu.memory_space<vmem>>, vector<2466x129xf32>
    tpu.vector_store %arg4[%c0_5, %c0_6], %23 {strides = array<i32>} : memref<2466x129xf32, #tpu.memory_space<vmem>>, vector<2466x129xf32>,
    return
  }
  func.func @transform_0(%arg0: i32) -> (i32, i32) {
    %c0_i32 = arith.constant 0 : i32
    %c0_i32_0 = arith.constant 0 : i32
    return %arg0, %c0_i32 : i32, i32
  }
  func.func @transform_1(%arg0: i32) -> (i32, i32) {
    %c0_i32 = arith.constant 0 : i32
    %c0_i32_0 = arith.constant 0 : i32
    %c0_i32_1 = arith.constant 0 : i32
    return %c0_i32, %c0_i32_0 : i32, i32
  }
  func.func @transform_2(%arg0: i32) -> (i32, i32) {
    %c0_i32 = arith.constant 0 : i32
    %c0_i32_0 = arith.constant 0 : i32
    %c0_i32_1 = arith.constant 0 : i32
    return %c0_i32, %c0_i32_0 : i32, i32
  }
  func.func @transform_3(%arg0: i32) -> (i32, i32) {
    %c0_i32 = arith.constant 0 : i32
    %c0_i32_0 = arith.constant 0 : i32
    return %arg0, %c0_i32 : i32, i32
  }
}

</mosaic_0001>

<bundles_post_ra>
// kernel: tpu_custom_call.1
= control target key start
LH: loop header
LB: loop body
LE: loop exit
PB: predicated region body
PF: predicated region fallthrough
CT: control target
= control target key end

     0   :  { %8 = vsyncpa [#allocation3], 0  ;;  %s18136_s0 = inlined_call_operand.vmem [shape: f32[2466,3], index: 0, kind: input, shape index: {}]   ;;  %s18137_s1 = inlined_call_operand.hbm [shape: f32[1,129], index: 1, kind: input, shape index: {}]   ;;  %s18138_s2 = inlined_call_operand.hbm [shape: s32[1,129], index: 2, kind: input, shape index: {}]   ;;  %s18139_s3 = inlined_call_operand.vmem [shape: f32[2466,129], index: 3, kind: output, shape index: {}]  }
   0x1   :  { %9 = vsyncpa [#allocation5], 0  ;;  %s7558_s12 = smov [#allocation2]   ;;  %s7559_s14 = smov [#allocation4]  }
   0x2   :  { %s18_s13 = sshll.u32 %s7558_s12, 4  ;;  %s28_s15 = sshll.u32 %s7559_s14, 4  ;;  %s19_s13 = int_to_ptr.vmem [resolvable:$true] %s18_s13  ;;  %s29_s15 = int_to_ptr.vmem [resolvable:$true] %s28_s15 }
   0x3   :  { %s7510_s18 = scalar_lea.hbm %s18137_s1, 32 }
   0x4   :  { %p7511_p0 = scmp.ne.s32.totalorder %s18137_s1, %s7510_s18  ;;  %p7514_p1 = scmp.lt.u32.totalorder %s7510_s18, %s18137_s1 }
   0x6   :  { %p7516_p2 = pnand %p7514_p1, %p7511_p0 }
   0x8   :  { %7519 = shalt.err (!%p7516_p2)
}
   0x9   :  { %s7520_s23 = scalar_lea.vmem %s19_s13, 32  ;;  %p7525_p4 = scmp.lt.s32.totalorder %s19_s13, %s19_s13 }
   0xa   :  { %p7521_p3 = scmp.ne.s32.totalorder %s19_s13, %s7520_s23  ;;  %p7526_p5 = scmp.lt.s32.totalorder %s7520_s23, %s7520_s23 }
   0xc   :  { %p7527_p6 = por %p7526_p5, %p7525_p4 }
   0xe   :  { %p7528_p7 = pnand %p7527_p6, %p7521_p3 }
  0x10   :  { %7531 = shalt.err (!%p7528_p7)
}
  0x11   :  { %21 = dma.hbm_to_vmem [thread:$0]  %s18137_s1, 32, %s19_s13, [#allocation3]  }
  0x12   :  { %s7532_s28 = scalar_lea.hbm %s18138_s2, 32 }
  0x13   :  { %p7533_p8 = scmp.ne.s32.totalorder %s18138_s2, %s7532_s28  ;;  %p7536_p9 = scmp.lt.u32.totalorder %s7532_s28, %s18138_s2 }
  0x15   :  { %p7538_p10 = pnand %p7536_p9, %p7533_p8 }
  0x17   :  { %7541 = shalt.err (!%p7538_p10)
}
  0x18   :  { %s7542_s6 = scalar_lea.vmem %s29_s15, 32  ;;  %p7547_p12 = scmp.lt.s32.totalorder %s29_s15, %s29_s15 }
  0x19   :  { %p7543_p11 = scmp.ne.s32.totalorder %s29_s15, %s7542_s6  ;;  %p7548_p13 = scmp.lt.s32.totalorder %s7542_s6, %s7542_s6 }
  0x1b   :  { %p7549_p0 = por %p7548_p13, %p7547_p12 }
  0x1d   :  { %p7550_p1 = pnand %p7549_p0, %p7543_p11 }
  0x1f   :  { %7553 = shalt.err (!%p7550_p1)
}
  0x20   :  { %31 = dma.hbm_to_vmem [thread:$0]  %s18138_s2, 32, %s29_s15, [#allocation5]  }
  0x21   :  { %7554 = dma.done.wait [#allocation3], 32  }
  0x22   :  { %7555 = vsyncadd [#allocation3], 4294967264 }
  0x23   :  { %7556 = dma.done.wait [#allocation5], 32  }
  0x24   :  { %7557 = vsyncadd [#allocation5], 4294967264  ;;  %v7560_v0 = vmov 1   ;;  %v40_v1 = vld [vmem:[%s18136_s0 + $0x10] sm:$0xff]  ;;  %v38_v2 = vld [vmem:[%s18136_s0] sm:$0xff]  ;;  %vm6256_vm6 = vcmask 7168  }
  0x25   :  { %6887 = vset.pattern.permute.xlu1 %v7560_v0  ;;  %6886 = vset.pattern.permute.xlu0 %v7560_v0  ;;  %v41_v3 = vld [vmem:[%s18136_s0 + $0x18] sm:$0xff]  ;;  %v39_v4 = vld [vmem:[%s18136_s0 + $0x8] sm:$0xff]  ;;  %v42_v6 = vld [vmem:[%s18136_s0 + $0x20] sm:$0xff]  ;;  %vm6873_vm7 = vcmask 1024  }
  0x26   :  { %373 = vperm.xlu1 %6887, %v40_v1   ;;  %363 = vperm.xlu0 %6886, %v38_v2   ;;  %v43_v5 = vld [vmem:[%s18136_s0 + $0x28] sm:$0xff]  ;;  %v45_v7 = vld [vmem:[%s18136_s0 + $0x38] sm:$0xff]  ;;  %v44_v8 = vld [vmem:[%s18136_s0 + $0x30] sm:$0xff] }
  0x27   :  { %v47_v9 = vld [vmem:[%s18136_s0 + $0x48] sm:$0xff]  ;;  %v46_v10 = vld [vmem:[%s18136_s0 + $0x40] sm:$0xff]  ;;  %v49_v11 = vld [vmem:[%s18136_s0 + $0x58] sm:$0xff] }
  0x28   :  { %v48_v12 = vld [vmem:[%s18136_s0 + $0x50] sm:$0xff]  ;;  %v51_v13 = vld [vmem:[%s18136_s0 + $0x68] sm:$0xff]  ;;  %v50_v14 = vld [vmem:[%s18136_s0 + $0x60] sm:$0xff] }
  0x29   :  { %v53_v15 = vld [vmem:[%s18136_s0 + $0x78] sm:$0xff]  ;;  %v52_v16 = vld [vmem:[%s18136_s0 + $0x70] sm:$0xff]  ;;  %v55_v17 = vld [vmem:[%s18136_s0 + $0x88] sm:$0xff] }
  0x2a   :  { %378 = vperm.xlu1 %6887, %v41_v3   ;;  %368 = vperm.xlu0 %6886, %v39_v4   ;;  %v54_v18 = vld [vmem:[%s18136_s0 + $0x80] sm:$0xff]  ;;  %v57_v19 = vld [vmem:[%s18136_s0 + $0x98] sm:$0xff]  ;;  %v56_v20 = vld [vmem:[%s18136_s0 + $0x90] sm:$0xff] }
  0x2b   :  { %v59_v21 = vld [vmem:[%s18136_s0 + $0xa8] sm:$0xff]  ;;  %v58_v22 = vld [vmem:[%s18136_s0 + $0xa0] sm:$0xff]  ;;  %v61_v23 = vld [vmem:[%s18136_s0 + $0xb8] sm:$0xff] }
  0x2c   :  { %v60_v24 = vld [vmem:[%s18136_s0 + $0xb0] sm:$0xff]  ;;  %v63_v25 = vld [vmem:[%s18136_s0 + $0xc8] sm:$0xff]  ;;  %v62_v26 = vld [vmem:[%s18136_s0 + $0xc0] sm:$0xff] }
  0x2d   :  { %v65_v27 = vld [vmem:[%s18136_s0 + $0xd8] sm:$0xff]  ;;  %v64_v28 = vld [vmem:[%s18136_s0 + $0xd0] sm:$0xff]  ;;  %v67_v29 = vld [vmem:[%s18136_s0 + $0xe8] sm:$0xff] }
  0x2e   :  { %388 = vperm.xlu1 %6887, %v43_v5   ;;  %383 = vperm.xlu0 %6886, %v42_v6   ;;  %v66_v30 = vld [vmem:[%s18136_s0 + $0xe0] sm:$0xff]  ;;  %v69_v31 = vld [vmem:[%s18136_s0 + $0xf8] sm:$0xff]  ;;  %v68_v32 = vld [vmem:[%s18136_s0 + $0xf0] sm:$0xff] }
  0x2f   :  { %v71_v33 = vld [vmem:[%s18136_s0 + $0x108] sm:$0xff]  ;;  %v70_v34 = vld [vmem:[%s18136_s0 + $0x100] sm:$0xff]  ;;  %v73_v35 = vld [vmem:[%s18136_s0 + $0x118] sm:$0xff] }
  0x30   :  { %v72_v36 = vld [vmem:[%s18136_s0 + $0x110] sm:$0xff]  ;;  %v75_v37 = vld [vmem:[%s18136_s0 + $0x128] sm:$0xff]  ;;  %v74_v38 = vld [vmem:[%s18136_s0 + $0x120] sm:$0xff] }
  0x31   :  { %v77_v39 = vld [vmem:[%s18136_s0 + $0x138] sm:$0xff]  ;;  %v76_v40 = vld [vmem:[%s18136_s0 + $0x130] sm:$0xff]  ;;  %v79_v41 = vld [vmem:[%s18136_s0 + $0x148] sm:$0xff] }
  0x32   :  { %398 = vperm.xlu1 %6887, %v45_v7   ;;  %393 = vperm.xlu0 %6886, %v44_v8   ;;  %v78_v42 = vld [vmem:[%s18136_s0 + $0x140] sm:$0xff]  ;;  %v81_v43 = vld [vmem:[%s18136_s0 + $0x158] sm:$0xff]  ;;  %v80_v44 = vld [vmem:[%s18136_s0 + $0x150] sm:$0xff] }
  0x33   :  { %v83_v45 = vld [vmem:[%s18136_s0 + $0x168] sm:$0xff]  ;;  %v82_v46 = vld [vmem:[%s18136_s0 + $0x160] sm:$0xff]  ;;  %v85_v47 = vld [vmem:[%s18136_s0 + $0x178] sm:$0xff] }
  0x34   :  { %v84_v48 = vld [vmem:[%s18136_s0 + $0x170] sm:$0xff]  ;;  %v87_v49 = vld [vmem:[%s18136_s0 + $0x188] sm:$0xff]  ;;  %v86_v50 = vld [vmem:[%s18136_s0 + $0x180] sm:$0xff] }
  0x35   :  { %v89_v51 = vld [vmem:[%s18136_s0 + $0x198] sm:$0xff]  ;;  %v88_v52 = vld [vmem:[%s18136_s0 + $0x190] sm:$0xff]  ;;  %v91_v53 = vld [vmem:[%s18136_s0 + $0x1a8] sm:$0xff] }
  0x36   :  { %408 = vperm.xlu1 %6887, %v47_v9   ;;  %403 = vperm.xlu0 %6886, %v46_v10   ;;  %v90_v54 = vld [vmem:[%s18136_s0 + $0x1a0] sm:$0xff]  ;;  %v93_v55 = vld [vmem:[%s18136_s0 + $0x1b8] sm:$0xff]  ;;  %v92_v56 = vld [vmem:[%s18136_s0 + $0x1b0] sm:$0xff] }
  0x37   :  { %v95_v57 = vld [vmem:[%s18136_s0 + $0x1c8] sm:$0xff]  ;;  %v94_v58 = vld [vmem:[%s18136_s0 + $0x1c0] sm:$0xff]  ;;  %v97_v59 = vld [vmem:[%s18136_s0 + $0x1d8] sm:$0xff] }
  0x38   :  { %v96_v60 = vld [vmem:[%s18136_s0 + $0x1d0] sm:$0xff]  ;;  %v99_v61 = vld [vmem:[%s18136_s0 + $0x1e8] sm:$0xff]  ;;  %v98_v62 = vld [vmem:[%s18136_s0 + $0x1e0] sm:$0xff] }
  0x39   :  { %v101_v63 = vld [vmem:[%s18136_s0 + $0x1f8] sm:$0xff]  ;;  %v100_v0 = vld [vmem:[%s18136_s0 + $0x1f0] sm:$0xff]  ;;  %v103_v1 = vld [vmem:[%s18136_s0 + $0x208] sm:$0xff] }
  0x3a   :  { %418 = vperm.xlu1 %6887, %v49_v11   ;;  %413 = vperm.xlu0 %6886, %v48_v12   ;;  %v102_v2 = vld [vmem:[%s18136_s0 + $0x200] sm:$0xff]  ;;  %v105_v5 = vld [vmem:[%s18136_s0 + $0x218] sm:$0xff]  ;;  %v104_v6 = vld [vmem:[%s18136_s0 + $0x210] sm:$0xff] }
  0x3b   :  { %v107_v9 = vld [vmem:[%s18136_s0 + $0x228] sm:$0xff]  ;;  %v106_v10 = vld [vmem:[%s18136_s0 + $0x220] sm:$0xff] }
  0x3e   :  { %428 = vperm.xlu1 %6887, %v51_v13   ;;  %423 = vperm.xlu0 %6886, %v50_v14   ;;  %v109_v13 = vld [vmem:[%s18136_s0 + $0x238] sm:$0xff]  ;;  %v108_v14 = vld [vmem:[%s18136_s0 + $0x230] sm:$0xff] }
  0x42   :  { %438 = vperm.xlu1 %6887, %v53_v15   ;;  %433 = vperm.xlu0 %6886, %v52_v16  }
  0x46   :  { %448 = vperm.xlu1 %6887, %v55_v17   ;;  %443 = vperm.xlu0 %6886, %v54_v18   ;;  %v111_v17 = vld [vmem:[%s18136_s0 + $0x248] sm:$0xff]  ;;  %v110_v18 = vld [vmem:[%s18136_s0 + $0x240] sm:$0xff] }
  0x4a   :  { %458 = vperm.xlu1 %6887, %v57_v19   ;;  %453 = vperm.xlu0 %6886, %v56_v20  }
  0x4e   :  { %468 = vperm.xlu1 %6887, %v59_v21   ;;  %463 = vperm.xlu0 %6886, %v58_v22   ;;  %v113_v21 = vld [vmem:[%s18136_s0 + $0x258] sm:$0xff]  ;;  %v112_v22 = vld [vmem:[%s18136_s0 + $0x250] sm:$0xff] }
  0x52   :  { %478 = vperm.xlu1 %6887, %v61_v23   ;;  %473 = vperm.xlu0 %6886, %v60_v24  }
  0x56   :  { %488 = vperm.xlu1 %6887, %v63_v25   ;;  %483 = vperm.xlu0 %6886, %v62_v26   ;;  %v115_v25 = vld [vmem:[%s18136_s0 + $0x268] sm:$0xff]  ;;  %v114_v26 = vld [vmem:[%s18136_s0 + $0x260] sm:$0xff] }
  0x5a   :  { %498 = vperm.xlu1 %6887, %v65_v27   ;;  %493 = vperm.xlu0 %6886, %v64_v28  }
  0x5e   :  { %508 = vperm.xlu1 %6887, %v67_v29   ;;  %503 = vperm.xlu0 %6886, %v66_v30   ;;  %v117_v29 = vld [vmem:[%s18136_s0 + $0x278] sm:$0xff]  ;;  %v116_v30 = vld [vmem:[%s18136_s0 + $0x270] sm:$0xff] }
  0x62   :  { %518 = vperm.xlu1 %6887, %v69_v31   ;;  %513 = vperm.xlu0 %6886, %v68_v32  }
  0x66   :  { %528 = vperm.xlu1 %6887, %v71_v33   ;;  %523 = vperm.xlu0 %6886, %v70_v34   ;;  %v119_v33 = vld [vmem:[%s18136_s0 + $0x288] sm:$0xff]  ;;  %v118_v34 = vld [vmem:[%s18136_s0 + $0x280] sm:$0xff] }
  0x6a   :  { %538 = vperm.xlu1 %6887, %v73_v35   ;;  %533 = vperm.xlu0 %6886, %v72_v36  }
  0x6e   :  { %548 = vperm.xlu1 %6887, %v75_v37   ;;  %543 = vperm.xlu0 %6886, %v74_v38   ;;  %v121_v37 = vld [vmem:[%s18136_s0 + $0x298] sm:$0xff]  ;;  %v120_v38 = vld [vmem:[%s18136_s0 + $0x290] sm:$0xff] }
  0x72   :  { %558 = vperm.xlu1 %6887, %v77_v39   ;;  %553 = vperm.xlu0 %6886, %v76_v40  }
  0x76   :  { %568 = vperm.xlu1 %6887, %v79_v41   ;;  %563 = vperm.xlu0 %6886, %v78_v42   ;;  %v123_v41 = vld [vmem:[%s18136_s0 + $0x2a8] sm:$0xff]  ;;  %v122_v42 = vld [vmem:[%s18136_s0 + $0x2a0] sm:$0xff] }
  0x7a   :  { %578 = vperm.xlu1 %6887, %v81_v43   ;;  %573 = vperm.xlu0 %6886, %v80_v44  }
  0x7e   :  { %588 = vperm.xlu1 %6887, %v83_v45   ;;  %583 = vperm.xlu0 %6886, %v82_v46   ;;  %v125_v45 = vld [vmem:[%s18136_s0 + $0x2b8] sm:$0xff]  ;;  %v124_v46 = vld [vmem:[%s18136_s0 + $0x2b0] sm:$0xff] }
  0x82   :  { %598 = vperm.xlu1 %6887, %v85_v47   ;;  %593 = vperm.xlu0 %6886, %v84_v48  }
  0x86   :  { %608 = vperm.xlu1 %6887, %v87_v49   ;;  %603 = vperm.xlu0 %6886, %v86_v50   ;;  %v127_v49 = vld [vmem:[%s18136_s0 + $0x2c8] sm:$0xff]  ;;  %v126_v50 = vld [vmem:[%s18136_s0 + $0x2c0] sm:$0xff] }
  0x8a   :  { %618 = vperm.xlu1 %6887, %v89_v51   ;;  %613 = vperm.xlu0 %6886, %v88_v52  }
  0x8e   :  { %628 = vperm.xlu1 %6887, %v91_v53   ;;  %623 = vperm.xlu0 %6886, %v90_v54   ;;  %v129_v53 = vld [vmem:[%s18136_s0 + $0x2d8] sm:$0xff]  ;;  %v128_v54 = vld [vmem:[%s18136_s0 + $0x2d0] sm:$0xff] }
  0x92   :  { %638 = vperm.xlu1 %6887, %v93_v55   ;;  %633 = vperm.xlu0 %6886, %v92_v56  }
  0x96   :  { %648 = vperm.xlu1 %6887, %v95_v57   ;;  %643 = vperm.xlu0 %6886, %v94_v58   ;;  %v131_v57 = vld [vmem:[%s18136_s0 + $0x2e8] sm:$0xff]  ;;  %v130_v58 = vld [vmem:[%s18136_s0 + $0x2e0] sm:$0xff] }
  0x9a   :  { %658 = vperm.xlu1 %6887, %v97_v59   ;;  %653 = vperm.xlu0 %6886, %v96_v60  }
  0x9e   :  { %668 = vperm.xlu1 %6887, %v99_v61   ;;  %663 = vperm.xlu0 %6886, %v98_v62   ;;  %v133_v61 = vld [vmem:[%s18136_s0 + $0x2f8] sm:$0xff]  ;;  %v132_v62 = vld [vmem:[%s18136_s0 + $0x2f0] sm:$0xff] }
  0xa2   :  { %678 = vperm.xlu1 %6887, %v101_v63   ;;  %673 = vperm.xlu0 %6886, %v100_v0  }
  0xa5   :  { %v7805_v3 = vpop.permute.xlu1 %373  ;;  %v7807_v4 = vpop.permute.xlu0 %363 }
  0xa6   :  { %688 = vperm.xlu1 %6887, %v103_v1   ;;  %683 = vperm.xlu0 %6886, %v102_v2   ;;  %v135_v1 = vld [vmem:[%s18136_s0 + $0x308] sm:$0xff]  ;;  %v134_v2 = vld [vmem:[%s18136_s0 + $0x300] sm:$0xff] }
  0xa9   :  { %v7815_v7 = vpop.permute.xlu1 %378  ;;  %v7817_v8 = vpop.permute.xlu0 %368 }
  0xaa   :  { %698 = vperm.xlu1 %6887, %v105_v5   ;;  %693 = vperm.xlu0 %6886, %v104_v6  }
  0xad   :  { %v7825_v11 = vpop.permute.xlu1 %388  ;;  %v7827_v12 = vpop.permute.xlu0 %383 }
  0xae   :  { %708 = vperm.xlu1 %6887, %v107_v9   ;;  %703 = vperm.xlu0 %6886, %v106_v10   ;;  %v137_v9 = vld [vmem:[%s18136_s0 + $0x318] sm:$0xff]  ;;  %v136_v10 = vld [vmem:[%s18136_s0 + $0x310] sm:$0xff] }
  0xb1   :  { %v7835_v15 = vpop.permute.xlu1 %398  ;;  %v7837_v16 = vpop.permute.xlu0 %393 }
  0xb2   :  { %718 = vperm.xlu1 %6887, %v109_v13   ;;  %713 = vperm.xlu0 %6886, %v108_v14  }
  0xb5   :  { %v7845_v19 = vpop.permute.xlu1 %408  ;;  %v7847_v20 = vpop.permute.xlu0 %403 }
  0xb6   :  { %728 = vperm.xlu1 %6887, %v111_v17   ;;  %723 = vperm.xlu0 %6886, %v110_v18   ;;  %v139_v17 = vld [vmem:[%s18136_s0 + $0x328] sm:$0xff]  ;;  %v138_v18 = vld [vmem:[%s18136_s0 + $0x320] sm:$0xff] }
  0xb9   :  { %v7855_v23 = vpop.permute.xlu1 %418  ;;  %v7857_v24 = vpop.permute.xlu0 %413 }
  0xba   :  { %738 = vperm.xlu1 %6887, %v113_v21   ;;  %733 = vperm.xlu0 %6886, %v112_v22  }
  0xbd   :  { %v7865_v27 = vpop.permute.xlu1 %428  ;;  %v7867_v28 = vpop.permute.xlu0 %423 }
  0xbe   :  { %748 = vperm.xlu1 %6887, %v115_v25   ;;  %743 = vperm.xlu0 %6886, %v114_v26   ;;  %v141_v25 = vld [vmem:[%s18136_s0 + $0x338] sm:$0xff]  ;;  %v140_v26 = vld [vmem:[%s18136_s0 + $0x330] sm:$0xff] }
  0xc1   :  { %v7875_v31 = vpop.permute.xlu1 %438  ;;  %v7877_v32 = vpop.permute.xlu0 %433 }
  0xc2   :  { %758 = vperm.xlu1 %6887, %v117_v29   ;;  %753 = vperm.xlu0 %6886, %v116_v30  }
  0xc5   :  { %v7885_v35 = vpop.permute.xlu1 %448  ;;  %v7887_v36 = vpop.permute.xlu0 %443 }
  0xc6   :  { %768 = vperm.xlu1 %6887, %v119_v33   ;;  %763 = vperm.xlu0 %6886, %v118_v34   ;;  %v143_v33 = vld [vmem:[%s18136_s0 + $0x348] sm:$0xff]  ;;  %v142_v34 = vld [vmem:[%s18136_s0 + $0x340] sm:$0xff] }
  0xc9   :  { %v7895_v39 = vpop.permute.xlu1 %458  ;;  %v7897_v40 = vpop.permute.xlu0 %453 }
  0xca   :  { %778 = vperm.xlu1 %6887, %v121_v37   ;;  %773 = vperm.xlu0 %6886, %v120_v38  }
  0xcd   :  { %v7905_v43 = vpop.permute.xlu1 %468  ;;  %v7907_v44 = vpop.permute.xlu0 %463 }
  0xce   :  { %788 = vperm.xlu1 %6887, %v123_v41   ;;  %783 = vperm.xlu0 %6886, %v122_v42   ;;  %v145_v41 = vld [vmem:[%s18136_s0 + $0x358] sm:$0xff]  ;;  %v144_v42 = vld [vmem:[%s18136_s0 + $0x350] sm:$0xff] }
  0xd1   :  { %v7915_v47 = vpop.permute.xlu1 %478  ;;  %v7917_v48 = vpop.permute.xlu0 %473 }
  0xd2   :  { %18711 = vst [vmem:[#allocation8_spill] sm:$0xff] %v7915_v47  ;;  %798 = vperm.xlu1 %6887, %v125_v45   ;;  %793 = vperm.xlu0 %6886, %v124_v46  }
  0xd5   :  { %v7925_v51 = vpop.permute.xlu1 %488  ;;  %v7927_v52 = vpop.permute.xlu0 %483 }
  0xd6   :  { %18712 = vst [vmem:[#allocation9_spill] sm:$0xff] %v7925_v51  ;;  %808 = vperm.xlu1 %6887, %v127_v49   ;;  %803 = vperm.xlu0 %6886, %v126_v50   ;;  %v147_v49 = vld [vmem:[%s18136_s0 + $0x368] sm:$0xff]  ;;  %v146_v50 = vld [vmem:[%s18136_s0 + $0x360] sm:$0xff] }
  0xd7   :  { %v7260_v51 = vld [vmem:[%s18136_s0 + $0x1e0] sm:$0xff] }
  0xd9   :  { %v7935_v55 = vpop.permute.xlu1 %498  ;;  %v7937_v56 = vpop.permute.xlu0 %493 }
  0xda   :  { %18713 = vst [vmem:[#allocation10_spill] sm:$0xff] %v7935_v55  ;;  %18714 = vst [vmem:[#allocation11_spill] sm:$0xff] %v7937_v56  ;;  %818 = vperm.xlu1 %6887, %v129_v53   ;;  %813 = vperm.xlu0 %6886, %v128_v54  }
  0xdd   :  { %v7945_v59 = vpop.permute.xlu1 %508  ;;  %v7947_v60 = vpop.permute.xlu0 %503 }
  0xde   :  { %18715 = vst [vmem:[#allocation12_spill] sm:$0xff] %v7945_v59  ;;  %18716 = vst [vmem:[#allocation13_spill] sm:$0xff] %v7947_v60  ;;  %828 = vperm.xlu1 %6887, %v131_v57   ;;  %823 = vperm.xlu0 %6886, %v130_v58   ;;  %v149_v57 = vld [vmem:[%s18136_s0 + $0x378] sm:$0xff]  ;;  %v148_v58 = vld [vmem:[%s18136_s0 + $0x370] sm:$0xff] }
  0xe1   :  { %v7955_v63 = vpop.permute.xlu1 %518  ;;  %v7957_v0 = vpop.permute.xlu0 %513 }
  0xe2   :  { %18717 = vst [vmem:[#allocation14_spill] sm:$0xff] %v7955_v63  ;;  %18718 = vst [vmem:[#allocation15_spill] sm:$0xff] %v7957_v0  ;;  %838 = vperm.xlu1 %6887, %v133_v61   ;;  %833 = vperm.xlu0 %6886, %v132_v62   ;;  %v6986_v0 = vld [vmem:[%s18136_s0 + $0x2f0] sm:$0xff] }
  0xe5   :  { %v7965_v5 = vpop.permute.xlu1 %528  ;;  %v7967_v6 = vpop.permute.xlu0 %523 }
  0xe6   :  { %18719 = vst [vmem:[#allocation16_spill] sm:$0xff] %v7965_v5  ;;  %18720 = vst [vmem:[#allocation17_spill] sm:$0xff] %v7967_v6  ;;  %848 = vperm.xlu1 %6887, %v135_v1   ;;  %843 = vperm.xlu0 %6886, %v134_v2   ;;  %v151_v1 = vld [vmem:[%s18136_s0 + $0x388] sm:$0xff]  ;;  %v150_v2 = vld [vmem:[%s18136_s0 + $0x380] sm:$0xff] }
  0xe7   :  { %v6984_v6 = vld [vmem:[%s18136_s0 + $0x2e0] sm:$0xff] }
  0xe9   :  { %v7975_v13 = vpop.permute.xlu1 %538  ;;  %v7977_v14 = vpop.permute.xlu0 %533 }
  0xea   :  { %18721 = vst [vmem:[#allocation18_spill] sm:$0xff] %v7975_v13  ;;  %18722 = vst [vmem:[#allocation19_spill] sm:$0xff] %v7977_v14  ;;  %858 = vperm.xlu1 %6887, %v137_v9   ;;  %853 = vperm.xlu0 %6886, %v136_v10   ;;  %v6982_v14 = vld [vmem:[%s18136_s0 + $0x2d0] sm:$0xff] }
  0xed   :  { %v7985_v21 = vpop.permute.xlu1 %548  ;;  %v7987_v22 = vpop.permute.xlu0 %543 }
  0xee   :  { %18723 = vst [vmem:[#allocation20_spill] sm:$0xff] %v7985_v21  ;;  %18724 = vst [vmem:[#allocation21_spill] sm:$0xff] %v7987_v22  ;;  %868 = vperm.xlu1 %6887, %v139_v17   ;;  %863 = vperm.xlu0 %6886, %v138_v18   ;;  %v153_v17 = vld [vmem:[%s18136_s0 + $0x398] sm:$0xff]  ;;  %v152_v18 = vld [vmem:[%s18136_s0 + $0x390] sm:$0xff] }
  0xef   :  { %v6980_v22 = vld [vmem:[%s18136_s0 + $0x2c0] sm:$0xff] }
  0xf1   :  { %v7995_v29 = vpop.permute.xlu1 %558  ;;  %v7997_v30 = vpop.permute.xlu0 %553 }
  0xf2   :  { %18725 = vst [vmem:[#allocation22_spill] sm:$0xff] %v7995_v29  ;;  %18726 = vst [vmem:[#allocation23_spill] sm:$0xff] %v7997_v30  ;;  %878 = vperm.xlu1 %6887, %v141_v25   ;;  %873 = vperm.xlu0 %6886, %v140_v26   ;;  %v6978_v30 = vld [vmem:[%s18136_s0 + $0x2b0] sm:$0xff] }
  0xf5   :  { %v8005_v37 = vpop.permute.xlu1 %568  ;;  %v8007_v38 = vpop.permute.xlu0 %563 }
  0xf6   :  { %18727 = vst [vmem:[#allocation24_spill] sm:$0xff] %v8005_v37  ;;  %18728 = vst [vmem:[#allocation25_spill] sm:$0xff] %v8007_v38  ;;  %888 = vperm.xlu1 %6887, %v143_v33   ;;  %883 = vperm.xlu0 %6886, %v142_v34   ;;  %v155_v33 = vld [vmem:[%s18136_s0 + $0x3a8] sm:$0xff]  ;;  %v154_v34 = vld [vmem:[%s18136_s0 + $0x3a0] sm:$0xff] }
  0xf7   :  { %v6976_v38 = vld [vmem:[%s18136_s0 + $0x2a0] sm:$0xff] }
  0xf9   :  { %v8015_v45 = vpop.permute.xlu1 %578  ;;  %v8017_v46 = vpop.permute.xlu0 %573 }
  0xfa   :  { %18729 = vst [vmem:[#allocation26_spill] sm:$0xff] %v8015_v45  ;;  %18730 = vst [vmem:[#allocation27_spill] sm:$0xff] %v8017_v46  ;;  %898 = vperm.xlu1 %6887, %v145_v41   ;;  %893 = vperm.xlu0 %6886, %v144_v42   ;;  %v6974_v46 = vld [vmem:[%s18136_s0 + $0x290] sm:$0xff] }
  0xfd   :  { %v8025_v53 = vpop.permute.xlu1 %588  ;;  %v8027_v54 = vpop.permute.xlu0 %583 }
  0xfe   :  { %18731 = vst [vmem:[#allocation28_spill] sm:$0xff] %v8025_v53  ;;  %18732 = vst [vmem:[#allocation29_spill] sm:$0xff] %v8027_v54  ;;  %908 = vperm.xlu1 %6887, %v147_v49   ;;  %903 = vperm.xlu0 %6886, %v146_v50   ;;  %v157_v49 = vld [vmem:[%s18136_s0 + $0x3b8] sm:$0xff]  ;;  %v156_v50 = vld [vmem:[%s18136_s0 + $0x3b0] sm:$0xff] }
  0xff   :  { %v6972_v54 = vld [vmem:[%s18136_s0 + $0x280] sm:$0xff] }
 0x101   :  { %v8035_v61 = vpop.permute.xlu1 %598  ;;  %v8037_v62 = vpop.permute.xlu0 %593 }
 0x102   :  { %18733 = vst [vmem:[#allocation30_spill] sm:$0xff] %v8035_v61  ;;  %18734 = vst [vmem:[#allocation31_spill] sm:$0xff] %v8037_v62  ;;  %918 = vperm.xlu1 %6887, %v149_v57   ;;  %913 = vperm.xlu0 %6886, %v148_v58   ;;  %v6970_v62 = vld [vmem:[%s18136_s0 + $0x270] sm:$0xff] }
 0x105   :  { %v8045_v9 = vpop.permute.xlu1 %608  ;;  %v8047_v10 = vpop.permute.xlu0 %603 }
 0x106   :  { %18735 = vst [vmem:[#allocation32_spill] sm:$0xff] %v8045_v9  ;;  %18736 = vst [vmem:[#allocation33_spill] sm:$0xff] %v8047_v10  ;;  %928 = vperm.xlu1 %6887, %v151_v1   ;;  %923 = vperm.xlu0 %6886, %v150_v2   ;;  %v159_v1 = vld [vmem:[%s18136_s0 + $0x3c8] sm:$0xff]  ;;  %v158_v2 = vld [vmem:[%s18136_s0 + $0x3c0] sm:$0xff] }
 0x107   :  { %v6968_v10 = vld [vmem:[%s18136_s0 + $0x260] sm:$0xff] }
 0x109   :  { %v8055_v25 = vpop.permute.xlu1 %618  ;;  %v8057_v26 = vpop.permute.xlu0 %613 }
 0x10a   :  { %18737 = vst [vmem:[#allocation34_spill] sm:$0xff] %v8055_v25  ;;  %18738 = vst [vmem:[#allocation35_spill] sm:$0xff] %v8057_v26  ;;  %938 = vperm.xlu1 %6887, %v153_v17   ;;  %933 = vperm.xlu0 %6886, %v152_v18   ;;  %v6966_v26 = vld [vmem:[%s18136_s0 + $0x250] sm:$0xff] }
 0x10d   :  { %v8065_v41 = vpop.permute.xlu1 %628  ;;  %v8067_v42 = vpop.permute.xlu0 %623 }
 0x10e   :  { %18739 = vst [vmem:[#allocation36_spill] sm:$0xff] %v8065_v41  ;;  %18740 = vst [vmem:[#allocation37_spill] sm:$0xff] %v8067_v42  ;;  %948 = vperm.xlu1 %6887, %v155_v33   ;;  %943 = vperm.xlu0 %6886, %v154_v34   ;;  %v161_v33 = vld [vmem:[%s18136_s0 + $0x3d8] sm:$0xff]  ;;  %v160_v34 = vld [vmem:[%s18136_s0 + $0x3d0] sm:$0xff] }
 0x10f   :  { %v6964_v42 = vld [vmem:[%s18136_s0 + $0x240] sm:$0xff] }
 0x111   :  { %v8075_v57 = vpop.permute.xlu1 %638  ;;  %v8077_v58 = vpop.permute.xlu0 %633 }
 0x112   :  { %18741 = vst [vmem:[#allocation38_spill] sm:$0xff] %v8075_v57  ;;  %18742 = vst [vmem:[#allocation39_spill] sm:$0xff] %v8077_v58  ;;  %958 = vperm.xlu1 %6887, %v157_v49   ;;  %953 = vperm.xlu0 %6886, %v156_v50   ;;  %v6962_v58 = vld [vmem:[%s18136_s0 + $0x230] sm:$0xff] }
 0x115   :  { %v8085_v17 = vpop.permute.xlu1 %648  ;;  %v8087_v18 = vpop.permute.xlu0 %643 }
 0x116   :  { %18743 = vst [vmem:[#allocation40_spill] sm:$0xff] %v8085_v17  ;;  %18744 = vst [vmem:[#allocation41_spill] sm:$0xff] %v8087_v18  ;;  %968 = vperm.xlu1 %6887, %v159_v1   ;;  %963 = vperm.xlu0 %6886, %v158_v2   ;;  %v163_v17 = vld [vmem:[%s18136_s0 + $0x3e8] sm:$0xff]  ;;  %v162_v1 = vld [vmem:[%s18136_s0 + $0x3e0] sm:$0xff] }
 0x117   :  { %v6892_v18 = vld [vmem:[%s18136_s0] sm:$0xff] }
 0x119   :  { %v8095_v49 = vpop.permute.xlu1 %658  ;;  %v8097_v50 = vpop.permute.xlu0 %653 }
 0x11a   :  { %18745 = vst [vmem:[#allocation42_spill] sm:$0xff] %v8095_v49  ;;  %18746 = vst [vmem:[#allocation43_spill] sm:$0xff] %v8097_v50  ;;  %978 = vperm.xlu1 %6887, %v161_v33   ;;  %973 = vperm.xlu0 %6886, %v160_v34   ;;  %v165_v49 = vld [vmem:[%s18136_s0 + $0x3f8] sm:$0xff]  ;;  %v164_v33 = vld [vmem:[%s18136_s0 + $0x3f0] sm:$0xff] }
 0x11d   :  { %v8105_v2 = vpop.permute.xlu1 %668  ;;  %v8107_v57 = vpop.permute.xlu0 %663 }
 0x11e   :  { %18747 = vst [vmem:[#allocation44_spill] sm:$0xff] %v8105_v2  ;;  %18748 = vst [vmem:[#allocation45_spill] sm:$0xff] %v8107_v57  ;;  %988 = vperm.xlu1 %6887, %v163_v17   ;;  %983 = vperm.xlu0 %6886, %v162_v1   ;;  %v167_v2 = vld [vmem:[%s18136_s0 + $0x408] sm:$0xff]  ;;  %v166_v17 = vld [vmem:[%s18136_s0 + $0x400] sm:$0xff] }
 0x121   :  { %v8115_v34 = vpop.permute.xlu1 %678  ;;  %v8117_v50 = vpop.permute.xlu0 %673 }
 0x122   :  { %18749 = vst [vmem:[#allocation46_spill] sm:$0xff] %v8115_v34  ;;  %18750 = vst [vmem:[#allocation47_spill] sm:$0xff] %v8117_v50  ;;  %998 = vperm.xlu1 %6887, %v165_v49   ;;  %993 = vperm.xlu0 %6886, %v164_v33   ;;  %v169_v34 = vld [vmem:[%s18136_s0 + $0x418] sm:$0xff]  ;;  %v168_v49 = vld [vmem:[%s18136_s0 + $0x410] sm:$0xff] }
 0x125   :  { %v8125_v1 = vpop.permute.xlu1 %688  ;;  %v8127_v57 = vpop.permute.xlu0 %683 }
 0x126   :  { %18751 = vst [vmem:[#allocation48_spill] sm:$0xff] %v8125_v1  ;;  %18752 = vst [vmem:[#allocation49_spill] sm:$0xff] %v8127_v57  ;;  %1008 = vperm.xlu1 %6887, %v167_v2   ;;  %1003 = vperm.xlu0 %6886, %v166_v17   ;;  %v171_v1 = vld [vmem:[%s18136_s0 + $0x428] sm:$0xff]  ;;  %v170_v2 = vld [vmem:[%s18136_s0 + $0x420] sm:$0xff] }
 0x129   :  { %v8135_v33 = vpop.permute.xlu1 %698  ;;  %v8137_v50 = vpop.permute.xlu0 %693 }
 0x12a   :  { %18753 = vst [vmem:[#allocation50_spill] sm:$0xff] %v8135_v33  ;;  %18754 = vst [vmem:[#allocation51_spill] sm:$0xff] %v8137_v50  ;;  %1018 = vperm.xlu1 %6887, %v169_v34   ;;  %1013 = vperm.xlu0 %6886, %v168_v49   ;;  %v173_v33 = vld [vmem:[%s18136_s0 + $0x438] sm:$0xff]  ;;  %v172_v34 = vld [vmem:[%s18136_s0 + $0x430] sm:$0xff] }
 0x12d   :  { %v8145_v17 = vpop.permute.xlu1 %708  ;;  %v8147_v57 = vpop.permute.xlu0 %703 }
 0x12e   :  { %18755 = vst [vmem:[#allocation52_spill] sm:$0xff] %v8145_v17  ;;  %18756 = vst [vmem:[#allocation53_spill] sm:$0xff] %v8147_v57  ;;  %1028 = vperm.xlu1 %6887, %v171_v1   ;;  %1023 = vperm.xlu0 %6886, %v170_v2   ;;  %v175_v17 = vld [vmem:[%s18136_s0 + $0x448] sm:$0xff]  ;;  %v174_v1 = vld [vmem:[%s18136_s0 + $0x440] sm:$0xff] }
 0x131   :  { %v8155_v49 = vpop.permute.xlu1 %718  ;;  %v8157_v50 = vpop.permute.xlu0 %713 }
 0x132   :  { %18757 = vst [vmem:[#allocation54_spill] sm:$0xff] %v8155_v49  ;;  %18758 = vst [vmem:[#allocation55_spill] sm:$0xff] %v8157_v50  ;;  %1038 = vperm.xlu1 %6887, %v173_v33   ;;  %1033 = vperm.xlu0 %6886, %v172_v34   ;;  %v177_v49 = vld [vmem:[%s18136_s0 + $0x458] sm:$0xff]  ;;  %v176_v33 = vld [vmem:[%s18136_s0 + $0x450] sm:$0xff] }
 0x135   :  { %v8165_v2 = vpop.permute.xlu1 %728  ;;  %v8167_v57 = vpop.permute.xlu0 %723 }
 0x136   :  { %18759 = vst [vmem:[#allocation56_spill] sm:$0xff] %v8165_v2  ;;  %18760 = vst [vmem:[#allocation57_spill] sm:$0xff] %v8167_v57  ;;  %1048 = vperm.xlu1 %6887, %v175_v17   ;;  %1043 = vperm.xlu0 %6886, %v174_v1   ;;  %v179_v2 = vld [vmem:[%s18136_s0 + $0x468] sm:$0xff]  ;;  %v178_v17 = vld [vmem:[%s18136_s0 + $0x460] sm:$0xff] }
 0x139   :  { %v8175_v34 = vpop.permute.xlu1 %738  ;;  %v8177_v50 = vpop.permute.xlu0 %733 }
 0x13a   :  { %18761 = vst [vmem:[#allocation58_spill] sm:$0xff] %v8175_v34  ;;  %18762 = vst [vmem:[#allocation59_spill] sm:$0xff] %v8177_v50  ;;  %1058 = vperm.xlu1 %6887, %v177_v49   ;;  %1053 = vperm.xlu0 %6886, %v176_v33   ;;  %v181_v34 = vld [vmem:[%s18136_s0 + $0x478] sm:$0xff]  ;;  %v180_v49 = vld [vmem:[%s18136_s0 + $0x470] sm:$0xff] }
 0x13d   :  { %v8185_v1 = vpop.permute.xlu1 %748  ;;  %v8187_v57 = vpop.permute.xlu0 %743 }
 0x13e   :  { %18763 = vst [vmem:[#allocation60_spill] sm:$0xff] %v8185_v1  ;;  %18764 = vst [vmem:[#allocation61_spill] sm:$0xff] %v8187_v57  ;;  %1068 = vperm.xlu1 %6887, %v179_v2   ;;  %1063 = vperm.xlu0 %6886, %v178_v17   ;;  %v183_v1 = vld [vmem:[%s18136_s0 + $0x488] sm:$0xff]  ;;  %v182_v2 = vld [vmem:[%s18136_s0 + $0x480] sm:$0xff] }
 0x141   :  { %v8195_v33 = vpop.permute.xlu1 %758  ;;  %v8197_v50 = vpop.permute.xlu0 %753 }
 0x142   :  { %18765 = vst [vmem:[#allocation62_spill] sm:$0xff] %v8195_v33  ;;  %18766 = vst [vmem:[#allocation63_spill] sm:$0xff] %v8197_v50  ;;  %1078 = vperm.xlu1 %6887, %v181_v34   ;;  %1073 = vperm.xlu0 %6886, %v180_v49   ;;  %v185_v33 = vld [vmem:[%s18136_s0 + $0x498] sm:$0xff]  ;;  %v184_v34 = vld [vmem:[%s18136_s0 + $0x490] sm:$0xff] }
 0x145   :  { %v8205_v17 = vpop.permute.xlu1 %768  ;;  %v8207_v57 = vpop.permute.xlu0 %763 }
 0x146   :  { %18767 = vst [vmem:[#allocation64_spill] sm:$0xff] %v8205_v17  ;;  %18768 = vst [vmem:[#allocation65_spill] sm:$0xff] %v8207_v57  ;;  %1088 = vperm.xlu1 %6887, %v183_v1   ;;  %1083 = vperm.xlu0 %6886, %v182_v2   ;;  %v187_v17 = vld [vmem:[%s18136_s0 + $0x4a8] sm:$0xff]  ;;  %v186_v1 = vld [vmem:[%s18136_s0 + $0x4a0] sm:$0xff] }
 0x149   :  { %v8215_v49 = vpop.permute.xlu1 %778  ;;  %v8217_v50 = vpop.permute.xlu0 %773 }
 0x14a   :  { %18769 = vst [vmem:[#allocation66_spill] sm:$0xff] %v8215_v49  ;;  %18770 = vst [vmem:[#allocation67_spill] sm:$0xff] %v8217_v50  ;;  %1098 = vperm.xlu1 %6887, %v185_v33   ;;  %1093 = vperm.xlu0 %6886, %v184_v34   ;;  %v189_v49 = vld [vmem:[%s18136_s0 + $0x4b8] sm:$0xff]  ;;  %v188_v33 = vld [vmem:[%s18136_s0 + $0x4b0] sm:$0xff] }
 0x14d   :  { %v8225_v2 = vpop.permute.xlu1 %788  ;;  %v8227_v57 = vpop.permute.xlu0 %783 }
 0x14e   :  { %18771 = vst [vmem:[#allocation68_spill] sm:$0xff] %v8225_v2  ;;  %18772 = vst [vmem:[#allocation69_spill] sm:$0xff] %v8227_v57  ;;  %1108 = vperm.xlu1 %6887, %v187_v17   ;;  %1103 = vperm.xlu0 %6886, %v186_v1   ;;  %v191_v2 = vld [vmem:[%s18136_s0 + $0x4c8] sm:$0xff]  ;;  %v190_v17 = vld [vmem:[%s18136_s0 + $0x4c0] sm:$0xff] }
 0x151   :  { %v8235_v34 = vpop.permute.xlu1 %798  ;;  %v8237_v50 = vpop.permute.xlu0 %793 }
 0x152   :  { %18773 = vst [vmem:[#allocation70_spill] sm:$0xff] %v8235_v34  ;;  %18774 = vst [vmem:[#allocation71_spill] sm:$0xff] %v8237_v50  ;;  %1118 = vperm.xlu1 %6887, %v189_v49   ;;  %1113 = vperm.xlu0 %6886, %v188_v33   ;;  %v193_v34 = vld [vmem:[%s18136_s0 + $0x4d8] sm:$0xff]  ;;  %v192_v49 = vld [vmem:[%s18136_s0 + $0x4d0] sm:$0xff] }
 0x155   :  { %v8245_v1 = vpop.permute.xlu1 %808  ;;  %v8247_v57 = vpop.permute.xlu0 %803 }
 0x156   :  { %18775 = vst [vmem:[#allocation72_spill] sm:$0xff] %v8245_v1  ;;  %18776 = vst [vmem:[#allocation73_spill] sm:$0xff] %v8247_v57  ;;  %1128 = vperm.xlu1 %6887, %v191_v2   ;;  %1123 = vperm.xlu0 %6886, %v190_v17   ;;  %v195_v1 = vld [vmem:[%s18136_s0 + $0x4e8] sm:$0xff]  ;;  %v194_v2 = vld [vmem:[%s18136_s0 + $0x4e0] sm:$0xff] }
 0x159   :  { %v8255_v33 = vpop.permute.xlu1 %818  ;;  %v8257_v50 = vpop.permute.xlu0 %813 }
 0x15a   :  { %18777 = vst [vmem:[#allocation74_spill] sm:$0xff] %v8255_v33  ;;  %18778 = vst [vmem:[#allocation75_spill] sm:$0xff] %v8257_v50  ;;  %1138 = vperm.xlu1 %6887, %v193_v34   ;;  %1133 = vperm.xlu0 %6886, %v192_v49   ;;  %v197_v33 = vld [vmem:[%s18136_s0 + $0x4f8] sm:$0xff]  ;;  %v196_v34 = vld [vmem:[%s18136_s0 + $0x4f0] sm:$0xff] }
 0x15d   :  { %v8265_v17 = vpop.permute.xlu1 %828  ;;  %v8267_v57 = vpop.permute.xlu0 %823 }
 0x15e   :  { %18779 = vst [vmem:[#allocation76_spill] sm:$0xff] %v8265_v17  ;;  %18780 = vst [vmem:[#allocation77_spill] sm:$0xff] %v8267_v57  ;;  %1148 = vperm.xlu1 %6887, %v195_v1   ;;  %1143 = vperm.xlu0 %6886, %v194_v2   ;;  %v199_v17 = vld [vmem:[%s18136_s0 + $0x508] sm:$0xff]  ;;  %v198_v1 = vld [vmem:[%s18136_s0 + $0x500] sm:$0xff] }
 0x161   :  { %v8275_v49 = vpop.permute.xlu1 %838  ;;  %v8277_v50 = vpop.permute.xlu0 %833 }
 0x162   :  { %18781 = vst [vmem:[#allocation78_spill] sm:$0xff] %v8275_v49  ;;  %18782 = vst [vmem:[#allocation79_spill] sm:$0xff] %v8277_v50  ;;  %1158 = vperm.xlu1 %6887, %v197_v33   ;;  %1153 = vperm.xlu0 %6886, %v196_v34   ;;  %v201_v49 = vld [vmem:[%s18136_s0 + $0x518] sm:$0xff]  ;;  %v200_v33 = vld [vmem:[%s18136_s0 + $0x510] sm:$0xff] }
 0x165   :  { %v8285_v2 = vpop.permute.xlu1 %848  ;;  %v8287_v57 = vpop.permute.xlu0 %843 }
 0x166   :  { %18783 = vst [vmem:[#allocation80_spill] sm:$0xff] %v8285_v2  ;;  %18784 = vst [vmem:[#allocation81_spill] sm:$0xff] %v8287_v57  ;;  %1168 = vperm.xlu1 %6887, %v199_v17   ;;  %1163 = vperm.xlu0 %6886, %v198_v1   ;;  %v203_v2 = vld [vmem:[%s18136_s0 + $0x528] sm:$0xff]  ;;  %v202_v17 = vld [vmem:[%s18136_s0 + $0x520] sm:$0xff] }
 0x169   :  { %v8295_v34 = vpop.permute.xlu1 %858  ;;  %v8297_v50 = vpop.permute.xlu0 %853 }
 0x16a   :  { %18785 = vst [vmem:[#allocation82_spill] sm:$0xff] %v8295_v34  ;;  %18786 = vst [vmem:[#allocation83_spill] sm:$0xff] %v8297_v50  ;;  %1178 = vperm.xlu1 %6887, %v201_v49   ;;  %1173 = vperm.xlu0 %6886, %v200_v33   ;;  %v205_v34 = vld [vmem:[%s18136_s0 + $0x538] sm:$0xff]  ;;  %v204_v49 = vld [vmem:[%s18136_s0 + $0x530] sm:$0xff] }
 0x16d   :  { %v8305_v1 = vpop.permute.xlu1 %868  ;;  %v8307_v57 = vpop.permute.xlu0 %863 }
 0x16e   :  { %18787 = vst [vmem:[#allocation84_spill] sm:$0xff] %v8305_v1  ;;  %18788 = vst [vmem:[#allocation85_spill] sm:$0xff] %v8307_v57  ;;  %1188 = vperm.xlu1 %6887, %v203_v2   ;;  %1183 = vperm.xlu0 %6886, %v202_v17   ;;  %v207_v1 = vld [vmem:[%s18136_s0 + $0x548] sm:$0xff]  ;;  %v206_v2 = vld [vmem:[%s18136_s0 + $0x540] sm:$0xff] }
 0x171   :  { %v8315_v33 = vpop.permute.xlu1 %878  ;;  %v8317_v50 = vpop.permute.xlu0 %873 }
 0x172   :  { %18789 = vst [vmem:[#allocation86_spill] sm:$0xff] %v8315_v33  ;;  %18790 = vst [vmem:[#allocation87_spill] sm:$0xff] %v8317_v50  ;;  %1198 = vperm.xlu1 %6887, %v205_v34   ;;  %1193 = vperm.xlu0 %6886, %v204_v49   ;;  %v209_v33 = vld [vmem:[%s18136_s0 + $0x558] sm:$0xff]  ;;  %v208_v34 = vld [vmem:[%s18136_s0 + $0x550] sm:$0xff] }
 0x175   :  { %v8325_v17 = vpop.permute.xlu1 %888  ;;  %v8327_v57 = vpop.permute.xlu0 %883 }
 0x176   :  { %18791 = vst [vmem:[#allocation88_spill] sm:$0xff] %v8325_v17  ;;  %18792 = vst [vmem:[#allocation89_spill] sm:$0xff] %v8327_v57  ;;  %1208 = vperm.xlu1 %6887, %v207_v1   ;;  %1203 = vperm.xlu0 %6886, %v206_v2   ;;  %v211_v17 = vld [vmem:[%s18136_s0 + $0x568] sm:$0xff]  ;;  %v210_v1 = vld [vmem:[%s18136_s0 + $0x560] sm:$0xff] }
 0x179   :  { %v8335_v49 = vpop.permute.xlu1 %898  ;;  %v8337_v50 = vpop.permute.xlu0 %893 }
 0x17a   :  { %18793 = vst [vmem:[#allocation90_spill] sm:$0xff] %v8335_v49  ;;  %18794 = vst [vmem:[#allocation91_spill] sm:$0xff] %v8337_v50  ;;  %1218 = vperm.xlu1 %6887, %v209_v33   ;;  %1213 = vperm.xlu0 %6886, %v208_v34   ;;  %v213_v49 = vld [vmem:[%s18136_s0 + $0x578] sm:$0xff]  ;;  %v212_v33 = vld [vmem:[%s18136_s0 + $0x570] sm:$0xff] }
 0x17d   :  { %v8345_v2 = vpop.permute.xlu1 %908  ;;  %v8347_v57 = vpop.permute.xlu0 %903 }
 0x17e   :  { %18795 = vst [vmem:[#allocation92_spill] sm:$0xff] %v8345_v2  ;;  %18796 = vst [vmem:[#allocation93_spill] sm:$0xff] %v8347_v57  ;;  %1228 = vperm.xlu1 %6887, %v211_v17   ;;  %1223 = vperm.xlu0 %6886, %v210_v1   ;;  %v215_v2 = vld [vmem:[%s18136_s0 + $0x588] sm:$0xff]  ;;  %v214_v17 = vld [vmem:[%s18136_s0 + $0x580] sm:$0xff] }
 0x181   :  { %v8355_v34 = vpop.permute.xlu1 %918  ;;  %v8357_v50 = vpop.permute.xlu0 %913 }
 0x182   :  { %18797 = vst [vmem:[#allocation94_spill] sm:$0xff] %v8355_v34  ;;  %18798 = vst [vmem:[#allocation95_spill] sm:$0xff] %v8357_v50  ;;  %1238 = vperm.xlu1 %6887, %v213_v49   ;;  %1233 = vperm.xlu0 %6886, %v212_v33   ;;  %v217_v34 = vld [vmem:[%s18136_s0 + $0x598] sm:$0xff]  ;;  %v216_v49 = vld [vmem:[%s18136_s0 + $0x590] sm:$0xff] }
 0x185   :  { %v8365_v1 = vpop.permute.xlu1 %928  ;;  %v8367_v57 = vpop.permute.xlu0 %923 }
 0x186   :  { %18799 = vst [vmem:[#allocation96_spill] sm:$0xff] %v8365_v1  ;;  %18800 = vst [vmem:[#allocation97_spill] sm:$0xff] %v8367_v57  ;;  %1248 = vperm.xlu1 %6887, %v215_v2   ;;  %1243 = vperm.xlu0 %6886, %v214_v17   ;;  %v219_v1 = vld [vmem:[%s18136_s0 + $0x5a8] sm:$0xff]  ;;  %v218_v2 = vld [vmem:[%s18136_s0 + $0x5a0] sm:$0xff] }
 0x189   :  { %v8375_v33 = vpop.permute.xlu1 %938  ;;  %v8377_v50 = vpop.permute.xlu0 %933 }
 0x18a   :  { %18801 = vst [vmem:[#allocation98_spill] sm:$0xff] %v8375_v33  ;;  %18802 = vst [vmem:[#allocation99_spill] sm:$0xff] %v8377_v50  ;;  %1258 = vperm.xlu1 %6887, %v217_v34   ;;  %1253 = vperm.xlu0 %6886, %v216_v49   ;;  %v221_v33 = vld [vmem:[%s18136_s0 + $0x5b8] sm:$0xff]  ;;  %v220_v34 = vld [vmem:[%s18136_s0 + $0x5b0] sm:$0xff] }
 0x18d   :  { %v8385_v17 = vpop.permute.xlu1 %948  ;;  %v8387_v57 = vpop.permute.xlu0 %943 }
 0x18e   :  { %18803 = vst [vmem:[#allocation100_spill] sm:$0xff] %v8385_v17  ;;  %18804 = vst [vmem:[#allocation101_spill] sm:$0xff] %v8387_v57  ;;  %1268 = vperm.xlu1 %6887, %v219_v1   ;;  %1263 = vperm.xlu0 %6886, %v218_v2   ;;  %v223_v17 = vld [vmem:[%s18136_s0 + $0x5c8] sm:$0xff]  ;;  %v222_v1 = vld [vmem:[%s18136_s0 + $0x5c0] sm:$0xff] }
 0x191   :  { %v8395_v49 = vpop.permute.xlu1 %958  ;;  %v8397_v50 = vpop.permute.xlu0 %953 }
 0x192   :  { %18805 = vst [vmem:[#allocation102_spill] sm:$0xff] %v8395_v49  ;;  %18806 = vst [vmem:[#allocation103_spill] sm:$0xff] %v8397_v50  ;;  %1278 = vperm.xlu1 %6887, %v221_v33   ;;  %1273 = vperm.xlu0 %6886, %v220_v34   ;;  %v225_v49 = vld [vmem:[%s18136_s0 + $0x5d8] sm:$0xff]  ;;  %v224_v33 = vld [vmem:[%s18136_s0 + $0x5d0] sm:$0xff] }
 0x195   :  { %v8405_v2 = vpop.permute.xlu1 %968  ;;  %v8407_v57 = vpop.permute.xlu0 %963 }
 0x196   :  { %18807 = vst [vmem:[#allocation104_spill] sm:$0xff] %v8405_v2  ;;  %18808 = vst [vmem:[#allocation105_spill] sm:$0xff] %v8407_v57  ;;  %1288 = vperm.xlu1 %6887, %v223_v17   ;;  %1283 = vperm.xlu0 %6886, %v222_v1   ;;  %v227_v2 = vld [vmem:[%s18136_s0 + $0x5e8] sm:$0xff]  ;;  %v226_v17 = vld [vmem:[%s18136_s0 + $0x5e0] sm:$0xff] }
 0x199   :  { %v8415_v34 = vpop.permute.xlu1 %978  ;;  %v8417_v50 = vpop.permute.xlu0 %973 }
 0x19a   :  { %18809 = vst [vmem:[#allocation106_spill] sm:$0xff] %v8415_v34  ;;  %18810 = vst [vmem:[#allocation107_spill] sm:$0xff] %v8417_v50  ;;  %1298 = vperm.xlu1 %6887, %v225_v49   ;;  %1293 = vperm.xlu0 %6886, %v224_v33   ;;  %v229_v34 = vld [vmem:[%s18136_s0 + $0x5f8] sm:$0xff]  ;;  %v228_v49 = vld [vmem:[%s18136_s0 + $0x5f0] sm:$0xff] }
 0x19d   :  { %v8425_v1 = vpop.permute.xlu1 %988  ;;  %v8427_v57 = vpop.permute.xlu0 %983 }
 0x19e   :  { %18811 = vst [vmem:[#allocation108_spill] sm:$0xff] %v8425_v1  ;;  %18812 = vst [vmem:[#allocation109_spill] sm:$0xff] %v8427_v57  ;;  %1308 = vperm.xlu1 %6887, %v227_v2   ;;  %1303 = vperm.xlu0 %6886, %v226_v17   ;;  %v231_v1 = vld [vmem:[%s18136_s0 + $0x608] sm:$0xff]  ;;  %v230_v2 = vld [vmem:[%s18136_s0 + $0x600] sm:$0xff] }
 0x1a1   :  { %v8435_v33 = vpop.permute.xlu1 %998  ;;  %v8437_v50 = vpop.permute.xlu0 %993 }
 0x1a2   :  { %18813 = vst [vmem:[#allocation110_spill] sm:$0xff] %v8435_v33  ;;  %18814 = vst [vmem:[#allocation111_spill] sm:$0xff] %v8437_v50  ;;  %1318 = vperm.xlu1 %6887, %v229_v34   ;;  %1313 = vperm.xlu0 %6886, %v228_v49   ;;  %v233_v33 = vld [vmem:[%s18136_s0 + $0x618] sm:$0xff]  ;;  %v232_v34 = vld [vmem:[%s18136_s0 + $0x610] sm:$0xff] }
 0x1a5   :  { %v8445_v17 = vpop.permute.xlu1 %1008  ;;  %v8447_v57 = vpop.permute.xlu0 %1003 }
 0x1a6   :  { %18815 = vst [vmem:[#allocation112_spill] sm:$0xff] %v8445_v17  ;;  %18816 = vst [vmem:[#allocation113_spill] sm:$0xff] %v8447_v57  ;;  %1328 = vperm.xlu1 %6887, %v231_v1   ;;  %1323 = vperm.xlu0 %6886, %v230_v2   ;;  %v235_v17 = vld [vmem:[%s18136_s0 + $0x628] sm:$0xff]  ;;  %v234_v1 = vld [vmem:[%s18136_s0 + $0x620] sm:$0xff] }
 0x1a9   :  { %v8455_v49 = vpop.permute.xlu1 %1018  ;;  %v8457_v50 = vpop.permute.xlu0 %1013 }
 0x1aa   :  { %18817 = vst [vmem:[#allocation114_spill] sm:$0xff] %v8455_v49  ;;  %18818 = vst [vmem:[#allocation115_spill] sm:$0xff] %v8457_v50  ;;  %1338 = vperm.xlu1 %6887, %v233_v33   ;;  %1333 = vperm.xlu0 %6886, %v232_v34   ;;  %v237_v49 = vld [vmem:[%s18136_s0 + $0x638] sm:$0xff]  ;;  %v236_v33 = vld [vmem:[%s18136_s0 + $0x630] sm:$0xff] }
 0x1ad   :  { %v8465_v2 = vpop.permute.xlu1 %1028  ;;  %v8467_v57 = vpop.permute.xlu0 %1023 }
 0x1ae   :  { %18819 = vst [vmem:[#allocation116_spill] sm:$0xff] %v8465_v2  ;;  %18820 = vst [vmem:[#allocation117_spill] sm:$0xff] %v8467_v57  ;;  %1348 = vperm.xlu1 %6887, %v235_v17   ;;  %1343 = vperm.xlu0 %6886, %v234_v1   ;;  %v239_v2 = vld [vmem:[%s18136_s0 + $0x648] sm:$0xff]  ;;  %v238_v17 = vld [vmem:[%s18136_s0 + $0x640] sm:$0xff] }
 0x1b1   :  { %v8475_v34 = vpop.permute.xlu1 %1038  ;;  %v8477_v50 = vpop.permute.xlu0 %1033 }
 0x1b2   :  { %18821 = vst [vmem:[#allocation118_spill] sm:$0xff] %v8475_v34  ;;  %18822 = vst [vmem:[#allocation119_spill] sm:$0xff] %v8477_v50  ;;  %1358 = vperm.xlu1 %6887, %v237_v49   ;;  %1353 = vperm.xlu0 %6886, %v236_v33   ;;  %v241_v34 = vld [vmem:[%s18136_s0 + $0x658] sm:$0xff]  ;;  %v240_v49 = vld [vmem:[%s18136_s0 + $0x650] sm:$0xff] }
 0x1b5   :  { %v8485_v1 = vpop.permute.xlu1 %1048  ;;  %v8487_v57 = vpop.permute.xlu0 %1043 }
 0x1b6   :  { %18823 = vst [vmem:[#allocation120_spill] sm:$0xff] %v8485_v1  ;;  %18824 = vst [vmem:[#allocation121_spill] sm:$0xff] %v8487_v57  ;;  %1368 = vperm.xlu1 %6887, %v239_v2   ;;  %1363 = vperm.xlu0 %6886, %v238_v17   ;;  %v243_v1 = vld [vmem:[%s18136_s0 + $0x668] sm:$0xff]  ;;  %v242_v2 = vld [vmem:[%s18136_s0 + $0x660] sm:$0xff] }
 0x1b9   :  { %v8495_v33 = vpop.permute.xlu1 %1058  ;;  %v8497_v50 = vpop.permute.xlu0 %1053 }
 0x1ba   :  { %18825 = vst [vmem:[#allocation122_spill] sm:$0xff] %v8495_v33  ;;  %18826 = vst [vmem:[#allocation123_spill] sm:$0xff] %v8497_v50  ;;  %1378 = vperm.xlu1 %6887, %v241_v34   ;;  %1373 = vperm.xlu0 %6886, %v240_v49   ;;  %v245_v33 = vld [vmem:[%s18136_s0 + $0x678] sm:$0xff]  ;;  %v244_v34 = vld [vmem:[%s18136_s0 + $0x670] sm:$0xff] }
 0x1bd   :  { %v8505_v17 = vpop.permute.xlu1 %1068  ;;  %v8507_v57 = vpop.permute.xlu0 %1063 }
 0x1be   :  { %18827 = vst [vmem:[#allocation124_spill] sm:$0xff] %v8505_v17  ;;  %18828 = vst [vmem:[#allocation125_spill] sm:$0xff] %v8507_v57  ;;  %1388 = vperm.xlu1 %6887, %v243_v1   ;;  %1383 = vperm.xlu0 %6886, %v242_v2   ;;  %v247_v17 = vld [vmem:[%s18136_s0 + $0x688] sm:$0xff]  ;;  %v246_v1 = vld [vmem:[%s18136_s0 + $0x680] sm:$0xff] }
 0x1c1   :  { %v8515_v49 = vpop.permute.xlu1 %1078  ;;  %v8517_v50 = vpop.permute.xlu0 %1073 }
 0x1c2   :  { %18829 = vst [vmem:[#allocation126_spill] sm:$0xff] %v8515_v49  ;;  %18830 = vst [vmem:[#allocation127_spill] sm:$0xff] %v8517_v50  ;;  %1398 = vperm.xlu1 %6887, %v245_v33   ;;  %1393 = vperm.xlu0 %6886, %v244_v34   ;;  %v249_v49 = vld [vmem:[%s18136_s0 + $0x698] sm:$0xff]  ;;  %v248_v33 = vld [vmem:[%s18136_s0 + $0x690] sm:$0xff] }
 0x1c5   :  { %v8525_v2 = vpop.permute.xlu1 %1088  ;;  %v8527_v57 = vpop.permute.xlu0 %1083 }
 0x1c6   :  { %18831 = vst [vmem:[#allocation128_spill] sm:$0xff] %v8525_v2  ;;  %18832 = vst [vmem:[#allocation129_spill] sm:$0xff] %v8527_v57  ;;  %1408 = vperm.xlu1 %6887, %v247_v17   ;;  %1403 = vperm.xlu0 %6886, %v246_v1   ;;  %v251_v2 = vld [vmem:[%s18136_s0 + $0x6a8] sm:$0xff]  ;;  %v250_v17 = vld [vmem:[%s18136_s0 + $0x6a0] sm:$0xff] }
 0x1c9   :  { %v8535_v34 = vpop.permute.xlu1 %1098  ;;  %v8537_v50 = vpop.permute.xlu0 %1093 }
 0x1ca   :  { %18833 = vst [vmem:[#allocation130_spill] sm:$0xff] %v8535_v34  ;;  %18834 = vst [vmem:[#allocation131_spill] sm:$0xff] %v8537_v50  ;;  %1418 = vperm.xlu1 %6887, %v249_v49   ;;  %1413 = vperm.xlu0 %6886, %v248_v33   ;;  %v253_v34 = vld [vmem:[%s18136_s0 + $0x6b8] sm:$0xff]  ;;  %v252_v49 = vld [vmem:[%s18136_s0 + $0x6b0] sm:$0xff] }
 0x1cd   :  { %v8545_v1 = vpop.permute.xlu1 %1108  ;;  %v8547_v57 = vpop.permute.xlu0 %1103 }
 0x1ce   :  { %18835 = vst [vmem:[#allocation132_spill] sm:$0xff] %v8545_v1  ;;  %18836 = vst [vmem:[#allocation133_spill] sm:$0xff] %v8547_v57  ;;  %1428 = vperm.xlu1 %6887, %v251_v2   ;;  %1423 = vperm.xlu0 %6886, %v250_v17   ;;  %v255_v1 = vld [vmem:[%s18136_s0 + $0x6c8] sm:$0xff]  ;;  %v254_v2 = vld [vmem:[%s18136_s0 + $0x6c0] sm:$0xff] }
 0x1d1   :  { %v8555_v33 = vpop.permute.xlu1 %1118  ;;  %v8557_v50 = vpop.permute.xlu0 %1113 }
 0x1d2   :  { %18837 = vst [vmem:[#allocation134_spill] sm:$0xff] %v8555_v33  ;;  %18838 = vst [vmem:[#allocation135_spill] sm:$0xff] %v8557_v50  ;;  %1438 = vperm.xlu1 %6887, %v253_v34   ;;  %1433 = vperm.xlu0 %6886, %v252_v49   ;;  %v257_v33 = vld [vmem:[%s18136_s0 + $0x6d8] sm:$0xff]  ;;  %v256_v34 = vld [vmem:[%s18136_s0 + $0x6d0] sm:$0xff] }
 0x1d5   :  { %v8565_v17 = vpop.permute.xlu1 %1128  ;;  %v8567_v57 = vpop.permute.xlu0 %1123 }
 0x1d6   :  { %18839 = vst [vmem:[#allocation136_spill] sm:$0xff] %v8565_v17  ;;  %18840 = vst [vmem:[#allocation137_spill] sm:$0xff] %v8567_v57  ;;  %1448 = vperm.xlu1 %6887, %v255_v1   ;;  %1443 = vperm.xlu0 %6886, %v254_v2   ;;  %v259_v17 = vld [vmem:[%s18136_s0 + $0x6e8] sm:$0xff]  ;;  %v258_v1 = vld [vmem:[%s18136_s0 + $0x6e0] sm:$0xff] }
 0x1d9   :  { %v8575_v49 = vpop.permute.xlu1 %1138  ;;  %v8577_v50 = vpop.permute.xlu0 %1133 }
 0x1da   :  { %18841 = vst [vmem:[#allocation138_spill] sm:$0xff] %v8575_v49  ;;  %18842 = vst [vmem:[#allocation139_spill] sm:$0xff] %v8577_v50  ;;  %1458 = vperm.xlu1 %6887, %v257_v33   ;;  %1453 = vperm.xlu0 %6886, %v256_v34   ;;  %v261_v49 = vld [vmem:[%s18136_s0 + $0x6f8] sm:$0xff]  ;;  %v260_v33 = vld [vmem:[%s18136_s0 + $0x6f0] sm:$0xff] }
 0x1dd   :  { %v8585_v2 = vpop.permute.xlu1 %1148  ;;  %v8587_v57 = vpop.permute.xlu0 %1143 }
 0x1de   :  { %18843 = vst [vmem:[#allocation140_spill] sm:$0xff] %v8585_v2  ;;  %18844 = vst [vmem:[#allocation141_spill] sm:$0xff] %v8587_v57  ;;  %1468 = vperm.xlu1 %6887, %v259_v17   ;;  %1463 = vperm.xlu0 %6886, %v258_v1   ;;  %v263_v2 = vld [vmem:[%s18136_s0 + $0x708] sm:$0xff]  ;;  %v262_v17 = vld [vmem:[%s18136_s0 + $0x700] sm:$0xff] }
 0x1e1   :  { %v8595_v34 = vpop.permute.xlu1 %1158  ;;  %v8597_v50 = vpop.permute.xlu0 %1153 }
 0x1e2   :  { %18845 = vst [vmem:[#allocation142_spill] sm:$0xff] %v8595_v34  ;;  %18846 = vst [vmem:[#allocation143_spill] sm:$0xff] %v8597_v50  ;;  %1478 = vperm.xlu1 %6887, %v261_v49   ;;  %1473 = vperm.xlu0 %6886, %v260_v33   ;;  %v265_v34 = vld [vmem:[%s18136_s0 + $0x718] sm:$0xff]  ;;  %v264_v49 = vld [vmem:[%s18136_s0 + $0x710] sm:$0xff] }
 0x1e5   :  { %v8605_v1 = vpop.permute.xlu1 %1168  ;;  %v8607_v57 = vpop.permute.xlu0 %1163 }
 0x1e6   :  { %18847 = vst [vmem:[#allocation144_spill] sm:$0xff] %v8605_v1  ;;  %18848 = vst [vmem:[#allocation145_spill] sm:$0xff] %v8607_v57  ;;  %1488 = vperm.xlu1 %6887, %v263_v2   ;;  %1483 = vperm.xlu0 %6886, %v262_v17   ;;  %v267_v1 = vld [vmem:[%s18136_s0 + $0x728] sm:$0xff]  ;;  %v266_v2 = vld [vmem:[%s18136_s0 + $0x720] sm:$0xff] }
 0x1e9   :  { %v8615_v33 = vpop.permute.xlu1 %1178  ;;  %v8617_v50 = vpop.permute.xlu0 %1173 }
 0x1ea   :  { %18849 = vst [vmem:[#allocation146_spill] sm:$0xff] %v8615_v33  ;;  %18850 = vst [vmem:[#allocation147_spill] sm:$0xff] %v8617_v50  ;;  %1498 = vperm.xlu1 %6887, %v265_v34   ;;  %1493 = vperm.xlu0 %6886, %v264_v49   ;;  %v269_v33 = vld [vmem:[%s18136_s0 + $0x738] sm:$0xff]  ;;  %v268_v34 = vld [vmem:[%s18136_s0 + $0x730] sm:$0xff] }
 0x1ed   :  { %v8625_v17 = vpop.permute.xlu1 %1188  ;;  %v8627_v57 = vpop.permute.xlu0 %1183 }
 0x1ee   :  { %18851 = vst [vmem:[#allocation148_spill] sm:$0xff] %v8625_v17  ;;  %18852 = vst [vmem:[#allocation149_spill] sm:$0xff] %v8627_v57  ;;  %1508 = vperm.xlu1 %6887, %v267_v1   ;;  %1503 = vperm.xlu0 %6886, %v266_v2   ;;  %v271_v17 = vld [vmem:[%s18136_s0 + $0x748] sm:$0xff]  ;;  %v270_v1 = vld [vmem:[%s18136_s0 + $0x740] sm:$0xff] }
 0x1f1   :  { %v8635_v49 = vpop.permute.xlu1 %1198  ;;  %v8637_v50 = vpop.permute.xlu0 %1193 }
 0x1f2   :  { %18853 = vst [vmem:[#allocation150_spill] sm:$0xff] %v8635_v49  ;;  %18854 = vst [vmem:[#allocation151_spill] sm:$0xff] %v8637_v50  ;;  %1518 = vperm.xlu1 %6887, %v269_v33   ;;  %1513 = vperm.xlu0 %6886, %v268_v34   ;;  %v273_v49 = vld [vmem:[%s18136_s0 + $0x758] sm:$0xff]  ;;  %v272_v33 = vld [vmem:[%s18136_s0 + $0x750] sm:$0xff] }
 0x1f5   :  { %v8645_v2 = vpop.permute.xlu1 %1208  ;;  %v8647_v57 = vpop.permute.xlu0 %1203 }
 0x1f6   :  { %18855 = vst [vmem:[#allocation152_spill] sm:$0xff] %v8645_v2  ;;  %18856 = vst [vmem:[#allocation153_spill] sm:$0xff] %v8647_v57  ;;  %1528 = vperm.xlu1 %6887, %v271_v17   ;;  %1523 = vperm.xlu0 %6886, %v270_v1   ;;  %v275_v2 = vld [vmem:[%s18136_s0 + $0x768] sm:$0xff]  ;;  %v274_v17 = vld [vmem:[%s18136_s0 + $0x760] sm:$0xff] }
 0x1f9   :  { %v8655_v34 = vpop.permute.xlu1 %1218  ;;  %v8657_v50 = vpop.permute.xlu0 %1213 }
 0x1fa   :  { %18857 = vst [vmem:[#allocation154_spill] sm:$0xff] %v8655_v34  ;;  %18858 = vst [vmem:[#allocation155_spill] sm:$0xff] %v8657_v50  ;;  %1538 = vperm.xlu1 %6887, %v273_v49   ;;  %1533 = vperm.xlu0 %6886, %v272_v33   ;;  %v277_v34 = vld [vmem:[%s18136_s0 + $0x778] sm:$0xff]  ;;  %v276_v49 = vld [vmem:[%s18136_s0 + $0x770] sm:$0xff] }
 0x1fd   :  { %v8665_v1 = vpop.permute.xlu1 %1228  ;;  %v8667_v57 = vpop.permute.xlu0 %1223 }
 0x1fe   :  { %18859 = vst [vmem:[#allocation156_spill] sm:$0xff] %v8665_v1  ;;  %18860 = vst [vmem:[#allocation157_spill] sm:$0xff] %v8667_v57  ;;  %1548 = vperm.xlu1 %6887, %v275_v2   ;;  %1543 = vperm.xlu0 %6886, %v274_v17   ;;  %v279_v1 = vld [vmem:[%s18136_s0 + $0x788] sm:$0xff]  ;;  %v278_v2 = vld [vmem:[%s18136_s0 + $0x780] sm:$0xff] }
 0x201   :  { %v8675_v33 = vpop.permute.xlu1 %1238  ;;  %v8677_v50 = vpop.permute.xlu0 %1233 }
 0x202   :  { %18861 = vst [vmem:[#allocation158_spill] sm:$0xff] %v8675_v33  ;;  %18862 = vst [vmem:[#allocation159_spill] sm:$0xff] %v8677_v50  ;;  %1558 = vperm.xlu1 %6887, %v277_v34   ;;  %1553 = vperm.xlu0 %6886, %v276_v49   ;;  %v281_v33 = vld [vmem:[%s18136_s0 + $0x798] sm:$0xff]  ;;  %v280_v34 = vld [vmem:[%s18136_s0 + $0x790] sm:$0xff] }
 0x205   :  { %v8685_v17 = vpop.permute.xlu1 %1248  ;;  %v8687_v57 = vpop.permute.xlu0 %1243 }
 0x206   :  { %18863 = vst [vmem:[#allocation160_spill] sm:$0xff] %v8685_v17  ;;  %18864 = vst [vmem:[#allocation161_spill] sm:$0xff] %v8687_v57  ;;  %1568 = vperm.xlu1 %6887, %v279_v1   ;;  %1563 = vperm.xlu0 %6886, %v278_v2   ;;  %v283_v17 = vld [vmem:[%s18136_s0 + $0x7a8] sm:$0xff]  ;;  %v282_v1 = vld [vmem:[%s18136_s0 + $0x7a0] sm:$0xff] }
 0x209   :  { %v8695_v49 = vpop.permute.xlu1 %1258  ;;  %v8697_v50 = vpop.permute.xlu0 %1253 }
 0x20a   :  { %18865 = vst [vmem:[#allocation162_spill] sm:$0xff] %v8695_v49  ;;  %18866 = vst [vmem:[#allocation163_spill] sm:$0xff] %v8697_v50  ;;  %1578 = vperm.xlu1 %6887, %v281_v33   ;;  %1573 = vperm.xlu0 %6886, %v280_v34   ;;  %v285_v49 = vld [vmem:[%s18136_s0 + $0x7b8] sm:$0xff]  ;;  %v284_v33 = vld [vmem:[%s18136_s0 + $0x7b0] sm:$0xff] }
 0x20d   :  { %v8705_v2 = vpop.permute.xlu1 %1268  ;;  %v8707_v57 = vpop.permute.xlu0 %1263 }
 0x20e   :  { %18867 = vst [vmem:[#allocation164_spill] sm:$0xff] %v8705_v2  ;;  %18868 = vst [vmem:[#allocation165_spill] sm:$0xff] %v8707_v57  ;;  %1588 = vperm.xlu1 %6887, %v283_v17   ;;  %1583 = vperm.xlu0 %6886, %v282_v1   ;;  %v287_v2 = vld [vmem:[%s18136_s0 + $0x7c8] sm:$0xff]  ;;  %v286_v17 = vld [vmem:[%s18136_s0 + $0x7c0] sm:$0xff] }
 0x211   :  { %v8715_v34 = vpop.permute.xlu1 %1278  ;;  %v8717_v50 = vpop.permute.xlu0 %1273 }
 0x212   :  { %18869 = vst [vmem:[#allocation166_spill] sm:$0xff] %v8715_v34  ;;  %18870 = vst [vmem:[#allocation167_spill] sm:$0xff] %v8717_v50  ;;  %1598 = vperm.xlu1 %6887, %v285_v49   ;;  %1593 = vperm.xlu0 %6886, %v284_v33   ;;  %v289_v34 = vld [vmem:[%s18136_s0 + $0x7d8] sm:$0xff]  ;;  %v288_v49 = vld [vmem:[%s18136_s0 + $0x7d0] sm:$0xff] }
 0x215   :  { %v8725_v1 = vpop.permute.xlu1 %1288  ;;  %v8727_v57 = vpop.permute.xlu0 %1283 }
 0x216   :  { %18871 = vst [vmem:[#allocation168_spill] sm:$0xff] %v8725_v1  ;;  %18872 = vst [vmem:[#allocation169_spill] sm:$0xff] %v8727_v57  ;;  %1608 = vperm.xlu1 %6887, %v287_v2   ;;  %1603 = vperm.xlu0 %6886, %v286_v17   ;;  %v291_v1 = vld [vmem:[%s18136_s0 + $0x7e8] sm:$0xff]  ;;  %v290_v2 = vld [vmem:[%s18136_s0 + $0x7e0] sm:$0xff] }
 0x219   :  { %v8735_v33 = vpop.permute.xlu1 %1298  ;;  %v8737_v50 = vpop.permute.xlu0 %1293 }
 0x21a   :  { %18873 = vst [vmem:[#allocation170_spill] sm:$0xff] %v8735_v33  ;;  %18874 = vst [vmem:[#allocation171_spill] sm:$0xff] %v8737_v50  ;;  %1618 = vperm.xlu1 %6887, %v289_v34   ;;  %1613 = vperm.xlu0 %6886, %v288_v49   ;;  %v293_v33 = vld [vmem:[%s18136_s0 + $0x7f8] sm:$0xff]  ;;  %v292_v34 = vld [vmem:[%s18136_s0 + $0x7f0] sm:$0xff] }
 0x21d   :  { %v8745_v17 = vpop.permute.xlu1 %1308  ;;  %v8747_v57 = vpop.permute.xlu0 %1303 }
 0x21e   :  { %18875 = vst [vmem:[#allocation172_spill] sm:$0xff] %v8745_v17  ;;  %18876 = vst [vmem:[#allocation173_spill] sm:$0xff] %v8747_v57  ;;  %1628 = vperm.xlu1 %6887, %v291_v1   ;;  %1623 = vperm.xlu0 %6886, %v290_v2   ;;  %v295_v17 = vld [vmem:[%s18136_s0 + $0x808] sm:$0xff]  ;;  %v294_v1 = vld [vmem:[%s18136_s0 + $0x800] sm:$0xff] }
 0x221   :  { %v8755_v49 = vpop.permute.xlu1 %1318  ;;  %v8757_v50 = vpop.permute.xlu0 %1313 }
 0x222   :  { %18877 = vst [vmem:[#allocation174_spill] sm:$0xff] %v8755_v49  ;;  %18878 = vst [vmem:[#allocation175_spill] sm:$0xff] %v8757_v50  ;;  %1638 = vperm.xlu1 %6887, %v293_v33   ;;  %1633 = vperm.xlu0 %6886, %v292_v34   ;;  %v297_v49 = vld [vmem:[%s18136_s0 + $0x818] sm:$0xff]  ;;  %v296_v33 = vld [vmem:[%s18136_s0 + $0x810] sm:$0xff] }
 0x225   :  { %v8765_v2 = vpop.permute.xlu1 %1328  ;;  %v8767_v57 = vpop.permute.xlu0 %1323 }
 0x226   :  { %18879 = vst [vmem:[#allocation176_spill] sm:$0xff] %v8765_v2  ;;  %18880 = vst [vmem:[#allocation177_spill] sm:$0xff] %v8767_v57  ;;  %1648 = vperm.xlu1 %6887, %v295_v17   ;;  %1643 = vperm.xlu0 %6886, %v294_v1   ;;  %v299_v2 = vld [vmem:[%s18136_s0 + $0x828] sm:$0xff]  ;;  %v298_v17 = vld [vmem:[%s18136_s0 + $0x820] sm:$0xff] }
 0x229   :  { %v8775_v34 = vpop.permute.xlu1 %1338  ;;  %v8777_v50 = vpop.permute.xlu0 %1333 }
 0x22a   :  { %18881 = vst [vmem:[#allocation178_spill] sm:$0xff] %v8775_v34  ;;  %18882 = vst [vmem:[#allocation179_spill] sm:$0xff] %v8777_v50  ;;  %1658 = vperm.xlu1 %6887, %v297_v49   ;;  %1653 = vperm.xlu0 %6886, %v296_v33   ;;  %v301_v34 = vld [vmem:[%s18136_s0 + $0x838] sm:$0xff]  ;;  %v300_v49 = vld [vmem:[%s18136_s0 + $0x830] sm:$0xff] }
 0x22d   :  { %v8785_v1 = vpop.permute.xlu1 %1348  ;;  %v8787_v57 = vpop.permute.xlu0 %1343 }
 0x22e   :  { %18883 = vst [vmem:[#allocation180_spill] sm:$0xff] %v8785_v1  ;;  %18884 = vst [vmem:[#allocation181_spill] sm:$0xff] %v8787_v57  ;;  %1668 = vperm.xlu1 %6887, %v299_v2   ;;  %1663 = vperm.xlu0 %6886, %v298_v17   ;;  %v303_v1 = vld [vmem:[%s18136_s0 + $0x848] sm:$0xff]  ;;  %v302_v2 = vld [vmem:[%s18136_s0 + $0x840] sm:$0xff] }
 0x231   :  { %v8795_v33 = vpop.permute.xlu1 %1358  ;;  %v8797_v50 = vpop.permute.xlu0 %1353 }
 0x232   :  { %18885 = vst [vmem:[#allocation182_spill] sm:$0xff] %v8795_v33  ;;  %18886 = vst [vmem:[#allocation183_spill] sm:$0xff] %v8797_v50  ;;  %1678 = vperm.xlu1 %6887, %v301_v34   ;;  %1673 = vperm.xlu0 %6886, %v300_v49   ;;  %v305_v33 = vld [vmem:[%s18136_s0 + $0x858] sm:$0xff]  ;;  %v304_v34 = vld [vmem:[%s18136_s0 + $0x850] sm:$0xff] }
 0x235   :  { %v8805_v17 = vpop.permute.xlu1 %1368  ;;  %v8807_v57 = vpop.permute.xlu0 %1363 }
 0x236   :  { %18887 = vst [vmem:[#allocation184_spill] sm:$0xff] %v8805_v17  ;;  %18888 = vst [vmem:[#allocation185_spill] sm:$0xff] %v8807_v57  ;;  %1688 = vperm.xlu1 %6887, %v303_v1   ;;  %1683 = vperm.xlu0 %6886, %v302_v2   ;;  %v307_v17 = vld [vmem:[%s18136_s0 + $0x868] sm:$0xff]  ;;  %v306_v1 = vld [vmem:[%s18136_s0 + $0x860] sm:$0xff] }
 0x239   :  { %v8815_v49 = vpop.permute.xlu1 %1378  ;;  %v8817_v50 = vpop.permute.xlu0 %1373 }
 0x23a   :  { %18889 = vst [vmem:[#allocation186_spill] sm:$0xff] %v8815_v49  ;;  %18890 = vst [vmem:[#allocation187_spill] sm:$0xff] %v8817_v50  ;;  %1698 = vperm.xlu1 %6887, %v305_v33   ;;  %1693 = vperm.xlu0 %6886, %v304_v34   ;;  %v309_v49 = vld [vmem:[%s18136_s0 + $0x878] sm:$0xff]  ;;  %v308_v33 = vld [vmem:[%s18136_s0 + $0x870] sm:$0xff] }
 0x23d   :  { %v8825_v2 = vpop.permute.xlu1 %1388  ;;  %v8827_v57 = vpop.permute.xlu0 %1383 }
 0x23e   :  { %18891 = vst [vmem:[#allocation188_spill] sm:$0xff] %v8825_v2  ;;  %18892 = vst [vmem:[#allocation189_spill] sm:$0xff] %v8827_v57  ;;  %1708 = vperm.xlu1 %6887, %v307_v17   ;;  %1703 = vperm.xlu0 %6886, %v306_v1   ;;  %v311_v2 = vld [vmem:[%s18136_s0 + $0x888] sm:$0xff]  ;;  %v310_v17 = vld [vmem:[%s18136_s0 + $0x880] sm:$0xff] }
 0x241   :  { %v8835_v34 = vpop.permute.xlu1 %1398  ;;  %v8837_v50 = vpop.permute.xlu0 %1393 }
 0x242   :  { %18893 = vst [vmem:[#allocation190_spill] sm:$0xff] %v8835_v34  ;;  %18894 = vst [vmem:[#allocation191_spill] sm:$0xff] %v8837_v50  ;;  %1718 = vperm.xlu1 %6887, %v309_v49   ;;  %1713 = vperm.xlu0 %6886, %v308_v33   ;;  %v313_v34 = vld [vmem:[%s18136_s0 + $0x898] sm:$0xff]  ;;  %v312_v49 = vld [vmem:[%s18136_s0 + $0x890] sm:$0xff] }
 0x245   :  { %v8845_v1 = vpop.permute.xlu1 %1408  ;;  %v8847_v57 = vpop.permute.xlu0 %1403 }
 0x246   :  { %18895 = vst [vmem:[#allocation192_spill] sm:$0xff] %v8845_v1  ;;  %18896 = vst [vmem:[#allocation193_spill] sm:$0xff] %v8847_v57  ;;  %1728 = vperm.xlu1 %6887, %v311_v2   ;;  %1723 = vperm.xlu0 %6886, %v310_v17   ;;  %v315_v1 = vld [vmem:[%s18136_s0 + $0x8a8] sm:$0xff]  ;;  %v314_v2 = vld [vmem:[%s18136_s0 + $0x8a0] sm:$0xff] }
 0x249   :  { %v8855_v33 = vpop.permute.xlu1 %1418  ;;  %v8857_v50 = vpop.permute.xlu0 %1413 }
 0x24a   :  { %18897 = vst [vmem:[#allocation194_spill] sm:$0xff] %v8855_v33  ;;  %18898 = vst [vmem:[#allocation195_spill] sm:$0xff] %v8857_v50  ;;  %1738 = vperm.xlu1 %6887, %v313_v34   ;;  %1733 = vperm.xlu0 %6886, %v312_v49   ;;  %v317_v33 = vld [vmem:[%s18136_s0 + $0x8b8] sm:$0xff]  ;;  %v316_v34 = vld [vmem:[%s18136_s0 + $0x8b0] sm:$0xff] }
 0x24d   :  { %v8865_v17 = vpop.permute.xlu1 %1428  ;;  %v8867_v57 = vpop.permute.xlu0 %1423 }
 0x24e   :  { %18899 = vst [vmem:[#allocation196_spill] sm:$0xff] %v8865_v17  ;;  %18900 = vst [vmem:[#allocation197_spill] sm:$0xff] %v8867_v57  ;;  %1748 = vperm.xlu1 %6887, %v315_v1   ;;  %1743 = vperm.xlu0 %6886, %v314_v2   ;;  %v319_v17 = vld [vmem:[%s18136_s0 + $0x8c8] sm:$0xff]  ;;  %v318_v1 = vld [vmem:[%s18136_s0 + $0x8c0] sm:$0xff] }
 0x251   :  { %v8875_v49 = vpop.permute.xlu1 %1438  ;;  %v8877_v50 = vpop.permute.xlu0 %1433 }
 0x252   :  { %18901 = vst [vmem:[#allocation198_spill] sm:$0xff] %v8875_v49  ;;  %18902 = vst [vmem:[#allocation199_spill] sm:$0xff] %v8877_v50  ;;  %1758 = vperm.xlu1 %6887, %v317_v33   ;;  %1753 = vperm.xlu0 %6886, %v316_v34   ;;  %v321_v49 = vld [vmem:[%s18136_s0 + $0x8d8] sm:$0xff]  ;;  %v320_v33 = vld [vmem:[%s18136_s0 + $0x8d0] sm:$0xff] }
 0x255   :  { %v8885_v2 = vpop.permute.xlu1 %1448  ;;  %v8887_v57 = vpop.permute.xlu0 %1443 }
 0x256   :  { %18903 = vst [vmem:[#allocation200_spill] sm:$0xff] %v8885_v2  ;;  %18904 = vst [vmem:[#allocation201_spill] sm:$0xff] %v8887_v57  ;;  %1768 = vperm.xlu1 %6887, %v319_v17   ;;  %1763 = vperm.xlu0 %6886, %v318_v1   ;;  %v323_v2 = vld [vmem:[%s18136_s0 + $0x8e8] sm:$0xff]  ;;  %v322_v17 = vld [vmem:[%s18136_s0 + $0x8e0] sm:$0xff] }
 0x259   :  { %v8895_v34 = vpop.permute.xlu1 %1458  ;;  %v8897_v50 = vpop.permute.xlu0 %1453 }
 0x25a   :  { %18905 = vst [vmem:[#allocation202_spill] sm:$0xff] %v8895_v34  ;;  %18906 = vst [vmem:[#allocation203_spill] sm:$0xff] %v8897_v50  ;;  %1778 = vperm.xlu1 %6887, %v321_v49   ;;  %1773 = vperm.xlu0 %6886, %v320_v33   ;;  %v325_v34 = vld [vmem:[%s18136_s0 + $0x8f8] sm:$0xff]  ;;  %v324_v49 = vld [vmem:[%s18136_s0 + $0x8f0] sm:$0xff] }
 0x25d   :  { %v8905_v1 = vpop.permute.xlu1 %1468  ;;  %v8907_v57 = vpop.permute.xlu0 %1463 }
 0x25e   :  { %18907 = vst [vmem:[#allocation204_spill] sm:$0xff] %v8905_v1  ;;  %18908 = vst [vmem:[#allocation205_spill] sm:$0xff] %v8907_v57  ;;  %1788 = vperm.xlu1 %6887, %v323_v2   ;;  %1783 = vperm.xlu0 %6886, %v322_v17   ;;  %v327_v1 = vld [vmem:[%s18136_s0 + $0x908] sm:$0xff]  ;;  %v326_v2 = vld [vmem:[%s18136_s0 + $0x900] sm:$0xff] }
 0x261   :  { %v8915_v33 = vpop.permute.xlu1 %1478  ;;  %v8917_v50 = vpop.permute.xlu0 %1473 }
 0x262   :  { %18909 = vst [vmem:[#allocation206_spill] sm:$0xff] %v8915_v33  ;;  %18910 = vst [vmem:[#allocation207_spill] sm:$0xff] %v8917_v50  ;;  %1798 = vperm.xlu1 %6887, %v325_v34   ;;  %1793 = vperm.xlu0 %6886, %v324_v49   ;;  %v329_v33 = vld [vmem:[%s18136_s0 + $0x918] sm:$0xff]  ;;  %v328_v34 = vld [vmem:[%s18136_s0 + $0x910] sm:$0xff] }
 0x265   :  { %v8925_v17 = vpop.permute.xlu1 %1488  ;;  %v8927_v57 = vpop.permute.xlu0 %1483 }
 0x266   :  { %18911 = vst [vmem:[#allocation208_spill] sm:$0xff] %v8925_v17  ;;  %18912 = vst [vmem:[#allocation209_spill] sm:$0xff] %v8927_v57  ;;  %1808 = vperm.xlu1 %6887, %v327_v1   ;;  %1803 = vperm.xlu0 %6886, %v326_v2   ;;  %v331_v17 = vld [vmem:[%s18136_s0 + $0x928] sm:$0xff]  ;;  %v330_v1 = vld [vmem:[%s18136_s0 + $0x920] sm:$0xff] }
 0x269   :  { %v8935_v49 = vpop.permute.xlu1 %1498  ;;  %v8937_v50 = vpop.permute.xlu0 %1493 }
 0x26a   :  { %18913 = vst [vmem:[#allocation210_spill] sm:$0xff] %v8935_v49  ;;  %18914 = vst [vmem:[#allocation211_spill] sm:$0xff] %v8937_v50  ;;  %1818 = vperm.xlu1 %6887, %v329_v33   ;;  %1813 = vperm.xlu0 %6886, %v328_v34   ;;  %v333_v49 = vld [vmem:[%s18136_s0 + $0x938] sm:$0xff]  ;;  %v332_v33 = vld [vmem:[%s18136_s0 + $0x930] sm:$0xff] }
 0x26d   :  { %v8945_v2 = vpop.permute.xlu1 %1508  ;;  %v8947_v57 = vpop.permute.xlu0 %1503 }
 0x26e   :  { %18915 = vst [vmem:[#allocation212_spill] sm:$0xff] %v8945_v2  ;;  %18916 = vst [vmem:[#allocation213_spill] sm:$0xff] %v8947_v57  ;;  %1828 = vperm.xlu1 %6887, %v331_v17   ;;  %1823 = vperm.xlu0 %6886, %v330_v1   ;;  %v335_v2 = vld [vmem:[%s18136_s0 + $0x948] sm:$0xff]  ;;  %v334_v17 = vld [vmem:[%s18136_s0 + $0x940] sm:$0xff] }
 0x271   :  { %v8955_v34 = vpop.permute.xlu1 %1518  ;;  %v8957_v50 = vpop.permute.xlu0 %1513 }
 0x272   :  { %18917 = vst [vmem:[#allocation214_spill] sm:$0xff] %v8955_v34  ;;  %18918 = vst [vmem:[#allocation215_spill] sm:$0xff] %v8957_v50  ;;  %1838 = vperm.xlu1 %6887, %v333_v49   ;;  %1833 = vperm.xlu0 %6886, %v332_v33   ;;  %v337_v34 = vld [vmem:[%s18136_s0 + $0x958] sm:$0xff]  ;;  %v336_v49 = vld [vmem:[%s18136_s0 + $0x950] sm:$0xff] }
 0x275   :  { %v8965_v1 = vpop.permute.xlu1 %1528  ;;  %v8967_v57 = vpop.permute.xlu0 %1523 }
 0x276   :  { %18919 = vst [vmem:[#allocation216_spill] sm:$0xff] %v8965_v1  ;;  %18920 = vst [vmem:[#allocation217_spill] sm:$0xff] %v8967_v57  ;;  %1848 = vperm.xlu1 %6887, %v335_v2   ;;  %1843 = vperm.xlu0 %6886, %v334_v17   ;;  %v339_v1 = vld [vmem:[%s18136_s0 + $0x968] sm:$0xff]  ;;  %v338_v2 = vld [vmem:[%s18136_s0 + $0x960] sm:$0xff] }
 0x279   :  { %v8975_v33 = vpop.permute.xlu1 %1538  ;;  %v8977_v50 = vpop.permute.xlu0 %1533 }
 0x27a   :  { %18921 = vst [vmem:[#allocation218_spill] sm:$0xff] %v8975_v33  ;;  %18922 = vst [vmem:[#allocation219_spill] sm:$0xff] %v8977_v50  ;;  %1858 = vperm.xlu1 %6887, %v337_v34   ;;  %1853 = vperm.xlu0 %6886, %v336_v49   ;;  %v341_v33 = vld [vmem:[%s18136_s0 + $0x978] sm:$0xff]  ;;  %v340_v34 = vld [vmem:[%s18136_s0 + $0x970] sm:$0xff] }
 0x27d   :  { %v8985_v17 = vpop.permute.xlu1 %1548  ;;  %v8987_v57 = vpop.permute.xlu0 %1543 }
 0x27e   :  { %18923 = vst [vmem:[#allocation220_spill] sm:$0xff] %v8985_v17  ;;  %18924 = vst [vmem:[#allocation221_spill] sm:$0xff] %v8987_v57  ;;  %1868 = vperm.xlu1 %6887, %v339_v1   ;;  %1863 = vperm.xlu0 %6886, %v338_v2   ;;  %v343_v17 = vld [vmem:[%s18136_s0 + $0x988] sm:$0xff]  ;;  %v342_v1 = vld [vmem:[%s18136_s0 + $0x980] sm:$0xff] }
 0x281   :  { %v8995_v49 = vpop.permute.xlu1 %1558  ;;  %v8997_v50 = vpop.permute.xlu0 %1553 }
 0x282   :  { %18925 = vst [vmem:[#allocation222_spill] sm:$0xff] %v8995_v49  ;;  %18926 = vst [vmem:[#allocation223_spill] sm:$0xff] %v8997_v50  ;;  %1878 = vperm.xlu1 %6887, %v341_v33   ;;  %1873 = vperm.xlu0 %6886, %v340_v34   ;;  %v345_v49 = vld [vmem:[%s18136_s0 + $0x998] sm:$0xff]  ;;  %v344_v33 = vld [vmem:[%s18136_s0 + $0x990] sm:$0xff] }
 0x285   :  { %v9005_v2 = vpop.permute.xlu1 %1568  ;;  %v9007_v57 = vpop.permute.xlu0 %1563 }
 0x286   :  { %18927 = vst [vmem:[#allocation224_spill] sm:$0xff] %v9005_v2  ;;  %18928 = vst [vmem:[#allocation225_spill] sm:$0xff] %v9007_v57  ;;  %1888 = vperm.xlu1 %6887, %v343_v17   ;;  %1883 = vperm.xlu0 %6886, %v342_v1   ;;  %v346_v2 = vld [vmem:[%s18136_s0 + $0x9a0] sm:$0x3]  ;;  %v7561_v57 = vmov 2  }
 0x289   :  { %v9015_v34 = vpop.permute.xlu1 %1578  ;;  %v9017_v50 = vpop.permute.xlu0 %1573 }
 0x28a   :  { %18929 = vst [vmem:[#allocation226_spill] sm:$0xff] %v9015_v34  ;;  %18930 = vst [vmem:[#allocation227_spill] sm:$0xff] %v9017_v50  ;;  %1898 = vperm.xlu1 %6887, %v345_v49   ;;  %1893 = vperm.xlu0 %6886, %v344_v33   ;;  %v6893_v33 = vld [vmem:[%s18136_s0 + $0x10] sm:$0xff]  ;;  %v6960_v50 = vld [vmem:[%s18136_s0 + $0x220] sm:$0xff] }
 0x28d   :  { %v9022_v17 = vpop.permute.xlu1 %1588  ;;  %v9024_v1 = vpop.permute.xlu0 %1583 }
 0x28e   :  { %18931 = vst [vmem:[#allocation228_spill] sm:$0xff] %v9022_v17  ;;  %18932 = vst [vmem:[#allocation229_spill] sm:$0xff] %v9024_v1  ;;  %6888 = vset.pattern.permute.xlu1 %v7561_v57  ;;  %1903 = vperm.xlu0 %6886, %v346_v2   ;;  %v6894_v17 = vld [vmem:[%s18136_s0 + $0x8] sm:$0xff] }
 0x28f   :  { %1907 = vperm.xlu1 %6888, %v6892_v18   ;;  %v6895_v18 = vld [vmem:[%s18136_s0 + $0x18] sm:$0xff] }
 0x291   :  { %v9029_v34 = vpop.permute.xlu1 %1598  ;;  %v9031_v49 = vpop.permute.xlu0 %1593 }
 0x292   :  { %18933 = vst [vmem:[#allocation230_spill] sm:$0xff] %v9029_v34  ;;  %18934 = vst [vmem:[#allocation231_spill] sm:$0xff] %v9031_v49  ;;  %6889 = vset.pattern.permute.xlu0 %v7561_v57  ;;  %v6896_v57 = vld [vmem:[%s18136_s0 + $0x20] sm:$0xff] }
 0x293   :  { %1915 = vperm.xlu1 %6888, %v6893_v33   ;;  %1911 = vperm.xlu0 %6889, %v6894_v17   ;;  %v6897_v17 = vld [vmem:[%s18136_s0 + $0x28] sm:$0xff] }
 0x295   :  { %v9039_v2 = vpop.permute.xlu1 %1608  ;;  %v9041_v1 = vpop.permute.xlu0 %1603 }
 0x296   :  { %18935 = vst [vmem:[#allocation232_spill] sm:$0xff] %v9039_v2  ;;  %18936 = vst [vmem:[#allocation233_spill] sm:$0xff] %v9041_v1  ;;  %v6898_v2 = vld [vmem:[%s18136_s0 + $0x30] sm:$0xff] }
 0x297   :  { %1919 = vperm.xlu1 %6888, %v6895_v18   ;;  %1923 = vperm.xlu0 %6889, %v6896_v57   ;;  %v6899_v57 = vld [vmem:[%s18136_s0 + $0x38] sm:$0xff] }
 0x299   :  { %v9049_v33 = vpop.permute.xlu1 %1618  ;;  %v9051_v34 = vpop.permute.xlu0 %1613 }
 0x29a   :  { %18937 = vst [vmem:[#allocation234_spill] sm:$0xff] %v9049_v33  ;;  %18938 = vst [vmem:[#allocation235_spill] sm:$0xff] %v9051_v34  ;;  %v6900_v33 = vld [vmem:[%s18136_s0 + $0x40] sm:$0xff] }
 0x29b   :  { %1927 = vperm.xlu1 %6888, %v6897_v17   ;;  %1931 = vperm.xlu0 %6889, %v6898_v2   ;;  %v6901_v2 = vld [vmem:[%s18136_s0 + $0x48] sm:$0xff] }
 0x29d   :  { %v9059_v18 = vpop.permute.xlu1 %1628  ;;  %v9061_v1 = vpop.permute.xlu0 %1623 }
 0x29e   :  { %18939 = vst [vmem:[#allocation236_spill] sm:$0xff] %v9059_v18  ;;  %18940 = vst [vmem:[#allocation237_spill] sm:$0xff] %v9061_v1  ;;  %v6902_v18 = vld [vmem:[%s18136_s0 + $0x50] sm:$0xff] }
 0x29f   :  { %1935 = vperm.xlu1 %6888, %v6899_v57   ;;  %1939 = vperm.xlu0 %6889, %v6900_v33   ;;  %v6903_v33 = vld [vmem:[%s18136_s0 + $0x58] sm:$0xff] }
 0x2a1   :  { %v9069_v17 = vpop.permute.xlu1 %1638  ;;  %v9071_v34 = vpop.permute.xlu0 %1633 }
 0x2a2   :  { %18941 = vst [vmem:[#allocation238_spill] sm:$0xff] %v9069_v17  ;;  %18942 = vst [vmem:[#allocation239_spill] sm:$0xff] %v9071_v34  ;;  %v6904_v17 = vld [vmem:[%s18136_s0 + $0x60] sm:$0xff] }
 0x2a3   :  { %1943 = vperm.xlu1 %6888, %v6901_v2   ;;  %1947 = vperm.xlu0 %6889, %v6902_v18   ;;  %v6905_v18 = vld [vmem:[%s18136_s0 + $0x68] sm:$0xff] }
 0x2a5   :  { %v9079_v57 = vpop.permute.xlu1 %1648  ;;  %v9081_v1 = vpop.permute.xlu0 %1643 }
 0x2a6   :  { %18943 = vst [vmem:[#allocation240_spill] sm:$0xff] %v9079_v57  ;;  %18944 = vst [vmem:[#allocation241_spill] sm:$0xff] %v9081_v1  ;;  %v6906_v57 = vld [vmem:[%s18136_s0 + $0x70] sm:$0xff] }
 0x2a7   :  { %1951 = vperm.xlu1 %6888, %v6903_v33   ;;  %1955 = vperm.xlu0 %6889, %v6904_v17   ;;  %v6907_v17 = vld [vmem:[%s18136_s0 + $0x78] sm:$0xff] }
 0x2a9   :  { %v9089_v2 = vpop.permute.xlu1 %1658  ;;  %v9091_v34 = vpop.permute.xlu0 %1653 }
 0x2aa   :  { %18945 = vst [vmem:[#allocation242_spill] sm:$0xff] %v9089_v2  ;;  %18946 = vst [vmem:[#allocation243_spill] sm:$0xff] %v9091_v34  ;;  %v6908_v2 = vld [vmem:[%s18136_s0 + $0x80] sm:$0xff] }
 0x2ab   :  { %1959 = vperm.xlu1 %6888, %v6905_v18   ;;  %1963 = vperm.xlu0 %6889, %v6906_v57   ;;  %v6909_v57 = vld [vmem:[%s18136_s0 + $0x88] sm:$0xff] }
 0x2ad   :  { %v9099_v33 = vpop.permute.xlu1 %1668  ;;  %v9101_v1 = vpop.permute.xlu0 %1663 }
 0x2ae   :  { %18947 = vst [vmem:[#allocation244_spill] sm:$0xff] %v9099_v33  ;;  %18948 = vst [vmem:[#allocation245_spill] sm:$0xff] %v9101_v1  ;;  %v6910_v33 = vld [vmem:[%s18136_s0 + $0x90] sm:$0xff] }
 0x2af   :  { %1967 = vperm.xlu1 %6888, %v6907_v17   ;;  %1971 = vperm.xlu0 %6889, %v6908_v2   ;;  %v6911_v2 = vld [vmem:[%s18136_s0 + $0x98] sm:$0xff] }
 0x2b1   :  { %v9109_v18 = vpop.permute.xlu1 %1678  ;;  %v9111_v34 = vpop.permute.xlu0 %1673 }
 0x2b2   :  { %18949 = vst [vmem:[#allocation246_spill] sm:$0xff] %v9109_v18  ;;  %18950 = vst [vmem:[#allocation247_spill] sm:$0xff] %v9111_v34  ;;  %v6912_v18 = vld [vmem:[%s18136_s0 + $0xa0] sm:$0xff] }
 0x2b3   :  { %1975 = vperm.xlu1 %6888, %v6909_v57   ;;  %1979 = vperm.xlu0 %6889, %v6910_v33   ;;  %v6913_v33 = vld [vmem:[%s18136_s0 + $0xa8] sm:$0xff] }
 0x2b5   :  { %v9119_v17 = vpop.permute.xlu1 %1688  ;;  %v9121_v1 = vpop.permute.xlu0 %1683 }
 0x2b6   :  { %18951 = vst [vmem:[#allocation248_spill] sm:$0xff] %v9119_v17  ;;  %18952 = vst [vmem:[#allocation249_spill] sm:$0xff] %v9121_v1  ;;  %v6914_v17 = vld [vmem:[%s18136_s0 + $0xb0] sm:$0xff] }
 0x2b7   :  { %1983 = vperm.xlu1 %6888, %v6911_v2   ;;  %1987 = vperm.xlu0 %6889, %v6912_v18   ;;  %v6915_v18 = vld [vmem:[%s18136_s0 + $0xb8] sm:$0xff] }
 0x2b9   :  { %v9129_v57 = vpop.permute.xlu1 %1698  ;;  %v9131_v34 = vpop.permute.xlu0 %1693 }
 0x2ba   :  { %18953 = vst [vmem:[#allocation250_spill] sm:$0xff] %v9129_v57  ;;  %18954 = vst [vmem:[#allocation251_spill] sm:$0xff] %v9131_v34  ;;  %v6916_v57 = vld [vmem:[%s18136_s0 + $0xc0] sm:$0xff] }
 0x2bb   :  { %1991 = vperm.xlu1 %6888, %v6913_v33   ;;  %1995 = vperm.xlu0 %6889, %v6914_v17   ;;  %v6917_v17 = vld [vmem:[%s18136_s0 + $0xc8] sm:$0xff] }
 0x2bd   :  { %v9139_v2 = vpop.permute.xlu1 %1708  ;;  %v9141_v1 = vpop.permute.xlu0 %1703 }
 0x2be   :  { %18955 = vst [vmem:[#allocation252_spill] sm:$0xff] %v9139_v2  ;;  %18956 = vst [vmem:[#allocation253_spill] sm:$0xff] %v9141_v1  ;;  %v6918_v2 = vld [vmem:[%s18136_s0 + $0xd0] sm:$0xff] }
 0x2bf   :  { %1999 = vperm.xlu1 %6888, %v6915_v18   ;;  %2003 = vperm.xlu0 %6889, %v6916_v57   ;;  %v6919_v57 = vld [vmem:[%s18136_s0 + $0xd8] sm:$0xff] }
 0x2c1   :  { %v9149_v33 = vpop.permute.xlu1 %1718  ;;  %v9151_v34 = vpop.permute.xlu0 %1713 }
 0x2c2   :  { %18957 = vst [vmem:[#allocation254_spill] sm:$0xff] %v9149_v33  ;;  %18958 = vst [vmem:[#allocation255_spill] sm:$0xff] %v9151_v34  ;;  %v6920_v33 = vld [vmem:[%s18136_s0 + $0xe0] sm:$0xff] }
 0x2c3   :  { %2007 = vperm.xlu1 %6888, %v6917_v17   ;;  %2011 = vperm.xlu0 %6889, %v6918_v2   ;;  %v6921_v2 = vld [vmem:[%s18136_s0 + $0xe8] sm:$0xff] }
 0x2c5   :  { %v9159_v18 = vpop.permute.xlu1 %1728  ;;  %v9161_v1 = vpop.permute.xlu0 %1723 }
 0x2c6   :  { %18959 = vst [vmem:[#allocation256_spill] sm:$0xff] %v9159_v18  ;;  %18960 = vst [vmem:[#allocation257_spill] sm:$0xff] %v9161_v1  ;;  %v6922_v18 = vld [vmem:[%s18136_s0 + $0xf0] sm:$0xff] }
 0x2c7   :  { %2015 = vperm.xlu1 %6888, %v6919_v57   ;;  %2019 = vperm.xlu0 %6889, %v6920_v33   ;;  %v6923_v33 = vld [vmem:[%s18136_s0 + $0xf8] sm:$0xff] }
 0x2c9   :  { %v9169_v17 = vpop.permute.xlu1 %1738  ;;  %v9171_v34 = vpop.permute.xlu0 %1733 }
 0x2ca   :  { %18961 = vst [vmem:[#allocation258_spill] sm:$0xff] %v9169_v17  ;;  %18962 = vst [vmem:[#allocation259_spill] sm:$0xff] %v9171_v34  ;;  %v6924_v17 = vld [vmem:[%s18136_s0 + $0x100] sm:$0xff] }
 0x2cb   :  { %2023 = vperm.xlu1 %6888, %v6921_v2   ;;  %2027 = vperm.xlu0 %6889, %v6922_v18   ;;  %v6925_v18 = vld [vmem:[%s18136_s0 + $0x108] sm:$0xff] }
 0x2cd   :  { %v9179_v57 = vpop.permute.xlu1 %1748  ;;  %v9181_v1 = vpop.permute.xlu0 %1743 }
 0x2ce   :  { %18963 = vst [vmem:[#allocation260_spill] sm:$0xff] %v9179_v57  ;;  %18964 = vst [vmem:[#allocation261_spill] sm:$0xff] %v9181_v1  ;;  %v6926_v57 = vld [vmem:[%s18136_s0 + $0x110] sm:$0xff] }
 0x2cf   :  { %2031 = vperm.xlu1 %6888, %v6923_v33   ;;  %2035 = vperm.xlu0 %6889, %v6924_v17   ;;  %v6927_v17 = vld [vmem:[%s18136_s0 + $0x118] sm:$0xff] }
 0x2d1   :  { %v9189_v2 = vpop.permute.xlu1 %1758  ;;  %v9191_v34 = vpop.permute.xlu0 %1753 }
 0x2d2   :  { %18965 = vst [vmem:[#allocation262_spill] sm:$0xff] %v9189_v2  ;;  %18966 = vst [vmem:[#allocation263_spill] sm:$0xff] %v9191_v34  ;;  %v6928_v2 = vld [vmem:[%s18136_s0 + $0x120] sm:$0xff] }
 0x2d3   :  { %2039 = vperm.xlu1 %6888, %v6925_v18   ;;  %2043 = vperm.xlu0 %6889, %v6926_v57   ;;  %v6929_v57 = vld [vmem:[%s18136_s0 + $0x128] sm:$0xff] }
 0x2d5   :  { %v9199_v33 = vpop.permute.xlu1 %1768  ;;  %v9201_v1 = vpop.permute.xlu0 %1763 }
 0x2d6   :  { %18967 = vst [vmem:[#allocation264_spill] sm:$0xff] %v9199_v33  ;;  %18968 = vst [vmem:[#allocation265_spill] sm:$0xff] %v9201_v1  ;;  %v6930_v33 = vld [vmem:[%s18136_s0 + $0x130] sm:$0xff] }
 0x2d7   :  { %2047 = vperm.xlu1 %6888, %v6927_v17   ;;  %2051 = vperm.xlu0 %6889, %v6928_v2   ;;  %v6931_v2 = vld [vmem:[%s18136_s0 + $0x138] sm:$0xff] }
 0x2d9   :  { %v9209_v18 = vpop.permute.xlu1 %1778  ;;  %v9211_v34 = vpop.permute.xlu0 %1773 }
 0x2da   :  { %18969 = vst [vmem:[#allocation266_spill] sm:$0xff] %v9209_v18  ;;  %18970 = vst [vmem:[#allocation267_spill] sm:$0xff] %v9211_v34  ;;  %v6932_v18 = vld [vmem:[%s18136_s0 + $0x140] sm:$0xff] }
 0x2db   :  { %2055 = vperm.xlu1 %6888, %v6929_v57   ;;  %2059 = vperm.xlu0 %6889, %v6930_v33   ;;  %v6933_v33 = vld [vmem:[%s18136_s0 + $0x148] sm:$0xff] }
 0x2dd   :  { %v9219_v17 = vpop.permute.xlu1 %1788  ;;  %v9221_v1 = vpop.permute.xlu0 %1783 }
 0x2de   :  { %18971 = vst [vmem:[#allocation268_spill] sm:$0xff] %v9219_v17  ;;  %18972 = vst [vmem:[#allocation269_spill] sm:$0xff] %v9221_v1  ;;  %v6934_v17 = vld [vmem:[%s18136_s0 + $0x150] sm:$0xff] }
 0x2df   :  { %2063 = vperm.xlu1 %6888, %v6931_v2   ;;  %2067 = vperm.xlu0 %6889, %v6932_v18   ;;  %v6935_v18 = vld [vmem:[%s18136_s0 + $0x158] sm:$0xff] }
 0x2e1   :  { %v9229_v57 = vpop.permute.xlu1 %1798  ;;  %v9231_v34 = vpop.permute.xlu0 %1793 }
 0x2e2   :  { %18973 = vst [vmem:[#allocation270_spill] sm:$0xff] %v9229_v57  ;;  %18974 = vst [vmem:[#allocation271_spill] sm:$0xff] %v9231_v34  ;;  %v6936_v57 = vld [vmem:[%s18136_s0 + $0x160] sm:$0xff] }
 0x2e3   :  { %2071 = vperm.xlu1 %6888, %v6933_v33   ;;  %2075 = vperm.xlu0 %6889, %v6934_v17   ;;  %v6937_v17 = vld [vmem:[%s18136_s0 + $0x168] sm:$0xff] }
 0x2e5   :  { %v9239_v2 = vpop.permute.xlu1 %1808  ;;  %v9241_v1 = vpop.permute.xlu0 %1803 }
 0x2e6   :  { %18975 = vst [vmem:[#allocation272_spill] sm:$0xff] %v9239_v2  ;;  %18976 = vst [vmem:[#allocation273_spill] sm:$0xff] %v9241_v1  ;;  %v6938_v2 = vld [vmem:[%s18136_s0 + $0x170] sm:$0xff] }
 0x2e7   :  { %2079 = vperm.xlu1 %6888, %v6935_v18   ;;  %2083 = vperm.xlu0 %6889, %v6936_v57   ;;  %v6939_v57 = vld [vmem:[%s18136_s0 + $0x178] sm:$0xff] }
 0x2e9   :  { %v9249_v33 = vpop.permute.xlu1 %1818  ;;  %v9251_v34 = vpop.permute.xlu0 %1813 }
 0x2ea   :  { %18977 = vst [vmem:[#allocation274_spill] sm:$0xff] %v9249_v33  ;;  %18978 = vst [vmem:[#allocation275_spill] sm:$0xff] %v9251_v34  ;;  %v6940_v33 = vld [vmem:[%s18136_s0 + $0x180] sm:$0xff] }
 0x2eb   :  { %2087 = vperm.xlu1 %6888, %v6937_v17   ;;  %2091 = vperm.xlu0 %6889, %v6938_v2   ;;  %v6941_v2 = vld [vmem:[%s18136_s0 + $0x188] sm:$0xff] }
 0x2ed   :  { %v9259_v18 = vpop.permute.xlu1 %1828  ;;  %v9261_v1 = vpop.permute.xlu0 %1823 }
 0x2ee   :  { %18979 = vst [vmem:[#allocation276_spill] sm:$0xff] %v9259_v18  ;;  %18980 = vst [vmem:[#allocation277_spill] sm:$0xff] %v9261_v1  ;;  %v6942_v18 = vld [vmem:[%s18136_s0 + $0x190] sm:$0xff] }
 0x2ef   :  { %2095 = vperm.xlu1 %6888, %v6939_v57   ;;  %2099 = vperm.xlu0 %6889, %v6940_v33   ;;  %v6943_v33 = vld [vmem:[%s18136_s0 + $0x198] sm:$0xff] }
 0x2f1   :  { %v9269_v17 = vpop.permute.xlu1 %1838  ;;  %v9271_v34 = vpop.permute.xlu0 %1833 }
 0x2f2   :  { %18981 = vst [vmem:[#allocation278_spill] sm:$0xff] %v9269_v17  ;;  %18982 = vst [vmem:[#allocation279_spill] sm:$0xff] %v9271_v34  ;;  %v6944_v17 = vld [vmem:[%s18136_s0 + $0x1a0] sm:$0xff] }
 0x2f3   :  { %2103 = vperm.xlu1 %6888, %v6941_v2   ;;  %2107 = vperm.xlu0 %6889, %v6942_v18   ;;  %v6945_v18 = vld [vmem:[%s18136_s0 + $0x1a8] sm:$0xff] }
 0x2f5   :  { %v9279_v57 = vpop.permute.xlu1 %1848  ;;  %v9281_v1 = vpop.permute.xlu0 %1843 }
 0x2f6   :  { %18983 = vst [vmem:[#allocation280_spill] sm:$0xff] %v9279_v57  ;;  %18984 = vst [vmem:[#allocation281_spill] sm:$0xff] %v9281_v1  ;;  %v6946_v57 = vld [vmem:[%s18136_s0 + $0x1b0] sm:$0xff] }
 0x2f7   :  { %2111 = vperm.xlu1 %6888, %v6943_v33   ;;  %2115 = vperm.xlu0 %6889, %v6944_v17   ;;  %v6947_v17 = vld [vmem:[%s18136_s0 + $0x1b8] sm:$0xff] }
 0x2f9   :  { %v9289_v2 = vpop.permute.xlu1 %1858  ;;  %v9291_v34 = vpop.permute.xlu0 %1853 }
 0x2fa   :  { %18985 = vst [vmem:[#allocation282_spill] sm:$0xff] %v9289_v2  ;;  %18986 = vst [vmem:[#allocation283_spill] sm:$0xff] %v9291_v34  ;;  %v6948_v2 = vld [vmem:[%s18136_s0 + $0x1c0] sm:$0xff] }
 0x2fb   :  { %2119 = vperm.xlu1 %6888, %v6945_v18   ;;  %2123 = vperm.xlu0 %6889, %v6946_v57   ;;  %v6949_v57 = vld [vmem:[%s18136_s0 + $0x1c8] sm:$0xff] }
 0x2fd   :  { %v9299_v33 = vpop.permute.xlu1 %1868  ;;  %v9301_v1 = vpop.permute.xlu0 %1863 }
 0x2fe   :  { %18987 = vst [vmem:[#allocation284_spill] sm:$0xff] %v9299_v33  ;;  %18988 = vst [vmem:[#allocation285_spill] sm:$0xff] %v9301_v1  ;;  %v6950_v33 = vld [vmem:[%s18136_s0 + $0x1d0] sm:$0xff] }
 0x2ff   :  { %2127 = vperm.xlu1 %6888, %v6947_v17   ;;  %2131 = vperm.xlu0 %6889, %v6948_v2   ;;  %v6951_v2 = vld [vmem:[%s18136_s0 + $0x1d8] sm:$0xff] }
 0x301   :  { %v9309_v18 = vpop.permute.xlu1 %1878  ;;  %v9311_v34 = vpop.permute.xlu0 %1873 }
 0x302   :  { %18989 = vst [vmem:[#allocation286_spill] sm:$0xff] %v9309_v18  ;;  %18990 = vst [vmem:[#allocation287_spill] sm:$0xff] %v9311_v34  ;;  %v6952_v18 = vld [vmem:[%s18136_s0 + $0x1e0] sm:$0xff] }
 0x303   :  { %2135 = vperm.xlu1 %6888, %v6949_v57   ;;  %2139 = vperm.xlu0 %6889, %v6950_v33   ;;  %v6953_v33 = vld [vmem:[%s18136_s0 + $0x1e8] sm:$0xff] }
 0x305   :  { %v9319_v17 = vpop.permute.xlu1 %1888  ;;  %v9321_v1 = vpop.permute.xlu0 %1883 }
 0x306   :  { %18991 = vst [vmem:[#allocation288_spill] sm:$0xff] %v9319_v17  ;;  %18992 = vst [vmem:[#allocation289_spill] sm:$0xff] %v9321_v1  ;;  %v6954_v17 = vld [vmem:[%s18136_s0 + $0x1f0] sm:$0xff] }
 0x307   :  { %2143 = vperm.xlu1 %6888, %v6951_v2   ;;  %2147 = vperm.xlu0 %6889, %v6952_v18   ;;  %v6955_v18 = vld [vmem:[%s18136_s0 + $0x1f8] sm:$0xff] }
 0x309   :  { %v9329_v57 = vpop.permute.xlu1 %1898  ;;  %v9331_v34 = vpop.permute.xlu0 %1893 }
 0x30a   :  { %18993 = vst [vmem:[#allocation290_spill] sm:$0xff] %v9329_v57  ;;  %18994 = vst [vmem:[#allocation291_spill] sm:$0xff] %v9331_v34  ;;  %v6956_v57 = vld [vmem:[%s18136_s0 + $0x200] sm:$0xff] }
 0x30b   :  { %2151 = vperm.xlu1 %6888, %v6953_v33   ;;  %2155 = vperm.xlu0 %6889, %v6954_v17   ;;  %v6957_v17 = vld [vmem:[%s18136_s0 + $0x208] sm:$0xff] }
 0x30d   :  { %v9339_v2 = vpop.permute.xlu0 %1903 }
 0x30e   :  { %18995 = vst [vmem:[#allocation292_spill] sm:$0xff] %v9339_v2  ;;  %v9341_v1 = vpop.permute.xlu1 %1907  ;;  %v6958_v2 = vld [vmem:[%s18136_s0 + $0x210] sm:$0xff] }
 0x30f   :  { %2159 = vperm.xlu1 %6888, %v6955_v18   ;;  %2163 = vperm.xlu0 %6889, %v6956_v57   ;;  %v6959_v57 = vld [vmem:[%s18136_s0 + $0x218] sm:$0xff] }
 0x312   :  { %v9349_v33 = vpop.permute.xlu1 %1915  ;;  %v9351_v34 = vpop.permute.xlu0 %1911 }
 0x313   :  { %2167 = vperm.xlu1 %6888, %v6957_v17   ;;  %2171 = vperm.xlu0 %6889, %v6958_v2   ;;  %v6961_v2 = vld [vmem:[%s18136_s0 + $0x228] sm:$0xff] }
 0x316   :  { %v9359_v18 = vpop.permute.xlu1 %1919  ;;  %v9361_v49 = vpop.permute.xlu0 %1923 }
 0x317   :  { %2175 = vperm.xlu1 %6888, %v6959_v57   ;;  %2179 = vperm.xlu0 %6889, %v6960_v50   ;;  %v6963_v50 = vld [vmem:[%s18136_s0 + $0x238] sm:$0xff] }
 0x31a   :  { %v9369_v17 = vpop.permute.xlu1 %1927  ;;  %v9371_v41 = vpop.permute.xlu0 %1931 }
 0x31b   :  { %2183 = vperm.xlu1 %6888, %v6961_v2   ;;  %2187 = vperm.xlu0 %6889, %v6962_v58   ;;  %v6965_v58 = vld [vmem:[%s18136_s0 + $0x248] sm:$0xff] }
 0x31e   :  { %v9379_v57 = vpop.permute.xlu1 %1935  ;;  %v9381_v25 = vpop.permute.xlu0 %1939 }
 0x31f   :  { %2191 = vperm.xlu1 %6888, %v6963_v50   ;;  %2195 = vperm.xlu0 %6889, %v6964_v42   ;;  %v6967_v42 = vld [vmem:[%s18136_s0 + $0x258] sm:$0xff] }
 0x322   :  { %v9389_v2 = vpop.permute.xlu1 %1943  ;;  %v9391_v9 = vpop.permute.xlu0 %1947 }
 0x323   :  { %2199 = vperm.xlu1 %6888, %v6965_v58   ;;  %2203 = vperm.xlu0 %6889, %v6966_v26   ;;  %v6969_v26 = vld [vmem:[%s18136_s0 + $0x268] sm:$0xff] }
 0x326   :  { %v9399_v50 = vpop.permute.xlu1 %1951  ;;  %v9401_v61 = vpop.permute.xlu0 %1955 }
 0x327   :  { %2207 = vperm.xlu1 %6888, %v6967_v42   ;;  %2211 = vperm.xlu0 %6889, %v6968_v10   ;;  %v6971_v10 = vld [vmem:[%s18136_s0 + $0x278] sm:$0xff] }
 0x32a   :  { %v9409_v58 = vpop.permute.xlu1 %1959  ;;  %v9411_v53 = vpop.permute.xlu0 %1963 }
 0x32b   :  { %2215 = vperm.xlu1 %6888, %v6969_v26   ;;  %2219 = vperm.xlu0 %6889, %v6970_v62   ;;  %v6973_v62 = vld [vmem:[%s18136_s0 + $0x288] sm:$0xff] }
 0x32e   :  { %v9419_v42 = vpop.permute.xlu1 %1967  ;;  %v9421_v45 = vpop.permute.xlu0 %1971 }
 0x32f   :  { %2223 = vperm.xlu1 %6888, %v6971_v10   ;;  %2227 = vperm.xlu0 %6889, %v6972_v54   ;;  %v6975_v54 = vld [vmem:[%s18136_s0 + $0x298] sm:$0xff] }
 0x332   :  { %v9429_v26 = vpop.permute.xlu1 %1975  ;;  %v9431_v37 = vpop.permute.xlu0 %1979 }
 0x333   :  { %2231 = vperm.xlu1 %6888, %v6973_v62   ;;  %2235 = vperm.xlu0 %6889, %v6974_v46   ;;  %v6977_v46 = vld [vmem:[%s18136_s0 + $0x2a8] sm:$0xff] }
 0x336   :  { %v9439_v10 = vpop.permute.xlu1 %1983  ;;  %v9441_v29 = vpop.permute.xlu0 %1987 }
 0x337   :  { %2239 = vperm.xlu1 %6888, %v6975_v54   ;;  %2243 = vperm.xlu0 %6889, %v6976_v38   ;;  %v6979_v38 = vld [vmem:[%s18136_s0 + $0x2b8] sm:$0xff] }
 0x33a   :  { %v9449_v62 = vpop.permute.xlu1 %1991  ;;  %v9451_v21 = vpop.permute.xlu0 %1995 }
 0x33b   :  { %2247 = vperm.xlu1 %6888, %v6977_v46   ;;  %2251 = vperm.xlu0 %6889, %v6978_v30   ;;  %v6981_v30 = vld [vmem:[%s18136_s0 + $0x2c8] sm:$0xff] }
 0x33e   :  { %v9459_v54 = vpop.permute.xlu1 %1999  ;;  %v9461_v13 = vpop.permute.xlu0 %2003 }
 0x33f   :  { %2255 = vperm.xlu1 %6888, %v6979_v38   ;;  %2259 = vperm.xlu0 %6889, %v6980_v22   ;;  %v6983_v22 = vld [vmem:[%s18136_s0 + $0x2d8] sm:$0xff] }
 0x342   :  { %v9469_v46 = vpop.permute.xlu1 %2007  ;;  %v9471_v5 = vpop.permute.xlu0 %2011 }
 0x343   :  { %18996 = vst [vmem:[#allocation293_spill] sm:$0xff] %v9469_v46  ;;  %18997 = vst [vmem:[#allocation294_spill] sm:$0xff] %v9471_v5  ;;  %2263 = vperm.xlu1 %6888, %v6981_v30   ;;  %2267 = vperm.xlu0 %6889, %v6982_v14   ;;  %v6985_v14 = vld [vmem:[%s18136_s0 + $0x2e8] sm:$0xff]  ;;  %v7261_v46 = vld [vmem:[%s18136_s0 + $0x1d8] sm:$0xff] }
 0x346   :  { %v9479_v38 = vpop.permute.xlu1 %2015  ;;  %v9481_v63 = vpop.permute.xlu0 %2019 }
 0x347   :  { %18998 = vst [vmem:[#allocation295_spill] sm:$0xff] %v9479_v38  ;;  %18999 = vst [vmem:[#allocation296_spill] sm:$0xff] %v9481_v63  ;;  %2271 = vperm.xlu1 %6888, %v6983_v22   ;;  %2275 = vperm.xlu0 %6889, %v6984_v6   ;;  %v6987_v6 = vld [vmem:[%s18136_s0 + $0x2f8] sm:$0xff]  ;;  %v18638_v38 = vmov 0  }
 0x34a   :  { %v9489_v30 = vpop.permute.xlu1 %2023  ;;  %v9491_v59 = vpop.permute.xlu0 %2027 }
 0x34b   :  { %19000 = vst [vmem:[#allocation297_spill] sm:$0xff] %v9489_v30  ;;  %19001 = vst [vmem:[#allocation298_spill] sm:$0xff] %v9491_v59  ;;  %2279 = vperm.xlu1 %6888, %v6985_v14   ;;  %2283 = vperm.xlu0 %6889, %v6986_v0   ;;  %v6988_v30 = vld [vmem:[%s18136_s0 + $0x300] sm:$0xff]  ;;  %v6989_v0 = vld [vmem:[%s18136_s0 + $0x308] sm:$0xff] }
 0x34e   :  { %v9499_v22 = vpop.permute.xlu1 %2031  ;;  %v9501_v55 = vpop.permute.xlu0 %2035 }
 0x34f   :  { %19002 = vst [vmem:[#allocation299_spill] sm:$0xff] %v9499_v22  ;;  %19003 = vst [vmem:[#allocation300_spill] sm:$0xff] %v9501_v55  ;;  %2287 = vperm.xlu1 %6888, %v6987_v6   ;;  %2291 = vperm.xlu0 %6889, %v6988_v30   ;;  %v6990_v22 = vld [vmem:[%s18136_s0 + $0x310] sm:$0xff]  ;;  %v6991_v30 = vld [vmem:[%s18136_s0 + $0x318] sm:$0xff] }
 0x352   :  { %v9509_v14 = vpop.permute.xlu1 %2039  ;;  %v9511_v59 = vpop.permute.xlu0 %2043 }
 0x353   :  { %19004 = vst [vmem:[#allocation301_spill] sm:$0xff] %v9509_v14  ;;  %19005 = vst [vmem:[#allocation302_spill] sm:$0xff] %v9511_v59  ;;  %2295 = vperm.xlu1 %6888, %v6989_v0   ;;  %2299 = vperm.xlu0 %6889, %v6990_v22   ;;  %v6992_v14 = vld [vmem:[%s18136_s0 + $0x320] sm:$0xff]  ;;  %v6993_v22 = vld [vmem:[%s18136_s0 + $0x328] sm:$0xff] }
 0x356   :  { %v9519_v6 = vpop.permute.xlu1 %2047  ;;  %v9521_v55 = vpop.permute.xlu0 %2051 }
 0x357   :  { %19006 = vst [vmem:[#allocation303_spill] sm:$0xff] %v9519_v6  ;;  %19007 = vst [vmem:[#allocation304_spill] sm:$0xff] %v9521_v55  ;;  %2303 = vperm.xlu1 %6888, %v6991_v30   ;;  %2307 = vperm.xlu0 %6889, %v6992_v14   ;;  %v6994_v6 = vld [vmem:[%s18136_s0 + $0x330] sm:$0xff]  ;;  %v6995_v14 = vld [vmem:[%s18136_s0 + $0x338] sm:$0xff] }
 0x35a   :  { %v9529_v0 = vpop.permute.xlu1 %2055  ;;  %v9531_v59 = vpop.permute.xlu0 %2059 }
 0x35b   :  { %19008 = vst [vmem:[#allocation305_spill] sm:$0xff] %v9529_v0  ;;  %19009 = vst [vmem:[#allocation306_spill] sm:$0xff] %v9531_v59  ;;  %2311 = vperm.xlu1 %6888, %v6993_v22   ;;  %2315 = vperm.xlu0 %6889, %v6994_v6   ;;  %v6996_v0 = vld [vmem:[%s18136_s0 + $0x340] sm:$0xff]  ;;  %v6997_v6 = vld [vmem:[%s18136_s0 + $0x348] sm:$0xff] }
 0x35e   :  { %v9539_v30 = vpop.permute.xlu1 %2063  ;;  %v9541_v55 = vpop.permute.xlu0 %2067 }
 0x35f   :  { %19010 = vst [vmem:[#allocation307_spill] sm:$0xff] %v9539_v30  ;;  %19011 = vst [vmem:[#allocation308_spill] sm:$0xff] %v9541_v55  ;;  %2319 = vperm.xlu1 %6888, %v6995_v14   ;;  %2323 = vperm.xlu0 %6889, %v6996_v0   ;;  %v6998_v30 = vld [vmem:[%s18136_s0 + $0x350] sm:$0xff]  ;;  %v6999_v0 = vld [vmem:[%s18136_s0 + $0x358] sm:$0xff] }
 0x362   :  { %v9549_v22 = vpop.permute.xlu1 %2071  ;;  %v9551_v59 = vpop.permute.xlu0 %2075 }
 0x363   :  { %19012 = vst [vmem:[#allocation309_spill] sm:$0xff] %v9549_v22  ;;  %19013 = vst [vmem:[#allocation310_spill] sm:$0xff] %v9551_v59  ;;  %2327 = vperm.xlu1 %6888, %v6997_v6   ;;  %2331 = vperm.xlu0 %6889, %v6998_v30   ;;  %v7000_v22 = vld [vmem:[%s18136_s0 + $0x360] sm:$0xff]  ;;  %v7001_v30 = vld [vmem:[%s18136_s0 + $0x368] sm:$0xff] }
 0x366   :  { %v9559_v14 = vpop.permute.xlu1 %2079  ;;  %v9561_v55 = vpop.permute.xlu0 %2083 }
 0x367   :  { %19014 = vst [vmem:[#allocation311_spill] sm:$0xff] %v9559_v14  ;;  %19015 = vst [vmem:[#allocation312_spill] sm:$0xff] %v9561_v55  ;;  %2335 = vperm.xlu1 %6888, %v6999_v0   ;;  %2339 = vperm.xlu0 %6889, %v7000_v22   ;;  %v7002_v14 = vld [vmem:[%s18136_s0 + $0x370] sm:$0xff]  ;;  %v7003_v22 = vld [vmem:[%s18136_s0 + $0x378] sm:$0xff] }
 0x36a   :  { %v9569_v6 = vpop.permute.xlu1 %2087  ;;  %v9571_v59 = vpop.permute.xlu0 %2091 }
 0x36b   :  { %19016 = vst [vmem:[#allocation313_spill] sm:$0xff] %v9569_v6  ;;  %19017 = vst [vmem:[#allocation314_spill] sm:$0xff] %v9571_v59  ;;  %2343 = vperm.xlu1 %6888, %v7001_v30   ;;  %2347 = vperm.xlu0 %6889, %v7002_v14   ;;  %v7004_v6 = vld [vmem:[%s18136_s0 + $0x380] sm:$0xff]  ;;  %v7005_v14 = vld [vmem:[%s18136_s0 + $0x388] sm:$0xff] }
 0x36e   :  { %v9579_v0 = vpop.permute.xlu1 %2095  ;;  %v9581_v55 = vpop.permute.xlu0 %2099 }
 0x36f   :  { %19018 = vst [vmem:[#allocation315_spill] sm:$0xff] %v9579_v0  ;;  %19019 = vst [vmem:[#allocation316_spill] sm:$0xff] %v9581_v55  ;;  %2351 = vperm.xlu1 %6888, %v7003_v22   ;;  %2355 = vperm.xlu0 %6889, %v7004_v6   ;;  %v7006_v0 = vld [vmem:[%s18136_s0 + $0x390] sm:$0xff]  ;;  %v7007_v6 = vld [vmem:[%s18136_s0 + $0x398] sm:$0xff] }
 0x372   :  { %v9589_v30 = vpop.permute.xlu1 %2103  ;;  %v9591_v59 = vpop.permute.xlu0 %2107 }
 0x373   :  { %19020 = vst [vmem:[#allocation317_spill] sm:$0xff] %v9589_v30  ;;  %19021 = vst [vmem:[#allocation318_spill] sm:$0xff] %v9591_v59  ;;  %2359 = vperm.xlu1 %6888, %v7005_v14   ;;  %2363 = vperm.xlu0 %6889, %v7006_v0   ;;  %v7008_v30 = vld [vmem:[%s18136_s0 + $0x3a0] sm:$0xff]  ;;  %v7009_v0 = vld [vmem:[%s18136_s0 + $0x3a8] sm:$0xff] }
 0x376   :  { %v9599_v22 = vpop.permute.xlu1 %2111  ;;  %v9601_v55 = vpop.permute.xlu0 %2115 }
 0x377   :  { %19022 = vst [vmem:[#allocation319_spill] sm:$0xff] %v9599_v22  ;;  %19023 = vst [vmem:[#allocation320_spill] sm:$0xff] %v9601_v55  ;;  %2367 = vperm.xlu1 %6888, %v7007_v6   ;;  %2371 = vperm.xlu0 %6889, %v7008_v30   ;;  %v7010_v22 = vld [vmem:[%s18136_s0 + $0x3b0] sm:$0xff]  ;;  %v7011_v30 = vld [vmem:[%s18136_s0 + $0x3b8] sm:$0xff] }
 0x37a   :  { %v9609_v14 = vpop.permute.xlu1 %2119  ;;  %v9611_v59 = vpop.permute.xlu0 %2123 }
 0x37b   :  { %19024 = vst [vmem:[#allocation321_spill] sm:$0xff] %v9609_v14  ;;  %19025 = vst [vmem:[#allocation322_spill] sm:$0xff] %v9611_v59  ;;  %2375 = vperm.xlu1 %6888, %v7009_v0   ;;  %2379 = vperm.xlu0 %6889, %v7010_v22   ;;  %v7012_v14 = vld [vmem:[%s18136_s0 + $0x3c0] sm:$0xff]  ;;  %v7013_v22 = vld [vmem:[%s18136_s0 + $0x3c8] sm:$0xff] }
 0x37e   :  { %v9619_v6 = vpop.permute.xlu1 %2127  ;;  %v9621_v55 = vpop.permute.xlu0 %2131 }
 0x37f   :  { %19026 = vst [vmem:[#allocation323_spill] sm:$0xff] %v9619_v6  ;;  %19027 = vst [vmem:[#allocation324_spill] sm:$0xff] %v9621_v55  ;;  %2383 = vperm.xlu1 %6888, %v7011_v30   ;;  %2387 = vperm.xlu0 %6889, %v7012_v14   ;;  %v7014_v6 = vld [vmem:[%s18136_s0 + $0x3d0] sm:$0xff]  ;;  %v7015_v14 = vld [vmem:[%s18136_s0 + $0x3d8] sm:$0xff] }
 0x382   :  { %v9629_v0 = vpop.permute.xlu1 %2135  ;;  %v9631_v59 = vpop.permute.xlu0 %2139 }
 0x383   :  { %19028 = vst [vmem:[#allocation325_spill] sm:$0xff] %v9629_v0  ;;  %19029 = vst [vmem:[#allocation326_spill] sm:$0xff] %v9631_v59  ;;  %2391 = vperm.xlu1 %6888, %v7013_v22   ;;  %2395 = vperm.xlu0 %6889, %v7014_v6   ;;  %v7016_v0 = vld [vmem:[%s18136_s0 + $0x3e0] sm:$0xff]  ;;  %v7017_v6 = vld [vmem:[%s18136_s0 + $0x3e8] sm:$0xff] }
 0x386   :  { %v9639_v30 = vpop.permute.xlu1 %2143  ;;  %v9641_v55 = vpop.permute.xlu0 %2147 }
 0x387   :  { %19030 = vst [vmem:[#allocation327_spill] sm:$0xff] %v9639_v30  ;;  %19031 = vst [vmem:[#allocation328_spill] sm:$0xff] %v9641_v55  ;;  %2399 = vperm.xlu1 %6888, %v7015_v14   ;;  %2403 = vperm.xlu0 %6889, %v7016_v0   ;;  %v7018_v30 = vld [vmem:[%s18136_s0 + $0x3f0] sm:$0xff]  ;;  %v7019_v0 = vld [vmem:[%s18136_s0 + $0x3f8] sm:$0xff] }
 0x38a   :  { %v9649_v22 = vpop.permute.xlu1 %2151  ;;  %v9651_v59 = vpop.permute.xlu0 %2155 }
 0x38b   :  { %19032 = vst [vmem:[#allocation329_spill] sm:$0xff] %v9649_v22  ;;  %19033 = vst [vmem:[#allocation330_spill] sm:$0xff] %v9651_v59  ;;  %2407 = vperm.xlu1 %6888, %v7017_v6   ;;  %2411 = vperm.xlu0 %6889, %v7018_v30   ;;  %v7020_v22 = vld [vmem:[%s18136_s0 + $0x400] sm:$0xff]  ;;  %v7021_v30 = vld [vmem:[%s18136_s0 + $0x408] sm:$0xff] }
 0x38e   :  { %v9659_v14 = vpop.permute.xlu1 %2159  ;;  %v9661_v55 = vpop.permute.xlu0 %2163 }
 0x38f   :  { %19034 = vst [vmem:[#allocation331_spill] sm:$0xff] %v9659_v14  ;;  %19035 = vst [vmem:[#allocation332_spill] sm:$0xff] %v9661_v55  ;;  %2415 = vperm.xlu1 %6888, %v7019_v0   ;;  %2419 = vperm.xlu0 %6889, %v7020_v22   ;;  %v7022_v14 = vld [vmem:[%s18136_s0 + $0x410] sm:$0xff]  ;;  %v7023_v22 = vld [vmem:[%s18136_s0 + $0x418] sm:$0xff] }
 0x392   :  { %v9669_v6 = vpop.permute.xlu1 %2167  ;;  %v9671_v59 = vpop.permute.xlu0 %2171 }
 0x393   :  { %19036 = vst [vmem:[#allocation333_spill] sm:$0xff] %v9669_v6  ;;  %19037 = vst [vmem:[#allocation334_spill] sm:$0xff] %v9671_v59  ;;  %2423 = vperm.xlu1 %6888, %v7021_v30   ;;  %2427 = vperm.xlu0 %6889, %v7022_v14   ;;  %v7024_v6 = vld [vmem:[%s18136_s0 + $0x420] sm:$0xff]  ;;  %v7025_v14 = vld [vmem:[%s18136_s0 + $0x428] sm:$0xff] }
 0x396   :  { %v9679_v0 = vpop.permute.xlu1 %2175  ;;  %v9681_v55 = vpop.permute.xlu0 %2179 }
 0x397   :  { %19038 = vst [vmem:[#allocation335_spill] sm:$0xff] %v9679_v0  ;;  %19039 = vst [vmem:[#allocation336_spill] sm:$0xff] %v9681_v55  ;;  %2431 = vperm.xlu1 %6888, %v7023_v22   ;;  %2435 = vperm.xlu0 %6889, %v7024_v6   ;;  %v7026_v0 = vld [vmem:[%s18136_s0 + $0x430] sm:$0xff]  ;;  %v7027_v6 = vld [vmem:[%s18136_s0 + $0x438] sm:$0xff] }
 0x39a   :  { %v9689_v30 = vpop.permute.xlu1 %2183  ;;  %v9691_v59 = vpop.permute.xlu0 %2187 }
 0x39b   :  { %19040 = vst [vmem:[#allocation337_spill] sm:$0xff] %v9689_v30  ;;  %19041 = vst [vmem:[#allocation338_spill] sm:$0xff] %v9691_v59  ;;  %2439 = vperm.xlu1 %6888, %v7025_v14   ;;  %2443 = vperm.xlu0 %6889, %v7026_v0   ;;  %v7028_v30 = vld [vmem:[%s18136_s0 + $0x440] sm:$0xff]  ;;  %v7029_v0 = vld [vmem:[%s18136_s0 + $0x448] sm:$0xff] }
 0x39e   :  { %v9699_v22 = vpop.permute.xlu1 %2191  ;;  %v9701_v55 = vpop.permute.xlu0 %2195 }
 0x39f   :  { %19042 = vst [vmem:[#allocation339_spill] sm:$0xff] %v9699_v22  ;;  %19043 = vst [vmem:[#allocation340_spill] sm:$0xff] %v9701_v55  ;;  %2447 = vperm.xlu1 %6888, %v7027_v6   ;;  %2451 = vperm.xlu0 %6889, %v7028_v30   ;;  %v7030_v22 = vld [vmem:[%s18136_s0 + $0x450] sm:$0xff]  ;;  %v7031_v30 = vld [vmem:[%s18136_s0 + $0x458] sm:$0xff] }
 0x3a2   :  { %v9709_v14 = vpop.permute.xlu1 %2199  ;;  %v9711_v59 = vpop.permute.xlu0 %2203 }
 0x3a3   :  { %19044 = vst [vmem:[#allocation341_spill] sm:$0xff] %v9709_v14  ;;  %19045 = vst [vmem:[#allocation342_spill] sm:$0xff] %v9711_v59  ;;  %2455 = vperm.xlu1 %6888, %v7029_v0   ;;  %2459 = vperm.xlu0 %6889, %v7030_v22   ;;  %v7032_v14 = vld [vmem:[%s18136_s0 + $0x460] sm:$0xff]  ;;  %v7033_v22 = vld [vmem:[%s18136_s0 + $0x468] sm:$0xff] }
 0x3a6   :  { %v9719_v6 = vpop.permute.xlu1 %2207  ;;  %v9721_v55 = vpop.permute.xlu0 %2211 }
 0x3a7   :  { %19046 = vst [vmem:[#allocation343_spill] sm:$0xff] %v9719_v6  ;;  %19047 = vst [vmem:[#allocation344_spill] sm:$0xff] %v9721_v55  ;;  %2463 = vperm.xlu1 %6888, %v7031_v30   ;;  %2467 = vperm.xlu0 %6889, %v7032_v14   ;;  %v7034_v6 = vld [vmem:[%s18136_s0 + $0x470] sm:$0xff]  ;;  %v7035_v14 = vld [vmem:[%s18136_s0 + $0x478] sm:$0xff] }
 0x3aa   :  { %v9729_v0 = vpop.permute.xlu1 %2215  ;;  %v9731_v59 = vpop.permute.xlu0 %2219 }
 0x3ab   :  { %19048 = vst [vmem:[#allocation345_spill] sm:$0xff] %v9729_v0  ;;  %19049 = vst [vmem:[#allocation346_spill] sm:$0xff] %v9731_v59  ;;  %2471 = vperm.xlu1 %6888, %v7033_v22   ;;  %2475 = vperm.xlu0 %6889, %v7034_v6   ;;  %v7036_v0 = vld [vmem:[%s18136_s0 + $0x480] sm:$0xff]  ;;  %v7037_v6 = vld [vmem:[%s18136_s0 + $0x488] sm:$0xff] }
 0x3ae   :  { %v9739_v30 = vpop.permute.xlu1 %2223  ;;  %v9741_v55 = vpop.permute.xlu0 %2227 }
 0x3af   :  { %19050 = vst [vmem:[#allocation347_spill] sm:$0xff] %v9739_v30  ;;  %19051 = vst [vmem:[#allocation348_spill] sm:$0xff] %v9741_v55  ;;  %2479 = vperm.xlu1 %6888, %v7035_v14   ;;  %2483 = vperm.xlu0 %6889, %v7036_v0   ;;  %v7038_v30 = vld [vmem:[%s18136_s0 + $0x490] sm:$0xff]  ;;  %v7039_v0 = vld [vmem:[%s18136_s0 + $0x498] sm:$0xff] }
 0x3b2   :  { %v9749_v22 = vpop.permute.xlu1 %2231  ;;  %v9751_v59 = vpop.permute.xlu0 %2235 }
 0x3b3   :  { %19052 = vst [vmem:[#allocation349_spill] sm:$0xff] %v9749_v22  ;;  %19053 = vst [vmem:[#allocation350_spill] sm:$0xff] %v9751_v59  ;;  %2487 = vperm.xlu1 %6888, %v7037_v6   ;;  %2491 = vperm.xlu0 %6889, %v7038_v30   ;;  %v7040_v22 = vld [vmem:[%s18136_s0 + $0x4a0] sm:$0xff]  ;;  %v7041_v30 = vld [vmem:[%s18136_s0 + $0x4a8] sm:$0xff] }
 0x3b6   :  { %v9759_v14 = vpop.permute.xlu1 %2239  ;;  %v9761_v55 = vpop.permute.xlu0 %2243 }
 0x3b7   :  { %19054 = vst [vmem:[#allocation351_spill] sm:$0xff] %v9759_v14  ;;  %19055 = vst [vmem:[#allocation352_spill] sm:$0xff] %v9761_v55  ;;  %2495 = vperm.xlu1 %6888, %v7039_v0   ;;  %2499 = vperm.xlu0 %6889, %v7040_v22   ;;  %v7042_v14 = vld [vmem:[%s18136_s0 + $0x4b0] sm:$0xff]  ;;  %v7043_v22 = vld [vmem:[%s18136_s0 + $0x4b8] sm:$0xff] }
 0x3ba   :  { %v9769_v6 = vpop.permute.xlu1 %2247  ;;  %v9771_v59 = vpop.permute.xlu0 %2251 }
 0x3bb   :  { %19056 = vst [vmem:[#allocation353_spill] sm:$0xff] %v9769_v6  ;;  %19057 = vst [vmem:[#allocation354_spill] sm:$0xff] %v9771_v59  ;;  %2503 = vperm.xlu1 %6888, %v7041_v30   ;;  %2507 = vperm.xlu0 %6889, %v7042_v14   ;;  %v7044_v6 = vld [vmem:[%s18136_s0 + $0x4c0] sm:$0xff]  ;;  %v7045_v14 = vld [vmem:[%s18136_s0 + $0x4c8] sm:$0xff] }
 0x3be   :  { %v9779_v0 = vpop.permute.xlu1 %2255  ;;  %v9781_v55 = vpop.permute.xlu0 %2259 }
 0x3bf   :  { %19058 = vst [vmem:[#allocation355_spill] sm:$0xff] %v9779_v0  ;;  %19059 = vst [vmem:[#allocation356_spill] sm:$0xff] %v9781_v55  ;;  %2511 = vperm.xlu1 %6888, %v7043_v22   ;;  %2515 = vperm.xlu0 %6889, %v7044_v6   ;;  %v7046_v0 = vld [vmem:[%s18136_s0 + $0x4d0] sm:$0xff]  ;;  %v7047_v6 = vld [vmem:[%s18136_s0 + $0x4d8] sm:$0xff] }
 0x3c2   :  { %v9789_v30 = vpop.permute.xlu1 %2263  ;;  %v9791_v59 = vpop.permute.xlu0 %2267 }
 0x3c3   :  { %19060 = vst [vmem:[#allocation357_spill] sm:$0xff] %v9789_v30  ;;  %19061 = vst [vmem:[#allocation358_spill] sm:$0xff] %v9791_v59  ;;  %2519 = vperm.xlu1 %6888, %v7045_v14   ;;  %2523 = vperm.xlu0 %6889, %v7046_v0   ;;  %v7048_v30 = vld [vmem:[%s18136_s0 + $0x4e0] sm:$0xff]  ;;  %v7049_v0 = vld [vmem:[%s18136_s0 + $0x4e8] sm:$0xff] }
 0x3c6   :  { %v9799_v22 = vpop.permute.xlu1 %2271  ;;  %v9801_v55 = vpop.permute.xlu0 %2275 }
 0x3c7   :  { %19062 = vst [vmem:[#allocation359_spill] sm:$0xff] %v9799_v22  ;;  %19063 = vst [vmem:[#allocation360_spill] sm:$0xff] %v9801_v55  ;;  %2527 = vperm.xlu1 %6888, %v7047_v6   ;;  %2531 = vperm.xlu0 %6889, %v7048_v30   ;;  %v7050_v22 = vld [vmem:[%s18136_s0 + $0x4f0] sm:$0xff]  ;;  %v7051_v30 = vld [vmem:[%s18136_s0 + $0x4f8] sm:$0xff] }
 0x3ca   :  { %v9809_v14 = vpop.permute.xlu1 %2279  ;;  %v9811_v59 = vpop.permute.xlu0 %2283 }
 0x3cb   :  { %19064 = vst [vmem:[#allocation361_spill] sm:$0xff] %v9809_v14  ;;  %19065 = vst [vmem:[#allocation362_spill] sm:$0xff] %v9811_v59  ;;  %2535 = vperm.xlu1 %6888, %v7049_v0   ;;  %2539 = vperm.xlu0 %6889, %v7050_v22   ;;  %v7052_v14 = vld [vmem:[%s18136_s0 + $0x500] sm:$0xff]  ;;  %v7053_v22 = vld [vmem:[%s18136_s0 + $0x508] sm:$0xff] }
 0x3ce   :  { %v9819_v6 = vpop.permute.xlu1 %2287  ;;  %v9821_v55 = vpop.permute.xlu0 %2291 }
 0x3cf   :  { %19066 = vst [vmem:[#allocation363_spill] sm:$0xff] %v9819_v6  ;;  %19067 = vst [vmem:[#allocation364_spill] sm:$0xff] %v9821_v55  ;;  %2543 = vperm.xlu1 %6888, %v7051_v30   ;;  %2547 = vperm.xlu0 %6889, %v7052_v14   ;;  %v7054_v6 = vld [vmem:[%s18136_s0 + $0x510] sm:$0xff]  ;;  %v7055_v14 = vld [vmem:[%s18136_s0 + $0x518] sm:$0xff] }
 0x3d2   :  { %v9829_v0 = vpop.permute.xlu1 %2295  ;;  %v9831_v59 = vpop.permute.xlu0 %2299 }
 0x3d3   :  { %19068 = vst [vmem:[#allocation365_spill] sm:$0xff] %v9829_v0  ;;  %19069 = vst [vmem:[#allocation366_spill] sm:$0xff] %v9831_v59  ;;  %2551 = vperm.xlu1 %6888, %v7053_v22   ;;  %2555 = vperm.xlu0 %6889, %v7054_v6   ;;  %v7056_v0 = vld [vmem:[%s18136_s0 + $0x520] sm:$0xff]  ;;  %v7057_v6 = vld [vmem:[%s18136_s0 + $0x528] sm:$0xff] }
 0x3d6   :  { %v9839_v30 = vpop.permute.xlu1 %2303  ;;  %v9841_v55 = vpop.permute.xlu0 %2307 }
 0x3d7   :  { %19070 = vst [vmem:[#allocation367_spill] sm:$0xff] %v9839_v30  ;;  %19071 = vst [vmem:[#allocation368_spill] sm:$0xff] %v9841_v55  ;;  %2559 = vperm.xlu1 %6888, %v7055_v14   ;;  %2563 = vperm.xlu0 %6889, %v7056_v0   ;;  %v7058_v30 = vld [vmem:[%s18136_s0 + $0x530] sm:$0xff]  ;;  %v7059_v0 = vld [vmem:[%s18136_s0 + $0x538] sm:$0xff] }
 0x3da   :  { %v9849_v22 = vpop.permute.xlu1 %2311  ;;  %v9851_v59 = vpop.permute.xlu0 %2315 }
 0x3db   :  { %19072 = vst [vmem:[#allocation369_spill] sm:$0xff] %v9849_v22  ;;  %19073 = vst [vmem:[#allocation370_spill] sm:$0xff] %v9851_v59  ;;  %2567 = vperm.xlu1 %6888, %v7057_v6   ;;  %2571 = vperm.xlu0 %6889, %v7058_v30   ;;  %v7060_v22 = vld [vmem:[%s18136_s0 + $0x540] sm:$0xff]  ;;  %v7061_v30 = vld [vmem:[%s18136_s0 + $0x548] sm:$0xff] }
 0x3de   :  { %v9859_v14 = vpop.permute.xlu1 %2319  ;;  %v9861_v55 = vpop.permute.xlu0 %2323 }
 0x3df   :  { %19074 = vst [vmem:[#allocation371_spill] sm:$0xff] %v9859_v14  ;;  %19075 = vst [vmem:[#allocation372_spill] sm:$0xff] %v9861_v55  ;;  %2575 = vperm.xlu1 %6888, %v7059_v0   ;;  %2579 = vperm.xlu0 %6889, %v7060_v22   ;;  %v7062_v14 = vld [vmem:[%s18136_s0 + $0x550] sm:$0xff]  ;;  %v7063_v22 = vld [vmem:[%s18136_s0 + $0x558] sm:$0xff] }
 0x3e2   :  { %v9869_v6 = vpop.permute.xlu1 %2327  ;;  %v9871_v59 = vpop.permute.xlu0 %2331 }
 0x3e3   :  { %19076 = vst [vmem:[#allocation373_spill] sm:$0xff] %v9869_v6  ;;  %19077 = vst [vmem:[#allocation374_spill] sm:$0xff] %v9871_v59  ;;  %2583 = vperm.xlu1 %6888, %v7061_v30   ;;  %2587 = vperm.xlu0 %6889, %v7062_v14   ;;  %v7064_v6 = vld [vmem:[%s18136_s0 + $0x560] sm:$0xff]  ;;  %v7065_v14 = vld [vmem:[%s18136_s0 + $0x568] sm:$0xff] }
 0x3e6   :  { %v9879_v0 = vpop.permute.xlu1 %2335  ;;  %v9881_v55 = vpop.permute.xlu0 %2339 }
 0x3e7   :  { %19078 = vst [vmem:[#allocation375_spill] sm:$0xff] %v9879_v0  ;;  %19079 = vst [vmem:[#allocation376_spill] sm:$0xff] %v9881_v55  ;;  %2591 = vperm.xlu1 %6888, %v7063_v22   ;;  %2595 = vperm.xlu0 %6889, %v7064_v6   ;;  %v7066_v0 = vld [vmem:[%s18136_s0 + $0x570] sm:$0xff]  ;;  %v7067_v6 = vld [vmem:[%s18136_s0 + $0x578] sm:$0xff] }
 0x3ea   :  { %v9889_v30 = vpop.permute.xlu1 %2343  ;;  %v9891_v59 = vpop.permute.xlu0 %2347 }
 0x3eb   :  { %19080 = vst [vmem:[#allocation377_spill] sm:$0xff] %v9889_v30  ;;  %19081 = vst [vmem:[#allocation378_spill] sm:$0xff] %v9891_v59  ;;  %2599 = vperm.xlu1 %6888, %v7065_v14   ;;  %2603 = vperm.xlu0 %6889, %v7066_v0   ;;  %v7068_v30 = vld [vmem:[%s18136_s0 + $0x580] sm:$0xff]  ;;  %v7069_v0 = vld [vmem:[%s18136_s0 + $0x588] sm:$0xff] }
 0x3ee   :  { %v9899_v22 = vpop.permute.xlu1 %2351  ;;  %v9901_v55 = vpop.permute.xlu0 %2355 }
 0x3ef   :  { %19082 = vst [vmem:[#allocation379_spill] sm:$0xff] %v9899_v22  ;;  %19083 = vst [vmem:[#allocation380_spill] sm:$0xff] %v9901_v55  ;;  %2607 = vperm.xlu1 %6888, %v7067_v6   ;;  %2611 = vperm.xlu0 %6889, %v7068_v30   ;;  %v7070_v22 = vld [vmem:[%s18136_s0 + $0x590] sm:$0xff]  ;;  %v7071_v30 = vld [vmem:[%s18136_s0 + $0x598] sm:$0xff] }
 0x3f2   :  { %v9909_v14 = vpop.permute.xlu1 %2359  ;;  %v9911_v59 = vpop.permute.xlu0 %2363 }
 0x3f3   :  { %19084 = vst [vmem:[#allocation381_spill] sm:$0xff] %v9909_v14  ;;  %19085 = vst [vmem:[#allocation382_spill] sm:$0xff] %v9911_v59  ;;  %2615 = vperm.xlu1 %6888, %v7069_v0   ;;  %2619 = vperm.xlu0 %6889, %v7070_v22   ;;  %v7072_v14 = vld [vmem:[%s18136_s0 + $0x5a0] sm:$0xff]  ;;  %v7073_v22 = vld [vmem:[%s18136_s0 + $0x5a8] sm:$0xff] }
 0x3f6   :  { %v9919_v6 = vpop.permute.xlu1 %2367  ;;  %v9921_v55 = vpop.permute.xlu0 %2371 }
 0x3f7   :  { %19086 = vst [vmem:[#allocation383_spill] sm:$0xff] %v9919_v6  ;;  %19087 = vst [vmem:[#allocation384_spill] sm:$0xff] %v9921_v55  ;;  %2623 = vperm.xlu1 %6888, %v7071_v30   ;;  %2627 = vperm.xlu0 %6889, %v7072_v14   ;;  %v7074_v6 = vld [vmem:[%s18136_s0 + $0x5b0] sm:$0xff]  ;;  %v7075_v14 = vld [vmem:[%s18136_s0 + $0x5b8] sm:$0xff] }
 0x3fa   :  { %v9929_v0 = vpop.permute.xlu1 %2375  ;;  %v9931_v59 = vpop.permute.xlu0 %2379 }
 0x3fb   :  { %19088 = vst [vmem:[#allocation385_spill] sm:$0xff] %v9929_v0  ;;  %19089 = vst [vmem:[#allocation386_spill] sm:$0xff] %v9931_v59  ;;  %2631 = vperm.xlu1 %6888, %v7073_v22   ;;  %2635 = vperm.xlu0 %6889, %v7074_v6   ;;  %v7076_v0 = vld [vmem:[%s18136_s0 + $0x5c0] sm:$0xff]  ;;  %v7077_v6 = vld [vmem:[%s18136_s0 + $0x5c8] sm:$0xff] }
 0x3fe   :  { %v9939_v30 = vpop.permute.xlu1 %2383  ;;  %v9941_v55 = vpop.permute.xlu0 %2387 }
 0x3ff   :  { %19090 = vst [vmem:[#allocation387_spill] sm:$0xff] %v9939_v30  ;;  %19091 = vst [vmem:[#allocation388_spill] sm:$0xff] %v9941_v55  ;;  %2639 = vperm.xlu1 %6888, %v7075_v14   ;;  %2643 = vperm.xlu0 %6889, %v7076_v0   ;;  %v7078_v30 = vld [vmem:[%s18136_s0 + $0x5d0] sm:$0xff]  ;;  %v7079_v0 = vld [vmem:[%s18136_s0 + $0x5d8] sm:$0xff] }
 0x402   :  { %v9949_v22 = vpop.permute.xlu1 %2391  ;;  %v9951_v59 = vpop.permute.xlu0 %2395 }
 0x403   :  { %19092 = vst [vmem:[#allocation389_spill] sm:$0xff] %v9949_v22  ;;  %19093 = vst [vmem:[#allocation390_spill] sm:$0xff] %v9951_v59  ;;  %2647 = vperm.xlu1 %6888, %v7077_v6   ;;  %2651 = vperm.xlu0 %6889, %v7078_v30   ;;  %v7080_v22 = vld [vmem:[%s18136_s0 + $0x5e0] sm:$0xff]  ;;  %v7081_v30 = vld [vmem:[%s18136_s0 + $0x5e8] sm:$0xff] }
 0x406   :  { %v9959_v14 = vpop.permute.xlu1 %2399  ;;  %v9961_v55 = vpop.permute.xlu0 %2403 }
 0x407   :  { %19094 = vst [vmem:[#allocation391_spill] sm:$0xff] %v9959_v14  ;;  %19095 = vst [vmem:[#allocation392_spill] sm:$0xff] %v9961_v55  ;;  %2655 = vperm.xlu1 %6888, %v7079_v0   ;;  %2659 = vperm.xlu0 %6889, %v7080_v22   ;;  %v7082_v14 = vld [vmem:[%s18136_s0 + $0x5f0] sm:$0xff]  ;;  %v7083_v22 = vld [vmem:[%s18136_s0 + $0x5f8] sm:$0xff] }
 0x40a   :  { %v9969_v6 = vpop.permute.xlu1 %2407  ;;  %v9971_v59 = vpop.permute.xlu0 %2411 }
 0x40b   :  { %19096 = vst [vmem:[#allocation393_spill] sm:$0xff] %v9969_v6  ;;  %19097 = vst [vmem:[#allocation394_spill] sm:$0xff] %v9971_v59  ;;  %2663 = vperm.xlu1 %6888, %v7081_v30   ;;  %2667 = vperm.xlu0 %6889, %v7082_v14   ;;  %v7084_v6 = vld [vmem:[%s18136_s0 + $0x600] sm:$0xff]  ;;  %v7085_v14 = vld [vmem:[%s18136_s0 + $0x608] sm:$0xff] }
 0x40e   :  { %v9979_v0 = vpop.permute.xlu1 %2415  ;;  %v9981_v55 = vpop.permute.xlu0 %2419 }
 0x40f   :  { %19098 = vst [vmem:[#allocation395_spill] sm:$0xff] %v9979_v0  ;;  %19099 = vst [vmem:[#allocation396_spill] sm:$0xff] %v9981_v55  ;;  %2671 = vperm.xlu1 %6888, %v7083_v22   ;;  %2675 = vperm.xlu0 %6889, %v7084_v6   ;;  %v7086_v0 = vld [vmem:[%s18136_s0 + $0x610] sm:$0xff]  ;;  %v7087_v6 = vld [vmem:[%s18136_s0 + $0x618] sm:$0xff] }
 0x412   :  { %v9989_v30 = vpop.permute.xlu1 %2423  ;;  %v9991_v59 = vpop.permute.xlu0 %2427 }
 0x413   :  { %19100 = vst [vmem:[#allocation397_spill] sm:$0xff] %v9989_v30  ;;  %19101 = vst [vmem:[#allocation398_spill] sm:$0xff] %v9991_v59  ;;  %2679 = vperm.xlu1 %6888, %v7085_v14   ;;  %2683 = vperm.xlu0 %6889, %v7086_v0   ;;  %v7088_v30 = vld [vmem:[%s18136_s0 + $0x620] sm:$0xff]  ;;  %v7089_v0 = vld [vmem:[%s18136_s0 + $0x628] sm:$0xff] }
 0x416   :  { %v9999_v22 = vpop.permute.xlu1 %2431  ;;  %v10001_v55 = vpop.permute.xlu0 %2435 }
 0x417   :  { %19102 = vst [vmem:[#allocation399_spill] sm:$0xff] %v9999_v22  ;;  %19103 = vst [vmem:[#allocation400_spill] sm:$0xff] %v10001_v55  ;;  %2687 = vperm.xlu1 %6888, %v7087_v6   ;;  %2691 = vperm.xlu0 %6889, %v7088_v30   ;;  %v7090_v22 = vld [vmem:[%s18136_s0 + $0x630] sm:$0xff]  ;;  %v7091_v30 = vld [vmem:[%s18136_s0 + $0x638] sm:$0xff] }
 0x41a   :  { %v10009_v14 = vpop.permute.xlu1 %2439  ;;  %v10011_v59 = vpop.permute.xlu0 %2443 }
 0x41b   :  { %19104 = vst [vmem:[#allocation401_spill] sm:$0xff] %v10009_v14  ;;  %19105 = vst [vmem:[#allocation402_spill] sm:$0xff] %v10011_v59  ;;  %2695 = vperm.xlu1 %6888, %v7089_v0   ;;  %2699 = vperm.xlu0 %6889, %v7090_v22   ;;  %v7092_v14 = vld [vmem:[%s18136_s0 + $0x640] sm:$0xff]  ;;  %v7093_v22 = vld [vmem:[%s18136_s0 + $0x648] sm:$0xff] }
 0x41e   :  { %v10019_v6 = vpop.permute.xlu1 %2447  ;;  %v10021_v55 = vpop.permute.xlu0 %2451 }
 0x41f   :  { %19106 = vst [vmem:[#allocation403_spill] sm:$0xff] %v10019_v6  ;;  %19107 = vst [vmem:[#allocation404_spill] sm:$0xff] %v10021_v55  ;;  %2703 = vperm.xlu1 %6888, %v7091_v30   ;;  %2707 = vperm.xlu0 %6889, %v7092_v14   ;;  %v7094_v6 = vld [vmem:[%s18136_s0 + $0x650] sm:$0xff]  ;;  %v7095_v14 = vld [vmem:[%s18136_s0 + $0x658] sm:$0xff] }
 0x422   :  { %v10029_v0 = vpop.permute.xlu1 %2455  ;;  %v10031_v59 = vpop.permute.xlu0 %2459 }
 0x423   :  { %19108 = vst [vmem:[#allocation405_spill] sm:$0xff] %v10029_v0  ;;  %19109 = vst [vmem:[#allocation406_spill] sm:$0xff] %v10031_v59  ;;  %2711 = vperm.xlu1 %6888, %v7093_v22   ;;  %2715 = vperm.xlu0 %6889, %v7094_v6   ;;  %v7096_v0 = vld [vmem:[%s18136_s0 + $0x660] sm:$0xff]  ;;  %v7097_v6 = vld [vmem:[%s18136_s0 + $0x668] sm:$0xff] }
 0x426   :  { %v10039_v30 = vpop.permute.xlu1 %2463  ;;  %v10041_v55 = vpop.permute.xlu0 %2467 }
 0x427   :  { %19110 = vst [vmem:[#allocation407_spill] sm:$0xff] %v10039_v30  ;;  %19111 = vst [vmem:[#allocation408_spill] sm:$0xff] %v10041_v55  ;;  %2719 = vperm.xlu1 %6888, %v7095_v14   ;;  %2723 = vperm.xlu0 %6889, %v7096_v0   ;;  %v7098_v30 = vld [vmem:[%s18136_s0 + $0x670] sm:$0xff]  ;;  %v7099_v0 = vld [vmem:[%s18136_s0 + $0x678] sm:$0xff] }
 0x42a   :  { %v10049_v22 = vpop.permute.xlu1 %2471  ;;  %v10051_v59 = vpop.permute.xlu0 %2475 }
 0x42b   :  { %19112 = vst [vmem:[#allocation409_spill] sm:$0xff] %v10049_v22  ;;  %19113 = vst [vmem:[#allocation410_spill] sm:$0xff] %v10051_v59  ;;  %2727 = vperm.xlu1 %6888, %v7097_v6   ;;  %2731 = vperm.xlu0 %6889, %v7098_v30   ;;  %v7100_v22 = vld [vmem:[%s18136_s0 + $0x680] sm:$0xff]  ;;  %v7101_v30 = vld [vmem:[%s18136_s0 + $0x688] sm:$0xff] }
 0x42e   :  { %v10059_v14 = vpop.permute.xlu1 %2479  ;;  %v10061_v55 = vpop.permute.xlu0 %2483 }
 0x42f   :  { %19114 = vst [vmem:[#allocation411_spill] sm:$0xff] %v10059_v14  ;;  %19115 = vst [vmem:[#allocation412_spill] sm:$0xff] %v10061_v55  ;;  %2735 = vperm.xlu1 %6888, %v7099_v0   ;;  %2739 = vperm.xlu0 %6889, %v7100_v22   ;;  %v7102_v14 = vld [vmem:[%s18136_s0 + $0x690] sm:$0xff]  ;;  %v7103_v22 = vld [vmem:[%s18136_s0 + $0x698] sm:$0xff] }
 0x432   :  { %v10069_v6 = vpop.permute.xlu1 %2487  ;;  %v10071_v59 = vpop.permute.xlu0 %2491 }
 0x433   :  { %19116 = vst [vmem:[#allocation413_spill] sm:$0xff] %v10069_v6  ;;  %19117 = vst [vmem:[#allocation414_spill] sm:$0xff] %v10071_v59  ;;  %2743 = vperm.xlu1 %6888, %v7101_v30   ;;  %2747 = vperm.xlu0 %6889, %v7102_v14   ;;  %v7104_v6 = vld [vmem:[%s18136_s0 + $0x6a0] sm:$0xff]  ;;  %v7105_v14 = vld [vmem:[%s18136_s0 + $0x6a8] sm:$0xff] }
 0x436   :  { %v10079_v0 = vpop.permute.xlu1 %2495  ;;  %v10081_v55 = vpop.permute.xlu0 %2499 }
 0x437   :  { %19118 = vst [vmem:[#allocation415_spill] sm:$0xff] %v10079_v0  ;;  %19119 = vst [vmem:[#allocation416_spill] sm:$0xff] %v10081_v55  ;;  %2751 = vperm.xlu1 %6888, %v7103_v22   ;;  %2755 = vperm.xlu0 %6889, %v7104_v6   ;;  %v7106_v0 = vld [vmem:[%s18136_s0 + $0x6b0] sm:$0xff]  ;;  %v7107_v6 = vld [vmem:[%s18136_s0 + $0x6b8] sm:$0xff] }
 0x43a   :  { %v10089_v30 = vpop.permute.xlu1 %2503  ;;  %v10091_v59 = vpop.permute.xlu0 %2507 }
 0x43b   :  { %19120 = vst [vmem:[#allocation417_spill] sm:$0xff] %v10089_v30  ;;  %19121 = vst [vmem:[#allocation418_spill] sm:$0xff] %v10091_v59  ;;  %2759 = vperm.xlu1 %6888, %v7105_v14   ;;  %2763 = vperm.xlu0 %6889, %v7106_v0   ;;  %v7108_v30 = vld [vmem:[%s18136_s0 + $0x6c0] sm:$0xff]  ;;  %v7109_v0 = vld [vmem:[%s18136_s0 + $0x6c8] sm:$0xff] }
 0x43e   :  { %v10099_v22 = vpop.permute.xlu1 %2511  ;;  %v10101_v55 = vpop.permute.xlu0 %2515 }
 0x43f   :  { %19122 = vst [vmem:[#allocation419_spill] sm:$0xff] %v10099_v22  ;;  %19123 = vst [vmem:[#allocation420_spill] sm:$0xff] %v10101_v55  ;;  %2767 = vperm.xlu1 %6888, %v7107_v6   ;;  %2771 = vperm.xlu0 %6889, %v7108_v30   ;;  %v7110_v22 = vld [vmem:[%s18136_s0 + $0x6d0] sm:$0xff]  ;;  %v7111_v30 = vld [vmem:[%s18136_s0 + $0x6d8] sm:$0xff] }
 0x442   :  { %v10109_v14 = vpop.permute.xlu1 %2519  ;;  %v10111_v59 = vpop.permute.xlu0 %2523 }
 0x443   :  { %19124 = vst [vmem:[#allocation421_spill] sm:$0xff] %v10109_v14  ;;  %19125 = vst [vmem:[#allocation422_spill] sm:$0xff] %v10111_v59  ;;  %2775 = vperm.xlu1 %6888, %v7109_v0   ;;  %2779 = vperm.xlu0 %6889, %v7110_v22   ;;  %v7112_v14 = vld [vmem:[%s18136_s0 + $0x6e0] sm:$0xff]  ;;  %v7113_v22 = vld [vmem:[%s18136_s0 + $0x6e8] sm:$0xff] }
 0x446   :  { %v10119_v6 = vpop.permute.xlu1 %2527  ;;  %v10121_v55 = vpop.permute.xlu0 %2531 }
 0x447   :  { %19126 = vst [vmem:[#allocation423_spill] sm:$0xff] %v10119_v6  ;;  %19127 = vst [vmem:[#allocation424_spill] sm:$0xff] %v10121_v55  ;;  %2783 = vperm.xlu1 %6888, %v7111_v30   ;;  %2787 = vperm.xlu0 %6889, %v7112_v14   ;;  %v7114_v6 = vld [vmem:[%s18136_s0 + $0x6f0] sm:$0xff]  ;;  %v7115_v14 = vld [vmem:[%s18136_s0 + $0x6f8] sm:$0xff] }
 0x44a   :  { %v10129_v0 = vpop.permute.xlu1 %2535  ;;  %v10131_v59 = vpop.permute.xlu0 %2539 }
 0x44b   :  { %19128 = vst [vmem:[#allocation425_spill] sm:$0xff] %v10129_v0  ;;  %19129 = vst [vmem:[#allocation426_spill] sm:$0xff] %v10131_v59  ;;  %2791 = vperm.xlu1 %6888, %v7113_v22   ;;  %2795 = vperm.xlu0 %6889, %v7114_v6   ;;  %v7116_v0 = vld [vmem:[%s18136_s0 + $0x700] sm:$0xff]  ;;  %v7117_v6 = vld [vmem:[%s18136_s0 + $0x708] sm:$0xff] }
 0x44e   :  { %v10139_v30 = vpop.permute.xlu1 %2543  ;;  %v10141_v55 = vpop.permute.xlu0 %2547 }
 0x44f   :  { %19130 = vst [vmem:[#allocation427_spill] sm:$0xff] %v10139_v30  ;;  %19131 = vst [vmem:[#allocation428_spill] sm:$0xff] %v10141_v55  ;;  %2799 = vperm.xlu1 %6888, %v7115_v14   ;;  %2803 = vperm.xlu0 %6889, %v7116_v0   ;;  %v7118_v30 = vld [vmem:[%s18136_s0 + $0x710] sm:$0xff]  ;;  %v7119_v0 = vld [vmem:[%s18136_s0 + $0x718] sm:$0xff] }
 0x452   :  { %v10149_v22 = vpop.permute.xlu1 %2551  ;;  %v10151_v59 = vpop.permute.xlu0 %2555 }
 0x453   :  { %19132 = vst [vmem:[#allocation429_spill] sm:$0xff] %v10149_v22  ;;  %19133 = vst [vmem:[#allocation430_spill] sm:$0xff] %v10151_v59  ;;  %2807 = vperm.xlu1 %6888, %v7117_v6   ;;  %2811 = vperm.xlu0 %6889, %v7118_v30   ;;  %v7120_v22 = vld [vmem:[%s18136_s0 + $0x720] sm:$0xff]  ;;  %v7121_v30 = vld [vmem:[%s18136_s0 + $0x728] sm:$0xff] }
 0x456   :  { %v10159_v14 = vpop.permute.xlu1 %2559  ;;  %v10161_v55 = vpop.permute.xlu0 %2563 }
 0x457   :  { %19134 = vst [vmem:[#allocation431_spill] sm:$0xff] %v10159_v14  ;;  %19135 = vst [vmem:[#allocation432_spill] sm:$0xff] %v10161_v55  ;;  %2815 = vperm.xlu1 %6888, %v7119_v0   ;;  %2819 = vperm.xlu0 %6889, %v7120_v22   ;;  %v7122_v14 = vld [vmem:[%s18136_s0 + $0x730] sm:$0xff]  ;;  %v7123_v22 = vld [vmem:[%s18136_s0 + $0x738] sm:$0xff] }
 0x45a   :  { %v10169_v6 = vpop.permute.xlu1 %2567  ;;  %v10171_v59 = vpop.permute.xlu0 %2571 }
 0x45b   :  { %19136 = vst [vmem:[#allocation433_spill] sm:$0xff] %v10169_v6  ;;  %19137 = vst [vmem:[#allocation434_spill] sm:$0xff] %v10171_v59  ;;  %2823 = vperm.xlu1 %6888, %v7121_v30   ;;  %2827 = vperm.xlu0 %6889, %v7122_v14   ;;  %v7124_v6 = vld [vmem:[%s18136_s0 + $0x740] sm:$0xff]  ;;  %v7125_v14 = vld [vmem:[%s18136_s0 + $0x748] sm:$0xff] }
 0x45e   :  { %v10179_v0 = vpop.permute.xlu1 %2575  ;;  %v10181_v55 = vpop.permute.xlu0 %2579 }
 0x45f   :  { %19138 = vst [vmem:[#allocation435_spill] sm:$0xff] %v10179_v0  ;;  %19139 = vst [vmem:[#allocation436_spill] sm:$0xff] %v10181_v55  ;;  %2831 = vperm.xlu1 %6888, %v7123_v22   ;;  %2835 = vperm.xlu0 %6889, %v7124_v6   ;;  %v7126_v0 = vld [vmem:[%s18136_s0 + $0x750] sm:$0xff]  ;;  %v7127_v6 = vld [vmem:[%s18136_s0 + $0x758] sm:$0xff] }
 0x462   :  { %v10189_v30 = vpop.permute.xlu1 %2583  ;;  %v10191_v59 = vpop.permute.xlu0 %2587 }
 0x463   :  { %19140 = vst [vmem:[#allocation437_spill] sm:$0xff] %v10189_v30  ;;  %19141 = vst [vmem:[#allocation438_spill] sm:$0xff] %v10191_v59  ;;  %2839 = vperm.xlu1 %6888, %v7125_v14   ;;  %2843 = vperm.xlu0 %6889, %v7126_v0   ;;  %v7128_v30 = vld [vmem:[%s18136_s0 + $0x760] sm:$0xff]  ;;  %v7129_v0 = vld [vmem:[%s18136_s0 + $0x768] sm:$0xff] }
 0x466   :  { %v10199_v22 = vpop.permute.xlu1 %2591  ;;  %v10201_v55 = vpop.permute.xlu0 %2595 }
 0x467   :  { %19142 = vst [vmem:[#allocation439_spill] sm:$0xff] %v10199_v22  ;;  %19143 = vst [vmem:[#allocation440_spill] sm:$0xff] %v10201_v55  ;;  %2847 = vperm.xlu1 %6888, %v7127_v6   ;;  %2851 = vperm.xlu0 %6889, %v7128_v30   ;;  %v7130_v22 = vld [vmem:[%s18136_s0 + $0x770] sm:$0xff]  ;;  %v7131_v30 = vld [vmem:[%s18136_s0 + $0x778] sm:$0xff] }
 0x46a   :  { %v10209_v14 = vpop.permute.xlu1 %2599  ;;  %v10211_v59 = vpop.permute.xlu0 %2603 }
 0x46b   :  { %19144 = vst [vmem:[#allocation441_spill] sm:$0xff] %v10209_v14  ;;  %19145 = vst [vmem:[#allocation442_spill] sm:$0xff] %v10211_v59  ;;  %2855 = vperm.xlu1 %6888, %v7129_v0   ;;  %2859 = vperm.xlu0 %6889, %v7130_v22   ;;  %v7132_v14 = vld [vmem:[%s18136_s0 + $0x780] sm:$0xff]  ;;  %v7133_v22 = vld [vmem:[%s18136_s0 + $0x788] sm:$0xff] }
 0x46e   :  { %v10219_v6 = vpop.permute.xlu1 %2607  ;;  %v10221_v55 = vpop.permute.xlu0 %2611 }
 0x46f   :  { %19146 = vst [vmem:[#allocation443_spill] sm:$0xff] %v10219_v6  ;;  %19147 = vst [vmem:[#allocation444_spill] sm:$0xff] %v10221_v55  ;;  %2863 = vperm.xlu1 %6888, %v7131_v30   ;;  %2867 = vperm.xlu0 %6889, %v7132_v14   ;;  %v7134_v6 = vld [vmem:[%s18136_s0 + $0x790] sm:$0xff]  ;;  %v7135_v14 = vld [vmem:[%s18136_s0 + $0x798] sm:$0xff] }
 0x472   :  { %v10229_v0 = vpop.permute.xlu1 %2615  ;;  %v10231_v59 = vpop.permute.xlu0 %2619 }
 0x473   :  { %19148 = vst [vmem:[#allocation445_spill] sm:$0xff] %v10229_v0  ;;  %19149 = vst [vmem:[#allocation446_spill] sm:$0xff] %v10231_v59  ;;  %2871 = vperm.xlu1 %6888, %v7133_v22   ;;  %2875 = vperm.xlu0 %6889, %v7134_v6   ;;  %v7136_v0 = vld [vmem:[%s18136_s0 + $0x7a0] sm:$0xff]  ;;  %v7137_v6 = vld [vmem:[%s18136_s0 + $0x7a8] sm:$0xff] }
 0x476   :  { %v10239_v30 = vpop.permute.xlu1 %2623  ;;  %v10241_v55 = vpop.permute.xlu0 %2627 }
 0x477   :  { %19150 = vst [vmem:[#allocation447_spill] sm:$0xff] %v10239_v30  ;;  %19151 = vst [vmem:[#allocation448_spill] sm:$0xff] %v10241_v55  ;;  %2879 = vperm.xlu1 %6888, %v7135_v14   ;;  %2883 = vperm.xlu0 %6889, %v7136_v0   ;;  %v7138_v30 = vld [vmem:[%s18136_s0 + $0x7b0] sm:$0xff]  ;;  %v7139_v0 = vld [vmem:[%s18136_s0 + $0x7b8] sm:$0xff] }
 0x47a   :  { %v10249_v22 = vpop.permute.xlu1 %2631  ;;  %v10251_v59 = vpop.permute.xlu0 %2635 }
 0x47b   :  { %19152 = vst [vmem:[#allocation449_spill] sm:$0xff] %v10249_v22  ;;  %19153 = vst [vmem:[#allocation450_spill] sm:$0xff] %v10251_v59  ;;  %2887 = vperm.xlu1 %6888, %v7137_v6   ;;  %2891 = vperm.xlu0 %6889, %v7138_v30   ;;  %v7140_v22 = vld [vmem:[%s18136_s0 + $0x7c0] sm:$0xff]  ;;  %v7141_v30 = vld [vmem:[%s18136_s0 + $0x7c8] sm:$0xff] }
 0x47e   :  { %v10259_v14 = vpop.permute.xlu1 %2639  ;;  %v10261_v55 = vpop.permute.xlu0 %2643 }
 0x47f   :  { %19154 = vst [vmem:[#allocation451_spill] sm:$0xff] %v10259_v14  ;;  %19155 = vst [vmem:[#allocation452_spill] sm:$0xff] %v10261_v55  ;;  %2895 = vperm.xlu1 %6888, %v7139_v0   ;;  %2899 = vperm.xlu0 %6889, %v7140_v22   ;;  %v7142_v14 = vld [vmem:[%s18136_s0 + $0x7d0] sm:$0xff]  ;;  %v7143_v22 = vld [vmem:[%s18136_s0 + $0x7d8] sm:$0xff] }
 0x482   :  { %v10269_v6 = vpop.permute.xlu1 %2647  ;;  %v10271_v59 = vpop.permute.xlu0 %2651 }
 0x483   :  { %19156 = vst [vmem:[#allocation453_spill] sm:$0xff] %v10269_v6  ;;  %19157 = vst [vmem:[#allocation454_spill] sm:$0xff] %v10271_v59  ;;  %2903 = vperm.xlu1 %6888, %v7141_v30   ;;  %2907 = vperm.xlu0 %6889, %v7142_v14   ;;  %v7144_v6 = vld [vmem:[%s18136_s0 + $0x7e0] sm:$0xff]  ;;  %v7145_v14 = vld [vmem:[%s18136_s0 + $0x7e8] sm:$0xff] }
 0x486   :  { %v10279_v0 = vpop.permute.xlu1 %2655  ;;  %v10281_v55 = vpop.permute.xlu0 %2659 }
 0x487   :  { %19158 = vst [vmem:[#allocation455_spill] sm:$0xff] %v10279_v0  ;;  %19159 = vst [vmem:[#allocation456_spill] sm:$0xff] %v10281_v55  ;;  %2911 = vperm.xlu1 %6888, %v7143_v22   ;;  %2915 = vperm.xlu0 %6889, %v7144_v6   ;;  %v7146_v0 = vld [vmem:[%s18136_s0 + $0x7f0] sm:$0xff]  ;;  %v7147_v6 = vld [vmem:[%s18136_s0 + $0x7f8] sm:$0xff] }
 0x48a   :  { %v10289_v30 = vpop.permute.xlu1 %2663  ;;  %v10291_v59 = vpop.permute.xlu0 %2667 }
 0x48b   :  { %19160 = vst [vmem:[#allocation457_spill] sm:$0xff] %v10289_v30  ;;  %19161 = vst [vmem:[#allocation458_spill] sm:$0xff] %v10291_v59  ;;  %2919 = vperm.xlu1 %6888, %v7145_v14   ;;  %2923 = vperm.xlu0 %6889, %v7146_v0   ;;  %v7148_v30 = vld [vmem:[%s18136_s0 + $0x800] sm:$0xff]  ;;  %v7149_v0 = vld [vmem:[%s18136_s0 + $0x808] sm:$0xff] }
 0x48e   :  { %v10299_v22 = vpop.permute.xlu1 %2671  ;;  %v10301_v55 = vpop.permute.xlu0 %2675 }
 0x48f   :  { %19162 = vst [vmem:[#allocation459_spill] sm:$0xff] %v10299_v22  ;;  %19163 = vst [vmem:[#allocation460_spill] sm:$0xff] %v10301_v55  ;;  %2927 = vperm.xlu1 %6888, %v7147_v6   ;;  %2931 = vperm.xlu0 %6889, %v7148_v30   ;;  %v7150_v22 = vld [vmem:[%s18136_s0 + $0x810] sm:$0xff]  ;;  %v7151_v30 = vld [vmem:[%s18136_s0 + $0x818] sm:$0xff] }
 0x492   :  { %v10309_v14 = vpop.permute.xlu1 %2679  ;;  %v10311_v59 = vpop.permute.xlu0 %2683 }
 0x493   :  { %19164 = vst [vmem:[#allocation461_spill] sm:$0xff] %v10309_v14  ;;  %19165 = vst [vmem:[#allocation462_spill] sm:$0xff] %v10311_v59  ;;  %2935 = vperm.xlu1 %6888, %v7149_v0   ;;  %2939 = vperm.xlu0 %6889, %v7150_v22   ;;  %v7152_v14 = vld [vmem:[%s18136_s0 + $0x820] sm:$0xff]  ;;  %v7153_v22 = vld [vmem:[%s18136_s0 + $0x828] sm:$0xff] }
 0x496   :  { %v10319_v6 = vpop.permute.xlu1 %2687  ;;  %v10321_v55 = vpop.permute.xlu0 %2691 }
 0x497   :  { %19166 = vst [vmem:[#allocation463_spill] sm:$0xff] %v10319_v6  ;;  %19167 = vst [vmem:[#allocation464_spill] sm:$0xff] %v10321_v55  ;;  %2943 = vperm.xlu1 %6888, %v7151_v30   ;;  %2947 = vperm.xlu0 %6889, %v7152_v14   ;;  %v7154_v6 = vld [vmem:[%s18136_s0 + $0x830] sm:$0xff]  ;;  %v7155_v14 = vld [vmem:[%s18136_s0 + $0x838] sm:$0xff] }
 0x49a   :  { %v10329_v0 = vpop.permute.xlu1 %2695  ;;  %v10331_v59 = vpop.permute.xlu0 %2699 }
 0x49b   :  { %19168 = vst [vmem:[#allocation465_spill] sm:$0xff] %v10329_v0  ;;  %19169 = vst [vmem:[#allocation466_spill] sm:$0xff] %v10331_v59  ;;  %2951 = vperm.xlu1 %6888, %v7153_v22   ;;  %2955 = vperm.xlu0 %6889, %v7154_v6   ;;  %v7156_v0 = vld [vmem:[%s18136_s0 + $0x840] sm:$0xff]  ;;  %v7157_v6 = vld [vmem:[%s18136_s0 + $0x848] sm:$0xff] }
 0x49e   :  { %v10339_v30 = vpop.permute.xlu1 %2703  ;;  %v10341_v55 = vpop.permute.xlu0 %2707 }
 0x49f   :  { %19170 = vst [vmem:[#allocation467_spill] sm:$0xff] %v10339_v30  ;;  %19171 = vst [vmem:[#allocation468_spill] sm:$0xff] %v10341_v55  ;;  %2959 = vperm.xlu1 %6888, %v7155_v14   ;;  %2963 = vperm.xlu0 %6889, %v7156_v0   ;;  %v7158_v30 = vld [vmem:[%s18136_s0 + $0x850] sm:$0xff]  ;;  %v7159_v0 = vld [vmem:[%s18136_s0 + $0x858] sm:$0xff] }
 0x4a2   :  { %v10349_v22 = vpop.permute.xlu1 %2711  ;;  %v10351_v59 = vpop.permute.xlu0 %2715 }
 0x4a3   :  { %19172 = vst [vmem:[#allocation469_spill] sm:$0xff] %v10349_v22  ;;  %19173 = vst [vmem:[#allocation470_spill] sm:$0xff] %v10351_v59  ;;  %2967 = vperm.xlu1 %6888, %v7157_v6   ;;  %2971 = vperm.xlu0 %6889, %v7158_v30   ;;  %v7160_v22 = vld [vmem:[%s18136_s0 + $0x860] sm:$0xff]  ;;  %v7161_v30 = vld [vmem:[%s18136_s0 + $0x868] sm:$0xff] }
 0x4a6   :  { %v10359_v14 = vpop.permute.xlu1 %2719  ;;  %v10361_v55 = vpop.permute.xlu0 %2723 }
 0x4a7   :  { %19174 = vst [vmem:[#allocation471_spill] sm:$0xff] %v10359_v14  ;;  %19175 = vst [vmem:[#allocation472_spill] sm:$0xff] %v10361_v55  ;;  %2975 = vperm.xlu1 %6888, %v7159_v0   ;;  %2979 = vperm.xlu0 %6889, %v7160_v22   ;;  %v7162_v14 = vld [vmem:[%s18136_s0 + $0x870] sm:$0xff]  ;;  %v7163_v22 = vld [vmem:[%s18136_s0 + $0x878] sm:$0xff] }
 0x4aa   :  { %v10369_v6 = vpop.permute.xlu1 %2727  ;;  %v10371_v59 = vpop.permute.xlu0 %2731 }
 0x4ab   :  { %19176 = vst [vmem:[#allocation473_spill] sm:$0xff] %v10369_v6  ;;  %19177 = vst [vmem:[#allocation474_spill] sm:$0xff] %v10371_v59  ;;  %2983 = vperm.xlu1 %6888, %v7161_v30   ;;  %2987 = vperm.xlu0 %6889, %v7162_v14   ;;  %v7164_v6 = vld [vmem:[%s18136_s0 + $0x880] sm:$0xff]  ;;  %v7165_v14 = vld [vmem:[%s18136_s0 + $0x888] sm:$0xff] }
 0x4ae   :  { %v10379_v0 = vpop.permute.xlu1 %2735  ;;  %v10381_v55 = vpop.permute.xlu0 %2739 }
 0x4af   :  { %19178 = vst [vmem:[#allocation475_spill] sm:$0xff] %v10379_v0  ;;  %19179 = vst [vmem:[#allocation476_spill] sm:$0xff] %v10381_v55  ;;  %2991 = vperm.xlu1 %6888, %v7163_v22   ;;  %2995 = vperm.xlu0 %6889, %v7164_v6   ;;  %v7166_v0 = vld [vmem:[%s18136_s0 + $0x890] sm:$0xff]  ;;  %v7167_v6 = vld [vmem:[%s18136_s0 + $0x898] sm:$0xff] }
 0x4b2   :  { %v10389_v30 = vpop.permute.xlu1 %2743  ;;  %v10391_v59 = vpop.permute.xlu0 %2747 }
 0x4b3   :  { %19180 = vst [vmem:[#allocation477_spill] sm:$0xff] %v10389_v30  ;;  %19181 = vst [vmem:[#allocation478_spill] sm:$0xff] %v10391_v59  ;;  %2999 = vperm.xlu1 %6888, %v7165_v14   ;;  %3003 = vperm.xlu0 %6889, %v7166_v0   ;;  %v7168_v30 = vld [vmem:[%s18136_s0 + $0x8a0] sm:$0xff]  ;;  %v7169_v0 = vld [vmem:[%s18136_s0 + $0x8a8] sm:$0xff] }
 0x4b6   :  { %v10399_v22 = vpop.permute.xlu1 %2751  ;;  %v10401_v55 = vpop.permute.xlu0 %2755 }
 0x4b7   :  { %19182 = vst [vmem:[#allocation479_spill] sm:$0xff] %v10399_v22  ;;  %19183 = vst [vmem:[#allocation480_spill] sm:$0xff] %v10401_v55  ;;  %3007 = vperm.xlu1 %6888, %v7167_v6   ;;  %3011 = vperm.xlu0 %6889, %v7168_v30   ;;  %v7170_v22 = vld [vmem:[%s18136_s0 + $0x8b0] sm:$0xff]  ;;  %v7171_v30 = vld [vmem:[%s18136_s0 + $0x8b8] sm:$0xff] }
 0x4ba   :  { %v10409_v14 = vpop.permute.xlu1 %2759  ;;  %v10411_v59 = vpop.permute.xlu0 %2763 }
 0x4bb   :  { %19184 = vst [vmem:[#allocation481_spill] sm:$0xff] %v10409_v14  ;;  %19185 = vst [vmem:[#allocation482_spill] sm:$0xff] %v10411_v59  ;;  %3015 = vperm.xlu1 %6888, %v7169_v0   ;;  %3019 = vperm.xlu0 %6889, %v7170_v22   ;;  %v7172_v14 = vld [vmem:[%s18136_s0 + $0x8c0] sm:$0xff]  ;;  %v7173_v22 = vld [vmem:[%s18136_s0 + $0x8c8] sm:$0xff] }
 0x4be   :  { %v10419_v6 = vpop.permute.xlu1 %2767  ;;  %v10421_v55 = vpop.permute.xlu0 %2771 }
 0x4bf   :  { %19186 = vst [vmem:[#allocation483_spill] sm:$0xff] %v10419_v6  ;;  %19187 = vst [vmem:[#allocation484_spill] sm:$0xff] %v10421_v55  ;;  %3023 = vperm.xlu1 %6888, %v7171_v30   ;;  %3027 = vperm.xlu0 %6889, %v7172_v14   ;;  %v7174_v6 = vld [vmem:[%s18136_s0 + $0x8d0] sm:$0xff]  ;;  %v7175_v14 = vld [vmem:[%s18136_s0 + $0x8d8] sm:$0xff] }
 0x4c2   :  { %v10429_v0 = vpop.permute.xlu1 %2775  ;;  %v10431_v59 = vpop.permute.xlu0 %2779 }
 0x4c3   :  { %19188 = vst [vmem:[#allocation485_spill] sm:$0xff] %v10429_v0  ;;  %19189 = vst [vmem:[#allocation486_spill] sm:$0xff] %v10431_v59  ;;  %3031 = vperm.xlu1 %6888, %v7173_v22   ;;  %3035 = vperm.xlu0 %6889, %v7174_v6   ;;  %v7176_v0 = vld [vmem:[%s18136_s0 + $0x8e0] sm:$0xff]  ;;  %v7177_v6 = vld [vmem:[%s18136_s0 + $0x8e8] sm:$0xff] }
 0x4c6   :  { %v10439_v30 = vpop.permute.xlu1 %2783  ;;  %v10441_v55 = vpop.permute.xlu0 %2787 }
 0x4c7   :  { %19190 = vst [vmem:[#allocation487_spill] sm:$0xff] %v10439_v30  ;;  %19191 = vst [vmem:[#allocation488_spill] sm:$0xff] %v10441_v55  ;;  %3039 = vperm.xlu1 %6888, %v7175_v14   ;;  %3043 = vperm.xlu0 %6889, %v7176_v0   ;;  %v7178_v30 = vld [vmem:[%s18136_s0 + $0x8f0] sm:$0xff]  ;;  %v7179_v0 = vld [vmem:[%s18136_s0 + $0x8f8] sm:$0xff] }
 0x4ca   :  { %v10449_v22 = vpop.permute.xlu1 %2791  ;;  %v10451_v59 = vpop.permute.xlu0 %2795 }
 0x4cb   :  { %19192 = vst [vmem:[#allocation489_spill] sm:$0xff] %v10449_v22  ;;  %19193 = vst [vmem:[#allocation490_spill] sm:$0xff] %v10451_v59  ;;  %3047 = vperm.xlu1 %6888, %v7177_v6   ;;  %3051 = vperm.xlu0 %6889, %v7178_v30   ;;  %v7180_v22 = vld [vmem:[%s18136_s0 + $0x900] sm:$0xff]  ;;  %v7181_v30 = vld [vmem:[%s18136_s0 + $0x908] sm:$0xff] }
 0x4ce   :  { %v10459_v14 = vpop.permute.xlu1 %2799  ;;  %v10461_v55 = vpop.permute.xlu0 %2803 }
 0x4cf   :  { %19194 = vst [vmem:[#allocation491_spill] sm:$0xff] %v10459_v14  ;;  %19195 = vst [vmem:[#allocation492_spill] sm:$0xff] %v10461_v55  ;;  %3055 = vperm.xlu1 %6888, %v7179_v0   ;;  %3059 = vperm.xlu0 %6889, %v7180_v22   ;;  %v7182_v14 = vld [vmem:[%s18136_s0 + $0x910] sm:$0xff]  ;;  %v7183_v22 = vld [vmem:[%s18136_s0 + $0x918] sm:$0xff] }
 0x4d2   :  { %v10469_v6 = vpop.permute.xlu1 %2807  ;;  %v10471_v59 = vpop.permute.xlu0 %2811 }
 0x4d3   :  { %19196 = vst [vmem:[#allocation493_spill] sm:$0xff] %v10469_v6  ;;  %19197 = vst [vmem:[#allocation494_spill] sm:$0xff] %v10471_v59  ;;  %3063 = vperm.xlu1 %6888, %v7181_v30   ;;  %3067 = vperm.xlu0 %6889, %v7182_v14   ;;  %v7184_v6 = vld [vmem:[%s18136_s0 + $0x920] sm:$0xff]  ;;  %v7185_v14 = vld [vmem:[%s18136_s0 + $0x928] sm:$0xff] }
 0x4d6   :  { %v10479_v0 = vpop.permute.xlu1 %2815  ;;  %v10481_v55 = vpop.permute.xlu0 %2819 }
 0x4d7   :  { %19198 = vst [vmem:[#allocation495_spill] sm:$0xff] %v10479_v0  ;;  %19199 = vst [vmem:[#allocation496_spill] sm:$0xff] %v10481_v55  ;;  %3071 = vperm.xlu1 %6888, %v7183_v22   ;;  %3075 = vperm.xlu0 %6889, %v7184_v6   ;;  %v7186_v0 = vld [vmem:[%s18136_s0 + $0x930] sm:$0xff]  ;;  %v7187_v6 = vld [vmem:[%s18136_s0 + $0x938] sm:$0xff] }
 0x4da   :  { %v10489_v30 = vpop.permute.xlu1 %2823  ;;  %v10491_v59 = vpop.permute.xlu0 %2827 }
 0x4db   :  { %19200 = vst [vmem:[#allocation497_spill] sm:$0xff] %v10489_v30  ;;  %19201 = vst [vmem:[#allocation498_spill] sm:$0xff] %v10491_v59  ;;  %3079 = vperm.xlu1 %6888, %v7185_v14   ;;  %3083 = vperm.xlu0 %6889, %v7186_v0   ;;  %v7188_v30 = vld [vmem:[%s18136_s0 + $0x940] sm:$0xff]  ;;  %v7189_v0 = vld [vmem:[%s18136_s0 + $0x948] sm:$0xff] }
 0x4de   :  { %v10499_v22 = vpop.permute.xlu1 %2831  ;;  %v10501_v55 = vpop.permute.xlu0 %2835 }
 0x4df   :  { %19202 = vst [vmem:[#allocation499_spill] sm:$0xff] %v10499_v22  ;;  %19203 = vst [vmem:[#allocation500_spill] sm:$0xff] %v10501_v55  ;;  %3087 = vperm.xlu1 %6888, %v7187_v6   ;;  %3091 = vperm.xlu0 %6889, %v7188_v30   ;;  %v7190_v22 = vld [vmem:[%s18136_s0 + $0x950] sm:$0xff]  ;;  %v7191_v30 = vld [vmem:[%s18136_s0 + $0x958] sm:$0xff] }
 0x4e2   :  { %v10509_v14 = vpop.permute.xlu1 %2839  ;;  %v10511_v59 = vpop.permute.xlu0 %2843 }
 0x4e3   :  { %19204 = vst [vmem:[#allocation501_spill] sm:$0xff] %v10509_v14  ;;  %19205 = vst [vmem:[#allocation502_spill] sm:$0xff] %v10511_v59  ;;  %3095 = vperm.xlu1 %6888, %v7189_v0   ;;  %3099 = vperm.xlu0 %6889, %v7190_v22   ;;  %v7192_v14 = vld [vmem:[%s18136_s0 + $0x960] sm:$0xff]  ;;  %v7193_v22 = vld [vmem:[%s18136_s0 + $0x968] sm:$0xff] }
 0x4e6   :  { %v10519_v6 = vpop.permute.xlu1 %2847  ;;  %v10521_v55 = vpop.permute.xlu0 %2851 }
 0x4e7   :  { %19206 = vst [vmem:[#allocation503_spill] sm:$0xff] %v10519_v6  ;;  %19207 = vst [vmem:[#allocation504_spill] sm:$0xff] %v10521_v55  ;;  %3103 = vperm.xlu1 %6888, %v7191_v30   ;;  %3107 = vperm.xlu0 %6889, %v7192_v14   ;;  %v7194_v6 = vld [vmem:[%s18136_s0 + $0x970] sm:$0xff]  ;;  %v7195_v14 = vld [vmem:[%s18136_s0 + $0x978] sm:$0xff] }
 0x4ea   :  { %v10529_v0 = vpop.permute.xlu1 %2855  ;;  %v10531_v59 = vpop.permute.xlu0 %2859 }
 0x4eb   :  { %19208 = vst [vmem:[#allocation505_spill] sm:$0xff] %v10529_v0  ;;  %19209 = vst [vmem:[#allocation506_spill] sm:$0xff] %v10531_v59  ;;  %3111 = vperm.xlu1 %6888, %v7193_v22   ;;  %3115 = vperm.xlu0 %6889, %v7194_v6   ;;  %v7196_v0 = vld [vmem:[%s18136_s0 + $0x980] sm:$0xff]  ;;  %v7197_v6 = vld [vmem:[%s18136_s0 + $0x988] sm:$0xff] }
 0x4ee   :  { %v10539_v30 = vpop.permute.xlu1 %2863  ;;  %v10541_v55 = vpop.permute.xlu0 %2867 }
 0x4ef   :  { %19210 = vst [vmem:[#allocation507_spill] sm:$0xff] %v10539_v30  ;;  %19211 = vst [vmem:[#allocation508_spill] sm:$0xff] %v10541_v55  ;;  %3119 = vperm.xlu1 %6888, %v7195_v14   ;;  %3123 = vperm.xlu0 %6889, %v7196_v0   ;;  %v7198_v30 = vld [vmem:[%s18136_s0 + $0x990] sm:$0xff]  ;;  %v7199_v0 = vld [vmem:[%s18136_s0 + $0x998] sm:$0xff] }
 0x4f2   :  { %v10549_v22 = vpop.permute.xlu1 %2871  ;;  %v10551_v59 = vpop.permute.xlu0 %2875 }
 0x4f3   :  { %19212 = vst [vmem:[#allocation509_spill] sm:$0xff] %v10549_v22  ;;  %19213 = vst [vmem:[#allocation510_spill] sm:$0xff] %v10551_v59  ;;  %3127 = vperm.xlu1 %6888, %v7197_v6   ;;  %3131 = vperm.xlu0 %6889, %v7198_v30   ;;  %v7200_v22 = vld [vmem:[%s18136_s0 + $0x9a0] sm:$0x3] }
 0x4f4   :  { %v7201_v30 = vld [vmem:[%s18136_s0] sm:$0xff] }
 0x4f6   :  { %v10559_v14 = vpop.permute.xlu1 %2879  ;;  %v10561_v55 = vpop.permute.xlu0 %2883 }
 0x4f7   :  { %19214 = vst [vmem:[#allocation511_spill] sm:$0xff] %v10559_v14  ;;  %19215 = vst [vmem:[#allocation512_spill] sm:$0xff] %v10561_v55  ;;  %3135 = vperm.xlu1 %6888, %v7199_v0   ;;  %3139 = vperm.xlu0 %6889, %v7200_v22   ;;  %v7202_v0 = vld [vmem:[%s18136_s0 + $0x8] sm:$0xff]  ;;  %v351_v55 = vlaneseq }
 0x4fa   :  { %v10569_v6 = vpop.permute.xlu1 %2887  ;;  %v10571_v59 = vpop.permute.xlu0 %2891 }
 0x4fb   :  { %19216 = vst [vmem:[#allocation513_spill] sm:$0xff] %v10569_v6  ;;  %19217 = vst [vmem:[#allocation514_spill] sm:$0xff] %v10571_v59  ;;  %6890 = vset.pattern.permute.xlu1 %v18638_v38  ;;  %6891 = vset.pattern.permute.xlu0 %v18638_v38  ;;  %v7203_v59 = vld [vmem:[%s18136_s0 + $0x10] sm:$0xff]  ;;  %v7204_v38 = vld [vmem:[%s18136_s0 + $0x20] sm:$0xff] }
 0x4fc   :  { %3772 = vperm.xlu1 %6890, %v7201_v30   ;;  %3776 = vperm.xlu0 %6891, %v7202_v0   ;;  %v7205_v0 = vld [vmem:[%s18136_s0 + $0x18] sm:$0xff] }
 0x4fe   :  { %v10581_v22 = vpop.permute.xlu1 %2895  ;;  %v10583_v6 = vpop.permute.xlu0 %2899 }
 0x4ff   :  { %19218 = vst [vmem:[#allocation515_spill] sm:$0xff] %v10581_v22  ;;  %19219 = vst [vmem:[#allocation516_spill] sm:$0xff] %v10583_v6  ;;  %v7206_v22 = vld [vmem:[%s18136_s0 + $0x30] sm:$0xff] }
 0x500   :  { %3780 = vperm.xlu1 %6890, %v7203_v59   ;;  %3788 = vperm.xlu0 %6891, %v7204_v38   ;;  %v7207_v38 = vld [vmem:[%s18136_s0 + $0x28] sm:$0xff] }
 0x502   :  { %v10591_v30 = vpop.permute.xlu1 %2903  ;;  %v10593_v14 = vpop.permute.xlu0 %2907 }
 0x503   :  { %19220 = vst [vmem:[#allocation517_spill] sm:$0xff] %v10591_v30  ;;  %19221 = vst [vmem:[#allocation518_spill] sm:$0xff] %v10593_v14  ;;  %v7208_v30 = vld [vmem:[%s18136_s0 + $0x40] sm:$0xff] }
 0x504   :  { %3784 = vperm.xlu1 %6890, %v7205_v0   ;;  %3796 = vperm.xlu0 %6891, %v7206_v22   ;;  %v7209_v22 = vld [vmem:[%s18136_s0 + $0x38] sm:$0xff] }
 0x506   :  { %v10601_v59 = vpop.permute.xlu1 %2911  ;;  %v10603_v6 = vpop.permute.xlu0 %2915 }
 0x507   :  { %19222 = vst [vmem:[#allocation519_spill] sm:$0xff] %v10601_v59  ;;  %19223 = vst [vmem:[#allocation520_spill] sm:$0xff] %v10603_v6  ;;  %v7210_v59 = vld [vmem:[%s18136_s0 + $0x50] sm:$0xff] }
 0x508   :  { %3792 = vperm.xlu1 %6890, %v7207_v38   ;;  %3804 = vperm.xlu0 %6891, %v7208_v30   ;;  %v7211_v30 = vld [vmem:[%s18136_s0 + $0x48] sm:$0xff] }
 0x50a   :  { %v10611_v0 = vpop.permute.xlu1 %2919  ;;  %v10613_v14 = vpop.permute.xlu0 %2923 }
 0x50b   :  { %19224 = vst [vmem:[#allocation521_spill] sm:$0xff] %v10611_v0  ;;  %19225 = vst [vmem:[#allocation522_spill] sm:$0xff] %v10613_v14  ;;  %v7212_v0 = vld [vmem:[%s18136_s0 + $0x60] sm:$0xff] }
 0x50c   :  { %3800 = vperm.xlu1 %6890, %v7209_v22   ;;  %3812 = vperm.xlu0 %6891, %v7210_v59   ;;  %v7213_v59 = vld [vmem:[%s18136_s0 + $0x58] sm:$0xff] }
 0x50e   :  { %v10621_v38 = vpop.permute.xlu1 %2927  ;;  %v10623_v6 = vpop.permute.xlu0 %2931 }
 0x50f   :  { %19226 = vst [vmem:[#allocation523_spill] sm:$0xff] %v10621_v38  ;;  %19227 = vst [vmem:[#allocation524_spill] sm:$0xff] %v10623_v6  ;;  %v7214_v38 = vld [vmem:[%s18136_s0 + $0x70] sm:$0xff] }
 0x510   :  { %3808 = vperm.xlu1 %6890, %v7211_v30   ;;  %3820 = vperm.xlu0 %6891, %v7212_v0   ;;  %v7215_v0 = vld [vmem:[%s18136_s0 + $0x68] sm:$0xff] }
 0x512   :  { %v10631_v22 = vpop.permute.xlu1 %2935  ;;  %v10633_v14 = vpop.permute.xlu0 %2939 }
 0x513   :  { %19228 = vst [vmem:[#allocation525_spill] sm:$0xff] %v10631_v22  ;;  %19229 = vst [vmem:[#allocation526_spill] sm:$0xff] %v10633_v14  ;;  %v7216_v22 = vld [vmem:[%s18136_s0 + $0x80] sm:$0xff] }
 0x514   :  { %3816 = vperm.xlu1 %6890, %v7213_v59   ;;  %3828 = vperm.xlu0 %6891, %v7214_v38   ;;  %v7217_v38 = vld [vmem:[%s18136_s0 + $0x78] sm:$0xff] }
 0x516   :  { %v10641_v30 = vpop.permute.xlu1 %2943  ;;  %v10643_v6 = vpop.permute.xlu0 %2947 }
 0x517   :  { %19230 = vst [vmem:[#allocation527_spill] sm:$0xff] %v10641_v30  ;;  %19231 = vst [vmem:[#allocation528_spill] sm:$0xff] %v10643_v6  ;;  %v7218_v30 = vld [vmem:[%s18136_s0 + $0x90] sm:$0xff] }
 0x518   :  { %3824 = vperm.xlu1 %6890, %v7215_v0   ;;  %3836 = vperm.xlu0 %6891, %v7216_v22   ;;  %v7219_v22 = vld [vmem:[%s18136_s0 + $0x88] sm:$0xff] }
 0x51a   :  { %v10651_v59 = vpop.permute.xlu1 %2951  ;;  %v10653_v14 = vpop.permute.xlu0 %2955 }
 0x51b   :  { %19232 = vst [vmem:[#allocation529_spill] sm:$0xff] %v10651_v59  ;;  %19233 = vst [vmem:[#allocation530_spill] sm:$0xff] %v10653_v14  ;;  %v7220_v59 = vld [vmem:[%s18136_s0 + $0xa0] sm:$0xff] }
 0x51c   :  { %3832 = vperm.xlu1 %6890, %v7217_v38   ;;  %3844 = vperm.xlu0 %6891, %v7218_v30   ;;  %v7221_v30 = vld [vmem:[%s18136_s0 + $0x98] sm:$0xff] }
 0x51e   :  { %v10661_v0 = vpop.permute.xlu1 %2959  ;;  %v10663_v6 = vpop.permute.xlu0 %2963 }
 0x51f   :  { %19234 = vst [vmem:[#allocation531_spill] sm:$0xff] %v10661_v0  ;;  %19235 = vst [vmem:[#allocation532_spill] sm:$0xff] %v10663_v6  ;;  %v7222_v0 = vld [vmem:[%s18136_s0 + $0xb0] sm:$0xff] }
 0x520   :  { %3840 = vperm.xlu1 %6890, %v7219_v22   ;;  %3852 = vperm.xlu0 %6891, %v7220_v59   ;;  %v7223_v59 = vld [vmem:[%s18136_s0 + $0xa8] sm:$0xff] }
 0x522   :  { %v10671_v38 = vpop.permute.xlu1 %2967  ;;  %v10673_v14 = vpop.permute.xlu0 %2971 }
 0x523   :  { %19236 = vst [vmem:[#allocation533_spill] sm:$0xff] %v10671_v38  ;;  %19237 = vst [vmem:[#allocation534_spill] sm:$0xff] %v10673_v14  ;;  %v7224_v38 = vld [vmem:[%s18136_s0 + $0xc0] sm:$0xff] }
 0x524   :  { %3848 = vperm.xlu1 %6890, %v7221_v30   ;;  %3860 = vperm.xlu0 %6891, %v7222_v0   ;;  %v7225_v0 = vld [vmem:[%s18136_s0 + $0xb8] sm:$0xff] }
 0x526   :  { %v10681_v22 = vpop.permute.xlu1 %2975  ;;  %v10683_v6 = vpop.permute.xlu0 %2979 }
 0x527   :  { %19238 = vst [vmem:[#allocation535_spill] sm:$0xff] %v10681_v22  ;;  %19239 = vst [vmem:[#allocation536_spill] sm:$0xff] %v10683_v6  ;;  %v7226_v22 = vld [vmem:[%s18136_s0 + $0xd0] sm:$0xff] }
 0x528   :  { %3856 = vperm.xlu1 %6890, %v7223_v59   ;;  %3868 = vperm.xlu0 %6891, %v7224_v38   ;;  %v7227_v38 = vld [vmem:[%s18136_s0 + $0xc8] sm:$0xff] }
 0x52a   :  { %v10691_v30 = vpop.permute.xlu1 %2983  ;;  %v10693_v14 = vpop.permute.xlu0 %2987 }
 0x52b   :  { %19240 = vst [vmem:[#allocation537_spill] sm:$0xff] %v10691_v30  ;;  %19241 = vst [vmem:[#allocation538_spill] sm:$0xff] %v10693_v14  ;;  %v7228_v30 = vld [vmem:[%s18136_s0 + $0xe0] sm:$0xff] }
 0x52c   :  { %3864 = vperm.xlu1 %6890, %v7225_v0   ;;  %3876 = vperm.xlu0 %6891, %v7226_v22   ;;  %v7229_v22 = vld [vmem:[%s18136_s0 + $0xd8] sm:$0xff] }
 0x52e   :  { %v10701_v59 = vpop.permute.xlu1 %2991  ;;  %v10703_v6 = vpop.permute.xlu0 %2995 }
 0x52f   :  { %19242 = vst [vmem:[#allocation539_spill] sm:$0xff] %v10701_v59  ;;  %19243 = vst [vmem:[#allocation540_spill] sm:$0xff] %v10703_v6  ;;  %v7230_v59 = vld [vmem:[%s18136_s0 + $0xf0] sm:$0xff] }
 0x530   :  { %3872 = vperm.xlu1 %6890, %v7227_v38   ;;  %3884 = vperm.xlu0 %6891, %v7228_v30   ;;  %v7231_v30 = vld [vmem:[%s18136_s0 + $0xe8] sm:$0xff] }
 0x532   :  { %v10711_v0 = vpop.permute.xlu1 %2999  ;;  %v10713_v14 = vpop.permute.xlu0 %3003 }
 0x533   :  { %19244 = vst [vmem:[#allocation541_spill] sm:$0xff] %v10711_v0  ;;  %19245 = vst [vmem:[#allocation542_spill] sm:$0xff] %v10713_v14  ;;  %v7232_v0 = vld [vmem:[%s18136_s0 + $0x100] sm:$0xff] }
 0x534   :  { %3880 = vperm.xlu1 %6890, %v7229_v22   ;;  %3892 = vperm.xlu0 %6891, %v7230_v59   ;;  %v7233_v59 = vld [vmem:[%s18136_s0 + $0xf8] sm:$0xff] }
 0x536   :  { %v10721_v38 = vpop.permute.xlu1 %3007  ;;  %v10723_v6 = vpop.permute.xlu0 %3011 }
 0x537   :  { %19246 = vst [vmem:[#allocation543_spill] sm:$0xff] %v10721_v38  ;;  %19247 = vst [vmem:[#allocation544_spill] sm:$0xff] %v10723_v6  ;;  %v7234_v38 = vld [vmem:[%s18136_s0 + $0x110] sm:$0xff] }
 0x538   :  { %3888 = vperm.xlu1 %6890, %v7231_v30   ;;  %3900 = vperm.xlu0 %6891, %v7232_v0   ;;  %v7235_v0 = vld [vmem:[%s18136_s0 + $0x108] sm:$0xff] }
 0x53a   :  { %v10731_v22 = vpop.permute.xlu1 %3015  ;;  %v10733_v14 = vpop.permute.xlu0 %3019 }
 0x53b   :  { %19248 = vst [vmem:[#allocation545_spill] sm:$0xff] %v10731_v22  ;;  %19249 = vst [vmem:[#allocation546_spill] sm:$0xff] %v10733_v14  ;;  %v7236_v22 = vld [vmem:[%s18136_s0 + $0x120] sm:$0xff] }
 0x53c   :  { %3896 = vperm.xlu1 %6890, %v7233_v59   ;;  %3908 = vperm.xlu0 %6891, %v7234_v38   ;;  %v7237_v38 = vld [vmem:[%s18136_s0 + $0x118] sm:$0xff] }
 0x53e   :  { %v10741_v30 = vpop.permute.xlu1 %3023  ;;  %v10743_v6 = vpop.permute.xlu0 %3027 }
 0x53f   :  { %19250 = vst [vmem:[#allocation547_spill] sm:$0xff] %v10741_v30  ;;  %19251 = vst [vmem:[#allocation548_spill] sm:$0xff] %v10743_v6  ;;  %v7238_v30 = vld [vmem:[%s18136_s0 + $0x130] sm:$0xff] }
 0x540   :  { %3904 = vperm.xlu1 %6890, %v7235_v0   ;;  %3916 = vperm.xlu0 %6891, %v7236_v22   ;;  %v7239_v22 = vld [vmem:[%s18136_s0 + $0x128] sm:$0xff] }
 0x542   :  { %v10751_v59 = vpop.permute.xlu1 %3031  ;;  %v10753_v14 = vpop.permute.xlu0 %3035 }
 0x543   :  { %19252 = vst [vmem:[#allocation549_spill] sm:$0xff] %v10751_v59  ;;  %19253 = vst [vmem:[#allocation550_spill] sm:$0xff] %v10753_v14  ;;  %v7240_v59 = vld [vmem:[%s18136_s0 + $0x140] sm:$0xff] }
 0x544   :  { %3912 = vperm.xlu1 %6890, %v7237_v38   ;;  %3924 = vperm.xlu0 %6891, %v7238_v30   ;;  %v7241_v30 = vld [vmem:[%s18136_s0 + $0x138] sm:$0xff] }
 0x546   :  { %v10761_v0 = vpop.permute.xlu1 %3039  ;;  %v10763_v6 = vpop.permute.xlu0 %3043 }
 0x547   :  { %19254 = vst [vmem:[#allocation551_spill] sm:$0xff] %v10761_v0  ;;  %19255 = vst [vmem:[#allocation552_spill] sm:$0xff] %v10763_v6  ;;  %v7242_v0 = vld [vmem:[%s18136_s0 + $0x150] sm:$0xff] }
 0x548   :  { %3920 = vperm.xlu1 %6890, %v7239_v22   ;;  %3932 = vperm.xlu0 %6891, %v7240_v59   ;;  %v7243_v59 = vld [vmem:[%s18136_s0 + $0x148] sm:$0xff] }
 0x54a   :  { %v10771_v38 = vpop.permute.xlu1 %3047  ;;  %v10773_v14 = vpop.permute.xlu0 %3051 }
 0x54b   :  { %19256 = vst [vmem:[#allocation553_spill] sm:$0xff] %v10771_v38  ;;  %19257 = vst [vmem:[#allocation554_spill] sm:$0xff] %v10773_v14  ;;  %v7244_v38 = vld [vmem:[%s18136_s0 + $0x160] sm:$0xff] }
 0x54c   :  { %3928 = vperm.xlu1 %6890, %v7241_v30   ;;  %3940 = vperm.xlu0 %6891, %v7242_v0   ;;  %v7245_v0 = vld [vmem:[%s18136_s0 + $0x158] sm:$0xff] }
 0x54e   :  { %v10781_v22 = vpop.permute.xlu1 %3055  ;;  %v10783_v6 = vpop.permute.xlu0 %3059 }
 0x54f   :  { %19258 = vst [vmem:[#allocation555_spill] sm:$0xff] %v10781_v22  ;;  %19259 = vst [vmem:[#allocation556_spill] sm:$0xff] %v10783_v6  ;;  %v7246_v22 = vld [vmem:[%s18136_s0 + $0x170] sm:$0xff] }
 0x550   :  { %3936 = vperm.xlu1 %6890, %v7243_v59   ;;  %3948 = vperm.xlu0 %6891, %v7244_v38   ;;  %v7247_v38 = vld [vmem:[%s18136_s0 + $0x168] sm:$0xff] }
 0x552   :  { %v10791_v30 = vpop.permute.xlu1 %3063  ;;  %v10793_v14 = vpop.permute.xlu0 %3067 }
 0x553   :  { %19260 = vst [vmem:[#allocation557_spill] sm:$0xff] %v10791_v30  ;;  %19261 = vst [vmem:[#allocation558_spill] sm:$0xff] %v10793_v14  ;;  %v7248_v30 = vld [vmem:[%s18136_s0 + $0x180] sm:$0xff] }
 0x554   :  { %3944 = vperm.xlu1 %6890, %v7245_v0   ;;  %3956 = vperm.xlu0 %6891, %v7246_v22   ;;  %v7249_v22 = vld [vmem:[%s18136_s0 + $0x178] sm:$0xff] }
 0x556   :  { %v10801_v59 = vpop.permute.xlu1 %3071  ;;  %v10803_v6 = vpop.permute.xlu0 %3075 }
 0x557   :  { %19262 = vst [vmem:[#allocation559_spill] sm:$0xff] %v10801_v59  ;;  %19263 = vst [vmem:[#allocation560_spill] sm:$0xff] %v10803_v6  ;;  %v7250_v59 = vld [vmem:[%s18136_s0 + $0x190] sm:$0xff] }
 0x558   :  { %3952 = vperm.xlu1 %6890, %v7247_v38   ;;  %3964 = vperm.xlu0 %6891, %v7248_v30   ;;  %v7251_v30 = vld [vmem:[%s18136_s0 + $0x188] sm:$0xff] }
 0x55a   :  { %v10811_v0 = vpop.permute.xlu1 %3079  ;;  %v10813_v14 = vpop.permute.xlu0 %3083 }
 0x55b   :  { %19264 = vst [vmem:[#allocation561_spill] sm:$0xff] %v10811_v0  ;;  %19265 = vst [vmem:[#allocation562_spill] sm:$0xff] %v10813_v14  ;;  %v7252_v0 = vld [vmem:[%s18136_s0 + $0x1a0] sm:$0xff] }
 0x55c   :  { %3960 = vperm.xlu1 %6890, %v7249_v22   ;;  %3972 = vperm.xlu0 %6891, %v7250_v59   ;;  %v7253_v59 = vld [vmem:[%s18136_s0 + $0x198] sm:$0xff] }
 0x55e   :  { %v10821_v38 = vpop.permute.xlu1 %3087  ;;  %v10823_v6 = vpop.permute.xlu0 %3091 }
 0x55f   :  { %19266 = vst [vmem:[#allocation563_spill] sm:$0xff] %v10821_v38  ;;  %19267 = vst [vmem:[#allocation564_spill] sm:$0xff] %v10823_v6  ;;  %v7254_v38 = vld [vmem:[%s18136_s0 + $0x1b0] sm:$0xff] }
 0x560   :  { %3968 = vperm.xlu1 %6890, %v7251_v30   ;;  %3980 = vperm.xlu0 %6891, %v7252_v0   ;;  %v7255_v0 = vld [vmem:[%s18136_s0 + $0x1a8] sm:$0xff] }
 0x562   :  { %v10831_v22 = vpop.permute.xlu1 %3095  ;;  %v10833_v14 = vpop.permute.xlu0 %3099 }
 0x563   :  { %19268 = vst [vmem:[#allocation565_spill] sm:$0xff] %v10831_v22  ;;  %19269 = vst [vmem:[#allocation566_spill] sm:$0xff] %v10833_v14  ;;  %v7256_v22 = vld [vmem:[%s18136_s0 + $0x1c0] sm:$0xff] }
 0x564   :  { %3976 = vperm.xlu1 %6890, %v7253_v59   ;;  %3988 = vperm.xlu0 %6891, %v7254_v38   ;;  %v347_v14 = vld [vmem:[#allocation4] sm:$0x3]  ;;  %v352_v38 = vshrl.u32 %v351_v55, 7  ;;  %v7259_v55 = vld [vmem:[%s18136_s0 + $0x1c8] sm:$0xff] }
 0x565   :  { %vm349_vm0 = vcmp.eq.s32.totalorder %v347_v14, 1  ;;  %vm348_vm1 = vcmp.eq.s32.totalorder %v347_v14, 0 }
 0x566   :  { %v10841_v30 = vpop.permute.xlu1 %3103  ;;  %v10843_v6 = vpop.permute.xlu0 %3107  ;;  %v357_v63 = vsub.s32 1, %v352_v38 }
 0x567   :  { %19270 = vst [vmem:[#allocation567_spill] sm:$0xff] %v10841_v30  ;;  %19271 = vst [vmem:[#allocation568_spill] sm:$0xff] %v10843_v6  ;;  %v7257_v30 = vld [vmem:[%s18136_s0 + $0x1b8] sm:$0xff] }
 0x568   :  { %3984 = vperm.xlu1 %6890, %v7255_v0   ;;  %3996 = vperm.xlu0 %6891, %v7256_v22   ;;  %v7258_v0 = vld [vmem:[%s18136_s0 + $0x1d0] sm:$0xff] }
 0x56a   :  { %v10851_v59 = vpop.permute.xlu1 %3111  ;;  %v10853_v60 = vpop.permute.xlu0 %3115 }
 0x56b   :  { %19272 = vst [vmem:[#allocation569_spill] sm:$0xff] %v10851_v59  ;;  %19273 = vst [vmem:[#allocation570_spill] sm:$0xff] %v10853_v60  ;;  %v353_v59 = vsub.s32 0, %v352_v38  ;;  %v19276_v60 = vmov 0  }
 0x56c   :  { %3992 = vperm.xlu1 %6890, %v7257_v30   ;;  %4004 = vperm.xlu0 %6891, %v7258_v0   ;;  %v350_v30 = vsel %vm349_vm0, 1, %v19276_v60 }
 0x56d   :  { %v354_v14 = vrot.slane %v350_v30, %v353_v59  ;;  %v358_v38 = vrot.slane %v350_v30, %v357_v63 }
 0x56e   :  { %v10861_v6 = vpop.permute.xlu1 %3119  ;;  %v10863_v22 = vpop.permute.xlu0 %3123 }
 0x56f   :  { %19274 = vst [vmem:[#allocation571_spill] sm:$0xff] %v10861_v6  ;;  %19275 = vst [vmem:[#allocation572_spill] sm:$0xff] %v10863_v22  ;;  %v3760_v6 = vsel %vm348_vm1, 1, %v19276_v60  ;;  %vm10887_vm2 = vcmp.eq.s32.totalorder %v354_v14, 1  ;;  %vm10891_vm3 = vcmp.eq.s32.totalorder %v358_v38, 1 }
 0x570   :  { %4000 = vperm.xlu1 %6890, %v7259_v55   ;;  %4012 = vperm.xlu0 %6891, %v7260_v51   ;;  %v7262_v55 = vld [vmem:[%s18136_s0 + $0x1f0] sm:$0xff]  ;;  %v3764_v56 = vrot.slane %v3760_v6, %v353_v59  ;;  %v3768_v51 = vrot.slane %v3760_v6, %v357_v63  ;;  %v7264_v6 = vld [vmem:[%s18136_s0 + $0x200] sm:$0xff] }
 0x572   :  { %v10872_v0 = vpop.permute.xlu1 %3127  ;;  %v10875_v22 = vpop.permute.xlu0 %3131  ;;  %vm10901_vm4 = vcmp.eq.s32.totalorder %v3764_v56, 1  ;;  %vm10905_vm5 = vcmp.eq.s32.totalorder %v3768_v51, 1  ;;  %v3143_v56 = vsel %vm10891_vm3, %v7807_v4, %v9341_v1  ;;  %v3144_v51 = vsel %vm10887_vm2, %v7817_v8, %v9351_v34 }
 0x573   :  { %19277 = vst [vmem:[#allocation573_spill] sm:$0xff] %v10872_v0  ;;  %19278 = vst [vmem:[#allocation574_spill] sm:$0xff] %v10875_v22  ;;  %v5625_v0 = vld [vmem:[#allocation2] sm:$0x3] }
 0x574   :  { %4008 = vperm.xlu1 %6890, %v7261_v46   ;;  %4020 = vperm.xlu0 %6891, %v7262_v55   ;;  %v7263_v46 = vld [vmem:[%s18136_s0 + $0x1e8] sm:$0xff]  ;;  %v10909_v38 = vrot.slane %v5625_v0, %v353_v59 }
 0x576   :  { %v10883_v5 = vpop.permute.xlu1 %3135  ;;  %v10885_v60 = vpop.permute.xlu0 %3139 }
 0x577   :  { %19279 = vst [vmem:[#allocation575_spill] sm:$0xff] %v10883_v5  ;;  %19280 = vst [vmem:[#allocation576_spill] sm:$0xff] %v10885_v60  ;;  %v10911_v5 = vrot.slane %v5625_v0, %v357_v63  ;;  %v3145_v63 = vsel %vm10891_vm3, %v7817_v8, %v9351_v34 }
 0x578   :  { %4016 = vperm.xlu1 %6890, %v7263_v46   ;;  %4028 = vperm.xlu0 %6891, %v7264_v6   ;;  %v3142_v46 = vsel %vm10887_vm2, %v7807_v4, %v9341_v1  ;;  %v7265_v4 = vld [vmem:[%s18136_s0 + $0x1f8] sm:$0xff] }
 0x57b   :  { %v3773_v6 = vpop.permute.xlu1 %3772  ;;  %v3777_v60 = vpop.permute.xlu0 %3776 }
 0x57c   :  { %v5007_v59 = vsel %vm10901_vm4, %v3773_v6, %v3142_v46  ;;  %v5008_v0 = vsel %vm10905_vm5, %v3773_v6, %v3143_v56  ;;  %4024 = vperm.xlu1 %6890, %v7265_v4   ;;  %v5009_v8 = vsel %vm10901_vm4, %v3777_v60, %v3144_v51  ;;  %v5010_v34 = vsel %vm10905_vm5, %v3777_v60, %v3145_v63  ;;  %v7266_v46 = vld [vmem:[%s18136_s0 + $0x210] sm:$0xff] }
 0x57d   :  { %v5637_v1 = vadd.f32 %v10909_v38, %v5007_v59  ;;  %v5638_v47 = vadd.f32 %v10911_v5, %v5008_v0  ;;  %4036 = vperm.xlu0 %6891, %v7266_v46   ;;  %v5639_v56 = vadd.f32 %v10909_v38, %v5009_v8  ;;  %v5640_v6 = vadd.f32 %v10911_v5, %v5010_v34  ;;  %v7268_v34 = vld [vmem:[%s18136_s0 + $0x220] sm:$0xff] }
 0x57e   :  { %v3146_v59 = vsel %vm10887_vm2, %v7805_v3, %v9349_v33  ;;  %v3147_v51 = vsel %vm10891_vm3, %v7805_v3, %v9349_v33  ;;  %v3150_v63 = vsel %vm10887_vm2, %v7827_v12, %v9361_v49  ;;  %v3151_v3 = vsel %vm10891_vm3, %v7827_v12, %v9361_v49  ;;  %v7267_v12 = vld [vmem:[%s18136_s0 + $0x208] sm:$0xff] }
 0x57f   :  { %6255 = vst [vmem:[%s18139_s3] sm:$0xff] %v5637_v1  ;;  %6257 = vst.msk [vmem:[%s18139_s3 + $0x8] sm:$0xff] %vm6256_vm6, %v5638_v47  ;;  %v3781_v60 = vpop.permute.xlu1 %3780  ;;  %v3789_v0 = vpop.permute.xlu0 %3788 }
 0x580   :  { %6258 = vst [vmem:[%s18139_s3 + $0x10] sm:$0xff] %v5639_v56  ;;  %6259 = vst.msk [vmem:[%s18139_s3 + $0x18] sm:$0xff] %vm6256_vm6, %v5640_v6  ;;  %v5011_v47 = vsel %vm10901_vm4, %v3781_v60, %v3146_v59  ;;  %v5012_v33 = vsel %vm10905_vm5, %v3781_v60, %v3147_v51  ;;  %4032 = vperm.xlu1 %6890, %v7267_v12   ;;  %v5015_v1 = vsel %vm10901_vm4, %v3789_v0, %v3150_v63  ;;  %v7270_v12 = vld [vmem:[%s18136_s0 + $0x230] sm:$0xff] }
 0x581   :  { %v5641_v49 = vadd.f32 %v10909_v38, %v5011_v47  ;;  %v5642_v4 = vadd.f32 %v10911_v5, %v5012_v33  ;;  %v5016_v8 = vsel %vm10905_vm5, %v3789_v0, %v3151_v3  ;;  %4044 = vperm.xlu0 %6891, %v7268_v34   ;;  %v5645_v46 = vadd.f32 %v10909_v38, %v5015_v1 }
 0x582   :  { %v5646_v56 = vadd.f32 %v10911_v5, %v5016_v8  ;;  %v3148_v6 = vsel %vm10887_vm2, %v7815_v7, %v9359_v18  ;;  %v3149_v59 = vsel %vm10891_vm3, %v7815_v7, %v9359_v18  ;;  %v3154_v60 = vsel %vm10887_vm2, %v7837_v16, %v9371_v41 }
 0x583   :  { %6260 = vst [vmem:[%s18139_s3 + $0x20] sm:$0xff] %v5641_v49  ;;  %6261 = vst.msk [vmem:[%s18139_s3 + $0x28] sm:$0xff] %vm6256_vm6, %v5642_v4  ;;  %v3785_v51 = vpop.permute.xlu1 %3784  ;;  %v3155_v7 = vsel %vm10891_vm3, %v7837_v16, %v9371_v41  ;;  %v3797_v3 = vpop.permute.xlu0 %3796  ;;  %v7269_v16 = vld [vmem:[%s18136_s0 + $0x218] sm:$0xff]  ;;  %v3152_v1 = vsel %vm10887_vm2, %v7825_v11, %v9369_v17  ;;  %v3153_v8 = vsel %vm10891_vm3, %v7825_v11, %v9369_v17 }
 0x584   :  { %6264 = vst [vmem:[%s18139_s3 + $0x40] sm:$0xff] %v5645_v46  ;;  %6265 = vst.msk [vmem:[%s18139_s3 + $0x48] sm:$0xff] %vm6256_vm6, %v5646_v56  ;;  %v5013_v18 = vsel %vm10901_vm4, %v3785_v51, %v3148_v6  ;;  %v5014_v63 = vsel %vm10905_vm5, %v3785_v51, %v3149_v59  ;;  %4040 = vperm.xlu1 %6890, %v7269_v16   ;;  %v5019_v33 = vsel %vm10901_vm4, %v3797_v3, %v3154_v60 }
 0x585   :  { %v5643_v41 = vadd.f32 %v10909_v38, %v5013_v18  ;;  %v5644_v47 = vadd.f32 %v10911_v5, %v5014_v63  ;;  %v5020_v0 = vsel %vm10905_vm5, %v3797_v3, %v3155_v7  ;;  %4052 = vperm.xlu0 %6891, %v7270_v12   ;;  %v5649_v49 = vadd.f32 %v10909_v38, %v5019_v33  ;;  %v7272_v7 = vld [vmem:[%s18136_s0 + $0x240] sm:$0xff] }
 0x586   :  { %v5650_v4 = vadd.f32 %v10911_v5, %v5020_v0  ;;  %v3158_v46 = vsel %vm10887_vm2, %v7847_v20, %v9381_v25  ;;  %v3159_v11 = vsel %vm10891_vm3, %v7847_v20, %v9381_v25  ;;  %v7271_v20 = vld [vmem:[%s18136_s0 + $0x228] sm:$0xff]  ;;  %v3156_v3 = vsel %vm10887_vm2, %v7835_v15, %v9379_v57 }
 0x587   :  { %6262 = vst [vmem:[%s18139_s3 + $0x30] sm:$0xff] %v5643_v41  ;;  %6263 = vst.msk [vmem:[%s18139_s3 + $0x38] sm:$0xff] %vm6256_vm6, %v5644_v47  ;;  %v3793_v34 = vpop.permute.xlu1 %3792  ;;  %v3805_v6 = vpop.permute.xlu0 %3804  ;;  %v3157_v16 = vsel %vm10891_vm3, %v7835_v15, %v9379_v57  ;;  %v3162_v47 = vsel %vm10887_vm2, %v7857_v24, %v9391_v9  ;;  %v3163_v15 = vsel %vm10891_vm3, %v7857_v24, %v9391_v9  ;;  %v7273_v24 = vld [vmem:[%s18136_s0 + $0x238] sm:$0xff] }
 0x588   :  { %6268 = vst [vmem:[%s18139_s3 + $0x60] sm:$0xff] %v5649_v49  ;;  %6269 = vst.msk [vmem:[%s18139_s3 + $0x68] sm:$0xff] %vm6256_vm6, %v5650_v4  ;;  %v5017_v17 = vsel %vm10901_vm4, %v3793_v34, %v3152_v1  ;;  %v5018_v56 = vsel %vm10905_vm5, %v3793_v34, %v3153_v8  ;;  %4048 = vperm.xlu1 %6890, %v7271_v20   ;;  %v5023_v51 = vsel %vm10901_vm4, %v3805_v6, %v3158_v46  ;;  %v7274_v1 = vld [vmem:[%s18136_s0 + $0x250] sm:$0xff] }
 0x589   :  { %v5647_v25 = vadd.f32 %v10909_v38, %v5017_v17  ;;  %v5648_v59 = vadd.f32 %v10911_v5, %v5018_v56  ;;  %v5024_v60 = vsel %vm10905_vm5, %v3805_v6, %v3159_v11  ;;  %4060 = vperm.xlu0 %6891, %v7272_v7   ;;  %v5653_v18 = vadd.f32 %v10909_v38, %v5023_v51 }
 0x58a   :  { %v5654_v63 = vadd.f32 %v10911_v5, %v5024_v60  ;;  %v3160_v46 = vsel %vm10887_vm2, %v7845_v19, %v9389_v2  ;;  %v3161_v11 = vsel %vm10891_vm3, %v7845_v19, %v9389_v2  ;;  %v3166_v56 = vsel %vm10887_vm2, %v7867_v28, %v9401_v61  ;;  %v7276_v60 = vld [vmem:[%s18136_s0 + $0x260] sm:$0xff] }
 0x58b   :  { %6266 = vst [vmem:[%s18139_s3 + $0x50] sm:$0xff] %v5647_v25  ;;  %6267 = vst.msk [vmem:[%s18139_s3 + $0x58] sm:$0xff] %vm6256_vm6, %v5648_v59  ;;  %v3801_v41 = vpop.permute.xlu1 %3800  ;;  %v3813_v0 = vpop.permute.xlu0 %3812  ;;  %v3167_v19 = vsel %vm10891_vm3, %v7867_v28, %v9401_v61  ;;  %v7275_v28 = vld [vmem:[%s18136_s0 + $0x248] sm:$0xff] }
 0x58c   :  { %6272 = vst [vmem:[%s18139_s3 + $0x80] sm:$0xff] %v5653_v18  ;;  %6273 = vst.msk [vmem:[%s18139_s3 + $0x88] sm:$0xff] %vm6256_vm6, %v5654_v63  ;;  %v5021_v57 = vsel %vm10901_vm4, %v3801_v41, %v3156_v3  ;;  %v5022_v33 = vsel %vm10905_vm5, %v3801_v41, %v3157_v16  ;;  %4056 = vperm.xlu1 %6890, %v7273_v24   ;;  %v5027_v49 = vsel %vm10901_vm4, %v3813_v0, %v3162_v47  ;;  %v7278_v24 = vld [vmem:[%s18136_s0 + $0x270] sm:$0xff] }
 0x58d   :  { %v5651_v9 = vadd.f32 %v10909_v38, %v5021_v57  ;;  %v5652_v12 = vadd.f32 %v10911_v5, %v5022_v33  ;;  %v5028_v4 = vsel %vm10905_vm5, %v3813_v0, %v3163_v15  ;;  %4068 = vperm.xlu0 %6891, %v7274_v1   ;;  %v5657_v8 = vadd.f32 %v10909_v38, %v5027_v49 }
 0x58e   :  { %v5658_v34 = vadd.f32 %v10911_v5, %v5028_v4  ;;  %v3164_v63 = vsel %vm10887_vm2, %v7855_v23, %v9399_v50  ;;  %v3165_v3 = vsel %vm10891_vm3, %v7855_v23, %v9399_v50  ;;  %v3170_v41 = vsel %vm10887_vm2, %v7877_v32, %v9411_v53 }
 0x58f   :  { %6270 = vst [vmem:[%s18139_s3 + $0x70] sm:$0xff] %v5651_v9  ;;  %6271 = vst.msk [vmem:[%s18139_s3 + $0x78] sm:$0xff] %vm6256_vm6, %v5652_v12  ;;  %v3809_v17 = vpop.permute.xlu1 %3808  ;;  %v3821_v20 = vpop.permute.xlu0 %3820  ;;  %v3171_v23 = vsel %vm10891_vm3, %v7877_v32, %v9411_v53  ;;  %v7277_v32 = vld [vmem:[%s18136_s0 + $0x258] sm:$0xff]  ;;  %v3168_v49 = vsel %vm10887_vm2, %v7865_v27, %v9409_v58  ;;  %v3169_v4 = vsel %vm10891_vm3, %v7865_v27, %v9409_v58 }
 0x590   :  { %6276 = vst [vmem:[%s18139_s3 + $0xa0] sm:$0xff] %v5657_v8  ;;  %6277 = vst.msk [vmem:[%s18139_s3 + $0xa8] sm:$0xff] %vm6256_vm6, %v5658_v34  ;;  %v5025_v2 = vsel %vm10901_vm4, %v3809_v17, %v3160_v46  ;;  %v5026_v6 = vsel %vm10905_vm5, %v3809_v17, %v3161_v11  ;;  %4064 = vperm.xlu1 %6890, %v7275_v28   ;;  %v5031_v59 = vsel %vm10901_vm4, %v3821_v20, %v3166_v56 }
 0x591   :  { %v5655_v61 = vadd.f32 %v10909_v38, %v5025_v2  ;;  %v5656_v25 = vadd.f32 %v10911_v5, %v5026_v6  ;;  %v5032_v51 = vsel %vm10905_vm5, %v3821_v20, %v3167_v19  ;;  %4076 = vperm.xlu0 %6891, %v7276_v60   ;;  %v5661_v7 = vadd.f32 %v10909_v38, %v5031_v59  ;;  %v7280_v19 = vld [vmem:[%s18136_s0 + $0x280] sm:$0xff] }
 0x592   :  { %v5662_v18 = vadd.f32 %v10911_v5, %v5032_v51  ;;  %v3174_v8 = vsel %vm10887_vm2, %v7887_v36, %v9421_v45  ;;  %v3175_v27 = vsel %vm10891_vm3, %v7887_v36, %v9421_v45  ;;  %v7279_v36 = vld [vmem:[%s18136_s0 + $0x268] sm:$0xff]  ;;  %v3172_v20 = vsel %vm10887_vm2, %v7875_v31, %v9419_v42 }
 0x593   :  { %6274 = vst [vmem:[%s18139_s3 + $0x90] sm:$0xff] %v5655_v61  ;;  %6275 = vst.msk [vmem:[%s18139_s3 + $0x98] sm:$0xff] %vm6256_vm6, %v5656_v25  ;;  %v3817_v16 = vpop.permute.xlu1 %3816  ;;  %v3829_v15 = vpop.permute.xlu0 %3828  ;;  %v3173_v28 = vsel %vm10891_vm3, %v7875_v31, %v9419_v42  ;;  %v3178_v25 = vsel %vm10887_vm2, %v7897_v40, %v9431_v37  ;;  %v3179_v31 = vsel %vm10891_vm3, %v7897_v40, %v9431_v37  ;;  %v7281_v40 = vld [vmem:[%s18136_s0 + $0x278] sm:$0xff] }
 0x594   :  { %6280 = vst [vmem:[%s18139_s3 + $0xc0] sm:$0xff] %v5661_v7  ;;  %6281 = vst.msk [vmem:[%s18139_s3 + $0xc8] sm:$0xff] %vm6256_vm6, %v5662_v18  ;;  %v5029_v50 = vsel %vm10901_vm4, %v3817_v16, %v3164_v63  ;;  %v5030_v47 = vsel %vm10905_vm5, %v3817_v16, %v3165_v3  ;;  %4072 = vperm.xlu1 %6890, %v7277_v32   ;;  %v5035_v33 = vsel %vm10901_vm4, %v3829_v15, %v3170_v41  ;;  %v7282_v63 = vld [vmem:[%s18136_s0 + $0x290] sm:$0xff] }
 0x595   :  { %v5659_v53 = vadd.f32 %v10909_v38, %v5029_v50  ;;  %v5660_v57 = vadd.f32 %v10911_v5, %v5030_v47  ;;  %v5036_v0 = vsel %vm10905_vm5, %v3829_v15, %v3171_v23  ;;  %4084 = vperm.xlu0 %6891, %v7278_v24   ;;  %v5665_v9 = vadd.f32 %v10909_v38, %v5035_v33 }
 0x596   :  { %v5666_v12 = vadd.f32 %v10911_v5, %v5036_v0  ;;  %v3176_v41 = vsel %vm10887_vm2, %v7885_v35, %v9429_v26  ;;  %v3177_v23 = vsel %vm10891_vm3, %v7885_v35, %v9429_v26  ;;  %v3182_v47 = vsel %vm10887_vm2, %v7907_v44, %v9441_v29  ;;  %v7284_v0 = vld [vmem:[%s18136_s0 + $0x2a0] sm:$0xff] }
 0x597   :  { %6278 = vst [vmem:[%s18139_s3 + $0xb0] sm:$0xff] %v5659_v53  ;;  %6279 = vst.msk [vmem:[%s18139_s3 + $0xb8] sm:$0xff] %vm6256_vm6, %v5660_v57  ;;  %v3825_v1 = vpop.permute.xlu1 %3824  ;;  %v3837_v46 = vpop.permute.xlu0 %3836  ;;  %v3183_v35 = vsel %vm10891_vm3, %v7907_v44, %v9441_v29  ;;  %v7283_v44 = vld [vmem:[%s18136_s0 + $0x288] sm:$0xff] }
 0x598   :  { %6284 = vst [vmem:[%s18139_s3 + $0xe0] sm:$0xff] %v5665_v9  ;;  %6285 = vst.msk [vmem:[%s18139_s3 + $0xe8] sm:$0xff] %vm6256_vm6, %v5666_v12  ;;  %v5033_v58 = vsel %vm10901_vm4, %v3825_v1, %v3168_v49  ;;  %v5034_v34 = vsel %vm10905_vm5, %v3825_v1, %v3169_v4  ;;  %4080 = vperm.xlu1 %6890, %v7279_v36   ;;  %v5039_v17 = vsel %vm10901_vm4, %v3837_v46, %v3174_v8  ;;  %v7286_v36 = vld [vmem:[%s18136_s0 + $0x2b0] sm:$0xff] }
 0x599   :  { %v5663_v45 = vadd.f32 %v10909_v38, %v5033_v58  ;;  %v5664_v11 = vadd.f32 %v10911_v5, %v5034_v34  ;;  %v5040_v56 = vsel %vm10905_vm5, %v3837_v46, %v3175_v27  ;;  %4092 = vperm.xlu0 %6891, %v7280_v19   ;;  %v5669_v2 = vadd.f32 %v10909_v38, %v5039_v17 }
 0x59a   :  { %v5670_v6 = vadd.f32 %v10911_v5, %v5040_v56  ;;  %v3180_v12 = vsel %vm10887_vm2, %v7895_v39, %v9439_v10  ;;  %v3181_v49 = vsel %vm10891_vm3, %v7895_v39, %v9439_v10  ;;  %v3186_v1 = vsel %vm10887_vm2, %v7917_v48, %v9451_v21 }
 0x59b   :  { %6282 = vst [vmem:[%s18139_s3 + $0xd0] sm:$0xff] %v5663_v45  ;;  %6283 = vst.msk [vmem:[%s18139_s3 + $0xd8] sm:$0xff] %vm6256_vm6, %v5664_v11  ;;  %v3833_v61 = vpop.permute.xlu1 %3832  ;;  %v3845_v51 = vpop.permute.xlu0 %3844  ;;  %v3187_v39 = vsel %vm10891_vm3, %v7917_v48, %v9451_v21  ;;  %v7285_v48 = vld [vmem:[%s18136_s0 + $0x298] sm:$0xff]  ;;  %v3184_v17 = vsel %vm10887_vm2, %v7905_v43, %v9449_v62  ;;  %v3185_v56 = vsel %vm10891_vm3, %v7905_v43, %v9449_v62 }
 0x59c   :  { %6288 = vst [vmem:[%s18139_s3 + $0x100] sm:$0xff] %v5669_v2  ;;  %6289 = vst.msk [vmem:[%s18139_s3 + $0x108] sm:$0xff] %vm6256_vm6, %v5670_v6  ;;  %v5037_v42 = vsel %vm10901_vm4, %v3833_v61, %v3172_v20  ;;  %v5038_v59 = vsel %vm10905_vm5, %v3833_v61, %v3173_v28  ;;  %4088 = vperm.xlu1 %6890, %v7281_v40   ;;  %v5043_v7 = vsel %vm10901_vm4, %v3845_v51, %v3178_v25 }
 0x59d   :  { %v5667_v37 = vadd.f32 %v10909_v38, %v5037_v42  ;;  %v5668_v60 = vadd.f32 %v10911_v5, %v5038_v59  ;;  %v5044_v18 = vsel %vm10905_vm5, %v3845_v51, %v3179_v31  ;;  %4100 = vperm.xlu0 %6891, %v7282_v63   ;;  %v5673_v3 = vadd.f32 %v10909_v38, %v5043_v7  ;;  %v7288_v31 = vld [vmem:[%s18136_s0 + $0x2c0] sm:$0xff]  ;;  %v19290_v7 = vld [vmem:[#allocation294_spill] sm:$0xff] }
 0x59e   :  { %v5674_v16 = vadd.f32 %v10911_v5, %v5044_v18  ;;  %v3190_v2 = vsel %vm10887_vm2, %v7927_v52, %v9461_v13  ;;  %v3191_v43 = vsel %vm10891_vm3, %v7927_v52, %v9461_v13  ;;  %v7287_v52 = vld [vmem:[%s18136_s0 + $0x2a8] sm:$0xff]  ;;  %v19291_v18 = vld [vmem:[#allocation11_spill] sm:$0xff] }
 0x59f   :  { %6286 = vst [vmem:[%s18139_s3 + $0xf0] sm:$0xff] %v5667_v37  ;;  %6287 = vst.msk [vmem:[%s18139_s3 + $0xf8] sm:$0xff] %vm6256_vm6, %v5668_v60  ;;  %v3841_v50 = vpop.permute.xlu1 %3840  ;;  %v3853_v32 = vpop.permute.xlu0 %3852  ;;  %v19289_v51 = vld [vmem:[#allocation8_spill] sm:$0xff]  ;;  %v3194_v63 = vsel %vm10887_vm2, %v19291_v18, %v19290_v7 }
 0x5a0   :  { %6292 = vst [vmem:[%s18139_s3 + $0x120] sm:$0xff] %v5673_v3  ;;  %6293 = vst.msk [vmem:[%s18139_s3 + $0x128] sm:$0xff] %vm6256_vm6, %v5674_v16  ;;  %v5041_v26 = vsel %vm10901_vm4, %v3841_v50, %v3176_v41  ;;  %v5042_v15 = vsel %vm10905_vm5, %v3841_v50, %v3177_v23  ;;  %4096 = vperm.xlu1 %6890, %v7283_v44   ;;  %v5047_v57 = vsel %vm10901_vm4, %v3853_v32, %v3182_v47  ;;  %v7289_v23 = vld [vmem:[%s18136_s0 + $0x2b8] sm:$0xff] }
 0x5a1   :  { %v5671_v29 = vadd.f32 %v10909_v38, %v5041_v26  ;;  %v5672_v53 = vadd.f32 %v10911_v5, %v5042_v15  ;;  %v5048_v33 = vsel %vm10905_vm5, %v3853_v32, %v3183_v35  ;;  %4108 = vperm.xlu0 %6891, %v7284_v0   ;;  %v5677_v24 = vadd.f32 %v10909_v38, %v5047_v57  ;;  %v7290_v15 = vld [vmem:[%s18136_s0 + $0x2d0] sm:$0xff] }
 0x5a2   :  { %v5678_v9 = vadd.f32 %v10911_v5, %v5048_v33  ;;  %v3188_v40 = vsel %vm10887_vm2, %v19289_v51, %v9459_v54  ;;  %v3189_v37 = vsel %vm10891_vm3, %v19289_v51, %v9459_v54  ;;  %v3195_v54 = vsel %vm10891_vm3, %v19291_v18, %v19290_v7 }
 0x5a3   :  { %6290 = vst [vmem:[%s18139_s3 + $0x110] sm:$0xff] %v5671_v29  ;;  %6291 = vst.msk [vmem:[%s18139_s3 + $0x118] sm:$0xff] %vm6256_vm6, %v5672_v53  ;;  %v3849_v4 = vpop.permute.xlu1 %3848  ;;  %v3861_v27 = vpop.permute.xlu0 %3860  ;;  %v19292_v29 = vld [vmem:[#allocation293_spill] sm:$0xff] }
 0x5a4   :  { %6296 = vst [vmem:[%s18139_s3 + $0x140] sm:$0xff] %v5677_v24  ;;  %6297 = vst.msk [vmem:[%s18139_s3 + $0x148] sm:$0xff] %vm6256_vm6, %v5678_v9  ;;  %v5045_v10 = vsel %vm10901_vm4, %v3849_v4, %v3180_v12  ;;  %v5046_v8 = vsel %vm10905_vm5, %v3849_v4, %v3181_v49  ;;  %4104 = vperm.xlu1 %6890, %v7285_v48   ;;  %v5051_v34 = vsel %vm10901_vm4, %v3861_v27, %v3186_v1  ;;  %v19293_v53 = vld [vmem:[#allocation9_spill] sm:$0xff]  ;;  %v19294_v24 = vld [vmem:[#allocation296_spill] sm:$0xff] }
 0x5a5   :  { %v5675_v21 = vadd.f32 %v10909_v38, %v5045_v10  ;;  %v5676_v58 = vadd.f32 %v10911_v5, %v5046_v8  ;;  %v5052_v46 = vsel %vm10905_vm5, %v3861_v27, %v3187_v39  ;;  %4116 = vperm.xlu0 %6891, %v7286_v36   ;;  %v5681_v45 = vadd.f32 %v10909_v38, %v5051_v34  ;;  %v19295_v9 = vld [vmem:[#allocation13_spill] sm:$0xff]  ;;  %v19296_v36 = vld [vmem:[#allocation295_spill] sm:$0xff] }
 0x5a6   :  { %v5682_v11 = vadd.f32 %v10911_v5, %v5052_v46  ;;  %v3192_v57 = vsel %vm10887_vm2, %v19293_v53, %v19292_v29  ;;  %v3193_v33 = vsel %vm10891_vm3, %v19293_v53, %v19292_v29  ;;  %v3198_v12 = vsel %vm10887_vm2, %v19295_v9, %v19294_v24  ;;  %v7291_v10 = vld [vmem:[%s18136_s0 + $0x2c8] sm:$0xff] }
 0x5a7   :  { %6294 = vst [vmem:[%s18139_s3 + $0x130] sm:$0xff] %v5675_v21  ;;  %6295 = vst.msk [vmem:[%s18139_s3 + $0x138] sm:$0xff] %vm6256_vm6, %v5676_v58  ;;  %v3857_v19 = vpop.permute.xlu1 %3856  ;;  %v3869_v20 = vpop.permute.xlu0 %3868  ;;  %v3199_v49 = vsel %vm10891_vm3, %v19295_v9, %v19294_v24  ;;  %v7292_v58 = vld [vmem:[%s18136_s0 + $0x2e0] sm:$0xff] }
 0x5a8   :  { %6300 = vst [vmem:[%s18139_s3 + $0x160] sm:$0xff] %v5681_v45  ;;  %6301 = vst.msk [vmem:[%s18139_s3 + $0x168] sm:$0xff] %vm6256_vm6, %v5682_v11  ;;  %v5049_v62 = vsel %vm10901_vm4, %v3857_v19, %v3184_v17  ;;  %v5050_v6 = vsel %vm10905_vm5, %v3857_v19, %v3185_v56  ;;  %4112 = vperm.xlu1 %6890, %v7287_v52   ;;  %v5055_v61 = vsel %vm10901_vm4, %v3869_v20, %v3190_v2  ;;  %v19297_v45 = vld [vmem:[#allocation10_spill] sm:$0xff]  ;;  %v19299_v2 = vld [vmem:[#allocation15_spill] sm:$0xff] }
 0x5a9   :  { %v5679_v13 = vadd.f32 %v10909_v38, %v5049_v62  ;;  %v5680_v28 = vadd.f32 %v10911_v5, %v5050_v6  ;;  %v5056_v25 = vsel %vm10905_vm5, %v3869_v20, %v3191_v43  ;;  %4124 = vperm.xlu0 %6891, %v7288_v31   ;;  %v5685_v42 = vadd.f32 %v10909_v38, %v5055_v61  ;;  %v19298_v19 = vld [vmem:[#allocation298_spill] sm:$0xff] }
 0x5aa   :  { %v5686_v59 = vadd.f32 %v10911_v5, %v5056_v25  ;;  %v3196_v11 = vsel %vm10887_vm2, %v19297_v45, %v19296_v36  ;;  %v3197_v17 = vsel %vm10891_vm3, %v19297_v45, %v19296_v36  ;;  %v3202_v43 = vsel %vm10887_vm2, %v19299_v2, %v19298_v19 }
 0x5ab   :  { %6298 = vst [vmem:[%s18139_s3 + $0x150] sm:$0xff] %v5679_v13  ;;  %6299 = vst.msk [vmem:[%s18139_s3 + $0x158] sm:$0xff] %vm6256_vm6, %v5680_v28  ;;  %v3865_v60 = vpop.permute.xlu1 %3864  ;;  %v3877_v41 = vpop.permute.xlu0 %3876  ;;  %v3203_v62 = vsel %vm10891_vm3, %v19299_v2, %v19298_v19  ;;  %v7293_v13 = vld [vmem:[%s18136_s0 + $0x2d8] sm:$0xff] }
 0x5ac   :  { %6304 = vst [vmem:[%s18139_s3 + $0x180] sm:$0xff] %v5685_v42  ;;  %6305 = vst.msk [vmem:[%s18139_s3 + $0x188] sm:$0xff] %vm6256_vm6, %v5686_v59  ;;  %v5053_v3 = vsel %vm10901_vm4, %v3865_v60, %v3188_v40  ;;  %v5054_v16 = vsel %vm10905_vm5, %v3865_v60, %v3189_v37  ;;  %4120 = vperm.xlu1 %6890, %v7289_v23   ;;  %v5059_v35 = vsel %vm10901_vm4, %v3877_v41, %v3194_v63  ;;  %v7294_v42 = vld [vmem:[%s18136_s0 + $0x2f0] sm:$0xff]  ;;  %v19301_v37 = vld [vmem:[#allocation12_spill] sm:$0xff] }
 0x5ad   :  { %v5683_v50 = vadd.f32 %v10909_v38, %v5053_v3  ;;  %v5684_v47 = vadd.f32 %v10911_v5, %v5054_v16  ;;  %v5060_v26 = vsel %vm10905_vm5, %v3877_v41, %v3195_v54  ;;  %4132 = vperm.xlu0 %6891, %v7290_v15   ;;  %v5689_v32 = vadd.f32 %v10909_v38, %v5059_v35  ;;  %v19300_v40 = vld [vmem:[#allocation297_spill] sm:$0xff]  ;;  %v19302_v63 = vld [vmem:[#allocation300_spill] sm:$0xff] }
 0x5ae   :  { %v5690_v44 = vadd.f32 %v10911_v5, %v5060_v26  ;;  %v3200_v60 = vsel %vm10887_vm2, %v19301_v37, %v19300_v40  ;;  %v3201_v7 = vsel %vm10891_vm3, %v19301_v37, %v19300_v40  ;;  %v19303_v54 = vld [vmem:[#allocation17_spill] sm:$0xff] }
 0x5af   :  { %6302 = vst [vmem:[%s18139_s3 + $0x170] sm:$0xff] %v5683_v50  ;;  %6303 = vst.msk [vmem:[%s18139_s3 + $0x178] sm:$0xff] %vm6256_vm6, %v5684_v47  ;;  %v3873_v0 = vpop.permute.xlu1 %3872  ;;  %v3885_v39 = vpop.permute.xlu0 %3884  ;;  %v3206_v3 = vsel %vm10887_vm2, %v19303_v54, %v19302_v63  ;;  %v3207_v16 = vsel %vm10891_vm3, %v19303_v54, %v19302_v63  ;;  %v7295_v47 = vld [vmem:[%s18136_s0 + $0x2e8] sm:$0xff] }
 0x5b0   :  { %6308 = vst [vmem:[%s18139_s3 + $0x1a0] sm:$0xff] %v5689_v32  ;;  %6309 = vst.msk [vmem:[%s18139_s3 + $0x1a8] sm:$0xff] %vm6256_vm6, %v5690_v44  ;;  %v5057_v4 = vsel %vm10901_vm4, %v3873_v0, %v3192_v57  ;;  %v5058_v1 = vsel %vm10905_vm5, %v3873_v0, %v3193_v33  ;;  %4128 = vperm.xlu1 %6890, %v7291_v10   ;;  %v5063_v48 = vsel %vm10901_vm4, %v3885_v39, %v3198_v12  ;;  %v7296_v44 = vld [vmem:[%s18136_s0 + $0x300] sm:$0xff]  ;;  %v19305_v33 = vld [vmem:[#allocation14_spill] sm:$0xff] }
 0x5b1   :  { %v5687_v8 = vadd.f32 %v10909_v38, %v5057_v4  ;;  %v5688_v27 = vadd.f32 %v10911_v5, %v5058_v1  ;;  %v5064_v21 = vsel %vm10905_vm5, %v3885_v39, %v3199_v49  ;;  %4140 = vperm.xlu0 %6891, %v7292_v58   ;;  %v5693_v34 = vadd.f32 %v10909_v38, %v5063_v48  ;;  %v19304_v57 = vld [vmem:[#allocation299_spill] sm:$0xff]  ;;  %v19306_v12 = vld [vmem:[#allocation302_spill] sm:$0xff] }
 0x5b2   :  { %v5694_v46 = vadd.f32 %v10911_v5, %v5064_v21  ;;  %v3204_v0 = vsel %vm10887_vm2, %v19305_v33, %v19304_v57  ;;  %v3205_v24 = vsel %vm10891_vm3, %v19305_v33, %v19304_v57  ;;  %v19307_v49 = vld [vmem:[#allocation19_spill] sm:$0xff] }
 0x5b3   :  { %6306 = vst [vmem:[%s18139_s3 + $0x190] sm:$0xff] %v5687_v8  ;;  %6307 = vst.msk [vmem:[%s18139_s3 + $0x198] sm:$0xff] %vm6256_vm6, %v5688_v27  ;;  %v3881_v56 = vpop.permute.xlu1 %3880  ;;  %v3893_v52 = vpop.permute.xlu0 %3892  ;;  %v3210_v4 = vsel %vm10887_vm2, %v19307_v49, %v19306_v12  ;;  %v3211_v1 = vsel %vm10891_vm3, %v19307_v49, %v19306_v12  ;;  %v7297_v27 = vld [vmem:[%s18136_s0 + $0x2f8] sm:$0xff] }
 0x5b4   :  { %6312 = vst [vmem:[%s18139_s3 + $0x1c0] sm:$0xff] %v5693_v34  ;;  %6313 = vst.msk [vmem:[%s18139_s3 + $0x1c8] sm:$0xff] %vm6256_vm6, %v5694_v46  ;;  %v5061_v6 = vsel %vm10901_vm4, %v3881_v56, %v3196_v11  ;;  %v5062_v20 = vsel %vm10905_vm5, %v3881_v56, %v3197_v17  ;;  %4136 = vperm.xlu1 %6890, %v7293_v13   ;;  %v5067_v25 = vsel %vm10901_vm4, %v3893_v52, %v3202_v43  ;;  %v7298_v46 = vld [vmem:[%s18136_s0 + $0x310] sm:$0xff]  ;;  %v19309_v17 = vld [vmem:[#allocation16_spill] sm:$0xff] }
 0x5b5   :  { %v5691_v28 = vadd.f32 %v10909_v38, %v5061_v6  ;;  %v5692_v61 = vadd.f32 %v10911_v5, %v5062_v20  ;;  %v5068_v31 = vsel %vm10905_vm5, %v3893_v52, %v3203_v62  ;;  %4148 = vperm.xlu0 %6891, %v7294_v42   ;;  %v5697_v59 = vadd.f32 %v10909_v38, %v5067_v25  ;;  %v19308_v11 = vld [vmem:[#allocation301_spill] sm:$0xff]  ;;  %v19310_v43 = vld [vmem:[#allocation304_spill] sm:$0xff] }
 0x5b6   :  { %v5698_v51 = vadd.f32 %v10911_v5, %v5068_v31  ;;  %v3208_v56 = vsel %vm10887_vm2, %v19309_v17, %v19308_v11  ;;  %v3209_v19 = vsel %vm10891_vm3, %v19309_v17, %v19308_v11  ;;  %v19311_v62 = vld [vmem:[#allocation21_spill] sm:$0xff] }
 0x5b7   :  { %6310 = vst [vmem:[%s18139_s3 + $0x1b0] sm:$0xff] %v5691_v28  ;;  %6311 = vst.msk [vmem:[%s18139_s3 + $0x1b8] sm:$0xff] %vm6256_vm6, %v5692_v61  ;;  %v3889_v18 = vpop.permute.xlu1 %3888  ;;  %v3901_v50 = vpop.permute.xlu0 %3900  ;;  %v3214_v6 = vsel %vm10887_vm2, %v19311_v62, %v19310_v43  ;;  %v3215_v20 = vsel %vm10891_vm3, %v19311_v62, %v19310_v43  ;;  %v7299_v61 = vld [vmem:[%s18136_s0 + $0x308] sm:$0xff] }
 0x5b8   :  { %6316 = vst [vmem:[%s18139_s3 + $0x1e0] sm:$0xff] %v5697_v59  ;;  %6317 = vst.msk [vmem:[%s18139_s3 + $0x1e8] sm:$0xff] %vm6256_vm6, %v5698_v51  ;;  %v5065_v41 = vsel %vm10901_vm4, %v3889_v18, %v3200_v60  ;;  %v5066_v23 = vsel %vm10905_vm5, %v3889_v18, %v3201_v7  ;;  %4144 = vperm.xlu1 %6890, %v7295_v47   ;;  %v5071_v15 = vsel %vm10901_vm4, %v3901_v50, %v3206_v3  ;;  %v7300_v51 = vld [vmem:[%s18136_s0 + $0x320] sm:$0xff]  ;;  %v19313_v7 = vld [vmem:[#allocation18_spill] sm:$0xff] }
 0x5b9   :  { %v5695_v35 = vadd.f32 %v10909_v38, %v5065_v41  ;;  %v5696_v26 = vadd.f32 %v10911_v5, %v5066_v23  ;;  %v5072_v32 = vsel %vm10905_vm5, %v3901_v50, %v3207_v16  ;;  %4156 = vperm.xlu0 %6891, %v7296_v44   ;;  %v5701_v29 = vadd.f32 %v10909_v38, %v5071_v15  ;;  %v19312_v60 = vld [vmem:[#allocation303_spill] sm:$0xff]  ;;  %v19314_v3 = vld [vmem:[#allocation306_spill] sm:$0xff] }
 0x5ba   :  { %v5702_v53 = vadd.f32 %v10911_v5, %v5072_v32  ;;  %v3212_v18 = vsel %vm10887_vm2, %v19313_v7, %v19312_v60  ;;  %v3213_v63 = vsel %vm10891_vm3, %v19313_v7, %v19312_v60  ;;  %v19315_v16 = vld [vmem:[#allocation23_spill] sm:$0xff] }
 0x5bb   :  { %6314 = vst [vmem:[%s18139_s3 + $0x1d0] sm:$0xff] %v5695_v35  ;;  %6315 = vst.msk [vmem:[%s18139_s3 + $0x1d8] sm:$0xff] %vm6256_vm6, %v5696_v26  ;;  %v3897_v9 = vpop.permute.xlu1 %3896  ;;  %v3909_v8 = vpop.permute.xlu0 %3908  ;;  %v3218_v41 = vsel %vm10887_vm2, %v19315_v16, %v19314_v3  ;;  %v3219_v23 = vsel %vm10891_vm3, %v19315_v16, %v19314_v3  ;;  %v7301_v26 = vld [vmem:[%s18136_s0 + $0x318] sm:$0xff] }
 0x5bc   :  { %6320 = vst [vmem:[%s18139_s3 + $0x200] sm:$0xff] %v5701_v29  ;;  %6321 = vst.msk [vmem:[%s18139_s3 + $0x208] sm:$0xff] %vm6256_vm6, %v5702_v53  ;;  %v5069_v39 = vsel %vm10901_vm4, %v3897_v9, %v3204_v0  ;;  %v5070_v10 = vsel %vm10905_vm5, %v3897_v9, %v3205_v24  ;;  %4152 = vperm.xlu1 %6890, %v7297_v27   ;;  %v5075_v58 = vsel %vm10901_vm4, %v3909_v8, %v3210_v4  ;;  %v7302_v53 = vld [vmem:[%s18136_s0 + $0x330] sm:$0xff]  ;;  %v19317_v24 = vld [vmem:[#allocation20_spill] sm:$0xff] }
 0x5bd   :  { %v5699_v48 = vadd.f32 %v10909_v38, %v5069_v39  ;;  %v5700_v21 = vadd.f32 %v10911_v5, %v5070_v10  ;;  %v5076_v34 = vsel %vm10905_vm5, %v3909_v8, %v3211_v1  ;;  %4164 = vperm.xlu0 %6891, %v7298_v46   ;;  %v5705_v36 = vadd.f32 %v10909_v38, %v5075_v58  ;;  %v19316_v0 = vld [vmem:[#allocation305_spill] sm:$0xff]  ;;  %v19318_v4 = vld [vmem:[#allocation308_spill] sm:$0xff] }
 0x5be   :  { %v5706_v45 = vadd.f32 %v10911_v5, %v5076_v34  ;;  %v3216_v9 = vsel %vm10887_vm2, %v19317_v24, %v19316_v0  ;;  %v3217_v12 = vsel %vm10891_vm3, %v19317_v24, %v19316_v0  ;;  %v19319_v1 = vld [vmem:[#allocation25_spill] sm:$0xff] }
 0x5bf   :  { %6318 = vst [vmem:[%s18139_s3 + $0x1f0] sm:$0xff] %v5699_v48  ;;  %6319 = vst.msk [vmem:[%s18139_s3 + $0x1f8] sm:$0xff] %vm6256_vm6, %v5700_v21  ;;  %v3905_v2 = vpop.permute.xlu1 %3904  ;;  %v3917_v28 = vpop.permute.xlu0 %3916  ;;  %v3222_v39 = vsel %vm10887_vm2, %v19319_v1, %v19318_v4  ;;  %v3223_v10 = vsel %vm10891_vm3, %v19319_v1, %v19318_v4  ;;  %v7303_v21 = vld [vmem:[%s18136_s0 + $0x328] sm:$0xff] }
 0x5c0   :  { %6324 = vst [vmem:[%s18139_s3 + $0x220] sm:$0xff] %v5705_v36  ;;  %6325 = vst.msk [vmem:[%s18139_s3 + $0x228] sm:$0xff] %vm6256_vm6, %v5706_v45  ;;  %v5073_v52 = vsel %vm10901_vm4, %v3905_v2, %v3208_v56  ;;  %v5074_v13 = vsel %vm10905_vm5, %v3905_v2, %v3209_v19  ;;  %4160 = vperm.xlu1 %6890, %v7299_v61   ;;  %v5079_v42 = vsel %vm10901_vm4, %v3917_v28, %v3214_v6  ;;  %v7304_v45 = vld [vmem:[%s18136_s0 + $0x340] sm:$0xff]  ;;  %v19321_v19 = vld [vmem:[#allocation22_spill] sm:$0xff] }
 0x5c1   :  { %v5703_v25 = vadd.f32 %v10909_v38, %v5073_v52  ;;  %v5704_v31 = vadd.f32 %v10911_v5, %v5074_v13  ;;  %v5080_v59 = vsel %vm10905_vm5, %v3917_v28, %v3215_v20  ;;  %4172 = vperm.xlu0 %6891, %v7300_v51   ;;  %v5709_v40 = vadd.f32 %v10909_v38, %v5079_v42  ;;  %v19320_v56 = vld [vmem:[#allocation307_spill] sm:$0xff]  ;;  %v19322_v6 = vld [vmem:[#allocation310_spill] sm:$0xff] }
 0x5c2   :  { %v5710_v37 = vadd.f32 %v10911_v5, %v5080_v59  ;;  %v3220_v2 = vsel %vm10887_vm2, %v19321_v19, %v19320_v56  ;;  %v3221_v43 = vsel %vm10891_vm3, %v19321_v19, %v19320_v56  ;;  %v19323_v20 = vld [vmem:[#allocation27_spill] sm:$0xff] }
 0x5c3   :  { %6322 = vst [vmem:[%s18139_s3 + $0x210] sm:$0xff] %v5703_v25  ;;  %6323 = vst.msk [vmem:[%s18139_s3 + $0x218] sm:$0xff] %vm6256_vm6, %v5704_v31  ;;  %v3913_v54 = vpop.permute.xlu1 %3912  ;;  %v3925_v35 = vpop.permute.xlu0 %3924  ;;  %v3226_v52 = vsel %vm10887_vm2, %v19323_v20, %v19322_v6  ;;  %v3227_v13 = vsel %vm10891_vm3, %v19323_v20, %v19322_v6  ;;  %v7305_v31 = vld [vmem:[%s18136_s0 + $0x338] sm:$0xff] }
 0x5c4   :  { %6328 = vst [vmem:[%s18139_s3 + $0x240] sm:$0xff] %v5709_v40  ;;  %6329 = vst.msk [vmem:[%s18139_s3 + $0x248] sm:$0xff] %vm6256_vm6, %v5710_v37  ;;  %v5077_v50 = vsel %vm10901_vm4, %v3913_v54, %v3212_v18  ;;  %v5078_v47 = vsel %vm10905_vm5, %v3913_v54, %v3213_v63  ;;  %4168 = vperm.xlu1 %6890, %v7301_v26   ;;  %v5083_v44 = vsel %vm10901_vm4, %v3925_v35, %v3218_v41  ;;  %v7306_v37 = vld [vmem:[%s18136_s0 + $0x350] sm:$0xff]  ;;  %v19325_v63 = vld [vmem:[#allocation24_spill] sm:$0xff] }
 0x5c5   :  { %v5707_v15 = vadd.f32 %v10909_v38, %v5077_v50  ;;  %v5708_v32 = vadd.f32 %v10911_v5, %v5078_v47  ;;  %v5084_v29 = vsel %vm10905_vm5, %v3925_v35, %v3219_v23  ;;  %4180 = vperm.xlu0 %6891, %v7302_v53   ;;  %v5713_v57 = vadd.f32 %v10909_v38, %v5083_v44  ;;  %v19324_v18 = vld [vmem:[#allocation309_spill] sm:$0xff]  ;;  %v19326_v41 = vld [vmem:[#allocation312_spill] sm:$0xff] }
 0x5c6   :  { %v5714_v33 = vadd.f32 %v10911_v5, %v5084_v29  ;;  %v3224_v54 = vsel %vm10887_vm2, %v19325_v63, %v19324_v18  ;;  %v3225_v3 = vsel %vm10891_vm3, %v19325_v63, %v19324_v18  ;;  %v19327_v23 = vld [vmem:[#allocation29_spill] sm:$0xff] }
 0x5c7   :  { %6326 = vst [vmem:[%s18139_s3 + $0x230] sm:$0xff] %v5707_v15  ;;  %6327 = vst.msk [vmem:[%s18139_s3 + $0x238] sm:$0xff] %vm6256_vm6, %v5708_v32  ;;  %v3921_v49 = vpop.permute.xlu1 %3920  ;;  %v3933_v48 = vpop.permute.xlu0 %3932  ;;  %v3230_v50 = vsel %vm10887_vm2, %v19327_v23, %v19326_v41  ;;  %v3231_v47 = vsel %vm10891_vm3, %v19327_v23, %v19326_v41  ;;  %v7307_v32 = vld [vmem:[%s18136_s0 + $0x348] sm:$0xff] }
 0x5c8   :  { %6332 = vst [vmem:[%s18139_s3 + $0x260] sm:$0xff] %v5713_v57  ;;  %6333 = vst.msk [vmem:[%s18139_s3 + $0x268] sm:$0xff] %vm6256_vm6, %v5714_v33  ;;  %v5081_v8 = vsel %vm10901_vm4, %v3921_v49, %v3216_v9  ;;  %v5082_v27 = vsel %vm10905_vm5, %v3921_v49, %v3217_v12  ;;  %4176 = vperm.xlu1 %6890, %v7303_v21   ;;  %v5087_v46 = vsel %vm10901_vm4, %v3933_v48, %v3222_v39  ;;  %v7308_v33 = vld [vmem:[%s18136_s0 + $0x360] sm:$0xff]  ;;  %v19329_v12 = vld [vmem:[#allocation26_spill] sm:$0xff] }
 0x5c9   :  { %v5711_v58 = vadd.f32 %v10909_v38, %v5081_v8  ;;  %v5712_v34 = vadd.f32 %v10911_v5, %v5082_v27  ;;  %v5088_v36 = vsel %vm10905_vm5, %v3933_v48, %v3223_v10  ;;  %4188 = vperm.xlu0 %6891, %v7304_v45   ;;  %v5717_v11 = vadd.f32 %v10909_v38, %v5087_v46  ;;  %v19328_v9 = vld [vmem:[#allocation311_spill] sm:$0xff]  ;;  %v19330_v39 = vld [vmem:[#allocation314_spill] sm:$0xff] }
 0x5ca   :  { %v5718_v17 = vadd.f32 %v10911_v5, %v5088_v36  ;;  %v3228_v49 = vsel %vm10887_vm2, %v19329_v12, %v19328_v9  ;;  %v3229_v4 = vsel %vm10891_vm3, %v19329_v12, %v19328_v9  ;;  %v19331_v10 = vld [vmem:[#allocation31_spill] sm:$0xff] }
 0x5cb   :  { %6330 = vst [vmem:[%s18139_s3 + $0x250] sm:$0xff] %v5711_v58  ;;  %6331 = vst.msk [vmem:[%s18139_s3 + $0x258] sm:$0xff] %vm6256_vm6, %v5712_v34  ;;  %v3929_v62 = vpop.permute.xlu1 %3928  ;;  %v3941_v25 = vpop.permute.xlu0 %3940  ;;  %v3234_v8 = vsel %vm10887_vm2, %v19331_v10, %v19330_v39  ;;  %v3235_v27 = vsel %vm10891_vm3, %v19331_v10, %v19330_v39  ;;  %v7309_v34 = vld [vmem:[%s18136_s0 + $0x358] sm:$0xff] }
 0x5cc   :  { %6336 = vst [vmem:[%s18139_s3 + $0x280] sm:$0xff] %v5717_v11  ;;  %6337 = vst.msk [vmem:[%s18139_s3 + $0x288] sm:$0xff] %vm6256_vm6, %v5718_v17  ;;  %v5085_v28 = vsel %vm10901_vm4, %v3929_v62, %v3220_v2  ;;  %v5086_v61 = vsel %vm10905_vm5, %v3929_v62, %v3221_v43  ;;  %4184 = vperm.xlu1 %6890, %v7305_v31   ;;  %v5091_v51 = vsel %vm10901_vm4, %v3941_v25, %v3226_v52  ;;  %v7310_v17 = vld [vmem:[%s18136_s0 + $0x370] sm:$0xff]  ;;  %v19333_v43 = vld [vmem:[#allocation28_spill] sm:$0xff] }
 0x5cd   :  { %v5715_v42 = vadd.f32 %v10909_v38, %v5085_v28  ;;  %v5716_v59 = vadd.f32 %v10911_v5, %v5086_v61  ;;  %v5092_v40 = vsel %vm10905_vm5, %v3941_v25, %v3227_v13  ;;  %4196 = vperm.xlu0 %6891, %v7306_v37   ;;  %v5721_v60 = vadd.f32 %v10909_v38, %v5091_v51  ;;  %v19332_v2 = vld [vmem:[#allocation313_spill] sm:$0xff]  ;;  %v19334_v52 = vld [vmem:[#allocation316_spill] sm:$0xff] }
 0x5ce   :  { %v5722_v7 = vadd.f32 %v10911_v5, %v5092_v40  ;;  %v3232_v62 = vsel %vm10887_vm2, %v19333_v43, %v19332_v2  ;;  %v3233_v6 = vsel %vm10891_vm3, %v19333_v43, %v19332_v2  ;;  %v19335_v13 = vld [vmem:[#allocation33_spill] sm:$0xff] }
 0x5cf   :  { %6334 = vst [vmem:[%s18139_s3 + $0x270] sm:$0xff] %v5715_v42  ;;  %6335 = vst.msk [vmem:[%s18139_s3 + $0x278] sm:$0xff] %vm6256_vm6, %v5716_v59  ;;  %v3937_v16 = vpop.permute.xlu1 %3936  ;;  %v3949_v15 = vpop.permute.xlu0 %3948  ;;  %v3238_v28 = vsel %vm10887_vm2, %v19335_v13, %v19334_v52  ;;  %v3239_v61 = vsel %vm10891_vm3, %v19335_v13, %v19334_v52  ;;  %v7311_v59 = vld [vmem:[%s18136_s0 + $0x368] sm:$0xff] }
 0x5d0   :  { %6340 = vst [vmem:[%s18139_s3 + $0x2a0] sm:$0xff] %v5721_v60  ;;  %6341 = vst.msk [vmem:[%s18139_s3 + $0x2a8] sm:$0xff] %vm6256_vm6, %v5722_v7  ;;  %v5089_v35 = vsel %vm10901_vm4, %v3937_v16, %v3224_v54  ;;  %v5090_v26 = vsel %vm10905_vm5, %v3937_v16, %v3225_v3  ;;  %4192 = vperm.xlu1 %6890, %v7307_v32   ;;  %v5095_v53 = vsel %vm10901_vm4, %v3949_v15, %v3230_v50  ;;  %v7312_v7 = vld [vmem:[%s18136_s0 + $0x380] sm:$0xff]  ;;  %v19337_v3 = vld [vmem:[#allocation30_spill] sm:$0xff] }
 0x5d1   :  { %v5719_v44 = vadd.f32 %v10909_v38, %v5089_v35  ;;  %v5720_v29 = vadd.f32 %v10911_v5, %v5090_v26  ;;  %v5096_v57 = vsel %vm10905_vm5, %v3949_v15, %v3231_v47  ;;  %4204 = vperm.xlu0 %6891, %v7308_v33   ;;  %v5725_v0 = vadd.f32 %v10909_v38, %v5095_v53  ;;  %v19336_v54 = vld [vmem:[#allocation315_spill] sm:$0xff]  ;;  %v19338_v50 = vld [vmem:[#allocation318_spill] sm:$0xff] }
 0x5d2   :  { %v5726_v24 = vadd.f32 %v10911_v5, %v5096_v57  ;;  %v3236_v16 = vsel %vm10887_vm2, %v19337_v3, %v19336_v54  ;;  %v3237_v41 = vsel %vm10891_vm3, %v19337_v3, %v19336_v54  ;;  %v19339_v47 = vld [vmem:[#allocation35_spill] sm:$0xff] }
 0x5d3   :  { %6338 = vst [vmem:[%s18139_s3 + $0x290] sm:$0xff] %v5719_v44  ;;  %6339 = vst.msk [vmem:[%s18139_s3 + $0x298] sm:$0xff] %vm6256_vm6, %v5720_v29  ;;  %v3945_v1 = vpop.permute.xlu1 %3944  ;;  %v3957_v58 = vpop.permute.xlu0 %3956  ;;  %v3242_v35 = vsel %vm10887_vm2, %v19339_v47, %v19338_v50  ;;  %v3243_v26 = vsel %vm10891_vm3, %v19339_v47, %v19338_v50  ;;  %v7313_v29 = vld [vmem:[%s18136_s0 + $0x378] sm:$0xff] }
 0x5d4   :  { %6344 = vst [vmem:[%s18139_s3 + $0x2c0] sm:$0xff] %v5725_v0  ;;  %6345 = vst.msk [vmem:[%s18139_s3 + $0x2c8] sm:$0xff] %vm6256_vm6, %v5726_v24  ;;  %v5093_v48 = vsel %vm10901_vm4, %v3945_v1, %v3228_v49  ;;  %v5094_v21 = vsel %vm10905_vm5, %v3945_v1, %v3229_v4  ;;  %4200 = vperm.xlu1 %6890, %v7309_v34   ;;  %v5099_v45 = vsel %vm10901_vm4, %v3957_v58, %v3234_v8  ;;  %v7314_v24 = vld [vmem:[%s18136_s0 + $0x390] sm:$0xff]  ;;  %v19341_v4 = vld [vmem:[#allocation32_spill] sm:$0xff] }
 0x5d5   :  { %v5723_v46 = vadd.f32 %v10909_v38, %v5093_v48  ;;  %v5724_v36 = vadd.f32 %v10911_v5, %v5094_v21  ;;  %v5100_v11 = vsel %vm10905_vm5, %v3957_v58, %v3235_v27  ;;  %4212 = vperm.xlu0 %6891, %v7310_v17   ;;  %v5729_v56 = vadd.f32 %v10909_v38, %v5099_v45  ;;  %v19340_v49 = vld [vmem:[#allocation317_spill] sm:$0xff]  ;;  %v19342_v8 = vld [vmem:[#allocation320_spill] sm:$0xff] }
 0x5d6   :  { %v5730_v19 = vadd.f32 %v10911_v5, %v5100_v11  ;;  %v3240_v1 = vsel %vm10887_vm2, %v19341_v4, %v19340_v49  ;;  %v3241_v39 = vsel %vm10891_vm3, %v19341_v4, %v19340_v49  ;;  %v19343_v27 = vld [vmem:[#allocation37_spill] sm:$0xff] }
 0x5d7   :  { %6342 = vst [vmem:[%s18139_s3 + $0x2b0] sm:$0xff] %v5723_v46  ;;  %6343 = vst.msk [vmem:[%s18139_s3 + $0x2b8] sm:$0xff] %vm6256_vm6, %v5724_v36  ;;  %v3953_v20 = vpop.permute.xlu1 %3952  ;;  %v3965_v42 = vpop.permute.xlu0 %3964  ;;  %v3246_v48 = vsel %vm10887_vm2, %v19343_v27, %v19342_v8  ;;  %v3247_v21 = vsel %vm10891_vm3, %v19343_v27, %v19342_v8  ;;  %v7315_v36 = vld [vmem:[%s18136_s0 + $0x388] sm:$0xff] }
 0x5d8   :  { %6348 = vst [vmem:[%s18139_s3 + $0x2e0] sm:$0xff] %v5729_v56  ;;  %6349 = vst.msk [vmem:[%s18139_s3 + $0x2e8] sm:$0xff] %vm6256_vm6, %v5730_v19  ;;  %v5097_v25 = vsel %vm10901_vm4, %v3953_v20, %v3232_v62  ;;  %v5098_v31 = vsel %vm10905_vm5, %v3953_v20, %v3233_v6  ;;  %4208 = vperm.xlu1 %6890, %v7311_v59   ;;  %v5103_v37 = vsel %vm10901_vm4, %v3965_v42, %v3238_v28  ;;  %v7316_v19 = vld [vmem:[%s18136_s0 + $0x3a0] sm:$0xff]  ;;  %v19345_v6 = vld [vmem:[#allocation34_spill] sm:$0xff] }
 0x5d9   :  { %v5727_v51 = vadd.f32 %v10909_v38, %v5097_v25  ;;  %v5728_v40 = vadd.f32 %v10911_v5, %v5098_v31  ;;  %v5104_v60 = vsel %vm10905_vm5, %v3965_v42, %v3239_v61  ;;  %4220 = vperm.xlu0 %6891, %v7312_v7   ;;  %v5733_v18 = vadd.f32 %v10909_v38, %v5103_v37  ;;  %v19344_v62 = vld [vmem:[#allocation319_spill] sm:$0xff]  ;;  %v19346_v28 = vld [vmem:[#allocation322_spill] sm:$0xff] }
 0x5da   :  { %v5734_v63 = vadd.f32 %v10911_v5, %v5104_v60  ;;  %v3244_v20 = vsel %vm10887_vm2, %v19345_v6, %v19344_v62  ;;  %v3245_v52 = vsel %vm10891_vm3, %v19345_v6, %v19344_v62  ;;  %v19347_v61 = vld [vmem:[#allocation39_spill] sm:$0xff] }
 0x5db   :  { %6346 = vst [vmem:[%s18139_s3 + $0x2d0] sm:$0xff] %v5727_v51  ;;  %6347 = vst.msk [vmem:[%s18139_s3 + $0x2d8] sm:$0xff] %vm6256_vm6, %v5728_v40  ;;  %v3961_v23 = vpop.permute.xlu1 %3960  ;;  %v3973_v44 = vpop.permute.xlu0 %3972  ;;  %v3250_v25 = vsel %vm10887_vm2, %v19347_v61, %v19346_v28  ;;  %v3251_v31 = vsel %vm10891_vm3, %v19347_v61, %v19346_v28  ;;  %v7317_v40 = vld [vmem:[%s18136_s0 + $0x398] sm:$0xff] }
 0x5dc   :  { %6352 = vst [vmem:[%s18139_s3 + $0x300] sm:$0xff] %v5733_v18  ;;  %6353 = vst.msk [vmem:[%s18139_s3 + $0x308] sm:$0xff] %vm6256_vm6, %v5734_v63  ;;  %v5101_v15 = vsel %vm10901_vm4, %v3961_v23, %v3236_v16  ;;  %v5102_v32 = vsel %vm10905_vm5, %v3961_v23, %v3237_v41  ;;  %4216 = vperm.xlu1 %6890, %v7313_v29   ;;  %v5107_v33 = vsel %vm10901_vm4, %v3973_v44, %v3242_v35  ;;  %v7318_v63 = vld [vmem:[%s18136_s0 + $0x3b0] sm:$0xff]  ;;  %v19349_v41 = vld [vmem:[#allocation36_spill] sm:$0xff] }
 0x5dd   :  { %v5731_v53 = vadd.f32 %v10909_v38, %v5101_v15  ;;  %v5732_v57 = vadd.f32 %v10911_v5, %v5102_v32  ;;  %v5108_v0 = vsel %vm10905_vm5, %v3973_v44, %v3243_v26  ;;  %4228 = vperm.xlu0 %6891, %v7314_v24   ;;  %v5737_v9 = vadd.f32 %v10909_v38, %v5107_v33  ;;  %v19348_v16 = vld [vmem:[#allocation321_spill] sm:$0xff]  ;;  %v19350_v35 = vld [vmem:[#allocation324_spill] sm:$0xff] }
 0x5de   :  { %v5738_v12 = vadd.f32 %v10911_v5, %v5108_v0  ;;  %v3248_v23 = vsel %vm10887_vm2, %v19349_v41, %v19348_v16  ;;  %v3249_v50 = vsel %vm10891_vm3, %v19349_v41, %v19348_v16  ;;  %v19351_v26 = vld [vmem:[#allocation41_spill] sm:$0xff] }
 0x5df   :  { %6350 = vst [vmem:[%s18139_s3 + $0x2f0] sm:$0xff] %v5731_v53  ;;  %6351 = vst.msk [vmem:[%s18139_s3 + $0x2f8] sm:$0xff] %vm6256_vm6, %v5732_v57  ;;  %v3969_v10 = vpop.permute.xlu1 %3968  ;;  %v3981_v46 = vpop.permute.xlu0 %3980  ;;  %v3254_v15 = vsel %vm10887_vm2, %v19351_v26, %v19350_v35  ;;  %v3255_v32 = vsel %vm10891_vm3, %v19351_v26, %v19350_v35  ;;  %v7319_v57 = vld [vmem:[%s18136_s0 + $0x3a8] sm:$0xff] }
 0x5e0   :  { %6356 = vst [vmem:[%s18139_s3 + $0x320] sm:$0xff] %v5737_v9  ;;  %6357 = vst.msk [vmem:[%s18139_s3 + $0x328] sm:$0xff] %vm6256_vm6, %v5738_v12  ;;  %v5105_v58 = vsel %vm10901_vm4, %v3969_v10, %v3240_v1  ;;  %v5106_v34 = vsel %vm10905_vm5, %v3969_v10, %v3241_v39  ;;  %4224 = vperm.xlu1 %6890, %v7315_v36   ;;  %v5111_v17 = vsel %vm10901_vm4, %v3981_v46, %v3246_v48  ;;  %v7320_v12 = vld [vmem:[%s18136_s0 + $0x3c0] sm:$0xff]  ;;  %v19353_v39 = vld [vmem:[#allocation38_spill] sm:$0xff] }
 0x5e1   :  { %v5735_v45 = vadd.f32 %v10909_v38, %v5105_v58  ;;  %v5736_v11 = vadd.f32 %v10911_v5, %v5106_v34  ;;  %v5112_v56 = vsel %vm10905_vm5, %v3981_v46, %v3247_v21  ;;  %4236 = vperm.xlu0 %6891, %v7316_v19   ;;  %v5741_v2 = vadd.f32 %v10909_v38, %v5111_v17  ;;  %v19352_v1 = vld [vmem:[#allocation323_spill] sm:$0xff]  ;;  %v19354_v48 = vld [vmem:[#allocation326_spill] sm:$0xff] }
 0x5e2   :  { %v5742_v43 = vadd.f32 %v10911_v5, %v5112_v56  ;;  %v3252_v10 = vsel %vm10887_vm2, %v19353_v39, %v19352_v1  ;;  %v3253_v8 = vsel %vm10891_vm3, %v19353_v39, %v19352_v1  ;;  %v19355_v21 = vld [vmem:[#allocation43_spill] sm:$0xff] }
 0x5e3   :  { %6354 = vst [vmem:[%s18139_s3 + $0x310] sm:$0xff] %v5735_v45  ;;  %6355 = vst.msk [vmem:[%s18139_s3 + $0x318] sm:$0xff] %vm6256_vm6, %v5736_v11  ;;  %v3977_v13 = vpop.permute.xlu1 %3976  ;;  %v3989_v51 = vpop.permute.xlu0 %3988  ;;  %v3258_v58 = vsel %vm10887_vm2, %v19355_v21, %v19354_v48  ;;  %v3259_v34 = vsel %vm10891_vm3, %v19355_v21, %v19354_v48  ;;  %v7321_v11 = vld [vmem:[%s18136_s0 + $0x3b8] sm:$0xff] }
 0x5e4   :  { %6360 = vst [vmem:[%s18139_s3 + $0x340] sm:$0xff] %v5741_v2  ;;  %6361 = vst.msk [vmem:[%s18139_s3 + $0x348] sm:$0xff] %vm6256_vm6, %v5742_v43  ;;  %v5109_v42 = vsel %vm10901_vm4, %v3977_v13, %v3244_v20  ;;  %v5110_v59 = vsel %vm10905_vm5, %v3977_v13, %v3245_v52  ;;  %4232 = vperm.xlu1 %6890, %v7317_v40   ;;  %v5115_v7 = vsel %vm10901_vm4, %v3989_v51, %v3250_v25  ;;  %v7322_v43 = vld [vmem:[%s18136_s0 + $0x3d0] sm:$0xff]  ;;  %v19357_v52 = vld [vmem:[#allocation40_spill] sm:$0xff] }
 0x5e5   :  { %v5739_v37 = vadd.f32 %v10909_v38, %v5109_v42  ;;  %v5740_v60 = vadd.f32 %v10911_v5, %v5110_v59  ;;  %v5116_v18 = vsel %vm10905_vm5, %v3989_v51, %v3251_v31  ;;  %4244 = vperm.xlu0 %6891, %v7318_v63   ;;  %v5745_v54 = vadd.f32 %v10909_v38, %v5115_v7  ;;  %v19356_v20 = vld [vmem:[#allocation325_spill] sm:$0xff]  ;;  %v19358_v25 = vld [vmem:[#allocation328_spill] sm:$0xff] }
 0x5e6   :  { %v5746_v3 = vadd.f32 %v10911_v5, %v5116_v18  ;;  %v3256_v13 = vsel %vm10887_vm2, %v19357_v52, %v19356_v20  ;;  %v3257_v28 = vsel %vm10891_vm3, %v19357_v52, %v19356_v20  ;;  %v19359_v31 = vld [vmem:[#allocation45_spill] sm:$0xff] }
 0x5e7   :  { %6358 = vst [vmem:[%s18139_s3 + $0x330] sm:$0xff] %v5739_v37  ;;  %6359 = vst.msk [vmem:[%s18139_s3 + $0x338] sm:$0xff] %vm6256_vm6, %v5740_v60  ;;  %v3985_v47 = vpop.permute.xlu1 %3984  ;;  %v3997_v53 = vpop.permute.xlu0 %3996  ;;  %v3262_v42 = vsel %vm10887_vm2, %v19359_v31, %v19358_v25  ;;  %v3263_v59 = vsel %vm10891_vm3, %v19359_v31, %v19358_v25  ;;  %v7323_v60 = vld [vmem:[%s18136_s0 + $0x3c8] sm:$0xff] }
 0x5e8   :  { %6364 = vst [vmem:[%s18139_s3 + $0x360] sm:$0xff] %v5745_v54  ;;  %6365 = vst.msk [vmem:[%s18139_s3 + $0x368] sm:$0xff] %vm6256_vm6, %v5746_v3  ;;  %v5113_v44 = vsel %vm10901_vm4, %v3985_v47, %v3248_v23  ;;  %v5114_v29 = vsel %vm10905_vm5, %v3985_v47, %v3249_v50  ;;  %4240 = vperm.xlu1 %6890, %v7319_v57   ;;  %v5119_v24 = vsel %vm10901_vm4, %v3997_v53, %v3254_v15  ;;  %v7324_v3 = vld [vmem:[%s18136_s0 + $0x3e0] sm:$0xff]  ;;  %v19361_v50 = vld [vmem:[#allocation42_spill] sm:$0xff] }
 0x5e9   :  { %v5743_v33 = vadd.f32 %v10909_v38, %v5113_v44  ;;  %v5744_v0 = vadd.f32 %v10911_v5, %v5114_v29  ;;  %v5120_v9 = vsel %vm10905_vm5, %v3997_v53, %v3255_v32  ;;  %4252 = vperm.xlu0 %6891, %v7320_v12   ;;  %v5749_v49 = vadd.f32 %v10909_v38, %v5119_v24  ;;  %v19360_v23 = vld [vmem:[#allocation327_spill] sm:$0xff]  ;;  %v19362_v15 = vld [vmem:[#allocation330_spill] sm:$0xff] }
 0x5ea   :  { %v5750_v4 = vadd.f32 %v10911_v5, %v5120_v9  ;;  %v3260_v47 = vsel %vm10887_vm2, %v19361_v50, %v19360_v23  ;;  %v3261_v35 = vsel %vm10891_vm3, %v19361_v50, %v19360_v23  ;;  %v19363_v32 = vld [vmem:[#allocation47_spill] sm:$0xff] }
 0x5eb   :  { %6362 = vst [vmem:[%s18139_s3 + $0x350] sm:$0xff] %v5743_v33  ;;  %6363 = vst.msk [vmem:[%s18139_s3 + $0x358] sm:$0xff] %vm6256_vm6, %v5744_v0  ;;  %v3993_v27 = vpop.permute.xlu1 %3992  ;;  %v4005_v45 = vpop.permute.xlu0 %4004  ;;  %v3266_v44 = vsel %vm10887_vm2, %v19363_v32, %v19362_v15  ;;  %v3267_v29 = vsel %vm10891_vm3, %v19363_v32, %v19362_v15  ;;  %v7325_v0 = vld [vmem:[%s18136_s0 + $0x3d8] sm:$0xff] }
 0x5ec   :  { %6368 = vst [vmem:[%s18139_s3 + $0x380] sm:$0xff] %v5749_v49  ;;  %6369 = vst.msk [vmem:[%s18139_s3 + $0x388] sm:$0xff] %vm6256_vm6, %v5750_v4  ;;  %v5117_v46 = vsel %vm10901_vm4, %v3993_v27, %v3252_v10  ;;  %v5118_v36 = vsel %vm10905_vm5, %v3993_v27, %v3253_v8  ;;  %4248 = vperm.xlu1 %6890, %v7321_v11   ;;  %v5123_v19 = vsel %vm10901_vm4, %v4005_v45, %v3258_v58  ;;  %v7326_v4 = vld [vmem:[%s18136_s0 + $0x3f0] sm:$0xff]  ;;  %v19365_v8 = vld [vmem:[#allocation44_spill] sm:$0xff] }
 0x5ed   :  { %v5747_v17 = vadd.f32 %v10909_v38, %v5117_v46  ;;  %v5748_v56 = vadd.f32 %v10911_v5, %v5118_v36  ;;  %v5124_v2 = vsel %vm10905_vm5, %v4005_v45, %v3259_v34  ;;  %4260 = vperm.xlu0 %6891, %v7322_v43   ;;  %v5753_v62 = vadd.f32 %v10909_v38, %v5123_v19  ;;  %v19364_v10 = vld [vmem:[#allocation329_spill] sm:$0xff]  ;;  %v19366_v58 = vld [vmem:[#allocation332_spill] sm:$0xff] }
 0x5ee   :  { %v5754_v6 = vadd.f32 %v10911_v5, %v5124_v2  ;;  %v3264_v27 = vsel %vm10887_vm2, %v19365_v8, %v19364_v10  ;;  %v3265_v48 = vsel %vm10891_vm3, %v19365_v8, %v19364_v10  ;;  %v19367_v34 = vld [vmem:[#allocation49_spill] sm:$0xff] }
 0x5ef   :  { %6366 = vst [vmem:[%s18139_s3 + $0x370] sm:$0xff] %v5747_v17  ;;  %6367 = vst.msk [vmem:[%s18139_s3 + $0x378] sm:$0xff] %vm6256_vm6, %v5748_v56  ;;  %v4001_v61 = vpop.permute.xlu1 %4000  ;;  %v4013_v37 = vpop.permute.xlu0 %4012  ;;  %v3270_v46 = vsel %vm10887_vm2, %v19367_v34, %v19366_v58  ;;  %v3271_v36 = vsel %vm10891_vm3, %v19367_v34, %v19366_v58  ;;  %v7327_v56 = vld [vmem:[%s18136_s0 + $0x3e8] sm:$0xff] }
 0x5f0   :  { %6372 = vst [vmem:[%s18139_s3 + $0x3a0] sm:$0xff] %v5753_v62  ;;  %6373 = vst.msk [vmem:[%s18139_s3 + $0x3a8] sm:$0xff] %vm6256_vm6, %v5754_v6  ;;  %v5121_v51 = vsel %vm10901_vm4, %v4001_v61, %v3256_v13  ;;  %v5122_v40 = vsel %vm10905_vm5, %v4001_v61, %v3257_v28  ;;  %4256 = vperm.xlu1 %6890, %v7323_v60   ;;  %v5127_v63 = vsel %vm10901_vm4, %v4013_v37, %v3262_v42  ;;  %v7328_v6 = vld [vmem:[%s18136_s0 + $0x400] sm:$0xff]  ;;  %v19369_v28 = vld [vmem:[#allocation46_spill] sm:$0xff] }
 0x5f1   :  { %v5751_v7 = vadd.f32 %v10909_v38, %v5121_v51  ;;  %v5752_v18 = vadd.f32 %v10911_v5, %v5122_v40  ;;  %v5128_v54 = vsel %vm10905_vm5, %v4013_v37, %v3263_v59  ;;  %4268 = vperm.xlu0 %6891, %v7324_v3   ;;  %v5757_v16 = vadd.f32 %v10909_v38, %v5127_v63  ;;  %v19368_v13 = vld [vmem:[#allocation331_spill] sm:$0xff]  ;;  %v19370_v42 = vld [vmem:[#allocation334_spill] sm:$0xff] }
 0x5f2   :  { %v5758_v41 = vadd.f32 %v10911_v5, %v5128_v54  ;;  %v3268_v61 = vsel %vm10887_vm2, %v19369_v28, %v19368_v13  ;;  %v3269_v25 = vsel %vm10891_vm3, %v19369_v28, %v19368_v13  ;;  %v19371_v59 = vld [vmem:[#allocation51_spill] sm:$0xff] }
 0x5f3   :  { %6370 = vst [vmem:[%s18139_s3 + $0x390] sm:$0xff] %v5751_v7  ;;  %6371 = vst.msk [vmem:[%s18139_s3 + $0x398] sm:$0xff] %vm6256_vm6, %v5752_v18  ;;  %v4009_v26 = vpop.permute.xlu1 %4008  ;;  %v4021_v33 = vpop.permute.xlu0 %4020  ;;  %v3274_v51 = vsel %vm10887_vm2, %v19371_v59, %v19370_v42  ;;  %v3275_v40 = vsel %vm10891_vm3, %v19371_v59, %v19370_v42  ;;  %v7329_v18 = vld [vmem:[%s18136_s0 + $0x3f8] sm:$0xff] }
 0x5f4   :  { %6376 = vst [vmem:[%s18139_s3 + $0x3c0] sm:$0xff] %v5757_v16  ;;  %6377 = vst.msk [vmem:[%s18139_s3 + $0x3c8] sm:$0xff] %vm6256_vm6, %v5758_v41  ;;  %v5125_v53 = vsel %vm10901_vm4, %v4009_v26, %v3260_v47  ;;  %v5126_v57 = vsel %vm10905_vm5, %v4009_v26, %v3261_v35  ;;  %4264 = vperm.xlu1 %6890, %v7325_v0   ;;  %v5131_v12 = vsel %vm10901_vm4, %v4021_v33, %v3266_v44  ;;  %v7330_v41 = vld [vmem:[%s18136_s0 + $0x410] sm:$0xff]  ;;  %v19373_v35 = vld [vmem:[#allocation48_spill] sm:$0xff] }
 0x5f5   :  { %v5755_v24 = vadd.f32 %v10909_v38, %v5125_v53  ;;  %v5756_v9 = vadd.f32 %v10911_v5, %v5126_v57  ;;  %v5132_v49 = vsel %vm10905_vm5, %v4021_v33, %v3267_v29  ;;  %4276 = vperm.xlu0 %6891, %v7326_v4   ;;  %v5761_v1 = vadd.f32 %v10909_v38, %v5131_v12  ;;  %v19372_v47 = vld [vmem:[#allocation333_spill] sm:$0xff]  ;;  %v19374_v44 = vld [vmem:[#allocation336_spill] sm:$0xff] }
 0x5f6   :  { %v5762_v39 = vadd.f32 %v10911_v5, %v5132_v49  ;;  %v3272_v26 = vsel %vm10887_vm2, %v19373_v35, %v19372_v47  ;;  %v3273_v15 = vsel %vm10891_vm3, %v19373_v35, %v19372_v47  ;;  %v19375_v29 = vld [vmem:[#allocation53_spill] sm:$0xff] }
 0x5f7   :  { %6374 = vst [vmem:[%s18139_s3 + $0x3b0] sm:$0xff] %v5755_v24  ;;  %6375 = vst.msk [vmem:[%s18139_s3 + $0x3b8] sm:$0xff] %vm6256_vm6, %v5756_v9  ;;  %v4017_v21 = vpop.permute.xlu1 %4016  ;;  %v4029_v17 = vpop.permute.xlu0 %4028  ;;  %v3278_v53 = vsel %vm10887_vm2, %v19375_v29, %v19374_v44  ;;  %v3279_v57 = vsel %vm10891_vm3, %v19375_v29, %v19374_v44  ;;  %v7331_v9 = vld [vmem:[%s18136_s0 + $0x408] sm:$0xff] }
 0x5f8   :  { %6380 = vst [vmem:[%s18139_s3 + $0x3e0] sm:$0xff] %v5761_v1  ;;  %6381 = vst.msk [vmem:[%s18139_s3 + $0x3e8] sm:$0xff] %vm6256_vm6, %v5762_v39  ;;  %v5129_v45 = vsel %vm10901_vm4, %v4017_v21, %v3264_v27  ;;  %v5130_v11 = vsel %vm10905_vm5, %v4017_v21, %v3265_v48  ;;  %4272 = vperm.xlu1 %6890, %v7327_v56   ;;  %v5135_v43 = vsel %vm10901_vm4, %v4029_v17, %v3270_v46  ;;  %v7332_v39 = vld [vmem:[%s18136_s0 + $0x420] sm:$0xff]  ;;  %v19377_v48 = vld [vmem:[#allocation50_spill] sm:$0xff] }
 0x5f9   :  { %v5759_v19 = vadd.f32 %v10909_v38, %v5129_v45  ;;  %v5760_v2 = vadd.f32 %v10911_v5, %v5130_v11  ;;  %v5136_v62 = vsel %vm10905_vm5, %v4029_v17, %v3271_v36  ;;  %4284 = vperm.xlu0 %6891, %v7328_v6   ;;  %v5765_v20 = vadd.f32 %v10909_v38, %v5135_v43  ;;  %v19376_v27 = vld [vmem:[#allocation335_spill] sm:$0xff]  ;;  %v19378_v46 = vld [vmem:[#allocation338_spill] sm:$0xff] }
 0x5fa   :  { %v5766_v52 = vadd.f32 %v10911_v5, %v5136_v62  ;;  %v3276_v21 = vsel %vm10887_vm2, %v19377_v48, %v19376_v27  ;;  %v3277_v58 = vsel %vm10891_vm3, %v19377_v48, %v19376_v27  ;;  %v19379_v36 = vld [vmem:[#allocation55_spill] sm:$0xff] }
 0x5fb   :  { %6378 = vst [vmem:[%s18139_s3 + $0x3d0] sm:$0xff] %v5759_v19  ;;  %6379 = vst.msk [vmem:[%s18139_s3 + $0x3d8] sm:$0xff] %vm6256_vm6, %v5760_v2  ;;  %v4025_v31 = vpop.permute.xlu1 %4024  ;;  %v3282_v45 = vsel %vm10887_vm2, %v19379_v36, %v19378_v46  ;;  %v3283_v11 = vsel %vm10891_vm3, %v19379_v36, %v19378_v46  ;;  %v7333_v2 = vld [vmem:[%s18136_s0 + $0x418] sm:$0xff] }
 0x5fc   :  { %6384 = vst [vmem:[%s18139_s3 + $0x400] sm:$0xff] %v5765_v20  ;;  %6385 = vst.msk [vmem:[%s18139_s3 + $0x408] sm:$0xff] %vm6256_vm6, %v5766_v52  ;;  %v5133_v37 = vsel %vm10901_vm4, %v4025_v31, %v3268_v61  ;;  %v5134_v60 = vsel %vm10905_vm5, %v4025_v31, %v3269_v25  ;;  %v4037_v7 = vpop.permute.xlu0 %4036  ;;  %4280 = vperm.xlu1 %6890, %v7329_v18   ;;  %v7334_v52 = vld [vmem:[%s18136_s0 + $0x430] sm:$0xff]  ;;  %v19381_v25 = vld [vmem:[#allocation52_spill] sm:$0xff] }
 0x5fd   :  { %v5763_v63 = vadd.f32 %v10909_v38, %v5133_v37  ;;  %v5764_v54 = vadd.f32 %v10911_v5, %v5134_v60  ;;  %v5139_v3 = vsel %vm10901_vm4, %v4037_v7, %v3274_v51  ;;  %v5140_v16 = vsel %vm10905_vm5, %v4037_v7, %v3275_v40  ;;  %4292 = vperm.xlu0 %6891, %v7330_v41   ;;  %v19380_v61 = vld [vmem:[#allocation337_spill] sm:$0xff]  ;;  %v19382_v51 = vld [vmem:[#allocation340_spill] sm:$0xff] }
 0x5fe   :  { %v5769_v23 = vadd.f32 %v10909_v38, %v5139_v3  ;;  %v5770_v50 = vadd.f32 %v10911_v5, %v5140_v16  ;;  %v3280_v31 = vsel %vm10887_vm2, %v19381_v25, %v19380_v61  ;;  %v3281_v42 = vsel %vm10891_vm3, %v19381_v25, %v19380_v61  ;;  %v19383_v40 = vld [vmem:[#allocation57_spill] sm:$0xff] }
 0x5ff   :  { %6382 = vst [vmem:[%s18139_s3 + $0x3f0] sm:$0xff] %v5763_v63  ;;  %6383 = vst.msk [vmem:[%s18139_s3 + $0x3f8] sm:$0xff] %vm6256_vm6, %v5764_v54  ;;  %v4033_v32 = vpop.permute.xlu1 %4032  ;;  %v3286_v37 = vsel %vm10887_vm2, %v19383_v40, %v19382_v51  ;;  %v3287_v60 = vsel %vm10891_vm3, %v19383_v40, %v19382_v51  ;;  %v7335_v54 = vld [vmem:[%s18136_s0 + $0x428] sm:$0xff] }
 0x600   :  { %6388 = vst [vmem:[%s18139_s3 + $0x420] sm:$0xff] %v5769_v23  ;;  %6389 = vst.msk [vmem:[%s18139_s3 + $0x428] sm:$0xff] %vm6256_vm6, %v5770_v50  ;;  %v5137_v33 = vsel %vm10901_vm4, %v4033_v32, %v3272_v26  ;;  %v5138_v0 = vsel %vm10905_vm5, %v4033_v32, %v3273_v15  ;;  %v4045_v24 = vpop.permute.xlu0 %4044  ;;  %4288 = vperm.xlu1 %6890, %v7331_v9   ;;  %v7336_v50 = vld [vmem:[%s18136_s0 + $0x440] sm:$0xff]  ;;  %v19385_v15 = vld [vmem:[#allocation54_spill] sm:$0xff] }
 0x601   :  { %v5767_v12 = vadd.f32 %v10909_v38, %v5137_v33  ;;  %v5768_v49 = vadd.f32 %v10911_v5, %v5138_v0  ;;  %v5143_v4 = vsel %vm10901_vm4, %v4045_v24, %v3278_v53  ;;  %v5144_v1 = vsel %vm10905_vm5, %v4045_v24, %v3279_v57  ;;  %4300 = vperm.xlu0 %6891, %v7332_v39   ;;  %v19384_v26 = vld [vmem:[#allocation339_spill] sm:$0xff]  ;;  %v19386_v53 = vld [vmem:[#allocation342_spill] sm:$0xff] }
 0x602   :  { %v5773_v10 = vadd.f32 %v10909_v38, %v5143_v4  ;;  %v5774_v8 = vadd.f32 %v10911_v5, %v5144_v1  ;;  %v3284_v32 = vsel %vm10887_vm2, %v19385_v15, %v19384_v26  ;;  %v3285_v44 = vsel %vm10891_vm3, %v19385_v15, %v19384_v26  ;;  %v19387_v57 = vld [vmem:[#allocation59_spill] sm:$0xff] }
 0x603   :  { %6386 = vst [vmem:[%s18139_s3 + $0x410] sm:$0xff] %v5767_v12  ;;  %6387 = vst.msk [vmem:[%s18139_s3 + $0x418] sm:$0xff] %vm6256_vm6, %v5768_v49  ;;  %v4041_v34 = vpop.permute.xlu1 %4040  ;;  %v3290_v33 = vsel %vm10887_vm2, %v19387_v57, %v19386_v53  ;;  %v3291_v0 = vsel %vm10891_vm3, %v19387_v57, %v19386_v53  ;;  %v7337_v49 = vld [vmem:[%s18136_s0 + $0x438] sm:$0xff] }
 0x604   :  { %6392 = vst [vmem:[%s18139_s3 + $0x440] sm:$0xff] %v5773_v10  ;;  %6393 = vst.msk [vmem:[%s18139_s3 + $0x448] sm:$0xff] %vm6256_vm6, %v5774_v8  ;;  %v5141_v17 = vsel %vm10901_vm4, %v4041_v34, %v3276_v21  ;;  %v5142_v56 = vsel %vm10905_vm5, %v4041_v34, %v3277_v58  ;;  %v4053_v19 = vpop.permute.xlu0 %4052  ;;  %4296 = vperm.xlu1 %6890, %v7333_v2   ;;  %v7338_v8 = vld [vmem:[%s18136_s0 + $0x450] sm:$0xff]  ;;  %v19389_v58 = vld [vmem:[#allocation56_spill] sm:$0xff] }
 0x605   :  { %v5771_v43 = vadd.f32 %v10909_v38, %v5141_v17  ;;  %v5772_v62 = vadd.f32 %v10911_v5, %v5142_v56  ;;  %v5147_v6 = vsel %vm10901_vm4, %v4053_v19, %v3282_v45  ;;  %v5148_v20 = vsel %vm10905_vm5, %v4053_v19, %v3283_v11  ;;  %4308 = vperm.xlu0 %6891, %v7334_v52   ;;  %v19388_v21 = vld [vmem:[#allocation341_spill] sm:$0xff]  ;;  %v19390_v45 = vld [vmem:[#allocation344_spill] sm:$0xff] }
 0x606   :  { %v5777_v13 = vadd.f32 %v10909_v38, %v5147_v6  ;;  %v5778_v28 = vadd.f32 %v10911_v5, %v5148_v20  ;;  %v3288_v34 = vsel %vm10887_vm2, %v19389_v58, %v19388_v21  ;;  %v3289_v46 = vsel %vm10891_vm3, %v19389_v58, %v19388_v21  ;;  %v19391_v11 = vld [vmem:[#allocation61_spill] sm:$0xff] }
 0x607   :  { %6390 = vst [vmem:[%s18139_s3 + $0x430] sm:$0xff] %v5771_v43  ;;  %6391 = vst.msk [vmem:[%s18139_s3 + $0x438] sm:$0xff] %vm6256_vm6, %v5772_v62  ;;  %v4049_v59 = vpop.permute.xlu1 %4048  ;;  %v3294_v17 = vsel %vm10887_vm2, %v19391_v11, %v19390_v45  ;;  %v3295_v56 = vsel %vm10891_vm3, %v19391_v11, %v19390_v45  ;;  %v7339_v62 = vld [vmem:[%s18136_s0 + $0x448] sm:$0xff] }
 0x608   :  { %6396 = vst [vmem:[%s18139_s3 + $0x460] sm:$0xff] %v5777_v13  ;;  %6397 = vst.msk [vmem:[%s18139_s3 + $0x468] sm:$0xff] %vm6256_vm6, %v5778_v28  ;;  %v5145_v7 = vsel %vm10901_vm4, %v4049_v59, %v3280_v31  ;;  %v5146_v18 = vsel %vm10905_vm5, %v4049_v59, %v3281_v42  ;;  %v4061_v63 = vpop.permute.xlu0 %4060  ;;  %4304 = vperm.xlu1 %6890, %v7335_v54   ;;  %v7340_v28 = vld [vmem:[%s18136_s0 + $0x460] sm:$0xff]  ;;  %v19393_v42 = vld [vmem:[#allocation58_spill] sm:$0xff] }
 0x609   :  { %v5775_v3 = vadd.f32 %v10909_v38, %v5145_v7  ;;  %v5776_v16 = vadd.f32 %v10911_v5, %v5146_v18  ;;  %v5151_v41 = vsel %vm10901_vm4, %v4061_v63, %v3286_v37  ;;  %v5152_v23 = vsel %vm10905_vm5, %v4061_v63, %v3287_v60  ;;  %4316 = vperm.xlu0 %6891, %v7336_v50   ;;  %v19392_v31 = vld [vmem:[#allocation343_spill] sm:$0xff]  ;;  %v19394_v37 = vld [vmem:[#allocation346_spill] sm:$0xff] }
 0x60a   :  { %v5781_v47 = vadd.f32 %v10909_v38, %v5151_v41  ;;  %v5782_v35 = vadd.f32 %v10911_v5, %v5152_v23  ;;  %v3292_v59 = vsel %vm10887_vm2, %v19393_v42, %v19392_v31  ;;  %v3293_v51 = vsel %vm10891_vm3, %v19393_v42, %v19392_v31  ;;  %v19395_v60 = vld [vmem:[#allocation63_spill] sm:$0xff] }
 0x60b   :  { %6394 = vst [vmem:[%s18139_s3 + $0x450] sm:$0xff] %v5775_v3  ;;  %6395 = vst.msk [vmem:[%s18139_s3 + $0x458] sm:$0xff] %vm6256_vm6, %v5776_v16  ;;  %v4057_v29 = vpop.permute.xlu1 %4056  ;;  %v3298_v7 = vsel %vm10887_vm2, %v19395_v60, %v19394_v37  ;;  %v3299_v18 = vsel %vm10891_vm3, %v19395_v60, %v19394_v37  ;;  %v7341_v16 = vld [vmem:[%s18136_s0 + $0x458] sm:$0xff] }
 0x60c   :  { %6400 = vst [vmem:[%s18139_s3 + $0x480] sm:$0xff] %v5781_v47  ;;  %6401 = vst.msk [vmem:[%s18139_s3 + $0x488] sm:$0xff] %vm6256_vm6, %v5782_v35  ;;  %v5149_v24 = vsel %vm10901_vm4, %v4057_v29, %v3284_v32  ;;  %v5150_v9 = vsel %vm10905_vm5, %v4057_v29, %v3285_v44  ;;  %v4069_v12 = vpop.permute.xlu0 %4068  ;;  %4312 = vperm.xlu1 %6890, %v7337_v49   ;;  %v7342_v35 = vld [vmem:[%s18136_s0 + $0x470] sm:$0xff]  ;;  %v19397_v44 = vld [vmem:[#allocation60_spill] sm:$0xff] }
 0x60d   :  { %v5779_v4 = vadd.f32 %v10909_v38, %v5149_v24  ;;  %v5780_v1 = vadd.f32 %v10911_v5, %v5150_v9  ;;  %v5155_v39 = vsel %vm10901_vm4, %v4069_v12, %v3290_v33  ;;  %v5156_v10 = vsel %vm10905_vm5, %v4069_v12, %v3291_v0  ;;  %4324 = vperm.xlu0 %6891, %v7338_v8   ;;  %v19396_v32 = vld [vmem:[#allocation345_spill] sm:$0xff]  ;;  %v19398_v33 = vld [vmem:[#allocation348_spill] sm:$0xff] }
 0x60e   :  { %v5785_v27 = vadd.f32 %v10909_v38, %v5155_v39  ;;  %v5786_v48 = vadd.f32 %v10911_v5, %v5156_v10  ;;  %v3296_v29 = vsel %vm10887_vm2, %v19397_v44, %v19396_v32  ;;  %v3297_v53 = vsel %vm10891_vm3, %v19397_v44, %v19396_v32  ;;  %v19399_v0 = vld [vmem:[#allocation65_spill] sm:$0xff] }
 0x60f   :  { %6398 = vst [vmem:[%s18139_s3 + $0x470] sm:$0xff] %v5779_v4  ;;  %6399 = vst.msk [vmem:[%s18139_s3 + $0x478] sm:$0xff] %vm6256_vm6, %v5780_v1  ;;  %v4065_v36 = vpop.permute.xlu1 %4064  ;;  %v3302_v24 = vsel %vm10887_vm2, %v19399_v0, %v19398_v33  ;;  %v3303_v9 = vsel %vm10891_vm3, %v19399_v0, %v19398_v33  ;;  %v7343_v1 = vld [vmem:[%s18136_s0 + $0x468] sm:$0xff] }
 0x610   :  { %6404 = vst [vmem:[%s18139_s3 + $0x4a0] sm:$0xff] %v5785_v27  ;;  %6405 = vst.msk [vmem:[%s18139_s3 + $0x4a8] sm:$0xff] %vm6256_vm6, %v5786_v48  ;;  %v5153_v19 = vsel %vm10901_vm4, %v4065_v36, %v3288_v34  ;;  %v5154_v2 = vsel %vm10905_vm5, %v4065_v36, %v3289_v46  ;;  %v4077_v43 = vpop.permute.xlu0 %4076  ;;  %4320 = vperm.xlu1 %6890, %v7339_v62   ;;  %v7344_v48 = vld [vmem:[%s18136_s0 + $0x480] sm:$0xff]  ;;  %v19401_v46 = vld [vmem:[#allocation62_spill] sm:$0xff] }
 0x611   :  { %v5783_v6 = vadd.f32 %v10909_v38, %v5153_v19  ;;  %v5784_v20 = vadd.f32 %v10911_v5, %v5154_v2  ;;  %v5159_v52 = vsel %vm10901_vm4, %v4077_v43, %v3294_v17  ;;  %v5160_v13 = vsel %vm10905_vm5, %v4077_v43, %v3295_v56  ;;  %4332 = vperm.xlu0 %6891, %v7340_v28   ;;  %v19400_v34 = vld [vmem:[#allocation347_spill] sm:$0xff]  ;;  %v19402_v17 = vld [vmem:[#allocation350_spill] sm:$0xff] }
 0x612   :  { %v5789_v61 = vadd.f32 %v10909_v38, %v5159_v52  ;;  %v5790_v25 = vadd.f32 %v10911_v5, %v5160_v13  ;;  %v3300_v36 = vsel %vm10887_vm2, %v19401_v46, %v19400_v34  ;;  %v3301_v45 = vsel %vm10891_vm3, %v19401_v46, %v19400_v34  ;;  %v19403_v56 = vld [vmem:[#allocation67_spill] sm:$0xff] }
 0x613   :  { %6402 = vst [vmem:[%s18139_s3 + $0x490] sm:$0xff] %v5783_v6  ;;  %6403 = vst.msk [vmem:[%s18139_s3 + $0x498] sm:$0xff] %vm6256_vm6, %v5784_v20  ;;  %v4073_v40 = vpop.permute.xlu1 %4072  ;;  %v3306_v19 = vsel %vm10887_vm2, %v19403_v56, %v19402_v17  ;;  %v3307_v2 = vsel %vm10891_vm3, %v19403_v56, %v19402_v17  ;;  %v7345_v20 = vld [vmem:[%s18136_s0 + $0x478] sm:$0xff] }
 0x614   :  { %6408 = vst [vmem:[%s18139_s3 + $0x4c0] sm:$0xff] %v5789_v61  ;;  %6409 = vst.msk [vmem:[%s18139_s3 + $0x4c8] sm:$0xff] %vm6256_vm6, %v5790_v25  ;;  %v5157_v63 = vsel %vm10901_vm4, %v4073_v40, %v3292_v59  ;;  %v5158_v54 = vsel %vm10905_vm5, %v4073_v40, %v3293_v51  ;;  %v4085_v3 = vpop.permute.xlu0 %4084  ;;  %4328 = vperm.xlu1 %6890, %v7341_v16   ;;  %v7346_v25 = vld [vmem:[%s18136_s0 + $0x490] sm:$0xff]  ;;  %v19405_v51 = vld [vmem:[#allocation64_spill] sm:$0xff] }
 0x615   :  { %v5787_v41 = vadd.f32 %v10909_v38, %v5157_v63  ;;  %v5788_v23 = vadd.f32 %v10911_v5, %v5158_v54  ;;  %v5163_v50 = vsel %vm10901_vm4, %v4085_v3, %v3298_v7  ;;  %v5164_v47 = vsel %vm10905_vm5, %v4085_v3, %v3299_v18  ;;  %4340 = vperm.xlu0 %6891, %v7342_v35   ;;  %v19404_v59 = vld [vmem:[#allocation349_spill] sm:$0xff]  ;;  %v19406_v7 = vld [vmem:[#allocation352_spill] sm:$0xff] }
 0x616   :  { %v5793_v26 = vadd.f32 %v10909_v38, %v5163_v50  ;;  %v5794_v15 = vadd.f32 %v10911_v5, %v5164_v47  ;;  %v3304_v40 = vsel %vm10887_vm2, %v19405_v51, %v19404_v59  ;;  %v3305_v37 = vsel %vm10891_vm3, %v19405_v51, %v19404_v59  ;;  %v19407_v18 = vld [vmem:[#allocation69_spill] sm:$0xff] }
 0x617   :  { %6406 = vst [vmem:[%s18139_s3 + $0x4b0] sm:$0xff] %v5787_v41  ;;  %6407 = vst.msk [vmem:[%s18139_s3 + $0x4b8] sm:$0xff] %vm6256_vm6, %v5788_v23  ;;  %v4081_v57 = vpop.permute.xlu1 %4080  ;;  %v3310_v63 = vsel %vm10887_vm2, %v19407_v18, %v19406_v7  ;;  %v3311_v54 = vsel %vm10891_vm3, %v19407_v18, %v19406_v7  ;;  %v7347_v23 = vld [vmem:[%s18136_s0 + $0x488] sm:$0xff] }
 0x618   :  { %6412 = vst [vmem:[%s18139_s3 + $0x4e0] sm:$0xff] %v5793_v26  ;;  %6413 = vst.msk [vmem:[%s18139_s3 + $0x4e8] sm:$0xff] %vm6256_vm6, %v5794_v15  ;;  %v5161_v12 = vsel %vm10901_vm4, %v4081_v57, %v3296_v29  ;;  %v5162_v49 = vsel %vm10905_vm5, %v4081_v57, %v3297_v53  ;;  %v4093_v4 = vpop.permute.xlu0 %4092  ;;  %4336 = vperm.xlu1 %6890, %v7343_v1   ;;  %v7348_v15 = vld [vmem:[%s18136_s0 + $0x4a0] sm:$0xff]  ;;  %v19409_v53 = vld [vmem:[#allocation66_spill] sm:$0xff] }
 0x619   :  { %v5791_v39 = vadd.f32 %v10909_v38, %v5161_v12  ;;  %v5792_v10 = vadd.f32 %v10911_v5, %v5162_v49  ;;  %v5167_v8 = vsel %vm10901_vm4, %v4093_v4, %v3302_v24  ;;  %v5168_v27 = vsel %vm10905_vm5, %v4093_v4, %v3303_v9  ;;  %4348 = vperm.xlu0 %6891, %v7344_v48   ;;  %v19408_v29 = vld [vmem:[#allocation351_spill] sm:$0xff]  ;;  %v19410_v24 = vld [vmem:[#allocation354_spill] sm:$0xff] }
 0x61a   :  { %v5797_v21 = vadd.f32 %v10909_v38, %v5167_v8  ;;  %v5798_v58 = vadd.f32 %v10911_v5, %v5168_v27  ;;  %v3308_v57 = vsel %vm10887_vm2, %v19409_v53, %v19408_v29  ;;  %v3309_v33 = vsel %vm10891_vm3, %v19409_v53, %v19408_v29  ;;  %v19411_v9 = vld [vmem:[#allocation71_spill] sm:$0xff] }
 0x61b   :  { %6410 = vst [vmem:[%s18139_s3 + $0x4d0] sm:$0xff] %v5791_v39  ;;  %6411 = vst.msk [vmem:[%s18139_s3 + $0x4d8] sm:$0xff] %vm6256_vm6, %v5792_v10  ;;  %v4089_v11 = vpop.permute.xlu1 %4088  ;;  %v3314_v12 = vsel %vm10887_vm2, %v19411_v9, %v19410_v24  ;;  %v3315_v49 = vsel %vm10891_vm3, %v19411_v9, %v19410_v24  ;;  %v7349_v10 = vld [vmem:[%s18136_s0 + $0x498] sm:$0xff] }
 0x61c   :  { %6416 = vst [vmem:[%s18139_s3 + $0x500] sm:$0xff] %v5797_v21  ;;  %6417 = vst.msk [vmem:[%s18139_s3 + $0x508] sm:$0xff] %vm6256_vm6, %v5798_v58  ;;  %v5165_v43 = vsel %vm10901_vm4, %v4089_v11, %v3300_v36  ;;  %v5166_v62 = vsel %vm10905_vm5, %v4089_v11, %v3301_v45  ;;  %v4101_v6 = vpop.permute.xlu0 %4100  ;;  %4344 = vperm.xlu1 %6890, %v7345_v20   ;;  %v7350_v58 = vld [vmem:[%s18136_s0 + $0x4b0] sm:$0xff]  ;;  %v19413_v45 = vld [vmem:[#allocation68_spill] sm:$0xff] }
 0x61d   :  { %v5795_v52 = vadd.f32 %v10909_v38, %v5165_v43  ;;  %v5796_v13 = vadd.f32 %v10911_v5, %v5166_v62  ;;  %v5171_v28 = vsel %vm10901_vm4, %v4101_v6, %v3306_v19  ;;  %v5172_v61 = vsel %vm10905_vm5, %v4101_v6, %v3307_v2  ;;  %4356 = vperm.xlu0 %6891, %v7346_v25   ;;  %v19412_v36 = vld [vmem:[#allocation353_spill] sm:$0xff]  ;;  %v19414_v19 = vld [vmem:[#allocation356_spill] sm:$0xff] }
 0x61e   :  { %v5801_v31 = vadd.f32 %v10909_v38, %v5171_v28  ;;  %v5802_v42 = vadd.f32 %v10911_v5, %v5172_v61  ;;  %v3312_v11 = vsel %vm10887_vm2, %v19413_v45, %v19412_v36  ;;  %v3313_v17 = vsel %vm10891_vm3, %v19413_v45, %v19412_v36  ;;  %v19415_v2 = vld [vmem:[#allocation73_spill] sm:$0xff] }
 0x61f   :  { %6414 = vst [vmem:[%s18139_s3 + $0x4f0] sm:$0xff] %v5795_v52  ;;  %6415 = vst.msk [vmem:[%s18139_s3 + $0x4f8] sm:$0xff] %vm6256_vm6, %v5796_v13  ;;  %v4097_v60 = vpop.permute.xlu1 %4096  ;;  %v3318_v43 = vsel %vm10887_vm2, %v19415_v2, %v19414_v19  ;;  %v3319_v62 = vsel %vm10891_vm3, %v19415_v2, %v19414_v19  ;;  %v7351_v13 = vld [vmem:[%s18136_s0 + $0x4a8] sm:$0xff] }
 0x620   :  { %6420 = vst [vmem:[%s18139_s3 + $0x520] sm:$0xff] %v5801_v31  ;;  %6421 = vst.msk [vmem:[%s18139_s3 + $0x528] sm:$0xff] %vm6256_vm6, %v5802_v42  ;;  %v5169_v3 = vsel %vm10901_vm4, %v4097_v60, %v3304_v40  ;;  %v5170_v16 = vsel %vm10905_vm5, %v4097_v60, %v3305_v37  ;;  %v4109_v41 = vpop.permute.xlu0 %4108  ;;  %4352 = vperm.xlu1 %6890, %v7347_v23   ;;  %v7352_v42 = vld [vmem:[%s18136_s0 + $0x4c0] sm:$0xff]  ;;  %v19417_v37 = vld [vmem:[#allocation70_spill] sm:$0xff] }
 0x621   :  { %v5799_v50 = vadd.f32 %v10909_v38, %v5169_v3  ;;  %v5800_v47 = vadd.f32 %v10911_v5, %v5170_v16  ;;  %v5175_v35 = vsel %vm10901_vm4, %v4109_v41, %v3310_v63  ;;  %v5176_v26 = vsel %vm10905_vm5, %v4109_v41, %v3311_v54  ;;  %4364 = vperm.xlu0 %6891, %v7348_v15   ;;  %v19416_v40 = vld [vmem:[#allocation355_spill] sm:$0xff]  ;;  %v19418_v63 = vld [vmem:[#allocation358_spill] sm:$0xff] }
 0x622   :  { %v5805_v32 = vadd.f32 %v10909_v38, %v5175_v35  ;;  %v5806_v44 = vadd.f32 %v10911_v5, %v5176_v26  ;;  %v3316_v60 = vsel %vm10887_vm2, %v19417_v37, %v19416_v40  ;;  %v3317_v7 = vsel %vm10891_vm3, %v19417_v37, %v19416_v40  ;;  %v19419_v54 = vld [vmem:[#allocation75_spill] sm:$0xff] }
 0x623   :  { %6418 = vst [vmem:[%s18139_s3 + $0x510] sm:$0xff] %v5799_v50  ;;  %6419 = vst.msk [vmem:[%s18139_s3 + $0x518] sm:$0xff] %vm6256_vm6, %v5800_v47  ;;  %v4105_v0 = vpop.permute.xlu1 %4104  ;;  %v3322_v3 = vsel %vm10887_vm2, %v19419_v54, %v19418_v63  ;;  %v3323_v16 = vsel %vm10891_vm3, %v19419_v54, %v19418_v63  ;;  %v7353_v47 = vld [vmem:[%s18136_s0 + $0x4b8] sm:$0xff] }
 0x624   :  { %6424 = vst [vmem:[%s18139_s3 + $0x540] sm:$0xff] %v5805_v32  ;;  %6425 = vst.msk [vmem:[%s18139_s3 + $0x548] sm:$0xff] %vm6256_vm6, %v5806_v44  ;;  %v5173_v4 = vsel %vm10901_vm4, %v4105_v0, %v3308_v57  ;;  %v5174_v1 = vsel %vm10905_vm5, %v4105_v0, %v3309_v33  ;;  %v4117_v39 = vpop.permute.xlu0 %4116  ;;  %4360 = vperm.xlu1 %6890, %v7349_v10   ;;  %v7354_v44 = vld [vmem:[%s18136_s0 + $0x4d0] sm:$0xff]  ;;  %v19421_v33 = vld [vmem:[#allocation72_spill] sm:$0xff] }
 0x625   :  { %v5803_v8 = vadd.f32 %v10909_v38, %v5173_v4  ;;  %v5804_v27 = vadd.f32 %v10911_v5, %v5174_v1  ;;  %v5179_v48 = vsel %vm10901_vm4, %v4117_v39, %v3314_v12  ;;  %v5180_v21 = vsel %vm10905_vm5, %v4117_v39, %v3315_v49  ;;  %4372 = vperm.xlu0 %6891, %v7350_v58   ;;  %v19420_v57 = vld [vmem:[#allocation357_spill] sm:$0xff]  ;;  %v19422_v12 = vld [vmem:[#allocation360_spill] sm:$0xff] }
 0x626   :  { %v5809_v34 = vadd.f32 %v10909_v38, %v5179_v48  ;;  %v5810_v46 = vadd.f32 %v10911_v5, %v5180_v21  ;;  %v3320_v0 = vsel %vm10887_vm2, %v19421_v33, %v19420_v57  ;;  %v3321_v24 = vsel %vm10891_vm3, %v19421_v33, %v19420_v57  ;;  %v19423_v49 = vld [vmem:[#allocation77_spill] sm:$0xff] }
 0x627   :  { %6422 = vst [vmem:[%s18139_s3 + $0x530] sm:$0xff] %v5803_v8  ;;  %6423 = vst.msk [vmem:[%s18139_s3 + $0x538] sm:$0xff] %vm6256_vm6, %v5804_v27  ;;  %v4113_v56 = vpop.permute.xlu1 %4112  ;;  %v3326_v4 = vsel %vm10887_vm2, %v19423_v49, %v19422_v12  ;;  %v3327_v1 = vsel %vm10891_vm3, %v19423_v49, %v19422_v12  ;;  %v7355_v27 = vld [vmem:[%s18136_s0 + $0x4c8] sm:$0xff] }
 0x628   :  { %6428 = vst [vmem:[%s18139_s3 + $0x560] sm:$0xff] %v5809_v34  ;;  %6429 = vst.msk [vmem:[%s18139_s3 + $0x568] sm:$0xff] %vm6256_vm6, %v5810_v46  ;;  %v5177_v6 = vsel %vm10901_vm4, %v4113_v56, %v3312_v11  ;;  %v5178_v20 = vsel %vm10905_vm5, %v4113_v56, %v3313_v17  ;;  %v4125_v52 = vpop.permute.xlu0 %4124  ;;  %4368 = vperm.xlu1 %6890, %v7351_v13   ;;  %v7356_v46 = vld [vmem:[%s18136_s0 + $0x4e0] sm:$0xff]  ;;  %v19425_v17 = vld [vmem:[#allocation74_spill] sm:$0xff] }
 0x629   :  { %v5807_v28 = vadd.f32 %v10909_v38, %v5177_v6  ;;  %v5808_v61 = vadd.f32 %v10911_v5, %v5178_v20  ;;  %v5183_v25 = vsel %vm10901_vm4, %v4125_v52, %v3318_v43  ;;  %v5184_v31 = vsel %vm10905_vm5, %v4125_v52, %v3319_v62  ;;  %4380 = vperm.xlu0 %6891, %v7352_v42   ;;  %v19424_v11 = vld [vmem:[#allocation359_spill] sm:$0xff]  ;;  %v19426_v43 = vld [vmem:[#allocation362_spill] sm:$0xff] }
 0x62a   :  { %v5813_v59 = vadd.f32 %v10909_v38, %v5183_v25  ;;  %v5814_v51 = vadd.f32 %v10911_v5, %v5184_v31  ;;  %v3324_v56 = vsel %vm10887_vm2, %v19425_v17, %v19424_v11  ;;  %v3325_v19 = vsel %vm10891_vm3, %v19425_v17, %v19424_v11  ;;  %v19427_v62 = vld [vmem:[#allocation79_spill] sm:$0xff] }
 0x62b   :  { %6426 = vst [vmem:[%s18139_s3 + $0x550] sm:$0xff] %v5807_v28  ;;  %6427 = vst.msk [vmem:[%s18139_s3 + $0x558] sm:$0xff] %vm6256_vm6, %v5808_v61  ;;  %v4121_v18 = vpop.permute.xlu1 %4120  ;;  %v3330_v6 = vsel %vm10887_vm2, %v19427_v62, %v19426_v43  ;;  %v3331_v20 = vsel %vm10891_vm3, %v19427_v62, %v19426_v43  ;;  %v7357_v61 = vld [vmem:[%s18136_s0 + $0x4d8] sm:$0xff] }
 0x62c   :  { %6432 = vst [vmem:[%s18139_s3 + $0x580] sm:$0xff] %v5813_v59  ;;  %6433 = vst.msk [vmem:[%s18139_s3 + $0x588] sm:$0xff] %vm6256_vm6, %v5814_v51  ;;  %v5181_v41 = vsel %vm10901_vm4, %v4121_v18, %v3316_v60  ;;  %v5182_v23 = vsel %vm10905_vm5, %v4121_v18, %v3317_v7  ;;  %v4133_v50 = vpop.permute.xlu0 %4132  ;;  %4376 = vperm.xlu1 %6890, %v7353_v47   ;;  %v7358_v51 = vld [vmem:[%s18136_s0 + $0x4f0] sm:$0xff]  ;;  %v19429_v7 = vld [vmem:[#allocation76_spill] sm:$0xff] }
 0x62d   :  { %v5811_v35 = vadd.f32 %v10909_v38, %v5181_v41  ;;  %v5812_v26 = vadd.f32 %v10911_v5, %v5182_v23  ;;  %v5187_v15 = vsel %vm10901_vm4, %v4133_v50, %v3322_v3  ;;  %v5188_v32 = vsel %vm10905_vm5, %v4133_v50, %v3323_v16  ;;  %4388 = vperm.xlu0 %6891, %v7354_v44   ;;  %v19428_v60 = vld [vmem:[#allocation361_spill] sm:$0xff]  ;;  %v19430_v3 = vld [vmem:[#allocation364_spill] sm:$0xff] }
 0x62e   :  { %v5817_v29 = vadd.f32 %v10909_v38, %v5187_v15  ;;  %v5818_v53 = vadd.f32 %v10911_v5, %v5188_v32  ;;  %v3328_v18 = vsel %vm10887_vm2, %v19429_v7, %v19428_v60  ;;  %v3329_v63 = vsel %vm10891_vm3, %v19429_v7, %v19428_v60  ;;  %v19431_v16 = vld [vmem:[#allocation81_spill] sm:$0xff] }
 0x62f   :  { %6430 = vst [vmem:[%s18139_s3 + $0x570] sm:$0xff] %v5811_v35  ;;  %6431 = vst.msk [vmem:[%s18139_s3 + $0x578] sm:$0xff] %vm6256_vm6, %v5812_v26  ;;  %v4129_v9 = vpop.permute.xlu1 %4128  ;;  %v3334_v41 = vsel %vm10887_vm2, %v19431_v16, %v19430_v3  ;;  %v3335_v23 = vsel %vm10891_vm3, %v19431_v16, %v19430_v3  ;;  %v7359_v26 = vld [vmem:[%s18136_s0 + $0x4e8] sm:$0xff] }
 0x630   :  { %6436 = vst [vmem:[%s18139_s3 + $0x5a0] sm:$0xff] %v5817_v29  ;;  %6437 = vst.msk [vmem:[%s18139_s3 + $0x5a8] sm:$0xff] %vm6256_vm6, %v5818_v53  ;;  %v5185_v39 = vsel %vm10901_vm4, %v4129_v9, %v3320_v0  ;;  %v5186_v10 = vsel %vm10905_vm5, %v4129_v9, %v3321_v24  ;;  %v4141_v8 = vpop.permute.xlu0 %4140  ;;  %4384 = vperm.xlu1 %6890, %v7355_v27   ;;  %v7360_v53 = vld [vmem:[%s18136_s0 + $0x500] sm:$0xff]  ;;  %v19433_v24 = vld [vmem:[#allocation78_spill] sm:$0xff] }
 0x631   :  { %v5815_v48 = vadd.f32 %v10909_v38, %v5185_v39  ;;  %v5816_v21 = vadd.f32 %v10911_v5, %v5186_v10  ;;  %v5191_v58 = vsel %vm10901_vm4, %v4141_v8, %v3326_v4  ;;  %v5192_v34 = vsel %vm10905_vm5, %v4141_v8, %v3327_v1  ;;  %4396 = vperm.xlu0 %6891, %v7356_v46   ;;  %v19432_v0 = vld [vmem:[#allocation363_spill] sm:$0xff]  ;;  %v19434_v4 = vld [vmem:[#allocation366_spill] sm:$0xff] }
 0x632   :  { %v5821_v36 = vadd.f32 %v10909_v38, %v5191_v58  ;;  %v5822_v45 = vadd.f32 %v10911_v5, %v5192_v34  ;;  %v3332_v9 = vsel %vm10887_vm2, %v19433_v24, %v19432_v0  ;;  %v3333_v12 = vsel %vm10891_vm3, %v19433_v24, %v19432_v0  ;;  %v19435_v1 = vld [vmem:[#allocation83_spill] sm:$0xff] }
 0x633   :  { %6434 = vst [vmem:[%s18139_s3 + $0x590] sm:$0xff] %v5815_v48  ;;  %6435 = vst.msk [vmem:[%s18139_s3 + $0x598] sm:$0xff] %vm6256_vm6, %v5816_v21  ;;  %v4137_v2 = vpop.permute.xlu1 %4136  ;;  %v3338_v39 = vsel %vm10887_vm2, %v19435_v1, %v19434_v4  ;;  %v3339_v10 = vsel %vm10891_vm3, %v19435_v1, %v19434_v4  ;;  %v7361_v21 = vld [vmem:[%s18136_s0 + $0x4f8] sm:$0xff] }
 0x634   :  { %6440 = vst [vmem:[%s18139_s3 + $0x5c0] sm:$0xff] %v5821_v36  ;;  %6441 = vst.msk [vmem:[%s18139_s3 + $0x5c8] sm:$0xff] %vm6256_vm6, %v5822_v45  ;;  %v5189_v52 = vsel %vm10901_vm4, %v4137_v2, %v3324_v56  ;;  %v5190_v13 = vsel %vm10905_vm5, %v4137_v2, %v3325_v19  ;;  %v4149_v28 = vpop.permute.xlu0 %4148  ;;  %4392 = vperm.xlu1 %6890, %v7357_v61   ;;  %v7362_v45 = vld [vmem:[%s18136_s0 + $0x510] sm:$0xff]  ;;  %v19437_v19 = vld [vmem:[#allocation80_spill] sm:$0xff] }
 0x635   :  { %v5819_v25 = vadd.f32 %v10909_v38, %v5189_v52  ;;  %v5820_v31 = vadd.f32 %v10911_v5, %v5190_v13  ;;  %v5195_v42 = vsel %vm10901_vm4, %v4149_v28, %v3330_v6  ;;  %v5196_v59 = vsel %vm10905_vm5, %v4149_v28, %v3331_v20  ;;  %4404 = vperm.xlu0 %6891, %v7358_v51   ;;  %v19436_v56 = vld [vmem:[#allocation365_spill] sm:$0xff]  ;;  %v19438_v6 = vld [vmem:[#allocation368_spill] sm:$0xff] }
 0x636   :  { %v5825_v40 = vadd.f32 %v10909_v38, %v5195_v42  ;;  %v5826_v37 = vadd.f32 %v10911_v5, %v5196_v59  ;;  %v3336_v2 = vsel %vm10887_vm2, %v19437_v19, %v19436_v56  ;;  %v3337_v43 = vsel %vm10891_vm3, %v19437_v19, %v19436_v56  ;;  %v19439_v20 = vld [vmem:[#allocation85_spill] sm:$0xff] }
 0x637   :  { %6438 = vst [vmem:[%s18139_s3 + $0x5b0] sm:$0xff] %v5819_v25  ;;  %6439 = vst.msk [vmem:[%s18139_s3 + $0x5b8] sm:$0xff] %vm6256_vm6, %v5820_v31  ;;  %v4145_v54 = vpop.permute.xlu1 %4144  ;;  %v3342_v52 = vsel %vm10887_vm2, %v19439_v20, %v19438_v6  ;;  %v3343_v13 = vsel %vm10891_vm3, %v19439_v20, %v19438_v6  ;;  %v7363_v31 = vld [vmem:[%s18136_s0 + $0x508] sm:$0xff] }
 0x638   :  { %6444 = vst [vmem:[%s18139_s3 + $0x5e0] sm:$0xff] %v5825_v40  ;;  %6445 = vst.msk [vmem:[%s18139_s3 + $0x5e8] sm:$0xff] %vm6256_vm6, %v5826_v37  ;;  %v5193_v50 = vsel %vm10901_vm4, %v4145_v54, %v3328_v18  ;;  %v5194_v47 = vsel %vm10905_vm5, %v4145_v54, %v3329_v63  ;;  %v4157_v35 = vpop.permute.xlu0 %4156  ;;  %4400 = vperm.xlu1 %6890, %v7359_v26   ;;  %v7364_v37 = vld [vmem:[%s18136_s0 + $0x520] sm:$0xff]  ;;  %v19441_v63 = vld [vmem:[#allocation82_spill] sm:$0xff] }
 0x639   :  { %v5823_v15 = vadd.f32 %v10909_v38, %v5193_v50  ;;  %v5824_v32 = vadd.f32 %v10911_v5, %v5194_v47  ;;  %v5199_v44 = vsel %vm10901_vm4, %v4157_v35, %v3334_v41  ;;  %v5200_v29 = vsel %vm10905_vm5, %v4157_v35, %v3335_v23  ;;  %4412 = vperm.xlu0 %6891, %v7360_v53   ;;  %v19440_v18 = vld [vmem:[#allocation367_spill] sm:$0xff]  ;;  %v19442_v41 = vld [vmem:[#allocation370_spill] sm:$0xff] }
 0x63a   :  { %v5829_v57 = vadd.f32 %v10909_v38, %v5199_v44  ;;  %v5830_v33 = vadd.f32 %v10911_v5, %v5200_v29  ;;  %v3340_v54 = vsel %vm10887_vm2, %v19441_v63, %v19440_v18  ;;  %v3341_v3 = vsel %vm10891_vm3, %v19441_v63, %v19440_v18  ;;  %v19443_v23 = vld [vmem:[#allocation87_spill] sm:$0xff] }
 0x63b   :  { %6442 = vst [vmem:[%s18139_s3 + $0x5d0] sm:$0xff] %v5823_v15  ;;  %6443 = vst.msk [vmem:[%s18139_s3 + $0x5d8] sm:$0xff] %vm6256_vm6, %v5824_v32  ;;  %v4153_v49 = vpop.permute.xlu1 %4152  ;;  %v3346_v50 = vsel %vm10887_vm2, %v19443_v23, %v19442_v41  ;;  %v3347_v47 = vsel %vm10891_vm3, %v19443_v23, %v19442_v41  ;;  %v7365_v32 = vld [vmem:[%s18136_s0 + $0x518] sm:$0xff] }
 0x63c   :  { %6448 = vst [vmem:[%s18139_s3 + $0x600] sm:$0xff] %v5829_v57  ;;  %6449 = vst.msk [vmem:[%s18139_s3 + $0x608] sm:$0xff] %vm6256_vm6, %v5830_v33  ;;  %v5197_v8 = vsel %vm10901_vm4, %v4153_v49, %v3332_v9  ;;  %v5198_v27 = vsel %vm10905_vm5, %v4153_v49, %v3333_v12  ;;  %v4165_v48 = vpop.permute.xlu0 %4164  ;;  %4408 = vperm.xlu1 %6890, %v7361_v21   ;;  %v7366_v33 = vld [vmem:[%s18136_s0 + $0x530] sm:$0xff]  ;;  %v19445_v12 = vld [vmem:[#allocation84_spill] sm:$0xff] }
 0x63d   :  { %v5827_v58 = vadd.f32 %v10909_v38, %v5197_v8  ;;  %v5828_v34 = vadd.f32 %v10911_v5, %v5198_v27  ;;  %v5203_v46 = vsel %vm10901_vm4, %v4165_v48, %v3338_v39  ;;  %v5204_v36 = vsel %vm10905_vm5, %v4165_v48, %v3339_v10  ;;  %4420 = vperm.xlu0 %6891, %v7362_v45   ;;  %v19444_v9 = vld [vmem:[#allocation369_spill] sm:$0xff]  ;;  %v19446_v39 = vld [vmem:[#allocation372_spill] sm:$0xff] }
 0x63e   :  { %v5833_v11 = vadd.f32 %v10909_v38, %v5203_v46  ;;  %v5834_v17 = vadd.f32 %v10911_v5, %v5204_v36  ;;  %v3344_v49 = vsel %vm10887_vm2, %v19445_v12, %v19444_v9  ;;  %v3345_v4 = vsel %vm10891_vm3, %v19445_v12, %v19444_v9  ;;  %v19447_v10 = vld [vmem:[#allocation89_spill] sm:$0xff] }
 0x63f   :  { %6446 = vst [vmem:[%s18139_s3 + $0x5f0] sm:$0xff] %v5827_v58  ;;  %6447 = vst.msk [vmem:[%s18139_s3 + $0x5f8] sm:$0xff] %vm6256_vm6, %v5828_v34  ;;  %v4161_v62 = vpop.permute.xlu1 %4160  ;;  %v3350_v8 = vsel %vm10887_vm2, %v19447_v10, %v19446_v39  ;;  %v3351_v27 = vsel %vm10891_vm3, %v19447_v10, %v19446_v39  ;;  %v7367_v34 = vld [vmem:[%s18136_s0 + $0x528] sm:$0xff] }
 0x640   :  { %6452 = vst [vmem:[%s18139_s3 + $0x620] sm:$0xff] %v5833_v11  ;;  %6453 = vst.msk [vmem:[%s18139_s3 + $0x628] sm:$0xff] %vm6256_vm6, %v5834_v17  ;;  %v5201_v28 = vsel %vm10901_vm4, %v4161_v62, %v3336_v2  ;;  %v5202_v61 = vsel %vm10905_vm5, %v4161_v62, %v3337_v43  ;;  %v4173_v25 = vpop.permute.xlu0 %4172  ;;  %4416 = vperm.xlu1 %6890, %v7363_v31   ;;  %v7368_v17 = vld [vmem:[%s18136_s0 + $0x540] sm:$0xff]  ;;  %v19449_v43 = vld [vmem:[#allocation86_spill] sm:$0xff] }
 0x641   :  { %v5831_v42 = vadd.f32 %v10909_v38, %v5201_v28  ;;  %v5832_v59 = vadd.f32 %v10911_v5, %v5202_v61  ;;  %v5207_v51 = vsel %vm10901_vm4, %v4173_v25, %v3342_v52  ;;  %v5208_v40 = vsel %vm10905_vm5, %v4173_v25, %v3343_v13  ;;  %4428 = vperm.xlu0 %6891, %v7364_v37   ;;  %v19448_v2 = vld [vmem:[#allocation371_spill] sm:$0xff]  ;;  %v19450_v52 = vld [vmem:[#allocation374_spill] sm:$0xff] }
 0x642   :  { %v5837_v60 = vadd.f32 %v10909_v38, %v5207_v51  ;;  %v5838_v7 = vadd.f32 %v10911_v5, %v5208_v40  ;;  %v3348_v62 = vsel %vm10887_vm2, %v19449_v43, %v19448_v2  ;;  %v3349_v6 = vsel %vm10891_vm3, %v19449_v43, %v19448_v2  ;;  %v19451_v13 = vld [vmem:[#allocation91_spill] sm:$0xff] }
 0x643   :  { %6450 = vst [vmem:[%s18139_s3 + $0x610] sm:$0xff] %v5831_v42  ;;  %6451 = vst.msk [vmem:[%s18139_s3 + $0x618] sm:$0xff] %vm6256_vm6, %v5832_v59  ;;  %v4169_v16 = vpop.permute.xlu1 %4168  ;;  %v3354_v28 = vsel %vm10887_vm2, %v19451_v13, %v19450_v52  ;;  %v3355_v61 = vsel %vm10891_vm3, %v19451_v13, %v19450_v52  ;;  %v7369_v59 = vld [vmem:[%s18136_s0 + $0x538] sm:$0xff] }
 0x644   :  { %6456 = vst [vmem:[%s18139_s3 + $0x640] sm:$0xff] %v5837_v60  ;;  %6457 = vst.msk [vmem:[%s18139_s3 + $0x648] sm:$0xff] %vm6256_vm6, %v5838_v7  ;;  %v5205_v35 = vsel %vm10901_vm4, %v4169_v16, %v3340_v54  ;;  %v5206_v26 = vsel %vm10905_vm5, %v4169_v16, %v3341_v3  ;;  %v4181_v15 = vpop.permute.xlu0 %4180  ;;  %4424 = vperm.xlu1 %6890, %v7365_v32   ;;  %v7370_v7 = vld [vmem:[%s18136_s0 + $0x550] sm:$0xff]  ;;  %v19453_v3 = vld [vmem:[#allocation88_spill] sm:$0xff] }
 0x645   :  { %v5835_v44 = vadd.f32 %v10909_v38, %v5205_v35  ;;  %v5836_v29 = vadd.f32 %v10911_v5, %v5206_v26  ;;  %v5211_v53 = vsel %vm10901_vm4, %v4181_v15, %v3346_v50  ;;  %v5212_v57 = vsel %vm10905_vm5, %v4181_v15, %v3347_v47  ;;  %4436 = vperm.xlu0 %6891, %v7366_v33   ;;  %v19452_v54 = vld [vmem:[#allocation373_spill] sm:$0xff]  ;;  %v19454_v50 = vld [vmem:[#allocation376_spill] sm:$0xff] }
 0x646   :  { %v5841_v0 = vadd.f32 %v10909_v38, %v5211_v53  ;;  %v5842_v24 = vadd.f32 %v10911_v5, %v5212_v57  ;;  %v3352_v16 = vsel %vm10887_vm2, %v19453_v3, %v19452_v54  ;;  %v3353_v41 = vsel %vm10891_vm3, %v19453_v3, %v19452_v54  ;;  %v19455_v47 = vld [vmem:[#allocation93_spill] sm:$0xff] }
 0x647   :  { %6454 = vst [vmem:[%s18139_s3 + $0x630] sm:$0xff] %v5835_v44  ;;  %6455 = vst.msk [vmem:[%s18139_s3 + $0x638] sm:$0xff] %vm6256_vm6, %v5836_v29  ;;  %v4177_v1 = vpop.permute.xlu1 %4176  ;;  %v3358_v35 = vsel %vm10887_vm2, %v19455_v47, %v19454_v50  ;;  %v3359_v26 = vsel %vm10891_vm3, %v19455_v47, %v19454_v50  ;;  %v7371_v29 = vld [vmem:[%s18136_s0 + $0x548] sm:$0xff] }
 0x648   :  { %6460 = vst [vmem:[%s18139_s3 + $0x660] sm:$0xff] %v5841_v0  ;;  %6461 = vst.msk [vmem:[%s18139_s3 + $0x668] sm:$0xff] %vm6256_vm6, %v5842_v24  ;;  %v5209_v48 = vsel %vm10901_vm4, %v4177_v1, %v3344_v49  ;;  %v5210_v21 = vsel %vm10905_vm5, %v4177_v1, %v3345_v4  ;;  %v4189_v58 = vpop.permute.xlu0 %4188  ;;  %4432 = vperm.xlu1 %6890, %v7367_v34   ;;  %v7372_v24 = vld [vmem:[%s18136_s0 + $0x560] sm:$0xff]  ;;  %v19457_v4 = vld [vmem:[#allocation90_spill] sm:$0xff] }
 0x649   :  { %v5839_v46 = vadd.f32 %v10909_v38, %v5209_v48  ;;  %v5840_v36 = vadd.f32 %v10911_v5, %v5210_v21  ;;  %v5215_v45 = vsel %vm10901_vm4, %v4189_v58, %v3350_v8  ;;  %v5216_v11 = vsel %vm10905_vm5, %v4189_v58, %v3351_v27  ;;  %4444 = vperm.xlu0 %6891, %v7368_v17   ;;  %v19456_v49 = vld [vmem:[#allocation375_spill] sm:$0xff]  ;;  %v19458_v8 = vld [vmem:[#allocation378_spill] sm:$0xff] }
 0x64a   :  { %v5845_v56 = vadd.f32 %v10909_v38, %v5215_v45  ;;  %v5846_v19 = vadd.f32 %v10911_v5, %v5216_v11  ;;  %v3356_v1 = vsel %vm10887_vm2, %v19457_v4, %v19456_v49  ;;  %v3357_v39 = vsel %vm10891_vm3, %v19457_v4, %v19456_v49  ;;  %v19459_v27 = vld [vmem:[#allocation95_spill] sm:$0xff] }
 0x64b   :  { %6458 = vst [vmem:[%s18139_s3 + $0x650] sm:$0xff] %v5839_v46  ;;  %6459 = vst.msk [vmem:[%s18139_s3 + $0x658] sm:$0xff] %vm6256_vm6, %v5840_v36  ;;  %v4185_v20 = vpop.permute.xlu1 %4184  ;;  %v3362_v48 = vsel %vm10887_vm2, %v19459_v27, %v19458_v8  ;;  %v3363_v21 = vsel %vm10891_vm3, %v19459_v27, %v19458_v8  ;;  %v7373_v36 = vld [vmem:[%s18136_s0 + $0x558] sm:$0xff] }
 0x64c   :  { %6464 = vst [vmem:[%s18139_s3 + $0x680] sm:$0xff] %v5845_v56  ;;  %6465 = vst.msk [vmem:[%s18139_s3 + $0x688] sm:$0xff] %vm6256_vm6, %v5846_v19  ;;  %v5213_v25 = vsel %vm10901_vm4, %v4185_v20, %v3348_v62  ;;  %v5214_v31 = vsel %vm10905_vm5, %v4185_v20, %v3349_v6  ;;  %v4197_v42 = vpop.permute.xlu0 %4196  ;;  %4440 = vperm.xlu1 %6890, %v7369_v59   ;;  %v7374_v19 = vld [vmem:[%s18136_s0 + $0x570] sm:$0xff]  ;;  %v19461_v6 = vld [vmem:[#allocation92_spill] sm:$0xff] }
 0x64d   :  { %v5843_v51 = vadd.f32 %v10909_v38, %v5213_v25  ;;  %v5844_v40 = vadd.f32 %v10911_v5, %v5214_v31  ;;  %v5219_v37 = vsel %vm10901_vm4, %v4197_v42, %v3354_v28  ;;  %v5220_v60 = vsel %vm10905_vm5, %v4197_v42, %v3355_v61  ;;  %4452 = vperm.xlu0 %6891, %v7370_v7   ;;  %v19460_v62 = vld [vmem:[#allocation377_spill] sm:$0xff]  ;;  %v19462_v28 = vld [vmem:[#allocation380_spill] sm:$0xff] }
 0x64e   :  { %v5849_v18 = vadd.f32 %v10909_v38, %v5219_v37  ;;  %v5850_v63 = vadd.f32 %v10911_v5, %v5220_v60  ;;  %v3360_v20 = vsel %vm10887_vm2, %v19461_v6, %v19460_v62  ;;  %v3361_v52 = vsel %vm10891_vm3, %v19461_v6, %v19460_v62  ;;  %v19463_v61 = vld [vmem:[#allocation97_spill] sm:$0xff] }
 0x64f   :  { %6462 = vst [vmem:[%s18139_s3 + $0x670] sm:$0xff] %v5843_v51  ;;  %6463 = vst.msk [vmem:[%s18139_s3 + $0x678] sm:$0xff] %vm6256_vm6, %v5844_v40  ;;  %v4193_v23 = vpop.permute.xlu1 %4192  ;;  %v3366_v25 = vsel %vm10887_vm2, %v19463_v61, %v19462_v28  ;;  %v3367_v31 = vsel %vm10891_vm3, %v19463_v61, %v19462_v28  ;;  %v7375_v40 = vld [vmem:[%s18136_s0 + $0x568] sm:$0xff] }
 0x650   :  { %6468 = vst [vmem:[%s18139_s3 + $0x6a0] sm:$0xff] %v5849_v18  ;;  %6469 = vst.msk [vmem:[%s18139_s3 + $0x6a8] sm:$0xff] %vm6256_vm6, %v5850_v63  ;;  %v5217_v15 = vsel %vm10901_vm4, %v4193_v23, %v3352_v16  ;;  %v5218_v32 = vsel %vm10905_vm5, %v4193_v23, %v3353_v41  ;;  %v4205_v44 = vpop.permute.xlu0 %4204  ;;  %4448 = vperm.xlu1 %6890, %v7371_v29   ;;  %v7376_v63 = vld [vmem:[%s18136_s0 + $0x580] sm:$0xff]  ;;  %v19465_v41 = vld [vmem:[#allocation94_spill] sm:$0xff] }
 0x651   :  { %v5847_v53 = vadd.f32 %v10909_v38, %v5217_v15  ;;  %v5848_v57 = vadd.f32 %v10911_v5, %v5218_v32  ;;  %v5223_v33 = vsel %vm10901_vm4, %v4205_v44, %v3358_v35  ;;  %v5224_v0 = vsel %vm10905_vm5, %v4205_v44, %v3359_v26  ;;  %4460 = vperm.xlu0 %6891, %v7372_v24   ;;  %v19464_v16 = vld [vmem:[#allocation379_spill] sm:$0xff]  ;;  %v19466_v35 = vld [vmem:[#allocation382_spill] sm:$0xff] }
 0x652   :  { %v5853_v9 = vadd.f32 %v10909_v38, %v5223_v33  ;;  %v5854_v12 = vadd.f32 %v10911_v5, %v5224_v0  ;;  %v3364_v23 = vsel %vm10887_vm2, %v19465_v41, %v19464_v16  ;;  %v3365_v50 = vsel %vm10891_vm3, %v19465_v41, %v19464_v16  ;;  %v19467_v26 = vld [vmem:[#allocation99_spill] sm:$0xff] }
 0x653   :  { %6466 = vst [vmem:[%s18139_s3 + $0x690] sm:$0xff] %v5847_v53  ;;  %6467 = vst.msk [vmem:[%s18139_s3 + $0x698] sm:$0xff] %vm6256_vm6, %v5848_v57  ;;  %v4201_v10 = vpop.permute.xlu1 %4200  ;;  %v3370_v15 = vsel %vm10887_vm2, %v19467_v26, %v19466_v35  ;;  %v3371_v32 = vsel %vm10891_vm3, %v19467_v26, %v19466_v35  ;;  %v7377_v57 = vld [vmem:[%s18136_s0 + $0x578] sm:$0xff] }
 0x654   :  { %6472 = vst [vmem:[%s18139_s3 + $0x6c0] sm:$0xff] %v5853_v9  ;;  %6473 = vst.msk [vmem:[%s18139_s3 + $0x6c8] sm:$0xff] %vm6256_vm6, %v5854_v12  ;;  %v5221_v58 = vsel %vm10901_vm4, %v4201_v10, %v3356_v1  ;;  %v5222_v34 = vsel %vm10905_vm5, %v4201_v10, %v3357_v39  ;;  %v4213_v46 = vpop.permute.xlu0 %4212  ;;  %4456 = vperm.xlu1 %6890, %v7373_v36   ;;  %v7378_v12 = vld [vmem:[%s18136_s0 + $0x590] sm:$0xff]  ;;  %v19469_v39 = vld [vmem:[#allocation96_spill] sm:$0xff] }
 0x655   :  { %v5851_v45 = vadd.f32 %v10909_v38, %v5221_v58  ;;  %v5852_v11 = vadd.f32 %v10911_v5, %v5222_v34  ;;  %v5227_v17 = vsel %vm10901_vm4, %v4213_v46, %v3362_v48  ;;  %v5228_v56 = vsel %vm10905_vm5, %v4213_v46, %v3363_v21  ;;  %4468 = vperm.xlu0 %6891, %v7374_v19   ;;  %v19468_v1 = vld [vmem:[#allocation381_spill] sm:$0xff]  ;;  %v19470_v48 = vld [vmem:[#allocation384_spill] sm:$0xff] }
 0x656   :  { %v5857_v2 = vadd.f32 %v10909_v38, %v5227_v17  ;;  %v5858_v43 = vadd.f32 %v10911_v5, %v5228_v56  ;;  %v3368_v10 = vsel %vm10887_vm2, %v19469_v39, %v19468_v1  ;;  %v3369_v8 = vsel %vm10891_vm3, %v19469_v39, %v19468_v1  ;;  %v19471_v21 = vld [vmem:[#allocation101_spill] sm:$0xff] }
 0x657   :  { %6470 = vst [vmem:[%s18139_s3 + $0x6b0] sm:$0xff] %v5851_v45  ;;  %6471 = vst.msk [vmem:[%s18139_s3 + $0x6b8] sm:$0xff] %vm6256_vm6, %v5852_v11  ;;  %v4209_v13 = vpop.permute.xlu1 %4208  ;;  %v3374_v58 = vsel %vm10887_vm2, %v19471_v21, %v19470_v48  ;;  %v3375_v34 = vsel %vm10891_vm3, %v19471_v21, %v19470_v48  ;;  %v7379_v11 = vld [vmem:[%s18136_s0 + $0x588] sm:$0xff] }
 0x658   :  { %6476 = vst [vmem:[%s18139_s3 + $0x6e0] sm:$0xff] %v5857_v2  ;;  %6477 = vst.msk [vmem:[%s18139_s3 + $0x6e8] sm:$0xff] %vm6256_vm6, %v5858_v43  ;;  %v5225_v42 = vsel %vm10901_vm4, %v4209_v13, %v3360_v20  ;;  %v5226_v59 = vsel %vm10905_vm5, %v4209_v13, %v3361_v52  ;;  %v4221_v51 = vpop.permute.xlu0 %4220  ;;  %4464 = vperm.xlu1 %6890, %v7375_v40   ;;  %v7380_v43 = vld [vmem:[%s18136_s0 + $0x5a0] sm:$0xff]  ;;  %v19473_v52 = vld [vmem:[#allocation98_spill] sm:$0xff] }
 0x659   :  { %v5855_v37 = vadd.f32 %v10909_v38, %v5225_v42  ;;  %v5856_v60 = vadd.f32 %v10911_v5, %v5226_v59  ;;  %v5231_v7 = vsel %vm10901_vm4, %v4221_v51, %v3366_v25  ;;  %v5232_v18 = vsel %vm10905_vm5, %v4221_v51, %v3367_v31  ;;  %4476 = vperm.xlu0 %6891, %v7376_v63   ;;  %v19472_v20 = vld [vmem:[#allocation383_spill] sm:$0xff]  ;;  %v19474_v25 = vld [vmem:[#allocation386_spill] sm:$0xff] }
 0x65a   :  { %v5861_v54 = vadd.f32 %v10909_v38, %v5231_v7  ;;  %v5862_v3 = vadd.f32 %v10911_v5, %v5232_v18  ;;  %v3372_v13 = vsel %vm10887_vm2, %v19473_v52, %v19472_v20  ;;  %v3373_v28 = vsel %vm10891_vm3, %v19473_v52, %v19472_v20  ;;  %v19475_v31 = vld [vmem:[#allocation103_spill] sm:$0xff] }
 0x65b   :  { %6474 = vst [vmem:[%s18139_s3 + $0x6d0] sm:$0xff] %v5855_v37  ;;  %6475 = vst.msk [vmem:[%s18139_s3 + $0x6d8] sm:$0xff] %vm6256_vm6, %v5856_v60  ;;  %v4217_v47 = vpop.permute.xlu1 %4216  ;;  %v3378_v42 = vsel %vm10887_vm2, %v19475_v31, %v19474_v25  ;;  %v3379_v59 = vsel %vm10891_vm3, %v19475_v31, %v19474_v25  ;;  %v7381_v60 = vld [vmem:[%s18136_s0 + $0x598] sm:$0xff] }
 0x65c   :  { %6480 = vst [vmem:[%s18139_s3 + $0x700] sm:$0xff] %v5861_v54  ;;  %6481 = vst.msk [vmem:[%s18139_s3 + $0x708] sm:$0xff] %vm6256_vm6, %v5862_v3  ;;  %v5229_v44 = vsel %vm10901_vm4, %v4217_v47, %v3364_v23  ;;  %v5230_v29 = vsel %vm10905_vm5, %v4217_v47, %v3365_v50  ;;  %v4229_v53 = vpop.permute.xlu0 %4228  ;;  %4472 = vperm.xlu1 %6890, %v7377_v57   ;;  %v7382_v3 = vld [vmem:[%s18136_s0 + $0x5b0] sm:$0xff]  ;;  %v19477_v50 = vld [vmem:[#allocation100_spill] sm:$0xff] }
 0x65d   :  { %v5859_v33 = vadd.f32 %v10909_v38, %v5229_v44  ;;  %v5860_v0 = vadd.f32 %v10911_v5, %v5230_v29  ;;  %v5235_v24 = vsel %vm10901_vm4, %v4229_v53, %v3370_v15  ;;  %v5236_v9 = vsel %vm10905_vm5, %v4229_v53, %v3371_v32  ;;  %4484 = vperm.xlu0 %6891, %v7378_v12   ;;  %v19476_v23 = vld [vmem:[#allocation385_spill] sm:$0xff]  ;;  %v19478_v15 = vld [vmem:[#allocation388_spill] sm:$0xff] }
 0x65e   :  { %v5865_v49 = vadd.f32 %v10909_v38, %v5235_v24  ;;  %v5866_v4 = vadd.f32 %v10911_v5, %v5236_v9  ;;  %v3376_v47 = vsel %vm10887_vm2, %v19477_v50, %v19476_v23  ;;  %v3377_v35 = vsel %vm10891_vm3, %v19477_v50, %v19476_v23  ;;  %v19479_v32 = vld [vmem:[#allocation105_spill] sm:$0xff] }
 0x65f   :  { %6478 = vst [vmem:[%s18139_s3 + $0x6f0] sm:$0xff] %v5859_v33  ;;  %6479 = vst.msk [vmem:[%s18139_s3 + $0x6f8] sm:$0xff] %vm6256_vm6, %v5860_v0  ;;  %v4225_v27 = vpop.permute.xlu1 %4224  ;;  %v3382_v44 = vsel %vm10887_vm2, %v19479_v32, %v19478_v15  ;;  %v3383_v29 = vsel %vm10891_vm3, %v19479_v32, %v19478_v15  ;;  %v7383_v0 = vld [vmem:[%s18136_s0 + $0x5a8] sm:$0xff] }
 0x660   :  { %6484 = vst [vmem:[%s18139_s3 + $0x720] sm:$0xff] %v5865_v49  ;;  %6485 = vst.msk [vmem:[%s18139_s3 + $0x728] sm:$0xff] %vm6256_vm6, %v5866_v4  ;;  %v5233_v46 = vsel %vm10901_vm4, %v4225_v27, %v3368_v10  ;;  %v5234_v36 = vsel %vm10905_vm5, %v4225_v27, %v3369_v8  ;;  %v4237_v45 = vpop.permute.xlu0 %4236  ;;  %4480 = vperm.xlu1 %6890, %v7379_v11   ;;  %v7384_v4 = vld [vmem:[%s18136_s0 + $0x5c0] sm:$0xff]  ;;  %v19481_v8 = vld [vmem:[#allocation102_spill] sm:$0xff] }
 0x661   :  { %v5863_v17 = vadd.f32 %v10909_v38, %v5233_v46  ;;  %v5864_v56 = vadd.f32 %v10911_v5, %v5234_v36  ;;  %v5239_v19 = vsel %vm10901_vm4, %v4237_v45, %v3374_v58  ;;  %v5240_v2 = vsel %vm10905_vm5, %v4237_v45, %v3375_v34  ;;  %4492 = vperm.xlu0 %6891, %v7380_v43   ;;  %v19480_v10 = vld [vmem:[#allocation387_spill] sm:$0xff]  ;;  %v19482_v58 = vld [vmem:[#allocation390_spill] sm:$0xff] }
 0x662   :  { %v5869_v62 = vadd.f32 %v10909_v38, %v5239_v19  ;;  %v5870_v6 = vadd.f32 %v10911_v5, %v5240_v2  ;;  %v3380_v27 = vsel %vm10887_vm2, %v19481_v8, %v19480_v10  ;;  %v3381_v48 = vsel %vm10891_vm3, %v19481_v8, %v19480_v10  ;;  %v19483_v34 = vld [vmem:[#allocation107_spill] sm:$0xff] }
 0x663   :  { %6482 = vst [vmem:[%s18139_s3 + $0x710] sm:$0xff] %v5863_v17  ;;  %6483 = vst.msk [vmem:[%s18139_s3 + $0x718] sm:$0xff] %vm6256_vm6, %v5864_v56  ;;  %v4233_v61 = vpop.permute.xlu1 %4232  ;;  %v3386_v46 = vsel %vm10887_vm2, %v19483_v34, %v19482_v58  ;;  %v3387_v36 = vsel %vm10891_vm3, %v19483_v34, %v19482_v58  ;;  %v7385_v56 = vld [vmem:[%s18136_s0 + $0x5b8] sm:$0xff] }
 0x664   :  { %6488 = vst [vmem:[%s18139_s3 + $0x740] sm:$0xff] %v5869_v62  ;;  %6489 = vst.msk [vmem:[%s18139_s3 + $0x748] sm:$0xff] %vm6256_vm6, %v5870_v6  ;;  %v5237_v51 = vsel %vm10901_vm4, %v4233_v61, %v3372_v13  ;;  %v5238_v40 = vsel %vm10905_vm5, %v4233_v61, %v3373_v28  ;;  %v4245_v37 = vpop.permute.xlu0 %4244  ;;  %4488 = vperm.xlu1 %6890, %v7381_v60   ;;  %v7386_v6 = vld [vmem:[%s18136_s0 + $0x5d0] sm:$0xff]  ;;  %v19485_v28 = vld [vmem:[#allocation104_spill] sm:$0xff] }
 0x665   :  { %v5867_v7 = vadd.f32 %v10909_v38, %v5237_v51  ;;  %v5868_v18 = vadd.f32 %v10911_v5, %v5238_v40  ;;  %v5243_v63 = vsel %vm10901_vm4, %v4245_v37, %v3378_v42  ;;  %v5244_v54 = vsel %vm10905_vm5, %v4245_v37, %v3379_v59  ;;  %4500 = vperm.xlu0 %6891, %v7382_v3   ;;  %v19484_v13 = vld [vmem:[#allocation389_spill] sm:$0xff]  ;;  %v19486_v42 = vld [vmem:[#allocation392_spill] sm:$0xff] }
 0x666   :  { %v5873_v16 = vadd.f32 %v10909_v38, %v5243_v63  ;;  %v5874_v41 = vadd.f32 %v10911_v5, %v5244_v54  ;;  %v3384_v61 = vsel %vm10887_vm2, %v19485_v28, %v19484_v13  ;;  %v3385_v25 = vsel %vm10891_vm3, %v19485_v28, %v19484_v13  ;;  %v19487_v59 = vld [vmem:[#allocation109_spill] sm:$0xff] }
 0x667   :  { %6486 = vst [vmem:[%s18139_s3 + $0x730] sm:$0xff] %v5867_v7  ;;  %6487 = vst.msk [vmem:[%s18139_s3 + $0x738] sm:$0xff] %vm6256_vm6, %v5868_v18  ;;  %v4241_v26 = vpop.permute.xlu1 %4240  ;;  %v3390_v51 = vsel %vm10887_vm2, %v19487_v59, %v19486_v42  ;;  %v3391_v40 = vsel %vm10891_vm3, %v19487_v59, %v19486_v42  ;;  %v7387_v18 = vld [vmem:[%s18136_s0 + $0x5c8] sm:$0xff] }
 0x668   :  { %6492 = vst [vmem:[%s18139_s3 + $0x760] sm:$0xff] %v5873_v16  ;;  %6493 = vst.msk [vmem:[%s18139_s3 + $0x768] sm:$0xff] %vm6256_vm6, %v5874_v41  ;;  %v5241_v53 = vsel %vm10901_vm4, %v4241_v26, %v3376_v47  ;;  %v5242_v57 = vsel %vm10905_vm5, %v4241_v26, %v3377_v35  ;;  %v4253_v33 = vpop.permute.xlu0 %4252  ;;  %4496 = vperm.xlu1 %6890, %v7383_v0   ;;  %v7388_v41 = vld [vmem:[%s18136_s0 + $0x5e0] sm:$0xff]  ;;  %v19489_v35 = vld [vmem:[#allocation106_spill] sm:$0xff] }
 0x669   :  { %v5871_v24 = vadd.f32 %v10909_v38, %v5241_v53  ;;  %v5872_v9 = vadd.f32 %v10911_v5, %v5242_v57  ;;  %v5247_v12 = vsel %vm10901_vm4, %v4253_v33, %v3382_v44  ;;  %v5248_v49 = vsel %vm10905_vm5, %v4253_v33, %v3383_v29  ;;  %4508 = vperm.xlu0 %6891, %v7384_v4   ;;  %v19488_v47 = vld [vmem:[#allocation391_spill] sm:$0xff]  ;;  %v19490_v44 = vld [vmem:[#allocation394_spill] sm:$0xff] }
 0x66a   :  { %v5877_v1 = vadd.f32 %v10909_v38, %v5247_v12  ;;  %v5878_v39 = vadd.f32 %v10911_v5, %v5248_v49  ;;  %v3388_v26 = vsel %vm10887_vm2, %v19489_v35, %v19488_v47  ;;  %v3389_v15 = vsel %vm10891_vm3, %v19489_v35, %v19488_v47  ;;  %v19491_v29 = vld [vmem:[#allocation111_spill] sm:$0xff] }
 0x66b   :  { %6490 = vst [vmem:[%s18139_s3 + $0x750] sm:$0xff] %v5871_v24  ;;  %6491 = vst.msk [vmem:[%s18139_s3 + $0x758] sm:$0xff] %vm6256_vm6, %v5872_v9  ;;  %v4249_v21 = vpop.permute.xlu1 %4248  ;;  %v3394_v53 = vsel %vm10887_vm2, %v19491_v29, %v19490_v44  ;;  %v3395_v57 = vsel %vm10891_vm3, %v19491_v29, %v19490_v44  ;;  %v7389_v9 = vld [vmem:[%s18136_s0 + $0x5d8] sm:$0xff] }
 0x66c   :  { %6496 = vst [vmem:[%s18139_s3 + $0x780] sm:$0xff] %v5877_v1  ;;  %6497 = vst.msk [vmem:[%s18139_s3 + $0x788] sm:$0xff] %vm6256_vm6, %v5878_v39  ;;  %v5245_v45 = vsel %vm10901_vm4, %v4249_v21, %v3380_v27  ;;  %v5246_v11 = vsel %vm10905_vm5, %v4249_v21, %v3381_v48  ;;  %v4261_v17 = vpop.permute.xlu0 %4260  ;;  %4504 = vperm.xlu1 %6890, %v7385_v56   ;;  %v7390_v39 = vld [vmem:[%s18136_s0 + $0x5f0] sm:$0xff]  ;;  %v19493_v48 = vld [vmem:[#allocation108_spill] sm:$0xff] }
 0x66d   :  { %v5875_v19 = vadd.f32 %v10909_v38, %v5245_v45  ;;  %v5876_v2 = vadd.f32 %v10911_v5, %v5246_v11  ;;  %v5251_v43 = vsel %vm10901_vm4, %v4261_v17, %v3386_v46  ;;  %v5252_v62 = vsel %vm10905_vm5, %v4261_v17, %v3387_v36  ;;  %4516 = vperm.xlu0 %6891, %v7386_v6   ;;  %v19492_v27 = vld [vmem:[#allocation393_spill] sm:$0xff]  ;;  %v19494_v46 = vld [vmem:[#allocation396_spill] sm:$0xff] }
 0x66e   :  { %v5881_v20 = vadd.f32 %v10909_v38, %v5251_v43  ;;  %v5882_v52 = vadd.f32 %v10911_v5, %v5252_v62  ;;  %v3392_v21 = vsel %vm10887_vm2, %v19493_v48, %v19492_v27  ;;  %v3393_v58 = vsel %vm10891_vm3, %v19493_v48, %v19492_v27  ;;  %v19495_v36 = vld [vmem:[#allocation113_spill] sm:$0xff] }
 0x66f   :  { %6494 = vst [vmem:[%s18139_s3 + $0x770] sm:$0xff] %v5875_v19  ;;  %6495 = vst.msk [vmem:[%s18139_s3 + $0x778] sm:$0xff] %vm6256_vm6, %v5876_v2  ;;  %v4257_v31 = vpop.permute.xlu1 %4256  ;;  %v3398_v45 = vsel %vm10887_vm2, %v19495_v36, %v19494_v46  ;;  %v3399_v11 = vsel %vm10891_vm3, %v19495_v36, %v19494_v46  ;;  %v7391_v2 = vld [vmem:[%s18136_s0 + $0x5e8] sm:$0xff] }
 0x670   :  { %6500 = vst [vmem:[%s18139_s3 + $0x7a0] sm:$0xff] %v5881_v20  ;;  %6501 = vst.msk [vmem:[%s18139_s3 + $0x7a8] sm:$0xff] %vm6256_vm6, %v5882_v52  ;;  %v5249_v37 = vsel %vm10901_vm4, %v4257_v31, %v3384_v61  ;;  %v5250_v60 = vsel %vm10905_vm5, %v4257_v31, %v3385_v25  ;;  %v4269_v7 = vpop.permute.xlu0 %4268  ;;  %4512 = vperm.xlu1 %6890, %v7387_v18   ;;  %v7392_v52 = vld [vmem:[%s18136_s0 + $0x600] sm:$0xff]  ;;  %v19497_v25 = vld [vmem:[#allocation110_spill] sm:$0xff] }
 0x671   :  { %v5879_v63 = vadd.f32 %v10909_v38, %v5249_v37  ;;  %v5880_v54 = vadd.f32 %v10911_v5, %v5250_v60  ;;  %v5255_v3 = vsel %vm10901_vm4, %v4269_v7, %v3390_v51  ;;  %v5256_v16 = vsel %vm10905_vm5, %v4269_v7, %v3391_v40  ;;  %4524 = vperm.xlu0 %6891, %v7388_v41   ;;  %v19496_v61 = vld [vmem:[#allocation395_spill] sm:$0xff]  ;;  %v19498_v51 = vld [vmem:[#allocation398_spill] sm:$0xff] }
 0x672   :  { %v5885_v23 = vadd.f32 %v10909_v38, %v5255_v3  ;;  %v5886_v50 = vadd.f32 %v10911_v5, %v5256_v16  ;;  %v3396_v31 = vsel %vm10887_vm2, %v19497_v25, %v19496_v61  ;;  %v3397_v42 = vsel %vm10891_vm3, %v19497_v25, %v19496_v61  ;;  %v19499_v40 = vld [vmem:[#allocation115_spill] sm:$0xff] }
 0x673   :  { %6498 = vst [vmem:[%s18139_s3 + $0x790] sm:$0xff] %v5879_v63  ;;  %6499 = vst.msk [vmem:[%s18139_s3 + $0x798] sm:$0xff] %vm6256_vm6, %v5880_v54  ;;  %v4265_v32 = vpop.permute.xlu1 %4264  ;;  %v3402_v37 = vsel %vm10887_vm2, %v19499_v40, %v19498_v51  ;;  %v3403_v60 = vsel %vm10891_vm3, %v19499_v40, %v19498_v51  ;;  %v7393_v54 = vld [vmem:[%s18136_s0 + $0x5f8] sm:$0xff] }
 0x674   :  { %6504 = vst [vmem:[%s18139_s3 + $0x7c0] sm:$0xff] %v5885_v23  ;;  %6505 = vst.msk [vmem:[%s18139_s3 + $0x7c8] sm:$0xff] %vm6256_vm6, %v5886_v50  ;;  %v5253_v33 = vsel %vm10901_vm4, %v4265_v32, %v3388_v26  ;;  %v5254_v0 = vsel %vm10905_vm5, %v4265_v32, %v3389_v15  ;;  %v4277_v24 = vpop.permute.xlu0 %4276  ;;  %4520 = vperm.xlu1 %6890, %v7389_v9   ;;  %v7394_v50 = vld [vmem:[%s18136_s0 + $0x610] sm:$0xff]  ;;  %v19501_v15 = vld [vmem:[#allocation112_spill] sm:$0xff] }
 0x675   :  { %v5883_v12 = vadd.f32 %v10909_v38, %v5253_v33  ;;  %v5884_v49 = vadd.f32 %v10911_v5, %v5254_v0  ;;  %v5259_v4 = vsel %vm10901_vm4, %v4277_v24, %v3394_v53  ;;  %v5260_v1 = vsel %vm10905_vm5, %v4277_v24, %v3395_v57  ;;  %4532 = vperm.xlu0 %6891, %v7390_v39   ;;  %v19500_v26 = vld [vmem:[#allocation397_spill] sm:$0xff]  ;;  %v19502_v53 = vld [vmem:[#allocation400_spill] sm:$0xff] }
 0x676   :  { %v5889_v10 = vadd.f32 %v10909_v38, %v5259_v4  ;;  %v5890_v8 = vadd.f32 %v10911_v5, %v5260_v1  ;;  %v3400_v32 = vsel %vm10887_vm2, %v19501_v15, %v19500_v26  ;;  %v3401_v44 = vsel %vm10891_vm3, %v19501_v15, %v19500_v26  ;;  %v19503_v57 = vld [vmem:[#allocation117_spill] sm:$0xff] }
 0x677   :  { %6502 = vst [vmem:[%s18139_s3 + $0x7b0] sm:$0xff] %v5883_v12  ;;  %6503 = vst.msk [vmem:[%s18139_s3 + $0x7b8] sm:$0xff] %vm6256_vm6, %v5884_v49  ;;  %v4273_v34 = vpop.permute.xlu1 %4272  ;;  %v3406_v33 = vsel %vm10887_vm2, %v19503_v57, %v19502_v53  ;;  %v3407_v0 = vsel %vm10891_vm3, %v19503_v57, %v19502_v53  ;;  %v7395_v49 = vld [vmem:[%s18136_s0 + $0x608] sm:$0xff] }
 0x678   :  { %6508 = vst [vmem:[%s18139_s3 + $0x7e0] sm:$0xff] %v5889_v10  ;;  %6509 = vst.msk [vmem:[%s18139_s3 + $0x7e8] sm:$0xff] %vm6256_vm6, %v5890_v8  ;;  %v5257_v17 = vsel %vm10901_vm4, %v4273_v34, %v3392_v21  ;;  %v5258_v56 = vsel %vm10905_vm5, %v4273_v34, %v3393_v58  ;;  %v4285_v19 = vpop.permute.xlu0 %4284  ;;  %4528 = vperm.xlu1 %6890, %v7391_v2   ;;  %v7396_v8 = vld [vmem:[%s18136_s0 + $0x620] sm:$0xff]  ;;  %v19505_v58 = vld [vmem:[#allocation114_spill] sm:$0xff] }
 0x679   :  { %v5887_v43 = vadd.f32 %v10909_v38, %v5257_v17  ;;  %v5888_v62 = vadd.f32 %v10911_v5, %v5258_v56  ;;  %v5263_v6 = vsel %vm10901_vm4, %v4285_v19, %v3398_v45  ;;  %v5264_v20 = vsel %vm10905_vm5, %v4285_v19, %v3399_v11  ;;  %4540 = vperm.xlu0 %6891, %v7392_v52   ;;  %v19504_v21 = vld [vmem:[#allocation399_spill] sm:$0xff]  ;;  %v19506_v45 = vld [vmem:[#allocation402_spill] sm:$0xff] }
 0x67a   :  { %v5893_v13 = vadd.f32 %v10909_v38, %v5263_v6  ;;  %v5894_v28 = vadd.f32 %v10911_v5, %v5264_v20  ;;  %v3404_v34 = vsel %vm10887_vm2, %v19505_v58, %v19504_v21  ;;  %v3405_v46 = vsel %vm10891_vm3, %v19505_v58, %v19504_v21  ;;  %v19507_v11 = vld [vmem:[#allocation119_spill] sm:$0xff] }
 0x67b   :  { %6506 = vst [vmem:[%s18139_s3 + $0x7d0] sm:$0xff] %v5887_v43  ;;  %6507 = vst.msk [vmem:[%s18139_s3 + $0x7d8] sm:$0xff] %vm6256_vm6, %v5888_v62  ;;  %v4281_v59 = vpop.permute.xlu1 %4280  ;;  %v3410_v17 = vsel %vm10887_vm2, %v19507_v11, %v19506_v45  ;;  %v3411_v56 = vsel %vm10891_vm3, %v19507_v11, %v19506_v45  ;;  %v7397_v62 = vld [vmem:[%s18136_s0 + $0x618] sm:$0xff] }
 0x67c   :  { %6512 = vst [vmem:[%s18139_s3 + $0x800] sm:$0xff] %v5893_v13  ;;  %6513 = vst.msk [vmem:[%s18139_s3 + $0x808] sm:$0xff] %vm6256_vm6, %v5894_v28  ;;  %v5261_v7 = vsel %vm10901_vm4, %v4281_v59, %v3396_v31  ;;  %v5262_v18 = vsel %vm10905_vm5, %v4281_v59, %v3397_v42  ;;  %v4293_v63 = vpop.permute.xlu0 %4292  ;;  %4536 = vperm.xlu1 %6890, %v7393_v54   ;;  %v7398_v28 = vld [vmem:[%s18136_s0 + $0x630] sm:$0xff]  ;;  %v19509_v42 = vld [vmem:[#allocation116_spill] sm:$0xff] }
 0x67d   :  { %v5891_v3 = vadd.f32 %v10909_v38, %v5261_v7  ;;  %v5892_v16 = vadd.f32 %v10911_v5, %v5262_v18  ;;  %v5267_v41 = vsel %vm10901_vm4, %v4293_v63, %v3402_v37  ;;  %v5268_v23 = vsel %vm10905_vm5, %v4293_v63, %v3403_v60  ;;  %4548 = vperm.xlu0 %6891, %v7394_v50   ;;  %v19508_v31 = vld [vmem:[#allocation401_spill] sm:$0xff]  ;;  %v19510_v37 = vld [vmem:[#allocation404_spill] sm:$0xff] }
 0x67e   :  { %v5897_v47 = vadd.f32 %v10909_v38, %v5267_v41  ;;  %v5898_v35 = vadd.f32 %v10911_v5, %v5268_v23  ;;  %v3408_v59 = vsel %vm10887_vm2, %v19509_v42, %v19508_v31  ;;  %v3409_v51 = vsel %vm10891_vm3, %v19509_v42, %v19508_v31  ;;  %v19511_v60 = vld [vmem:[#allocation121_spill] sm:$0xff] }
 0x67f   :  { %6510 = vst [vmem:[%s18139_s3 + $0x7f0] sm:$0xff] %v5891_v3  ;;  %6511 = vst.msk [vmem:[%s18139_s3 + $0x7f8] sm:$0xff] %vm6256_vm6, %v5892_v16  ;;  %v4289_v29 = vpop.permute.xlu1 %4288  ;;  %v3414_v7 = vsel %vm10887_vm2, %v19511_v60, %v19510_v37  ;;  %v3415_v18 = vsel %vm10891_vm3, %v19511_v60, %v19510_v37  ;;  %v7399_v16 = vld [vmem:[%s18136_s0 + $0x628] sm:$0xff] }
 0x680   :  { %6516 = vst [vmem:[%s18139_s3 + $0x820] sm:$0xff] %v5897_v47  ;;  %6517 = vst.msk [vmem:[%s18139_s3 + $0x828] sm:$0xff] %vm6256_vm6, %v5898_v35  ;;  %v5265_v24 = vsel %vm10901_vm4, %v4289_v29, %v3400_v32  ;;  %v5266_v9 = vsel %vm10905_vm5, %v4289_v29, %v3401_v44  ;;  %v4301_v12 = vpop.permute.xlu0 %4300  ;;  %4544 = vperm.xlu1 %6890, %v7395_v49   ;;  %v7400_v35 = vld [vmem:[%s18136_s0 + $0x640] sm:$0xff]  ;;  %v19513_v44 = vld [vmem:[#allocation118_spill] sm:$0xff] }
 0x681   :  { %v5895_v4 = vadd.f32 %v10909_v38, %v5265_v24  ;;  %v5896_v1 = vadd.f32 %v10911_v5, %v5266_v9  ;;  %v5271_v39 = vsel %vm10901_vm4, %v4301_v12, %v3406_v33  ;;  %v5272_v10 = vsel %vm10905_vm5, %v4301_v12, %v3407_v0  ;;  %4556 = vperm.xlu0 %6891, %v7396_v8   ;;  %v19512_v32 = vld [vmem:[#allocation403_spill] sm:$0xff]  ;;  %v19514_v33 = vld [vmem:[#allocation406_spill] sm:$0xff] }
 0x682   :  { %v5901_v27 = vadd.f32 %v10909_v38, %v5271_v39  ;;  %v5902_v48 = vadd.f32 %v10911_v5, %v5272_v10  ;;  %v3412_v29 = vsel %vm10887_vm2, %v19513_v44, %v19512_v32  ;;  %v3413_v53 = vsel %vm10891_vm3, %v19513_v44, %v19512_v32  ;;  %v19515_v0 = vld [vmem:[#allocation123_spill] sm:$0xff] }
 0x683   :  { %6514 = vst [vmem:[%s18139_s3 + $0x810] sm:$0xff] %v5895_v4  ;;  %6515 = vst.msk [vmem:[%s18139_s3 + $0x818] sm:$0xff] %vm6256_vm6, %v5896_v1  ;;  %v4297_v36 = vpop.permute.xlu1 %4296  ;;  %v3418_v24 = vsel %vm10887_vm2, %v19515_v0, %v19514_v33  ;;  %v3419_v9 = vsel %vm10891_vm3, %v19515_v0, %v19514_v33  ;;  %v7401_v1 = vld [vmem:[%s18136_s0 + $0x638] sm:$0xff] }
 0x684   :  { %6520 = vst [vmem:[%s18139_s3 + $0x840] sm:$0xff] %v5901_v27  ;;  %6521 = vst.msk [vmem:[%s18139_s3 + $0x848] sm:$0xff] %vm6256_vm6, %v5902_v48  ;;  %v5269_v19 = vsel %vm10901_vm4, %v4297_v36, %v3404_v34  ;;  %v5270_v2 = vsel %vm10905_vm5, %v4297_v36, %v3405_v46  ;;  %v4309_v43 = vpop.permute.xlu0 %4308  ;;  %4552 = vperm.xlu1 %6890, %v7397_v62   ;;  %v7402_v48 = vld [vmem:[%s18136_s0 + $0x650] sm:$0xff]  ;;  %v19517_v46 = vld [vmem:[#allocation120_spill] sm:$0xff] }
 0x685   :  { %v5899_v6 = vadd.f32 %v10909_v38, %v5269_v19  ;;  %v5900_v20 = vadd.f32 %v10911_v5, %v5270_v2  ;;  %v5275_v52 = vsel %vm10901_vm4, %v4309_v43, %v3410_v17  ;;  %v5276_v13 = vsel %vm10905_vm5, %v4309_v43, %v3411_v56  ;;  %4564 = vperm.xlu0 %6891, %v7398_v28   ;;  %v19516_v34 = vld [vmem:[#allocation405_spill] sm:$0xff]  ;;  %v19518_v17 = vld [vmem:[#allocation408_spill] sm:$0xff] }
 0x686   :  { %v5905_v61 = vadd.f32 %v10909_v38, %v5275_v52  ;;  %v5906_v25 = vadd.f32 %v10911_v5, %v5276_v13  ;;  %v3416_v36 = vsel %vm10887_vm2, %v19517_v46, %v19516_v34  ;;  %v3417_v45 = vsel %vm10891_vm3, %v19517_v46, %v19516_v34  ;;  %v19519_v56 = vld [vmem:[#allocation125_spill] sm:$0xff] }
 0x687   :  { %6518 = vst [vmem:[%s18139_s3 + $0x830] sm:$0xff] %v5899_v6  ;;  %6519 = vst.msk [vmem:[%s18139_s3 + $0x838] sm:$0xff] %vm6256_vm6, %v5900_v20  ;;  %v4305_v40 = vpop.permute.xlu1 %4304  ;;  %v3422_v19 = vsel %vm10887_vm2, %v19519_v56, %v19518_v17  ;;  %v3423_v2 = vsel %vm10891_vm3, %v19519_v56, %v19518_v17  ;;  %v7403_v20 = vld [vmem:[%s18136_s0 + $0x648] sm:$0xff] }
 0x688   :  { %6524 = vst [vmem:[%s18139_s3 + $0x860] sm:$0xff] %v5905_v61  ;;  %6525 = vst.msk [vmem:[%s18139_s3 + $0x868] sm:$0xff] %vm6256_vm6, %v5906_v25  ;;  %v5273_v63 = vsel %vm10901_vm4, %v4305_v40, %v3408_v59  ;;  %v5274_v54 = vsel %vm10905_vm5, %v4305_v40, %v3409_v51  ;;  %v4317_v3 = vpop.permute.xlu0 %4316  ;;  %4560 = vperm.xlu1 %6890, %v7399_v16   ;;  %v7404_v25 = vld [vmem:[%s18136_s0 + $0x660] sm:$0xff]  ;;  %v19521_v51 = vld [vmem:[#allocation122_spill] sm:$0xff] }
 0x689   :  { %v5903_v41 = vadd.f32 %v10909_v38, %v5273_v63  ;;  %v5904_v23 = vadd.f32 %v10911_v5, %v5274_v54  ;;  %v5279_v50 = vsel %vm10901_vm4, %v4317_v3, %v3414_v7  ;;  %v5280_v47 = vsel %vm10905_vm5, %v4317_v3, %v3415_v18  ;;  %4572 = vperm.xlu0 %6891, %v7400_v35   ;;  %v19520_v59 = vld [vmem:[#allocation407_spill] sm:$0xff]  ;;  %v19522_v7 = vld [vmem:[#allocation410_spill] sm:$0xff] }
 0x68a   :  { %v5909_v26 = vadd.f32 %v10909_v38, %v5279_v50  ;;  %v5910_v15 = vadd.f32 %v10911_v5, %v5280_v47  ;;  %v3420_v40 = vsel %vm10887_vm2, %v19521_v51, %v19520_v59  ;;  %v3421_v37 = vsel %vm10891_vm3, %v19521_v51, %v19520_v59  ;;  %v19523_v18 = vld [vmem:[#allocation127_spill] sm:$0xff] }
 0x68b   :  { %6522 = vst [vmem:[%s18139_s3 + $0x850] sm:$0xff] %v5903_v41  ;;  %6523 = vst.msk [vmem:[%s18139_s3 + $0x858] sm:$0xff] %vm6256_vm6, %v5904_v23  ;;  %v4313_v57 = vpop.permute.xlu1 %4312  ;;  %v3426_v63 = vsel %vm10887_vm2, %v19523_v18, %v19522_v7  ;;  %v3427_v54 = vsel %vm10891_vm3, %v19523_v18, %v19522_v7  ;;  %v7405_v23 = vld [vmem:[%s18136_s0 + $0x658] sm:$0xff] }
 0x68c   :  { %6528 = vst [vmem:[%s18139_s3 + $0x880] sm:$0xff] %v5909_v26  ;;  %6529 = vst.msk [vmem:[%s18139_s3 + $0x888] sm:$0xff] %vm6256_vm6, %v5910_v15  ;;  %v5277_v12 = vsel %vm10901_vm4, %v4313_v57, %v3412_v29  ;;  %v5278_v49 = vsel %vm10905_vm5, %v4313_v57, %v3413_v53  ;;  %v4325_v4 = vpop.permute.xlu0 %4324  ;;  %4568 = vperm.xlu1 %6890, %v7401_v1   ;;  %v7406_v15 = vld [vmem:[%s18136_s0 + $0x670] sm:$0xff]  ;;  %v19525_v53 = vld [vmem:[#allocation124_spill] sm:$0xff] }
 0x68d   :  { %v5907_v39 = vadd.f32 %v10909_v38, %v5277_v12  ;;  %v5908_v10 = vadd.f32 %v10911_v5, %v5278_v49  ;;  %v5283_v8 = vsel %vm10901_vm4, %v4325_v4, %v3418_v24  ;;  %v5284_v27 = vsel %vm10905_vm5, %v4325_v4, %v3419_v9  ;;  %4580 = vperm.xlu0 %6891, %v7402_v48   ;;  %v19524_v29 = vld [vmem:[#allocation409_spill] sm:$0xff]  ;;  %v19526_v24 = vld [vmem:[#allocation412_spill] sm:$0xff] }
 0x68e   :  { %v5913_v21 = vadd.f32 %v10909_v38, %v5283_v8  ;;  %v5914_v58 = vadd.f32 %v10911_v5, %v5284_v27  ;;  %v3424_v57 = vsel %vm10887_vm2, %v19525_v53, %v19524_v29  ;;  %v3425_v33 = vsel %vm10891_vm3, %v19525_v53, %v19524_v29  ;;  %v19527_v9 = vld [vmem:[#allocation129_spill] sm:$0xff] }
 0x68f   :  { %6526 = vst [vmem:[%s18139_s3 + $0x870] sm:$0xff] %v5907_v39  ;;  %6527 = vst.msk [vmem:[%s18139_s3 + $0x878] sm:$0xff] %vm6256_vm6, %v5908_v10  ;;  %v4321_v11 = vpop.permute.xlu1 %4320  ;;  %v3430_v12 = vsel %vm10887_vm2, %v19527_v9, %v19526_v24  ;;  %v3431_v49 = vsel %vm10891_vm3, %v19527_v9, %v19526_v24  ;;  %v7407_v10 = vld [vmem:[%s18136_s0 + $0x668] sm:$0xff] }
 0x690   :  { %6532 = vst [vmem:[%s18139_s3 + $0x8a0] sm:$0xff] %v5913_v21  ;;  %6533 = vst.msk [vmem:[%s18139_s3 + $0x8a8] sm:$0xff] %vm6256_vm6, %v5914_v58  ;;  %v5281_v43 = vsel %vm10901_vm4, %v4321_v11, %v3416_v36  ;;  %v5282_v62 = vsel %vm10905_vm5, %v4321_v11, %v3417_v45  ;;  %v4333_v6 = vpop.permute.xlu0 %4332  ;;  %4576 = vperm.xlu1 %6890, %v7403_v20   ;;  %v7408_v58 = vld [vmem:[%s18136_s0 + $0x680] sm:$0xff]  ;;  %v19529_v45 = vld [vmem:[#allocation126_spill] sm:$0xff] }
 0x691   :  { %v5911_v52 = vadd.f32 %v10909_v38, %v5281_v43  ;;  %v5912_v13 = vadd.f32 %v10911_v5, %v5282_v62  ;;  %v5287_v28 = vsel %vm10901_vm4, %v4333_v6, %v3422_v19  ;;  %v5288_v61 = vsel %vm10905_vm5, %v4333_v6, %v3423_v2  ;;  %4588 = vperm.xlu0 %6891, %v7404_v25   ;;  %v19528_v36 = vld [vmem:[#allocation411_spill] sm:$0xff]  ;;  %v19530_v19 = vld [vmem:[#allocation414_spill] sm:$0xff] }
 0x692   :  { %v5917_v31 = vadd.f32 %v10909_v38, %v5287_v28  ;;  %v5918_v42 = vadd.f32 %v10911_v5, %v5288_v61  ;;  %v3428_v11 = vsel %vm10887_vm2, %v19529_v45, %v19528_v36  ;;  %v3429_v17 = vsel %vm10891_vm3, %v19529_v45, %v19528_v36  ;;  %v19531_v2 = vld [vmem:[#allocation131_spill] sm:$0xff] }
 0x693   :  { %6530 = vst [vmem:[%s18139_s3 + $0x890] sm:$0xff] %v5911_v52  ;;  %6531 = vst.msk [vmem:[%s18139_s3 + $0x898] sm:$0xff] %vm6256_vm6, %v5912_v13  ;;  %v4329_v60 = vpop.permute.xlu1 %4328  ;;  %v3434_v43 = vsel %vm10887_vm2, %v19531_v2, %v19530_v19  ;;  %v3435_v62 = vsel %vm10891_vm3, %v19531_v2, %v19530_v19  ;;  %v7409_v13 = vld [vmem:[%s18136_s0 + $0x678] sm:$0xff] }
 0x694   :  { %6536 = vst [vmem:[%s18139_s3 + $0x8c0] sm:$0xff] %v5917_v31  ;;  %6537 = vst.msk [vmem:[%s18139_s3 + $0x8c8] sm:$0xff] %vm6256_vm6, %v5918_v42  ;;  %v5285_v3 = vsel %vm10901_vm4, %v4329_v60, %v3420_v40  ;;  %v5286_v16 = vsel %vm10905_vm5, %v4329_v60, %v3421_v37  ;;  %v4341_v41 = vpop.permute.xlu0 %4340  ;;  %4584 = vperm.xlu1 %6890, %v7405_v23   ;;  %v7410_v42 = vld [vmem:[%s18136_s0 + $0x690] sm:$0xff]  ;;  %v19533_v37 = vld [vmem:[#allocation128_spill] sm:$0xff] }
 0x695   :  { %v5915_v50 = vadd.f32 %v10909_v38, %v5285_v3  ;;  %v5916_v47 = vadd.f32 %v10911_v5, %v5286_v16  ;;  %v5291_v35 = vsel %vm10901_vm4, %v4341_v41, %v3426_v63  ;;  %v5292_v26 = vsel %vm10905_vm5, %v4341_v41, %v3427_v54  ;;  %4596 = vperm.xlu0 %6891, %v7406_v15   ;;  %v19532_v40 = vld [vmem:[#allocation413_spill] sm:$0xff]  ;;  %v19534_v63 = vld [vmem:[#allocation416_spill] sm:$0xff] }
 0x696   :  { %v5921_v32 = vadd.f32 %v10909_v38, %v5291_v35  ;;  %v5922_v44 = vadd.f32 %v10911_v5, %v5292_v26  ;;  %v3432_v60 = vsel %vm10887_vm2, %v19533_v37, %v19532_v40  ;;  %v3433_v7 = vsel %vm10891_vm3, %v19533_v37, %v19532_v40  ;;  %v19535_v54 = vld [vmem:[#allocation133_spill] sm:$0xff] }
 0x697   :  { %6534 = vst [vmem:[%s18139_s3 + $0x8b0] sm:$0xff] %v5915_v50  ;;  %6535 = vst.msk [vmem:[%s18139_s3 + $0x8b8] sm:$0xff] %vm6256_vm6, %v5916_v47  ;;  %v4337_v0 = vpop.permute.xlu1 %4336  ;;  %v3438_v3 = vsel %vm10887_vm2, %v19535_v54, %v19534_v63  ;;  %v3439_v16 = vsel %vm10891_vm3, %v19535_v54, %v19534_v63  ;;  %v7411_v47 = vld [vmem:[%s18136_s0 + $0x688] sm:$0xff] }
 0x698   :  { %6540 = vst [vmem:[%s18139_s3 + $0x8e0] sm:$0xff] %v5921_v32  ;;  %6541 = vst.msk [vmem:[%s18139_s3 + $0x8e8] sm:$0xff] %vm6256_vm6, %v5922_v44  ;;  %v5289_v4 = vsel %vm10901_vm4, %v4337_v0, %v3424_v57  ;;  %v5290_v1 = vsel %vm10905_vm5, %v4337_v0, %v3425_v33  ;;  %v4349_v39 = vpop.permute.xlu0 %4348  ;;  %4592 = vperm.xlu1 %6890, %v7407_v10   ;;  %v7412_v44 = vld [vmem:[%s18136_s0 + $0x6a0] sm:$0xff]  ;;  %v19537_v33 = vld [vmem:[#allocation130_spill] sm:$0xff] }
 0x699   :  { %v5919_v8 = vadd.f32 %v10909_v38, %v5289_v4  ;;  %v5920_v27 = vadd.f32 %v10911_v5, %v5290_v1  ;;  %v5295_v48 = vsel %vm10901_vm4, %v4349_v39, %v3430_v12  ;;  %v5296_v21 = vsel %vm10905_vm5, %v4349_v39, %v3431_v49  ;;  %4604 = vperm.xlu0 %6891, %v7408_v58   ;;  %v19536_v57 = vld [vmem:[#allocation415_spill] sm:$0xff]  ;;  %v19538_v12 = vld [vmem:[#allocation418_spill] sm:$0xff] }
 0x69a   :  { %v5925_v34 = vadd.f32 %v10909_v38, %v5295_v48  ;;  %v5926_v46 = vadd.f32 %v10911_v5, %v5296_v21  ;;  %v3436_v0 = vsel %vm10887_vm2, %v19537_v33, %v19536_v57  ;;  %v3437_v24 = vsel %vm10891_vm3, %v19537_v33, %v19536_v57  ;;  %v19539_v49 = vld [vmem:[#allocation135_spill] sm:$0xff] }
 0x69b   :  { %6538 = vst [vmem:[%s18139_s3 + $0x8d0] sm:$0xff] %v5919_v8  ;;  %6539 = vst.msk [vmem:[%s18139_s3 + $0x8d8] sm:$0xff] %vm6256_vm6, %v5920_v27  ;;  %v4345_v56 = vpop.permute.xlu1 %4344  ;;  %v3442_v4 = vsel %vm10887_vm2, %v19539_v49, %v19538_v12  ;;  %v3443_v1 = vsel %vm10891_vm3, %v19539_v49, %v19538_v12  ;;  %v7413_v27 = vld [vmem:[%s18136_s0 + $0x698] sm:$0xff] }
 0x69c   :  { %6544 = vst [vmem:[%s18139_s3 + $0x900] sm:$0xff] %v5925_v34  ;;  %6545 = vst.msk [vmem:[%s18139_s3 + $0x908] sm:$0xff] %vm6256_vm6, %v5926_v46  ;;  %v5293_v6 = vsel %vm10901_vm4, %v4345_v56, %v3428_v11  ;;  %v5294_v20 = vsel %vm10905_vm5, %v4345_v56, %v3429_v17  ;;  %v4357_v52 = vpop.permute.xlu0 %4356  ;;  %4600 = vperm.xlu1 %6890, %v7409_v13   ;;  %v7414_v46 = vld [vmem:[%s18136_s0 + $0x6b0] sm:$0xff]  ;;  %v19541_v17 = vld [vmem:[#allocation132_spill] sm:$0xff] }
 0x69d   :  { %v5923_v28 = vadd.f32 %v10909_v38, %v5293_v6  ;;  %v5924_v61 = vadd.f32 %v10911_v5, %v5294_v20  ;;  %v5299_v25 = vsel %vm10901_vm4, %v4357_v52, %v3434_v43  ;;  %v5300_v31 = vsel %vm10905_vm5, %v4357_v52, %v3435_v62  ;;  %4612 = vperm.xlu0 %6891, %v7410_v42   ;;  %v19540_v11 = vld [vmem:[#allocation417_spill] sm:$0xff]  ;;  %v19542_v43 = vld [vmem:[#allocation420_spill] sm:$0xff] }
 0x69e   :  { %v5929_v59 = vadd.f32 %v10909_v38, %v5299_v25  ;;  %v5930_v51 = vadd.f32 %v10911_v5, %v5300_v31  ;;  %v3440_v56 = vsel %vm10887_vm2, %v19541_v17, %v19540_v11  ;;  %v3441_v19 = vsel %vm10891_vm3, %v19541_v17, %v19540_v11  ;;  %v19543_v62 = vld [vmem:[#allocation137_spill] sm:$0xff] }
 0x69f   :  { %6542 = vst [vmem:[%s18139_s3 + $0x8f0] sm:$0xff] %v5923_v28  ;;  %6543 = vst.msk [vmem:[%s18139_s3 + $0x8f8] sm:$0xff] %vm6256_vm6, %v5924_v61  ;;  %v4353_v18 = vpop.permute.xlu1 %4352  ;;  %v3446_v6 = vsel %vm10887_vm2, %v19543_v62, %v19542_v43  ;;  %v3447_v20 = vsel %vm10891_vm3, %v19543_v62, %v19542_v43  ;;  %v7415_v61 = vld [vmem:[%s18136_s0 + $0x6a8] sm:$0xff] }
 0x6a0   :  { %6548 = vst [vmem:[%s18139_s3 + $0x920] sm:$0xff] %v5929_v59  ;;  %6549 = vst.msk [vmem:[%s18139_s3 + $0x928] sm:$0xff] %vm6256_vm6, %v5930_v51  ;;  %v5297_v41 = vsel %vm10901_vm4, %v4353_v18, %v3432_v60  ;;  %v5298_v23 = vsel %vm10905_vm5, %v4353_v18, %v3433_v7  ;;  %v4365_v50 = vpop.permute.xlu0 %4364  ;;  %4608 = vperm.xlu1 %6890, %v7411_v47   ;;  %v7416_v51 = vld [vmem:[%s18136_s0 + $0x6c0] sm:$0xff]  ;;  %v19545_v7 = vld [vmem:[#allocation134_spill] sm:$0xff] }
 0x6a1   :  { %v5927_v35 = vadd.f32 %v10909_v38, %v5297_v41  ;;  %v5928_v26 = vadd.f32 %v10911_v5, %v5298_v23  ;;  %v5303_v15 = vsel %vm10901_vm4, %v4365_v50, %v3438_v3  ;;  %v5304_v32 = vsel %vm10905_vm5, %v4365_v50, %v3439_v16  ;;  %4620 = vperm.xlu0 %6891, %v7412_v44   ;;  %v19544_v60 = vld [vmem:[#allocation419_spill] sm:$0xff]  ;;  %v19546_v3 = vld [vmem:[#allocation422_spill] sm:$0xff] }
 0x6a2   :  { %v5933_v29 = vadd.f32 %v10909_v38, %v5303_v15  ;;  %v5934_v53 = vadd.f32 %v10911_v5, %v5304_v32  ;;  %v3444_v18 = vsel %vm10887_vm2, %v19545_v7, %v19544_v60  ;;  %v3445_v63 = vsel %vm10891_vm3, %v19545_v7, %v19544_v60  ;;  %v19547_v16 = vld [vmem:[#allocation139_spill] sm:$0xff] }
 0x6a3   :  { %6546 = vst [vmem:[%s18139_s3 + $0x910] sm:$0xff] %v5927_v35  ;;  %6547 = vst.msk [vmem:[%s18139_s3 + $0x918] sm:$0xff] %vm6256_vm6, %v5928_v26  ;;  %v4361_v9 = vpop.permute.xlu1 %4360  ;;  %v3450_v41 = vsel %vm10887_vm2, %v19547_v16, %v19546_v3  ;;  %v3451_v23 = vsel %vm10891_vm3, %v19547_v16, %v19546_v3  ;;  %v7417_v26 = vld [vmem:[%s18136_s0 + $0x6b8] sm:$0xff] }
 0x6a4   :  { %6552 = vst [vmem:[%s18139_s3 + $0x940] sm:$0xff] %v5933_v29  ;;  %6553 = vst.msk [vmem:[%s18139_s3 + $0x948] sm:$0xff] %vm6256_vm6, %v5934_v53  ;;  %v5301_v39 = vsel %vm10901_vm4, %v4361_v9, %v3436_v0  ;;  %v5302_v10 = vsel %vm10905_vm5, %v4361_v9, %v3437_v24  ;;  %v4373_v8 = vpop.permute.xlu0 %4372  ;;  %4616 = vperm.xlu1 %6890, %v7413_v27   ;;  %v7418_v53 = vld [vmem:[%s18136_s0 + $0x6d0] sm:$0xff]  ;;  %v19549_v24 = vld [vmem:[#allocation136_spill] sm:$0xff] }
 0x6a5   :  { %v5931_v48 = vadd.f32 %v10909_v38, %v5301_v39  ;;  %v5932_v21 = vadd.f32 %v10911_v5, %v5302_v10  ;;  %v5307_v58 = vsel %vm10901_vm4, %v4373_v8, %v3442_v4  ;;  %v5308_v34 = vsel %vm10905_vm5, %v4373_v8, %v3443_v1  ;;  %4628 = vperm.xlu0 %6891, %v7414_v46   ;;  %v19548_v0 = vld [vmem:[#allocation421_spill] sm:$0xff]  ;;  %v19550_v4 = vld [vmem:[#allocation424_spill] sm:$0xff] }
 0x6a6   :  { %v5937_v36 = vadd.f32 %v10909_v38, %v5307_v58  ;;  %v5938_v45 = vadd.f32 %v10911_v5, %v5308_v34  ;;  %v3448_v9 = vsel %vm10887_vm2, %v19549_v24, %v19548_v0  ;;  %v3449_v12 = vsel %vm10891_vm3, %v19549_v24, %v19548_v0  ;;  %v19551_v1 = vld [vmem:[#allocation141_spill] sm:$0xff] }
 0x6a7   :  { %6550 = vst [vmem:[%s18139_s3 + $0x930] sm:$0xff] %v5931_v48  ;;  %6551 = vst.msk [vmem:[%s18139_s3 + $0x938] sm:$0xff] %vm6256_vm6, %v5932_v21  ;;  %v4369_v2 = vpop.permute.xlu1 %4368  ;;  %v3454_v39 = vsel %vm10887_vm2, %v19551_v1, %v19550_v4  ;;  %v3455_v10 = vsel %vm10891_vm3, %v19551_v1, %v19550_v4  ;;  %v7419_v21 = vld [vmem:[%s18136_s0 + $0x6c8] sm:$0xff] }
 0x6a8   :  { %6556 = vst [vmem:[%s18139_s3 + $0x960] sm:$0xff] %v5937_v36  ;;  %6557 = vst.msk [vmem:[%s18139_s3 + $0x968] sm:$0xff] %vm6256_vm6, %v5938_v45  ;;  %v5305_v52 = vsel %vm10901_vm4, %v4369_v2, %v3440_v56  ;;  %v5306_v13 = vsel %vm10905_vm5, %v4369_v2, %v3441_v19  ;;  %v4381_v28 = vpop.permute.xlu0 %4380  ;;  %4624 = vperm.xlu1 %6890, %v7415_v61   ;;  %v7420_v45 = vld [vmem:[%s18136_s0 + $0x6e0] sm:$0xff]  ;;  %v19553_v19 = vld [vmem:[#allocation138_spill] sm:$0xff] }
 0x6a9   :  { %v5935_v25 = vadd.f32 %v10909_v38, %v5305_v52  ;;  %v5936_v31 = vadd.f32 %v10911_v5, %v5306_v13  ;;  %v5311_v42 = vsel %vm10901_vm4, %v4381_v28, %v3446_v6  ;;  %v5312_v59 = vsel %vm10905_vm5, %v4381_v28, %v3447_v20  ;;  %4636 = vperm.xlu0 %6891, %v7416_v51   ;;  %v19552_v56 = vld [vmem:[#allocation423_spill] sm:$0xff]  ;;  %v19554_v6 = vld [vmem:[#allocation426_spill] sm:$0xff] }
 0x6aa   :  { %v5941_v40 = vadd.f32 %v10909_v38, %v5311_v42  ;;  %v5942_v37 = vadd.f32 %v10911_v5, %v5312_v59  ;;  %v3452_v2 = vsel %vm10887_vm2, %v19553_v19, %v19552_v56  ;;  %v3453_v43 = vsel %vm10891_vm3, %v19553_v19, %v19552_v56  ;;  %v19555_v20 = vld [vmem:[#allocation143_spill] sm:$0xff] }
 0x6ab   :  { %6554 = vst [vmem:[%s18139_s3 + $0x950] sm:$0xff] %v5935_v25  ;;  %6555 = vst.msk [vmem:[%s18139_s3 + $0x958] sm:$0xff] %vm6256_vm6, %v5936_v31  ;;  %v4377_v54 = vpop.permute.xlu1 %4376  ;;  %v3458_v52 = vsel %vm10887_vm2, %v19555_v20, %v19554_v6  ;;  %v3459_v13 = vsel %vm10891_vm3, %v19555_v20, %v19554_v6  ;;  %v7421_v31 = vld [vmem:[%s18136_s0 + $0x6d8] sm:$0xff] }
 0x6ac   :  { %6560 = vst [vmem:[%s18139_s3 + $0x980] sm:$0xff] %v5941_v40  ;;  %6561 = vst.msk [vmem:[%s18139_s3 + $0x988] sm:$0xff] %vm6256_vm6, %v5942_v37  ;;  %v5309_v50 = vsel %vm10901_vm4, %v4377_v54, %v3444_v18  ;;  %v5310_v47 = vsel %vm10905_vm5, %v4377_v54, %v3445_v63  ;;  %v4389_v35 = vpop.permute.xlu0 %4388  ;;  %4632 = vperm.xlu1 %6890, %v7417_v26   ;;  %v7422_v37 = vld [vmem:[%s18136_s0 + $0x6f0] sm:$0xff]  ;;  %v19557_v63 = vld [vmem:[#allocation140_spill] sm:$0xff] }
 0x6ad   :  { %v5939_v15 = vadd.f32 %v10909_v38, %v5309_v50  ;;  %v5940_v32 = vadd.f32 %v10911_v5, %v5310_v47  ;;  %v5315_v44 = vsel %vm10901_vm4, %v4389_v35, %v3450_v41  ;;  %v5316_v29 = vsel %vm10905_vm5, %v4389_v35, %v3451_v23  ;;  %4644 = vperm.xlu0 %6891, %v7418_v53   ;;  %v19556_v18 = vld [vmem:[#allocation425_spill] sm:$0xff]  ;;  %v19558_v41 = vld [vmem:[#allocation428_spill] sm:$0xff] }
 0x6ae   :  { %v5945_v57 = vadd.f32 %v10909_v38, %v5315_v44  ;;  %v5946_v33 = vadd.f32 %v10911_v5, %v5316_v29  ;;  %v3456_v54 = vsel %vm10887_vm2, %v19557_v63, %v19556_v18  ;;  %v3457_v3 = vsel %vm10891_vm3, %v19557_v63, %v19556_v18  ;;  %v19559_v23 = vld [vmem:[#allocation145_spill] sm:$0xff] }
 0x6af   :  { %6558 = vst [vmem:[%s18139_s3 + $0x970] sm:$0xff] %v5939_v15  ;;  %6559 = vst.msk [vmem:[%s18139_s3 + $0x978] sm:$0xff] %vm6256_vm6, %v5940_v32  ;;  %v4385_v49 = vpop.permute.xlu1 %4384  ;;  %v3462_v50 = vsel %vm10887_vm2, %v19559_v23, %v19558_v41  ;;  %v3463_v47 = vsel %vm10891_vm3, %v19559_v23, %v19558_v41  ;;  %v7423_v32 = vld [vmem:[%s18136_s0 + $0x6e8] sm:$0xff] }
 0x6b0   :  { %6564 = vst [vmem:[%s18139_s3 + $0x9a0] sm:$0xff] %v5945_v57  ;;  %6565 = vst.msk [vmem:[%s18139_s3 + $0x9a8] sm:$0xff] %vm6256_vm6, %v5946_v33  ;;  %v5313_v8 = vsel %vm10901_vm4, %v4385_v49, %v3448_v9  ;;  %v5314_v27 = vsel %vm10905_vm5, %v4385_v49, %v3449_v12  ;;  %v4397_v48 = vpop.permute.xlu0 %4396  ;;  %4640 = vperm.xlu1 %6890, %v7419_v21   ;;  %v7424_v33 = vld [vmem:[%s18136_s0 + $0x700] sm:$0xff]  ;;  %v19561_v12 = vld [vmem:[#allocation142_spill] sm:$0xff] }
 0x6b1   :  { %v5943_v58 = vadd.f32 %v10909_v38, %v5313_v8  ;;  %v5944_v34 = vadd.f32 %v10911_v5, %v5314_v27  ;;  %v5319_v46 = vsel %vm10901_vm4, %v4397_v48, %v3454_v39  ;;  %v5320_v36 = vsel %vm10905_vm5, %v4397_v48, %v3455_v10  ;;  %4652 = vperm.xlu0 %6891, %v7420_v45   ;;  %v19560_v9 = vld [vmem:[#allocation427_spill] sm:$0xff]  ;;  %v19562_v39 = vld [vmem:[#allocation430_spill] sm:$0xff] }
 0x6b2   :  { %v5949_v11 = vadd.f32 %v10909_v38, %v5319_v46  ;;  %v5950_v17 = vadd.f32 %v10911_v5, %v5320_v36  ;;  %v3460_v49 = vsel %vm10887_vm2, %v19561_v12, %v19560_v9  ;;  %v3461_v4 = vsel %vm10891_vm3, %v19561_v12, %v19560_v9  ;;  %v19563_v10 = vld [vmem:[#allocation147_spill] sm:$0xff] }
 0x6b3   :  { %6562 = vst [vmem:[%s18139_s3 + $0x990] sm:$0xff] %v5943_v58  ;;  %6563 = vst.msk [vmem:[%s18139_s3 + $0x998] sm:$0xff] %vm6256_vm6, %v5944_v34  ;;  %v4393_v62 = vpop.permute.xlu1 %4392  ;;  %v3466_v8 = vsel %vm10887_vm2, %v19563_v10, %v19562_v39  ;;  %v3467_v27 = vsel %vm10891_vm3, %v19563_v10, %v19562_v39  ;;  %v7425_v34 = vld [vmem:[%s18136_s0 + $0x6f8] sm:$0xff] }
 0x6b4   :  { %6568 = vst [vmem:[%s18139_s3 + $0x9c0] sm:$0xff] %v5949_v11  ;;  %6569 = vst.msk [vmem:[%s18139_s3 + $0x9c8] sm:$0xff] %vm6256_vm6, %v5950_v17  ;;  %v5317_v28 = vsel %vm10901_vm4, %v4393_v62, %v3452_v2  ;;  %v5318_v61 = vsel %vm10905_vm5, %v4393_v62, %v3453_v43  ;;  %v4405_v25 = vpop.permute.xlu0 %4404  ;;  %4648 = vperm.xlu1 %6890, %v7421_v31   ;;  %v7426_v17 = vld [vmem:[%s18136_s0 + $0x710] sm:$0xff]  ;;  %v19565_v43 = vld [vmem:[#allocation144_spill] sm:$0xff] }
 0x6b5   :  { %v5947_v42 = vadd.f32 %v10909_v38, %v5317_v28  ;;  %v5948_v59 = vadd.f32 %v10911_v5, %v5318_v61  ;;  %v5323_v51 = vsel %vm10901_vm4, %v4405_v25, %v3458_v52  ;;  %v5324_v40 = vsel %vm10905_vm5, %v4405_v25, %v3459_v13  ;;  %4660 = vperm.xlu0 %6891, %v7422_v37   ;;  %v19564_v2 = vld [vmem:[#allocation429_spill] sm:$0xff]  ;;  %v19566_v52 = vld [vmem:[#allocation432_spill] sm:$0xff] }
 0x6b6   :  { %v5953_v60 = vadd.f32 %v10909_v38, %v5323_v51  ;;  %v5954_v7 = vadd.f32 %v10911_v5, %v5324_v40  ;;  %v3464_v62 = vsel %vm10887_vm2, %v19565_v43, %v19564_v2  ;;  %v3465_v6 = vsel %vm10891_vm3, %v19565_v43, %v19564_v2  ;;  %v19567_v13 = vld [vmem:[#allocation149_spill] sm:$0xff] }
 0x6b7   :  { %6566 = vst [vmem:[%s18139_s3 + $0x9b0] sm:$0xff] %v5947_v42  ;;  %6567 = vst.msk [vmem:[%s18139_s3 + $0x9b8] sm:$0xff] %vm6256_vm6, %v5948_v59  ;;  %v4401_v16 = vpop.permute.xlu1 %4400  ;;  %v3470_v28 = vsel %vm10887_vm2, %v19567_v13, %v19566_v52  ;;  %v3471_v61 = vsel %vm10891_vm3, %v19567_v13, %v19566_v52  ;;  %v7427_v59 = vld [vmem:[%s18136_s0 + $0x708] sm:$0xff] }
 0x6b8   :  { %6572 = vst [vmem:[%s18139_s3 + $0x9e0] sm:$0xff] %v5953_v60  ;;  %6573 = vst.msk [vmem:[%s18139_s3 + $0x9e8] sm:$0xff] %vm6256_vm6, %v5954_v7  ;;  %v5321_v35 = vsel %vm10901_vm4, %v4401_v16, %v3456_v54  ;;  %v5322_v26 = vsel %vm10905_vm5, %v4401_v16, %v3457_v3  ;;  %v4413_v15 = vpop.permute.xlu0 %4412  ;;  %4656 = vperm.xlu1 %6890, %v7423_v32   ;;  %v7428_v7 = vld [vmem:[%s18136_s0 + $0x720] sm:$0xff]  ;;  %v19569_v3 = vld [vmem:[#allocation146_spill] sm:$0xff] }
 0x6b9   :  { %v5951_v44 = vadd.f32 %v10909_v38, %v5321_v35  ;;  %v5952_v29 = vadd.f32 %v10911_v5, %v5322_v26  ;;  %v5327_v53 = vsel %vm10901_vm4, %v4413_v15, %v3462_v50  ;;  %v5328_v57 = vsel %vm10905_vm5, %v4413_v15, %v3463_v47  ;;  %4668 = vperm.xlu0 %6891, %v7424_v33   ;;  %v19568_v54 = vld [vmem:[#allocation431_spill] sm:$0xff]  ;;  %v19570_v50 = vld [vmem:[#allocation434_spill] sm:$0xff] }
 0x6ba   :  { %v5957_v0 = vadd.f32 %v10909_v38, %v5327_v53  ;;  %v5958_v24 = vadd.f32 %v10911_v5, %v5328_v57  ;;  %v3468_v16 = vsel %vm10887_vm2, %v19569_v3, %v19568_v54  ;;  %v3469_v41 = vsel %vm10891_vm3, %v19569_v3, %v19568_v54  ;;  %v19571_v47 = vld [vmem:[#allocation151_spill] sm:$0xff] }
 0x6bb   :  { %6570 = vst [vmem:[%s18139_s3 + $0x9d0] sm:$0xff] %v5951_v44  ;;  %6571 = vst.msk [vmem:[%s18139_s3 + $0x9d8] sm:$0xff] %vm6256_vm6, %v5952_v29  ;;  %v4409_v1 = vpop.permute.xlu1 %4408  ;;  %v3474_v35 = vsel %vm10887_vm2, %v19571_v47, %v19570_v50  ;;  %v3475_v26 = vsel %vm10891_vm3, %v19571_v47, %v19570_v50  ;;  %v7429_v29 = vld [vmem:[%s18136_s0 + $0x718] sm:$0xff] }
 0x6bc   :  { %6576 = vst [vmem:[%s18139_s3 + $0xa00] sm:$0xff] %v5957_v0  ;;  %6577 = vst.msk [vmem:[%s18139_s3 + $0xa08] sm:$0xff] %vm6256_vm6, %v5958_v24  ;;  %v5325_v48 = vsel %vm10901_vm4, %v4409_v1, %v3460_v49  ;;  %v5326_v21 = vsel %vm10905_vm5, %v4409_v1, %v3461_v4  ;;  %v4421_v58 = vpop.permute.xlu0 %4420  ;;  %4664 = vperm.xlu1 %6890, %v7425_v34   ;;  %v7430_v24 = vld [vmem:[%s18136_s0 + $0x730] sm:$0xff]  ;;  %v19573_v4 = vld [vmem:[#allocation148_spill] sm:$0xff] }
 0x6bd   :  { %v5955_v46 = vadd.f32 %v10909_v38, %v5325_v48  ;;  %v5956_v36 = vadd.f32 %v10911_v5, %v5326_v21  ;;  %v5331_v45 = vsel %vm10901_vm4, %v4421_v58, %v3466_v8  ;;  %v5332_v11 = vsel %vm10905_vm5, %v4421_v58, %v3467_v27  ;;  %4676 = vperm.xlu0 %6891, %v7426_v17   ;;  %v19572_v49 = vld [vmem:[#allocation433_spill] sm:$0xff]  ;;  %v19574_v8 = vld [vmem:[#allocation436_spill] sm:$0xff] }
 0x6be   :  { %v5961_v56 = vadd.f32 %v10909_v38, %v5331_v45  ;;  %v5962_v19 = vadd.f32 %v10911_v5, %v5332_v11  ;;  %v3472_v1 = vsel %vm10887_vm2, %v19573_v4, %v19572_v49  ;;  %v3473_v39 = vsel %vm10891_vm3, %v19573_v4, %v19572_v49  ;;  %v19575_v27 = vld [vmem:[#allocation153_spill] sm:$0xff] }
 0x6bf   :  { %6574 = vst [vmem:[%s18139_s3 + $0x9f0] sm:$0xff] %v5955_v46  ;;  %6575 = vst.msk [vmem:[%s18139_s3 + $0x9f8] sm:$0xff] %vm6256_vm6, %v5956_v36  ;;  %v4417_v20 = vpop.permute.xlu1 %4416  ;;  %v3478_v48 = vsel %vm10887_vm2, %v19575_v27, %v19574_v8  ;;  %v3479_v21 = vsel %vm10891_vm3, %v19575_v27, %v19574_v8  ;;  %v7431_v36 = vld [vmem:[%s18136_s0 + $0x728] sm:$0xff] }
 0x6c0   :  { %6580 = vst [vmem:[%s18139_s3 + $0xa20] sm:$0xff] %v5961_v56  ;;  %6581 = vst.msk [vmem:[%s18139_s3 + $0xa28] sm:$0xff] %vm6256_vm6, %v5962_v19  ;;  %v5329_v25 = vsel %vm10901_vm4, %v4417_v20, %v3464_v62  ;;  %v5330_v31 = vsel %vm10905_vm5, %v4417_v20, %v3465_v6  ;;  %v4429_v42 = vpop.permute.xlu0 %4428  ;;  %4672 = vperm.xlu1 %6890, %v7427_v59   ;;  %v7432_v19 = vld [vmem:[%s18136_s0 + $0x740] sm:$0xff]  ;;  %v19577_v6 = vld [vmem:[#allocation150_spill] sm:$0xff] }
 0x6c1   :  { %v5959_v51 = vadd.f32 %v10909_v38, %v5329_v25  ;;  %v5960_v40 = vadd.f32 %v10911_v5, %v5330_v31  ;;  %v5335_v37 = vsel %vm10901_vm4, %v4429_v42, %v3470_v28  ;;  %v5336_v60 = vsel %vm10905_vm5, %v4429_v42, %v3471_v61  ;;  %4684 = vperm.xlu0 %6891, %v7428_v7   ;;  %v19576_v62 = vld [vmem:[#allocation435_spill] sm:$0xff]  ;;  %v19578_v28 = vld [vmem:[#allocation438_spill] sm:$0xff] }
 0x6c2   :  { %v5965_v18 = vadd.f32 %v10909_v38, %v5335_v37  ;;  %v5966_v63 = vadd.f32 %v10911_v5, %v5336_v60  ;;  %v3476_v20 = vsel %vm10887_vm2, %v19577_v6, %v19576_v62  ;;  %v3477_v52 = vsel %vm10891_vm3, %v19577_v6, %v19576_v62  ;;  %v19579_v61 = vld [vmem:[#allocation155_spill] sm:$0xff] }
 0x6c3   :  { %6578 = vst [vmem:[%s18139_s3 + $0xa10] sm:$0xff] %v5959_v51  ;;  %6579 = vst.msk [vmem:[%s18139_s3 + $0xa18] sm:$0xff] %vm6256_vm6, %v5960_v40  ;;  %v4425_v23 = vpop.permute.xlu1 %4424  ;;  %v3482_v25 = vsel %vm10887_vm2, %v19579_v61, %v19578_v28  ;;  %v3483_v31 = vsel %vm10891_vm3, %v19579_v61, %v19578_v28  ;;  %v7433_v40 = vld [vmem:[%s18136_s0 + $0x738] sm:$0xff] }
 0x6c4   :  { %6584 = vst [vmem:[%s18139_s3 + $0xa40] sm:$0xff] %v5965_v18  ;;  %6585 = vst.msk [vmem:[%s18139_s3 + $0xa48] sm:$0xff] %vm6256_vm6, %v5966_v63  ;;  %v5333_v15 = vsel %vm10901_vm4, %v4425_v23, %v3468_v16  ;;  %v5334_v32 = vsel %vm10905_vm5, %v4425_v23, %v3469_v41  ;;  %v4437_v44 = vpop.permute.xlu0 %4436  ;;  %4680 = vperm.xlu1 %6890, %v7429_v29   ;;  %v7434_v63 = vld [vmem:[%s18136_s0 + $0x750] sm:$0xff]  ;;  %v19581_v41 = vld [vmem:[#allocation152_spill] sm:$0xff] }
 0x6c5   :  { %v5963_v53 = vadd.f32 %v10909_v38, %v5333_v15  ;;  %v5964_v57 = vadd.f32 %v10911_v5, %v5334_v32  ;;  %v5339_v33 = vsel %vm10901_vm4, %v4437_v44, %v3474_v35  ;;  %v5340_v0 = vsel %vm10905_vm5, %v4437_v44, %v3475_v26  ;;  %4692 = vperm.xlu0 %6891, %v7430_v24   ;;  %v19580_v16 = vld [vmem:[#allocation437_spill] sm:$0xff]  ;;  %v19582_v35 = vld [vmem:[#allocation440_spill] sm:$0xff] }
 0x6c6   :  { %v5969_v9 = vadd.f32 %v10909_v38, %v5339_v33  ;;  %v5970_v12 = vadd.f32 %v10911_v5, %v5340_v0  ;;  %v3480_v23 = vsel %vm10887_vm2, %v19581_v41, %v19580_v16  ;;  %v3481_v50 = vsel %vm10891_vm3, %v19581_v41, %v19580_v16  ;;  %v19583_v26 = vld [vmem:[#allocation157_spill] sm:$0xff] }
 0x6c7   :  { %6582 = vst [vmem:[%s18139_s3 + $0xa30] sm:$0xff] %v5963_v53  ;;  %6583 = vst.msk [vmem:[%s18139_s3 + $0xa38] sm:$0xff] %vm6256_vm6, %v5964_v57  ;;  %v4433_v10 = vpop.permute.xlu1 %4432  ;;  %v3486_v15 = vsel %vm10887_vm2, %v19583_v26, %v19582_v35  ;;  %v3487_v32 = vsel %vm10891_vm3, %v19583_v26, %v19582_v35  ;;  %v7435_v57 = vld [vmem:[%s18136_s0 + $0x748] sm:$0xff] }
 0x6c8   :  { %6588 = vst [vmem:[%s18139_s3 + $0xa60] sm:$0xff] %v5969_v9  ;;  %6589 = vst.msk [vmem:[%s18139_s3 + $0xa68] sm:$0xff] %vm6256_vm6, %v5970_v12  ;;  %v5337_v58 = vsel %vm10901_vm4, %v4433_v10, %v3472_v1  ;;  %v5338_v34 = vsel %vm10905_vm5, %v4433_v10, %v3473_v39  ;;  %v4445_v46 = vpop.permute.xlu0 %4444  ;;  %4688 = vperm.xlu1 %6890, %v7431_v36   ;;  %v7436_v12 = vld [vmem:[%s18136_s0 + $0x760] sm:$0xff]  ;;  %v19585_v39 = vld [vmem:[#allocation154_spill] sm:$0xff] }
 0x6c9   :  { %v5967_v45 = vadd.f32 %v10909_v38, %v5337_v58  ;;  %v5968_v11 = vadd.f32 %v10911_v5, %v5338_v34  ;;  %v5343_v17 = vsel %vm10901_vm4, %v4445_v46, %v3478_v48  ;;  %v5344_v56 = vsel %vm10905_vm5, %v4445_v46, %v3479_v21  ;;  %4700 = vperm.xlu0 %6891, %v7432_v19   ;;  %v19584_v1 = vld [vmem:[#allocation439_spill] sm:$0xff]  ;;  %v19586_v48 = vld [vmem:[#allocation442_spill] sm:$0xff] }
 0x6ca   :  { %v5973_v2 = vadd.f32 %v10909_v38, %v5343_v17  ;;  %v5974_v43 = vadd.f32 %v10911_v5, %v5344_v56  ;;  %v3484_v10 = vsel %vm10887_vm2, %v19585_v39, %v19584_v1  ;;  %v3485_v8 = vsel %vm10891_vm3, %v19585_v39, %v19584_v1  ;;  %v19587_v21 = vld [vmem:[#allocation159_spill] sm:$0xff] }
 0x6cb   :  { %6586 = vst [vmem:[%s18139_s3 + $0xa50] sm:$0xff] %v5967_v45  ;;  %6587 = vst.msk [vmem:[%s18139_s3 + $0xa58] sm:$0xff] %vm6256_vm6, %v5968_v11  ;;  %v4441_v13 = vpop.permute.xlu1 %4440  ;;  %v3490_v58 = vsel %vm10887_vm2, %v19587_v21, %v19586_v48  ;;  %v3491_v34 = vsel %vm10891_vm3, %v19587_v21, %v19586_v48  ;;  %v7437_v11 = vld [vmem:[%s18136_s0 + $0x758] sm:$0xff] }
 0x6cc   :  { %6592 = vst [vmem:[%s18139_s3 + $0xa80] sm:$0xff] %v5973_v2  ;;  %6593 = vst.msk [vmem:[%s18139_s3 + $0xa88] sm:$0xff] %vm6256_vm6, %v5974_v43  ;;  %v5341_v42 = vsel %vm10901_vm4, %v4441_v13, %v3476_v20  ;;  %v5342_v59 = vsel %vm10905_vm5, %v4441_v13, %v3477_v52  ;;  %v4453_v51 = vpop.permute.xlu0 %4452  ;;  %4696 = vperm.xlu1 %6890, %v7433_v40   ;;  %v7438_v43 = vld [vmem:[%s18136_s0 + $0x770] sm:$0xff]  ;;  %v19589_v52 = vld [vmem:[#allocation156_spill] sm:$0xff] }
 0x6cd   :  { %v5971_v37 = vadd.f32 %v10909_v38, %v5341_v42  ;;  %v5972_v60 = vadd.f32 %v10911_v5, %v5342_v59  ;;  %v5347_v7 = vsel %vm10901_vm4, %v4453_v51, %v3482_v25  ;;  %v5348_v18 = vsel %vm10905_vm5, %v4453_v51, %v3483_v31  ;;  %4708 = vperm.xlu0 %6891, %v7434_v63   ;;  %v19588_v20 = vld [vmem:[#allocation441_spill] sm:$0xff]  ;;  %v19590_v25 = vld [vmem:[#allocation444_spill] sm:$0xff] }
 0x6ce   :  { %v5977_v54 = vadd.f32 %v10909_v38, %v5347_v7  ;;  %v5978_v3 = vadd.f32 %v10911_v5, %v5348_v18  ;;  %v3488_v13 = vsel %vm10887_vm2, %v19589_v52, %v19588_v20  ;;  %v3489_v28 = vsel %vm10891_vm3, %v19589_v52, %v19588_v20  ;;  %v19591_v31 = vld [vmem:[#allocation161_spill] sm:$0xff] }
 0x6cf   :  { %6590 = vst [vmem:[%s18139_s3 + $0xa70] sm:$0xff] %v5971_v37  ;;  %6591 = vst.msk [vmem:[%s18139_s3 + $0xa78] sm:$0xff] %vm6256_vm6, %v5972_v60  ;;  %v4449_v47 = vpop.permute.xlu1 %4448  ;;  %v3494_v42 = vsel %vm10887_vm2, %v19591_v31, %v19590_v25  ;;  %v3495_v59 = vsel %vm10891_vm3, %v19591_v31, %v19590_v25  ;;  %v7439_v60 = vld [vmem:[%s18136_s0 + $0x768] sm:$0xff] }
 0x6d0   :  { %6596 = vst [vmem:[%s18139_s3 + $0xaa0] sm:$0xff] %v5977_v54  ;;  %6597 = vst.msk [vmem:[%s18139_s3 + $0xaa8] sm:$0xff] %vm6256_vm6, %v5978_v3  ;;  %v5345_v44 = vsel %vm10901_vm4, %v4449_v47, %v3480_v23  ;;  %v5346_v29 = vsel %vm10905_vm5, %v4449_v47, %v3481_v50  ;;  %v4461_v53 = vpop.permute.xlu0 %4460  ;;  %4704 = vperm.xlu1 %6890, %v7435_v57   ;;  %v7440_v3 = vld [vmem:[%s18136_s0 + $0x780] sm:$0xff]  ;;  %v19593_v50 = vld [vmem:[#allocation158_spill] sm:$0xff] }
 0x6d1   :  { %v5975_v33 = vadd.f32 %v10909_v38, %v5345_v44  ;;  %v5976_v0 = vadd.f32 %v10911_v5, %v5346_v29  ;;  %v5351_v24 = vsel %vm10901_vm4, %v4461_v53, %v3486_v15  ;;  %v5352_v9 = vsel %vm10905_vm5, %v4461_v53, %v3487_v32  ;;  %4716 = vperm.xlu0 %6891, %v7436_v12   ;;  %v19592_v23 = vld [vmem:[#allocation443_spill] sm:$0xff]  ;;  %v19594_v15 = vld [vmem:[#allocation446_spill] sm:$0xff] }
 0x6d2   :  { %v5981_v49 = vadd.f32 %v10909_v38, %v5351_v24  ;;  %v5982_v4 = vadd.f32 %v10911_v5, %v5352_v9  ;;  %v3492_v47 = vsel %vm10887_vm2, %v19593_v50, %v19592_v23  ;;  %v3493_v35 = vsel %vm10891_vm3, %v19593_v50, %v19592_v23  ;;  %v19595_v32 = vld [vmem:[#allocation163_spill] sm:$0xff] }
 0x6d3   :  { %6594 = vst [vmem:[%s18139_s3 + $0xa90] sm:$0xff] %v5975_v33  ;;  %6595 = vst.msk [vmem:[%s18139_s3 + $0xa98] sm:$0xff] %vm6256_vm6, %v5976_v0  ;;  %v4457_v27 = vpop.permute.xlu1 %4456  ;;  %v3498_v44 = vsel %vm10887_vm2, %v19595_v32, %v19594_v15  ;;  %v3499_v29 = vsel %vm10891_vm3, %v19595_v32, %v19594_v15  ;;  %v7441_v0 = vld [vmem:[%s18136_s0 + $0x778] sm:$0xff] }
 0x6d4   :  { %6600 = vst [vmem:[%s18139_s3 + $0xac0] sm:$0xff] %v5981_v49  ;;  %6601 = vst.msk [vmem:[%s18139_s3 + $0xac8] sm:$0xff] %vm6256_vm6, %v5982_v4  ;;  %v5349_v46 = vsel %vm10901_vm4, %v4457_v27, %v3484_v10  ;;  %v5350_v36 = vsel %vm10905_vm5, %v4457_v27, %v3485_v8  ;;  %v4469_v45 = vpop.permute.xlu0 %4468  ;;  %4712 = vperm.xlu1 %6890, %v7437_v11   ;;  %v7442_v4 = vld [vmem:[%s18136_s0 + $0x790] sm:$0xff]  ;;  %v19597_v8 = vld [vmem:[#allocation160_spill] sm:$0xff] }
 0x6d5   :  { %v5979_v17 = vadd.f32 %v10909_v38, %v5349_v46  ;;  %v5980_v56 = vadd.f32 %v10911_v5, %v5350_v36  ;;  %v5355_v19 = vsel %vm10901_vm4, %v4469_v45, %v3490_v58  ;;  %v5356_v2 = vsel %vm10905_vm5, %v4469_v45, %v3491_v34  ;;  %4724 = vperm.xlu0 %6891, %v7438_v43   ;;  %v19596_v10 = vld [vmem:[#allocation445_spill] sm:$0xff]  ;;  %v19598_v58 = vld [vmem:[#allocation448_spill] sm:$0xff] }
 0x6d6   :  { %v5985_v62 = vadd.f32 %v10909_v38, %v5355_v19  ;;  %v5986_v6 = vadd.f32 %v10911_v5, %v5356_v2  ;;  %v3496_v27 = vsel %vm10887_vm2, %v19597_v8, %v19596_v10  ;;  %v3497_v48 = vsel %vm10891_vm3, %v19597_v8, %v19596_v10  ;;  %v19599_v34 = vld [vmem:[#allocation165_spill] sm:$0xff] }
 0x6d7   :  { %6598 = vst [vmem:[%s18139_s3 + $0xab0] sm:$0xff] %v5979_v17  ;;  %6599 = vst.msk [vmem:[%s18139_s3 + $0xab8] sm:$0xff] %vm6256_vm6, %v5980_v56  ;;  %v4465_v61 = vpop.permute.xlu1 %4464  ;;  %v3502_v46 = vsel %vm10887_vm2, %v19599_v34, %v19598_v58  ;;  %v3503_v36 = vsel %vm10891_vm3, %v19599_v34, %v19598_v58  ;;  %v7443_v56 = vld [vmem:[%s18136_s0 + $0x788] sm:$0xff] }
 0x6d8   :  { %6604 = vst [vmem:[%s18139_s3 + $0xae0] sm:$0xff] %v5985_v62  ;;  %6605 = vst.msk [vmem:[%s18139_s3 + $0xae8] sm:$0xff] %vm6256_vm6, %v5986_v6  ;;  %v5353_v51 = vsel %vm10901_vm4, %v4465_v61, %v3488_v13  ;;  %v5354_v40 = vsel %vm10905_vm5, %v4465_v61, %v3489_v28  ;;  %v4477_v37 = vpop.permute.xlu0 %4476  ;;  %4720 = vperm.xlu1 %6890, %v7439_v60   ;;  %v7444_v6 = vld [vmem:[%s18136_s0 + $0x7a0] sm:$0xff]  ;;  %v19601_v28 = vld [vmem:[#allocation162_spill] sm:$0xff] }
 0x6d9   :  { %v5983_v7 = vadd.f32 %v10909_v38, %v5353_v51  ;;  %v5984_v18 = vadd.f32 %v10911_v5, %v5354_v40  ;;  %v5359_v63 = vsel %vm10901_vm4, %v4477_v37, %v3494_v42  ;;  %v5360_v54 = vsel %vm10905_vm5, %v4477_v37, %v3495_v59  ;;  %4732 = vperm.xlu0 %6891, %v7440_v3   ;;  %v19600_v13 = vld [vmem:[#allocation447_spill] sm:$0xff]  ;;  %v19602_v42 = vld [vmem:[#allocation450_spill] sm:$0xff] }
 0x6da   :  { %v5989_v16 = vadd.f32 %v10909_v38, %v5359_v63  ;;  %v5990_v41 = vadd.f32 %v10911_v5, %v5360_v54  ;;  %v3500_v61 = vsel %vm10887_vm2, %v19601_v28, %v19600_v13  ;;  %v3501_v25 = vsel %vm10891_vm3, %v19601_v28, %v19600_v13  ;;  %v19603_v59 = vld [vmem:[#allocation167_spill] sm:$0xff] }
 0x6db   :  { %6602 = vst [vmem:[%s18139_s3 + $0xad0] sm:$0xff] %v5983_v7  ;;  %6603 = vst.msk [vmem:[%s18139_s3 + $0xad8] sm:$0xff] %vm6256_vm6, %v5984_v18  ;;  %v4473_v26 = vpop.permute.xlu1 %4472  ;;  %v3506_v51 = vsel %vm10887_vm2, %v19603_v59, %v19602_v42  ;;  %v3507_v40 = vsel %vm10891_vm3, %v19603_v59, %v19602_v42  ;;  %v7445_v18 = vld [vmem:[%s18136_s0 + $0x798] sm:$0xff] }
 0x6dc   :  { %6608 = vst [vmem:[%s18139_s3 + $0xb00] sm:$0xff] %v5989_v16  ;;  %6609 = vst.msk [vmem:[%s18139_s3 + $0xb08] sm:$0xff] %vm6256_vm6, %v5990_v41  ;;  %v5357_v53 = vsel %vm10901_vm4, %v4473_v26, %v3492_v47  ;;  %v5358_v57 = vsel %vm10905_vm5, %v4473_v26, %v3493_v35  ;;  %v4485_v33 = vpop.permute.xlu0 %4484  ;;  %4728 = vperm.xlu1 %6890, %v7441_v0   ;;  %v7446_v41 = vld [vmem:[%s18136_s0 + $0x7b0] sm:$0xff]  ;;  %v19605_v35 = vld [vmem:[#allocation164_spill] sm:$0xff] }
 0x6dd   :  { %v5987_v24 = vadd.f32 %v10909_v38, %v5357_v53  ;;  %v5988_v9 = vadd.f32 %v10911_v5, %v5358_v57  ;;  %v5363_v12 = vsel %vm10901_vm4, %v4485_v33, %v3498_v44  ;;  %v5364_v49 = vsel %vm10905_vm5, %v4485_v33, %v3499_v29  ;;  %4740 = vperm.xlu0 %6891, %v7442_v4   ;;  %v19604_v47 = vld [vmem:[#allocation449_spill] sm:$0xff]  ;;  %v19606_v44 = vld [vmem:[#allocation452_spill] sm:$0xff] }
 0x6de   :  { %v5993_v1 = vadd.f32 %v10909_v38, %v5363_v12  ;;  %v5994_v39 = vadd.f32 %v10911_v5, %v5364_v49  ;;  %v3504_v26 = vsel %vm10887_vm2, %v19605_v35, %v19604_v47  ;;  %v3505_v15 = vsel %vm10891_vm3, %v19605_v35, %v19604_v47  ;;  %v19607_v29 = vld [vmem:[#allocation169_spill] sm:$0xff] }
 0x6df   :  { %6606 = vst [vmem:[%s18139_s3 + $0xaf0] sm:$0xff] %v5987_v24  ;;  %6607 = vst.msk [vmem:[%s18139_s3 + $0xaf8] sm:$0xff] %vm6256_vm6, %v5988_v9  ;;  %v4481_v21 = vpop.permute.xlu1 %4480  ;;  %v3510_v53 = vsel %vm10887_vm2, %v19607_v29, %v19606_v44  ;;  %v3511_v57 = vsel %vm10891_vm3, %v19607_v29, %v19606_v44  ;;  %v7447_v9 = vld [vmem:[%s18136_s0 + $0x7a8] sm:$0xff] }
 0x6e0   :  { %6612 = vst [vmem:[%s18139_s3 + $0xb20] sm:$0xff] %v5993_v1  ;;  %6613 = vst.msk [vmem:[%s18139_s3 + $0xb28] sm:$0xff] %vm6256_vm6, %v5994_v39  ;;  %v5361_v45 = vsel %vm10901_vm4, %v4481_v21, %v3496_v27  ;;  %v5362_v11 = vsel %vm10905_vm5, %v4481_v21, %v3497_v48  ;;  %v4493_v17 = vpop.permute.xlu0 %4492  ;;  %4736 = vperm.xlu1 %6890, %v7443_v56   ;;  %v7448_v39 = vld [vmem:[%s18136_s0 + $0x7c0] sm:$0xff]  ;;  %v19609_v48 = vld [vmem:[#allocation166_spill] sm:$0xff] }
 0x6e1   :  { %v5991_v19 = vadd.f32 %v10909_v38, %v5361_v45  ;;  %v5992_v2 = vadd.f32 %v10911_v5, %v5362_v11  ;;  %v5367_v43 = vsel %vm10901_vm4, %v4493_v17, %v3502_v46  ;;  %v5368_v62 = vsel %vm10905_vm5, %v4493_v17, %v3503_v36  ;;  %4748 = vperm.xlu0 %6891, %v7444_v6   ;;  %v19608_v27 = vld [vmem:[#allocation451_spill] sm:$0xff]  ;;  %v19610_v46 = vld [vmem:[#allocation454_spill] sm:$0xff] }
 0x6e2   :  { %v5997_v20 = vadd.f32 %v10909_v38, %v5367_v43  ;;  %v5998_v52 = vadd.f32 %v10911_v5, %v5368_v62  ;;  %v3508_v21 = vsel %vm10887_vm2, %v19609_v48, %v19608_v27  ;;  %v3509_v58 = vsel %vm10891_vm3, %v19609_v48, %v19608_v27  ;;  %v19611_v36 = vld [vmem:[#allocation171_spill] sm:$0xff] }
 0x6e3   :  { %6610 = vst [vmem:[%s18139_s3 + $0xb10] sm:$0xff] %v5991_v19  ;;  %6611 = vst.msk [vmem:[%s18139_s3 + $0xb18] sm:$0xff] %vm6256_vm6, %v5992_v2  ;;  %v4489_v31 = vpop.permute.xlu1 %4488  ;;  %v3514_v45 = vsel %vm10887_vm2, %v19611_v36, %v19610_v46  ;;  %v3515_v11 = vsel %vm10891_vm3, %v19611_v36, %v19610_v46  ;;  %v7449_v2 = vld [vmem:[%s18136_s0 + $0x7b8] sm:$0xff] }
 0x6e4   :  { %6616 = vst [vmem:[%s18139_s3 + $0xb40] sm:$0xff] %v5997_v20  ;;  %6617 = vst.msk [vmem:[%s18139_s3 + $0xb48] sm:$0xff] %vm6256_vm6, %v5998_v52  ;;  %v5365_v37 = vsel %vm10901_vm4, %v4489_v31, %v3500_v61  ;;  %v5366_v60 = vsel %vm10905_vm5, %v4489_v31, %v3501_v25  ;;  %v4501_v7 = vpop.permute.xlu0 %4500  ;;  %4744 = vperm.xlu1 %6890, %v7445_v18   ;;  %v7450_v52 = vld [vmem:[%s18136_s0 + $0x7d0] sm:$0xff]  ;;  %v19613_v25 = vld [vmem:[#allocation168_spill] sm:$0xff] }
 0x6e5   :  { %v5995_v63 = vadd.f32 %v10909_v38, %v5365_v37  ;;  %v5996_v54 = vadd.f32 %v10911_v5, %v5366_v60  ;;  %v5371_v3 = vsel %vm10901_vm4, %v4501_v7, %v3506_v51  ;;  %v5372_v16 = vsel %vm10905_vm5, %v4501_v7, %v3507_v40  ;;  %4756 = vperm.xlu0 %6891, %v7446_v41   ;;  %v19612_v61 = vld [vmem:[#allocation453_spill] sm:$0xff]  ;;  %v19614_v51 = vld [vmem:[#allocation456_spill] sm:$0xff] }
 0x6e6   :  { %v6001_v23 = vadd.f32 %v10909_v38, %v5371_v3  ;;  %v6002_v50 = vadd.f32 %v10911_v5, %v5372_v16  ;;  %v3512_v31 = vsel %vm10887_vm2, %v19613_v25, %v19612_v61  ;;  %v3513_v42 = vsel %vm10891_vm3, %v19613_v25, %v19612_v61  ;;  %v19615_v40 = vld [vmem:[#allocation173_spill] sm:$0xff] }
 0x6e7   :  { %6614 = vst [vmem:[%s18139_s3 + $0xb30] sm:$0xff] %v5995_v63  ;;  %6615 = vst.msk [vmem:[%s18139_s3 + $0xb38] sm:$0xff] %vm6256_vm6, %v5996_v54  ;;  %v4497_v32 = vpop.permute.xlu1 %4496  ;;  %v3518_v37 = vsel %vm10887_vm2, %v19615_v40, %v19614_v51  ;;  %v3519_v60 = vsel %vm10891_vm3, %v19615_v40, %v19614_v51  ;;  %v7451_v54 = vld [vmem:[%s18136_s0 + $0x7c8] sm:$0xff] }
 0x6e8   :  { %6620 = vst [vmem:[%s18139_s3 + $0xb60] sm:$0xff] %v6001_v23  ;;  %6621 = vst.msk [vmem:[%s18139_s3 + $0xb68] sm:$0xff] %vm6256_vm6, %v6002_v50  ;;  %v5369_v33 = vsel %vm10901_vm4, %v4497_v32, %v3504_v26  ;;  %v5370_v0 = vsel %vm10905_vm5, %v4497_v32, %v3505_v15  ;;  %v4509_v24 = vpop.permute.xlu0 %4508  ;;  %4752 = vperm.xlu1 %6890, %v7447_v9   ;;  %v7452_v50 = vld [vmem:[%s18136_s0 + $0x7e0] sm:$0xff]  ;;  %v19617_v15 = vld [vmem:[#allocation170_spill] sm:$0xff] }
 0x6e9   :  { %v5999_v12 = vadd.f32 %v10909_v38, %v5369_v33  ;;  %v6000_v49 = vadd.f32 %v10911_v5, %v5370_v0  ;;  %v5375_v4 = vsel %vm10901_vm4, %v4509_v24, %v3510_v53  ;;  %v5376_v1 = vsel %vm10905_vm5, %v4509_v24, %v3511_v57  ;;  %4764 = vperm.xlu0 %6891, %v7448_v39   ;;  %v19616_v26 = vld [vmem:[#allocation455_spill] sm:$0xff]  ;;  %v19618_v53 = vld [vmem:[#allocation458_spill] sm:$0xff] }
 0x6ea   :  { %v6005_v10 = vadd.f32 %v10909_v38, %v5375_v4  ;;  %v6006_v8 = vadd.f32 %v10911_v5, %v5376_v1  ;;  %v3516_v32 = vsel %vm10887_vm2, %v19617_v15, %v19616_v26  ;;  %v3517_v44 = vsel %vm10891_vm3, %v19617_v15, %v19616_v26  ;;  %v19619_v57 = vld [vmem:[#allocation175_spill] sm:$0xff] }
 0x6eb   :  { %6618 = vst [vmem:[%s18139_s3 + $0xb50] sm:$0xff] %v5999_v12  ;;  %6619 = vst.msk [vmem:[%s18139_s3 + $0xb58] sm:$0xff] %vm6256_vm6, %v6000_v49  ;;  %v4505_v34 = vpop.permute.xlu1 %4504  ;;  %v3522_v33 = vsel %vm10887_vm2, %v19619_v57, %v19618_v53  ;;  %v3523_v0 = vsel %vm10891_vm3, %v19619_v57, %v19618_v53  ;;  %v7453_v49 = vld [vmem:[%s18136_s0 + $0x7d8] sm:$0xff] }
 0x6ec   :  { %6624 = vst [vmem:[%s18139_s3 + $0xb80] sm:$0xff] %v6005_v10  ;;  %6625 = vst.msk [vmem:[%s18139_s3 + $0xb88] sm:$0xff] %vm6256_vm6, %v6006_v8  ;;  %v5373_v17 = vsel %vm10901_vm4, %v4505_v34, %v3508_v21  ;;  %v5374_v56 = vsel %vm10905_vm5, %v4505_v34, %v3509_v58  ;;  %v4517_v19 = vpop.permute.xlu0 %4516  ;;  %4760 = vperm.xlu1 %6890, %v7449_v2   ;;  %v7454_v8 = vld [vmem:[%s18136_s0 + $0x7f0] sm:$0xff]  ;;  %v19621_v58 = vld [vmem:[#allocation172_spill] sm:$0xff] }
 0x6ed   :  { %v6003_v43 = vadd.f32 %v10909_v38, %v5373_v17  ;;  %v6004_v62 = vadd.f32 %v10911_v5, %v5374_v56  ;;  %v5379_v6 = vsel %vm10901_vm4, %v4517_v19, %v3514_v45  ;;  %v5380_v20 = vsel %vm10905_vm5, %v4517_v19, %v3515_v11  ;;  %4772 = vperm.xlu0 %6891, %v7450_v52   ;;  %v19620_v21 = vld [vmem:[#allocation457_spill] sm:$0xff]  ;;  %v19622_v45 = vld [vmem:[#allocation460_spill] sm:$0xff] }
 0x6ee   :  { %v6009_v13 = vadd.f32 %v10909_v38, %v5379_v6  ;;  %v6010_v28 = vadd.f32 %v10911_v5, %v5380_v20  ;;  %v3520_v34 = vsel %vm10887_vm2, %v19621_v58, %v19620_v21  ;;  %v3521_v46 = vsel %vm10891_vm3, %v19621_v58, %v19620_v21  ;;  %v19623_v11 = vld [vmem:[#allocation177_spill] sm:$0xff] }
 0x6ef   :  { %6622 = vst [vmem:[%s18139_s3 + $0xb70] sm:$0xff] %v6003_v43  ;;  %6623 = vst.msk [vmem:[%s18139_s3 + $0xb78] sm:$0xff] %vm6256_vm6, %v6004_v62  ;;  %v4513_v59 = vpop.permute.xlu1 %4512  ;;  %v3526_v17 = vsel %vm10887_vm2, %v19623_v11, %v19622_v45  ;;  %v3527_v56 = vsel %vm10891_vm3, %v19623_v11, %v19622_v45  ;;  %v7455_v62 = vld [vmem:[%s18136_s0 + $0x7e8] sm:$0xff] }
 0x6f0   :  { %6628 = vst [vmem:[%s18139_s3 + $0xba0] sm:$0xff] %v6009_v13  ;;  %6629 = vst.msk [vmem:[%s18139_s3 + $0xba8] sm:$0xff] %vm6256_vm6, %v6010_v28  ;;  %v5377_v7 = vsel %vm10901_vm4, %v4513_v59, %v3512_v31  ;;  %v5378_v18 = vsel %vm10905_vm5, %v4513_v59, %v3513_v42  ;;  %v4525_v63 = vpop.permute.xlu0 %4524  ;;  %4768 = vperm.xlu1 %6890, %v7451_v54   ;;  %v7456_v28 = vld [vmem:[%s18136_s0 + $0x800] sm:$0xff]  ;;  %v19625_v42 = vld [vmem:[#allocation174_spill] sm:$0xff] }
 0x6f1   :  { %v6007_v3 = vadd.f32 %v10909_v38, %v5377_v7  ;;  %v6008_v16 = vadd.f32 %v10911_v5, %v5378_v18  ;;  %v5383_v41 = vsel %vm10901_vm4, %v4525_v63, %v3518_v37  ;;  %v5384_v23 = vsel %vm10905_vm5, %v4525_v63, %v3519_v60  ;;  %4780 = vperm.xlu0 %6891, %v7452_v50   ;;  %v19624_v31 = vld [vmem:[#allocation459_spill] sm:$0xff]  ;;  %v19626_v37 = vld [vmem:[#allocation462_spill] sm:$0xff] }
 0x6f2   :  { %v6013_v47 = vadd.f32 %v10909_v38, %v5383_v41  ;;  %v6014_v35 = vadd.f32 %v10911_v5, %v5384_v23  ;;  %v3524_v59 = vsel %vm10887_vm2, %v19625_v42, %v19624_v31  ;;  %v3525_v51 = vsel %vm10891_vm3, %v19625_v42, %v19624_v31  ;;  %v19627_v60 = vld [vmem:[#allocation179_spill] sm:$0xff] }
 0x6f3   :  { %6626 = vst [vmem:[%s18139_s3 + $0xb90] sm:$0xff] %v6007_v3  ;;  %6627 = vst.msk [vmem:[%s18139_s3 + $0xb98] sm:$0xff] %vm6256_vm6, %v6008_v16  ;;  %v4521_v29 = vpop.permute.xlu1 %4520  ;;  %v3530_v7 = vsel %vm10887_vm2, %v19627_v60, %v19626_v37  ;;  %v3531_v18 = vsel %vm10891_vm3, %v19627_v60, %v19626_v37  ;;  %v7457_v16 = vld [vmem:[%s18136_s0 + $0x7f8] sm:$0xff] }
 0x6f4   :  { %6632 = vst [vmem:[%s18139_s3 + $0xbc0] sm:$0xff] %v6013_v47  ;;  %6633 = vst.msk [vmem:[%s18139_s3 + $0xbc8] sm:$0xff] %vm6256_vm6, %v6014_v35  ;;  %v5381_v24 = vsel %vm10901_vm4, %v4521_v29, %v3516_v32  ;;  %v5382_v9 = vsel %vm10905_vm5, %v4521_v29, %v3517_v44  ;;  %v4533_v12 = vpop.permute.xlu0 %4532  ;;  %4776 = vperm.xlu1 %6890, %v7453_v49   ;;  %v7458_v35 = vld [vmem:[%s18136_s0 + $0x810] sm:$0xff]  ;;  %v19629_v44 = vld [vmem:[#allocation176_spill] sm:$0xff] }
 0x6f5   :  { %v6011_v4 = vadd.f32 %v10909_v38, %v5381_v24  ;;  %v6012_v1 = vadd.f32 %v10911_v5, %v5382_v9  ;;  %v5387_v39 = vsel %vm10901_vm4, %v4533_v12, %v3522_v33  ;;  %v5388_v10 = vsel %vm10905_vm5, %v4533_v12, %v3523_v0  ;;  %4788 = vperm.xlu0 %6891, %v7454_v8   ;;  %v19628_v32 = vld [vmem:[#allocation461_spill] sm:$0xff]  ;;  %v19630_v33 = vld [vmem:[#allocation464_spill] sm:$0xff] }
 0x6f6   :  { %v6017_v27 = vadd.f32 %v10909_v38, %v5387_v39  ;;  %v6018_v48 = vadd.f32 %v10911_v5, %v5388_v10  ;;  %v3528_v29 = vsel %vm10887_vm2, %v19629_v44, %v19628_v32  ;;  %v3529_v53 = vsel %vm10891_vm3, %v19629_v44, %v19628_v32  ;;  %v19631_v0 = vld [vmem:[#allocation181_spill] sm:$0xff] }
 0x6f7   :  { %6630 = vst [vmem:[%s18139_s3 + $0xbb0] sm:$0xff] %v6011_v4  ;;  %6631 = vst.msk [vmem:[%s18139_s3 + $0xbb8] sm:$0xff] %vm6256_vm6, %v6012_v1  ;;  %v4529_v36 = vpop.permute.xlu1 %4528  ;;  %v3534_v24 = vsel %vm10887_vm2, %v19631_v0, %v19630_v33  ;;  %v3535_v9 = vsel %vm10891_vm3, %v19631_v0, %v19630_v33  ;;  %v7459_v1 = vld [vmem:[%s18136_s0 + $0x808] sm:$0xff] }
 0x6f8   :  { %6636 = vst [vmem:[%s18139_s3 + $0xbe0] sm:$0xff] %v6017_v27  ;;  %6637 = vst.msk [vmem:[%s18139_s3 + $0xbe8] sm:$0xff] %vm6256_vm6, %v6018_v48  ;;  %v5385_v19 = vsel %vm10901_vm4, %v4529_v36, %v3520_v34  ;;  %v5386_v2 = vsel %vm10905_vm5, %v4529_v36, %v3521_v46  ;;  %v4541_v43 = vpop.permute.xlu0 %4540  ;;  %4784 = vperm.xlu1 %6890, %v7455_v62   ;;  %v7460_v48 = vld [vmem:[%s18136_s0 + $0x820] sm:$0xff]  ;;  %v19633_v46 = vld [vmem:[#allocation178_spill] sm:$0xff] }
 0x6f9   :  { %v6015_v6 = vadd.f32 %v10909_v38, %v5385_v19  ;;  %v6016_v20 = vadd.f32 %v10911_v5, %v5386_v2  ;;  %v5391_v52 = vsel %vm10901_vm4, %v4541_v43, %v3526_v17  ;;  %v5392_v13 = vsel %vm10905_vm5, %v4541_v43, %v3527_v56  ;;  %4796 = vperm.xlu0 %6891, %v7456_v28   ;;  %v19632_v34 = vld [vmem:[#allocation463_spill] sm:$0xff]  ;;  %v19634_v17 = vld [vmem:[#allocation466_spill] sm:$0xff] }
 0x6fa   :  { %v6021_v61 = vadd.f32 %v10909_v38, %v5391_v52  ;;  %v6022_v25 = vadd.f32 %v10911_v5, %v5392_v13  ;;  %v3532_v36 = vsel %vm10887_vm2, %v19633_v46, %v19632_v34  ;;  %v3533_v45 = vsel %vm10891_vm3, %v19633_v46, %v19632_v34  ;;  %v19635_v56 = vld [vmem:[#allocation183_spill] sm:$0xff] }
 0x6fb   :  { %6634 = vst [vmem:[%s18139_s3 + $0xbd0] sm:$0xff] %v6015_v6  ;;  %6635 = vst.msk [vmem:[%s18139_s3 + $0xbd8] sm:$0xff] %vm6256_vm6, %v6016_v20  ;;  %v4537_v40 = vpop.permute.xlu1 %4536  ;;  %v3538_v19 = vsel %vm10887_vm2, %v19635_v56, %v19634_v17  ;;  %v3539_v2 = vsel %vm10891_vm3, %v19635_v56, %v19634_v17  ;;  %v7461_v20 = vld [vmem:[%s18136_s0 + $0x818] sm:$0xff] }
 0x6fc   :  { %6640 = vst [vmem:[%s18139_s3 + $0xc00] sm:$0xff] %v6021_v61  ;;  %6641 = vst.msk [vmem:[%s18139_s3 + $0xc08] sm:$0xff] %vm6256_vm6, %v6022_v25  ;;  %v5389_v63 = vsel %vm10901_vm4, %v4537_v40, %v3524_v59  ;;  %v5390_v54 = vsel %vm10905_vm5, %v4537_v40, %v3525_v51  ;;  %v4549_v3 = vpop.permute.xlu0 %4548  ;;  %4792 = vperm.xlu1 %6890, %v7457_v16   ;;  %v7462_v25 = vld [vmem:[%s18136_s0 + $0x830] sm:$0xff]  ;;  %v19637_v51 = vld [vmem:[#allocation180_spill] sm:$0xff] }
 0x6fd   :  { %v6019_v41 = vadd.f32 %v10909_v38, %v5389_v63  ;;  %v6020_v23 = vadd.f32 %v10911_v5, %v5390_v54  ;;  %v5395_v50 = vsel %vm10901_vm4, %v4549_v3, %v3530_v7  ;;  %v5396_v47 = vsel %vm10905_vm5, %v4549_v3, %v3531_v18  ;;  %4804 = vperm.xlu0 %6891, %v7458_v35   ;;  %v19636_v59 = vld [vmem:[#allocation465_spill] sm:$0xff]  ;;  %v19638_v7 = vld [vmem:[#allocation468_spill] sm:$0xff] }
 0x6fe   :  { %v6025_v26 = vadd.f32 %v10909_v38, %v5395_v50  ;;  %v6026_v15 = vadd.f32 %v10911_v5, %v5396_v47  ;;  %v3536_v40 = vsel %vm10887_vm2, %v19637_v51, %v19636_v59  ;;  %v3537_v37 = vsel %vm10891_vm3, %v19637_v51, %v19636_v59  ;;  %v19639_v18 = vld [vmem:[#allocation185_spill] sm:$0xff] }
 0x6ff   :  { %6638 = vst [vmem:[%s18139_s3 + $0xbf0] sm:$0xff] %v6019_v41  ;;  %6639 = vst.msk [vmem:[%s18139_s3 + $0xbf8] sm:$0xff] %vm6256_vm6, %v6020_v23  ;;  %v4545_v57 = vpop.permute.xlu1 %4544  ;;  %v3542_v63 = vsel %vm10887_vm2, %v19639_v18, %v19638_v7  ;;  %v3543_v54 = vsel %vm10891_vm3, %v19639_v18, %v19638_v7  ;;  %v7463_v23 = vld [vmem:[%s18136_s0 + $0x828] sm:$0xff] }
 0x700   :  { %6644 = vst [vmem:[%s18139_s3 + $0xc20] sm:$0xff] %v6025_v26  ;;  %6645 = vst.msk [vmem:[%s18139_s3 + $0xc28] sm:$0xff] %vm6256_vm6, %v6026_v15  ;;  %v5393_v12 = vsel %vm10901_vm4, %v4545_v57, %v3528_v29  ;;  %v5394_v49 = vsel %vm10905_vm5, %v4545_v57, %v3529_v53  ;;  %v4557_v4 = vpop.permute.xlu0 %4556  ;;  %4800 = vperm.xlu1 %6890, %v7459_v1   ;;  %v7464_v15 = vld [vmem:[%s18136_s0 + $0x840] sm:$0xff]  ;;  %v19641_v53 = vld [vmem:[#allocation182_spill] sm:$0xff] }
 0x701   :  { %v6023_v39 = vadd.f32 %v10909_v38, %v5393_v12  ;;  %v6024_v10 = vadd.f32 %v10911_v5, %v5394_v49  ;;  %v5399_v8 = vsel %vm10901_vm4, %v4557_v4, %v3534_v24  ;;  %v5400_v27 = vsel %vm10905_vm5, %v4557_v4, %v3535_v9  ;;  %4812 = vperm.xlu0 %6891, %v7460_v48   ;;  %v19640_v29 = vld [vmem:[#allocation467_spill] sm:$0xff]  ;;  %v19642_v24 = vld [vmem:[#allocation470_spill] sm:$0xff] }
 0x702   :  { %v6029_v21 = vadd.f32 %v10909_v38, %v5399_v8  ;;  %v6030_v58 = vadd.f32 %v10911_v5, %v5400_v27  ;;  %v3540_v57 = vsel %vm10887_vm2, %v19641_v53, %v19640_v29  ;;  %v3541_v33 = vsel %vm10891_vm3, %v19641_v53, %v19640_v29  ;;  %v19643_v9 = vld [vmem:[#allocation187_spill] sm:$0xff] }
 0x703   :  { %6642 = vst [vmem:[%s18139_s3 + $0xc10] sm:$0xff] %v6023_v39  ;;  %6643 = vst.msk [vmem:[%s18139_s3 + $0xc18] sm:$0xff] %vm6256_vm6, %v6024_v10  ;;  %v4553_v11 = vpop.permute.xlu1 %4552  ;;  %v3546_v12 = vsel %vm10887_vm2, %v19643_v9, %v19642_v24  ;;  %v3547_v49 = vsel %vm10891_vm3, %v19643_v9, %v19642_v24  ;;  %v7465_v10 = vld [vmem:[%s18136_s0 + $0x838] sm:$0xff] }
 0x704   :  { %6648 = vst [vmem:[%s18139_s3 + $0xc40] sm:$0xff] %v6029_v21  ;;  %6649 = vst.msk [vmem:[%s18139_s3 + $0xc48] sm:$0xff] %vm6256_vm6, %v6030_v58  ;;  %v5397_v43 = vsel %vm10901_vm4, %v4553_v11, %v3532_v36  ;;  %v5398_v62 = vsel %vm10905_vm5, %v4553_v11, %v3533_v45  ;;  %v4565_v6 = vpop.permute.xlu0 %4564  ;;  %4808 = vperm.xlu1 %6890, %v7461_v20   ;;  %v7466_v58 = vld [vmem:[%s18136_s0 + $0x850] sm:$0xff]  ;;  %v19645_v45 = vld [vmem:[#allocation184_spill] sm:$0xff] }
 0x705   :  { %v6027_v52 = vadd.f32 %v10909_v38, %v5397_v43  ;;  %v6028_v13 = vadd.f32 %v10911_v5, %v5398_v62  ;;  %v5403_v28 = vsel %vm10901_vm4, %v4565_v6, %v3538_v19  ;;  %v5404_v61 = vsel %vm10905_vm5, %v4565_v6, %v3539_v2  ;;  %4820 = vperm.xlu0 %6891, %v7462_v25   ;;  %v19644_v36 = vld [vmem:[#allocation469_spill] sm:$0xff]  ;;  %v19646_v19 = vld [vmem:[#allocation472_spill] sm:$0xff] }
 0x706   :  { %v6033_v31 = vadd.f32 %v10909_v38, %v5403_v28  ;;  %v6034_v42 = vadd.f32 %v10911_v5, %v5404_v61  ;;  %v3544_v11 = vsel %vm10887_vm2, %v19645_v45, %v19644_v36  ;;  %v3545_v17 = vsel %vm10891_vm3, %v19645_v45, %v19644_v36  ;;  %v19647_v2 = vld [vmem:[#allocation189_spill] sm:$0xff] }
 0x707   :  { %6646 = vst [vmem:[%s18139_s3 + $0xc30] sm:$0xff] %v6027_v52  ;;  %6647 = vst.msk [vmem:[%s18139_s3 + $0xc38] sm:$0xff] %vm6256_vm6, %v6028_v13  ;;  %v4561_v60 = vpop.permute.xlu1 %4560  ;;  %v3550_v43 = vsel %vm10887_vm2, %v19647_v2, %v19646_v19  ;;  %v3551_v62 = vsel %vm10891_vm3, %v19647_v2, %v19646_v19  ;;  %v7467_v13 = vld [vmem:[%s18136_s0 + $0x848] sm:$0xff] }
 0x708   :  { %6652 = vst [vmem:[%s18139_s3 + $0xc60] sm:$0xff] %v6033_v31  ;;  %6653 = vst.msk [vmem:[%s18139_s3 + $0xc68] sm:$0xff] %vm6256_vm6, %v6034_v42  ;;  %v5401_v3 = vsel %vm10901_vm4, %v4561_v60, %v3536_v40  ;;  %v5402_v16 = vsel %vm10905_vm5, %v4561_v60, %v3537_v37  ;;  %v4573_v41 = vpop.permute.xlu0 %4572  ;;  %4816 = vperm.xlu1 %6890, %v7463_v23   ;;  %v7468_v42 = vld [vmem:[%s18136_s0 + $0x860] sm:$0xff]  ;;  %v19649_v37 = vld [vmem:[#allocation186_spill] sm:$0xff] }
 0x709   :  { %v6031_v50 = vadd.f32 %v10909_v38, %v5401_v3  ;;  %v6032_v47 = vadd.f32 %v10911_v5, %v5402_v16  ;;  %v5407_v35 = vsel %vm10901_vm4, %v4573_v41, %v3542_v63  ;;  %v5408_v26 = vsel %vm10905_vm5, %v4573_v41, %v3543_v54  ;;  %4828 = vperm.xlu0 %6891, %v7464_v15   ;;  %v19648_v40 = vld [vmem:[#allocation471_spill] sm:$0xff]  ;;  %v19650_v63 = vld [vmem:[#allocation474_spill] sm:$0xff] }
 0x70a   :  { %v6037_v32 = vadd.f32 %v10909_v38, %v5407_v35  ;;  %v6038_v44 = vadd.f32 %v10911_v5, %v5408_v26  ;;  %v3548_v60 = vsel %vm10887_vm2, %v19649_v37, %v19648_v40  ;;  %v3549_v7 = vsel %vm10891_vm3, %v19649_v37, %v19648_v40  ;;  %v19651_v54 = vld [vmem:[#allocation191_spill] sm:$0xff] }
 0x70b   :  { %6650 = vst [vmem:[%s18139_s3 + $0xc50] sm:$0xff] %v6031_v50  ;;  %6651 = vst.msk [vmem:[%s18139_s3 + $0xc58] sm:$0xff] %vm6256_vm6, %v6032_v47  ;;  %v4569_v0 = vpop.permute.xlu1 %4568  ;;  %v3554_v3 = vsel %vm10887_vm2, %v19651_v54, %v19650_v63  ;;  %v3555_v16 = vsel %vm10891_vm3, %v19651_v54, %v19650_v63  ;;  %v7469_v47 = vld [vmem:[%s18136_s0 + $0x858] sm:$0xff] }
 0x70c   :  { %6656 = vst [vmem:[%s18139_s3 + $0xc80] sm:$0xff] %v6037_v32  ;;  %6657 = vst.msk [vmem:[%s18139_s3 + $0xc88] sm:$0xff] %vm6256_vm6, %v6038_v44  ;;  %v5405_v4 = vsel %vm10901_vm4, %v4569_v0, %v3540_v57  ;;  %v5406_v1 = vsel %vm10905_vm5, %v4569_v0, %v3541_v33  ;;  %v4581_v39 = vpop.permute.xlu0 %4580  ;;  %4824 = vperm.xlu1 %6890, %v7465_v10   ;;  %v7470_v44 = vld [vmem:[%s18136_s0 + $0x870] sm:$0xff]  ;;  %v19653_v33 = vld [vmem:[#allocation188_spill] sm:$0xff] }
 0x70d   :  { %v6035_v8 = vadd.f32 %v10909_v38, %v5405_v4  ;;  %v6036_v27 = vadd.f32 %v10911_v5, %v5406_v1  ;;  %v5411_v48 = vsel %vm10901_vm4, %v4581_v39, %v3546_v12  ;;  %v5412_v21 = vsel %vm10905_vm5, %v4581_v39, %v3547_v49  ;;  %4836 = vperm.xlu0 %6891, %v7466_v58   ;;  %v19652_v57 = vld [vmem:[#allocation473_spill] sm:$0xff]  ;;  %v19654_v12 = vld [vmem:[#allocation476_spill] sm:$0xff] }
 0x70e   :  { %v6041_v34 = vadd.f32 %v10909_v38, %v5411_v48  ;;  %v6042_v46 = vadd.f32 %v10911_v5, %v5412_v21  ;;  %v3552_v0 = vsel %vm10887_vm2, %v19653_v33, %v19652_v57  ;;  %v3553_v24 = vsel %vm10891_vm3, %v19653_v33, %v19652_v57  ;;  %v19655_v49 = vld [vmem:[#allocation193_spill] sm:$0xff] }
 0x70f   :  { %6654 = vst [vmem:[%s18139_s3 + $0xc70] sm:$0xff] %v6035_v8  ;;  %6655 = vst.msk [vmem:[%s18139_s3 + $0xc78] sm:$0xff] %vm6256_vm6, %v6036_v27  ;;  %v4577_v56 = vpop.permute.xlu1 %4576  ;;  %v3558_v4 = vsel %vm10887_vm2, %v19655_v49, %v19654_v12  ;;  %v3559_v1 = vsel %vm10891_vm3, %v19655_v49, %v19654_v12  ;;  %v7471_v27 = vld [vmem:[%s18136_s0 + $0x868] sm:$0xff] }
 0x710   :  { %6660 = vst [vmem:[%s18139_s3 + $0xca0] sm:$0xff] %v6041_v34  ;;  %6661 = vst.msk [vmem:[%s18139_s3 + $0xca8] sm:$0xff] %vm6256_vm6, %v6042_v46  ;;  %v5409_v6 = vsel %vm10901_vm4, %v4577_v56, %v3544_v11  ;;  %v5410_v20 = vsel %vm10905_vm5, %v4577_v56, %v3545_v17  ;;  %v4589_v52 = vpop.permute.xlu0 %4588  ;;  %4832 = vperm.xlu1 %6890, %v7467_v13   ;;  %v7472_v46 = vld [vmem:[%s18136_s0 + $0x880] sm:$0xff]  ;;  %v19657_v17 = vld [vmem:[#allocation190_spill] sm:$0xff] }
 0x711   :  { %v6039_v28 = vadd.f32 %v10909_v38, %v5409_v6  ;;  %v6040_v61 = vadd.f32 %v10911_v5, %v5410_v20  ;;  %v5415_v25 = vsel %vm10901_vm4, %v4589_v52, %v3550_v43  ;;  %v5416_v31 = vsel %vm10905_vm5, %v4589_v52, %v3551_v62  ;;  %4844 = vperm.xlu0 %6891, %v7468_v42   ;;  %v19656_v11 = vld [vmem:[#allocation475_spill] sm:$0xff]  ;;  %v19658_v43 = vld [vmem:[#allocation478_spill] sm:$0xff] }
 0x712   :  { %v6045_v59 = vadd.f32 %v10909_v38, %v5415_v25  ;;  %v6046_v51 = vadd.f32 %v10911_v5, %v5416_v31  ;;  %v3556_v56 = vsel %vm10887_vm2, %v19657_v17, %v19656_v11  ;;  %v3557_v19 = vsel %vm10891_vm3, %v19657_v17, %v19656_v11  ;;  %v19659_v62 = vld [vmem:[#allocation195_spill] sm:$0xff] }
 0x713   :  { %6658 = vst [vmem:[%s18139_s3 + $0xc90] sm:$0xff] %v6039_v28  ;;  %6659 = vst.msk [vmem:[%s18139_s3 + $0xc98] sm:$0xff] %vm6256_vm6, %v6040_v61  ;;  %v4585_v18 = vpop.permute.xlu1 %4584  ;;  %v3562_v6 = vsel %vm10887_vm2, %v19659_v62, %v19658_v43  ;;  %v3563_v20 = vsel %vm10891_vm3, %v19659_v62, %v19658_v43  ;;  %v7473_v61 = vld [vmem:[%s18136_s0 + $0x878] sm:$0xff] }
 0x714   :  { %6664 = vst [vmem:[%s18139_s3 + $0xcc0] sm:$0xff] %v6045_v59  ;;  %6665 = vst.msk [vmem:[%s18139_s3 + $0xcc8] sm:$0xff] %vm6256_vm6, %v6046_v51  ;;  %v5413_v41 = vsel %vm10901_vm4, %v4585_v18, %v3548_v60  ;;  %v5414_v23 = vsel %vm10905_vm5, %v4585_v18, %v3549_v7  ;;  %v4597_v50 = vpop.permute.xlu0 %4596  ;;  %4840 = vperm.xlu1 %6890, %v7469_v47   ;;  %v7474_v51 = vld [vmem:[%s18136_s0 + $0x890] sm:$0xff]  ;;  %v19661_v7 = vld [vmem:[#allocation192_spill] sm:$0xff] }
 0x715   :  { %v6043_v35 = vadd.f32 %v10909_v38, %v5413_v41  ;;  %v6044_v26 = vadd.f32 %v10911_v5, %v5414_v23  ;;  %v5419_v15 = vsel %vm10901_vm4, %v4597_v50, %v3554_v3  ;;  %v5420_v32 = vsel %vm10905_vm5, %v4597_v50, %v3555_v16  ;;  %4852 = vperm.xlu0 %6891, %v7470_v44   ;;  %v19660_v60 = vld [vmem:[#allocation477_spill] sm:$0xff]  ;;  %v19662_v3 = vld [vmem:[#allocation480_spill] sm:$0xff] }
 0x716   :  { %v6049_v29 = vadd.f32 %v10909_v38, %v5419_v15  ;;  %v6050_v53 = vadd.f32 %v10911_v5, %v5420_v32  ;;  %v3560_v18 = vsel %vm10887_vm2, %v19661_v7, %v19660_v60  ;;  %v3561_v63 = vsel %vm10891_vm3, %v19661_v7, %v19660_v60  ;;  %v19663_v16 = vld [vmem:[#allocation197_spill] sm:$0xff] }
 0x717   :  { %6662 = vst [vmem:[%s18139_s3 + $0xcb0] sm:$0xff] %v6043_v35  ;;  %6663 = vst.msk [vmem:[%s18139_s3 + $0xcb8] sm:$0xff] %vm6256_vm6, %v6044_v26  ;;  %v4593_v9 = vpop.permute.xlu1 %4592  ;;  %v3566_v41 = vsel %vm10887_vm2, %v19663_v16, %v19662_v3  ;;  %v3567_v23 = vsel %vm10891_vm3, %v19663_v16, %v19662_v3  ;;  %v7475_v26 = vld [vmem:[%s18136_s0 + $0x888] sm:$0xff] }
 0x718   :  { %6668 = vst [vmem:[%s18139_s3 + $0xce0] sm:$0xff] %v6049_v29  ;;  %6669 = vst.msk [vmem:[%s18139_s3 + $0xce8] sm:$0xff] %vm6256_vm6, %v6050_v53  ;;  %v5417_v39 = vsel %vm10901_vm4, %v4593_v9, %v3552_v0  ;;  %v5418_v10 = vsel %vm10905_vm5, %v4593_v9, %v3553_v24  ;;  %v4605_v8 = vpop.permute.xlu0 %4604  ;;  %4848 = vperm.xlu1 %6890, %v7471_v27   ;;  %v7476_v53 = vld [vmem:[%s18136_s0 + $0x8a0] sm:$0xff]  ;;  %v19665_v24 = vld [vmem:[#allocation194_spill] sm:$0xff] }
 0x719   :  { %v6047_v48 = vadd.f32 %v10909_v38, %v5417_v39  ;;  %v6048_v21 = vadd.f32 %v10911_v5, %v5418_v10  ;;  %v5423_v58 = vsel %vm10901_vm4, %v4605_v8, %v3558_v4  ;;  %v5424_v34 = vsel %vm10905_vm5, %v4605_v8, %v3559_v1  ;;  %4860 = vperm.xlu0 %6891, %v7472_v46   ;;  %v19664_v0 = vld [vmem:[#allocation479_spill] sm:$0xff]  ;;  %v19666_v4 = vld [vmem:[#allocation482_spill] sm:$0xff] }
 0x71a   :  { %v6053_v36 = vadd.f32 %v10909_v38, %v5423_v58  ;;  %v6054_v45 = vadd.f32 %v10911_v5, %v5424_v34  ;;  %v3564_v9 = vsel %vm10887_vm2, %v19665_v24, %v19664_v0  ;;  %v3565_v12 = vsel %vm10891_vm3, %v19665_v24, %v19664_v0  ;;  %v19667_v1 = vld [vmem:[#allocation199_spill] sm:$0xff] }
 0x71b   :  { %6666 = vst [vmem:[%s18139_s3 + $0xcd0] sm:$0xff] %v6047_v48  ;;  %6667 = vst.msk [vmem:[%s18139_s3 + $0xcd8] sm:$0xff] %vm6256_vm6, %v6048_v21  ;;  %v4601_v2 = vpop.permute.xlu1 %4600  ;;  %v3570_v39 = vsel %vm10887_vm2, %v19667_v1, %v19666_v4  ;;  %v3571_v10 = vsel %vm10891_vm3, %v19667_v1, %v19666_v4  ;;  %v7477_v21 = vld [vmem:[%s18136_s0 + $0x898] sm:$0xff] }
 0x71c   :  { %6672 = vst [vmem:[%s18139_s3 + $0xd00] sm:$0xff] %v6053_v36  ;;  %6673 = vst.msk [vmem:[%s18139_s3 + $0xd08] sm:$0xff] %vm6256_vm6, %v6054_v45  ;;  %v5421_v52 = vsel %vm10901_vm4, %v4601_v2, %v3556_v56  ;;  %v5422_v13 = vsel %vm10905_vm5, %v4601_v2, %v3557_v19  ;;  %v4613_v28 = vpop.permute.xlu0 %4612  ;;  %4856 = vperm.xlu1 %6890, %v7473_v61   ;;  %v7478_v45 = vld [vmem:[%s18136_s0 + $0x8b0] sm:$0xff]  ;;  %v19669_v19 = vld [vmem:[#allocation196_spill] sm:$0xff] }
 0x71d   :  { %v6051_v25 = vadd.f32 %v10909_v38, %v5421_v52  ;;  %v6052_v31 = vadd.f32 %v10911_v5, %v5422_v13  ;;  %v5427_v42 = vsel %vm10901_vm4, %v4613_v28, %v3562_v6  ;;  %v5428_v59 = vsel %vm10905_vm5, %v4613_v28, %v3563_v20  ;;  %4868 = vperm.xlu0 %6891, %v7474_v51   ;;  %v19668_v56 = vld [vmem:[#allocation481_spill] sm:$0xff]  ;;  %v19670_v6 = vld [vmem:[#allocation484_spill] sm:$0xff] }
 0x71e   :  { %v6057_v40 = vadd.f32 %v10909_v38, %v5427_v42  ;;  %v6058_v37 = vadd.f32 %v10911_v5, %v5428_v59  ;;  %v3568_v2 = vsel %vm10887_vm2, %v19669_v19, %v19668_v56  ;;  %v3569_v43 = vsel %vm10891_vm3, %v19669_v19, %v19668_v56  ;;  %v19671_v20 = vld [vmem:[#allocation201_spill] sm:$0xff] }
 0x71f   :  { %6670 = vst [vmem:[%s18139_s3 + $0xcf0] sm:$0xff] %v6051_v25  ;;  %6671 = vst.msk [vmem:[%s18139_s3 + $0xcf8] sm:$0xff] %vm6256_vm6, %v6052_v31  ;;  %v4609_v54 = vpop.permute.xlu1 %4608  ;;  %v3574_v52 = vsel %vm10887_vm2, %v19671_v20, %v19670_v6  ;;  %v3575_v13 = vsel %vm10891_vm3, %v19671_v20, %v19670_v6  ;;  %v7479_v31 = vld [vmem:[%s18136_s0 + $0x8a8] sm:$0xff] }
 0x720   :  { %6676 = vst [vmem:[%s18139_s3 + $0xd20] sm:$0xff] %v6057_v40  ;;  %6677 = vst.msk [vmem:[%s18139_s3 + $0xd28] sm:$0xff] %vm6256_vm6, %v6058_v37  ;;  %v5425_v50 = vsel %vm10901_vm4, %v4609_v54, %v3560_v18  ;;  %v5426_v47 = vsel %vm10905_vm5, %v4609_v54, %v3561_v63  ;;  %v4621_v35 = vpop.permute.xlu0 %4620  ;;  %4864 = vperm.xlu1 %6890, %v7475_v26   ;;  %v7480_v37 = vld [vmem:[%s18136_s0 + $0x8c0] sm:$0xff]  ;;  %v19673_v63 = vld [vmem:[#allocation198_spill] sm:$0xff] }
 0x721   :  { %v6055_v15 = vadd.f32 %v10909_v38, %v5425_v50  ;;  %v6056_v32 = vadd.f32 %v10911_v5, %v5426_v47  ;;  %v5431_v44 = vsel %vm10901_vm4, %v4621_v35, %v3566_v41  ;;  %v5432_v29 = vsel %vm10905_vm5, %v4621_v35, %v3567_v23  ;;  %4876 = vperm.xlu0 %6891, %v7476_v53   ;;  %v19672_v18 = vld [vmem:[#allocation483_spill] sm:$0xff]  ;;  %v19674_v41 = vld [vmem:[#allocation486_spill] sm:$0xff] }
 0x722   :  { %v6061_v57 = vadd.f32 %v10909_v38, %v5431_v44  ;;  %v6062_v33 = vadd.f32 %v10911_v5, %v5432_v29  ;;  %v3572_v54 = vsel %vm10887_vm2, %v19673_v63, %v19672_v18  ;;  %v3573_v3 = vsel %vm10891_vm3, %v19673_v63, %v19672_v18  ;;  %v19675_v23 = vld [vmem:[#allocation203_spill] sm:$0xff] }
 0x723   :  { %6674 = vst [vmem:[%s18139_s3 + $0xd10] sm:$0xff] %v6055_v15  ;;  %6675 = vst.msk [vmem:[%s18139_s3 + $0xd18] sm:$0xff] %vm6256_vm6, %v6056_v32  ;;  %v4617_v49 = vpop.permute.xlu1 %4616  ;;  %v3578_v50 = vsel %vm10887_vm2, %v19675_v23, %v19674_v41  ;;  %v3579_v47 = vsel %vm10891_vm3, %v19675_v23, %v19674_v41  ;;  %v7481_v32 = vld [vmem:[%s18136_s0 + $0x8b8] sm:$0xff] }
 0x724   :  { %6680 = vst [vmem:[%s18139_s3 + $0xd40] sm:$0xff] %v6061_v57  ;;  %6681 = vst.msk [vmem:[%s18139_s3 + $0xd48] sm:$0xff] %vm6256_vm6, %v6062_v33  ;;  %v5429_v8 = vsel %vm10901_vm4, %v4617_v49, %v3564_v9  ;;  %v5430_v27 = vsel %vm10905_vm5, %v4617_v49, %v3565_v12  ;;  %v4629_v48 = vpop.permute.xlu0 %4628  ;;  %4872 = vperm.xlu1 %6890, %v7477_v21   ;;  %v7482_v33 = vld [vmem:[%s18136_s0 + $0x8d0] sm:$0xff]  ;;  %v19677_v12 = vld [vmem:[#allocation200_spill] sm:$0xff] }
 0x725   :  { %v6059_v58 = vadd.f32 %v10909_v38, %v5429_v8  ;;  %v6060_v34 = vadd.f32 %v10911_v5, %v5430_v27  ;;  %v5435_v46 = vsel %vm10901_vm4, %v4629_v48, %v3570_v39  ;;  %v5436_v36 = vsel %vm10905_vm5, %v4629_v48, %v3571_v10  ;;  %4884 = vperm.xlu0 %6891, %v7478_v45   ;;  %v19676_v9 = vld [vmem:[#allocation485_spill] sm:$0xff]  ;;  %v19678_v39 = vld [vmem:[#allocation488_spill] sm:$0xff] }
 0x726   :  { %v6065_v11 = vadd.f32 %v10909_v38, %v5435_v46  ;;  %v6066_v17 = vadd.f32 %v10911_v5, %v5436_v36  ;;  %v3576_v49 = vsel %vm10887_vm2, %v19677_v12, %v19676_v9  ;;  %v3577_v4 = vsel %vm10891_vm3, %v19677_v12, %v19676_v9  ;;  %v19679_v10 = vld [vmem:[#allocation205_spill] sm:$0xff] }
 0x727   :  { %6678 = vst [vmem:[%s18139_s3 + $0xd30] sm:$0xff] %v6059_v58  ;;  %6679 = vst.msk [vmem:[%s18139_s3 + $0xd38] sm:$0xff] %vm6256_vm6, %v6060_v34  ;;  %v4625_v62 = vpop.permute.xlu1 %4624  ;;  %v3582_v8 = vsel %vm10887_vm2, %v19679_v10, %v19678_v39  ;;  %v3583_v27 = vsel %vm10891_vm3, %v19679_v10, %v19678_v39  ;;  %v7483_v34 = vld [vmem:[%s18136_s0 + $0x8c8] sm:$0xff] }
 0x728   :  { %6684 = vst [vmem:[%s18139_s3 + $0xd60] sm:$0xff] %v6065_v11  ;;  %6685 = vst.msk [vmem:[%s18139_s3 + $0xd68] sm:$0xff] %vm6256_vm6, %v6066_v17  ;;  %v5433_v28 = vsel %vm10901_vm4, %v4625_v62, %v3568_v2  ;;  %v5434_v61 = vsel %vm10905_vm5, %v4625_v62, %v3569_v43  ;;  %v4637_v25 = vpop.permute.xlu0 %4636  ;;  %4880 = vperm.xlu1 %6890, %v7479_v31   ;;  %v7484_v17 = vld [vmem:[%s18136_s0 + $0x8e0] sm:$0xff]  ;;  %v19681_v43 = vld [vmem:[#allocation202_spill] sm:$0xff] }
 0x729   :  { %v6063_v42 = vadd.f32 %v10909_v38, %v5433_v28  ;;  %v6064_v59 = vadd.f32 %v10911_v5, %v5434_v61  ;;  %v5439_v51 = vsel %vm10901_vm4, %v4637_v25, %v3574_v52  ;;  %v5440_v40 = vsel %vm10905_vm5, %v4637_v25, %v3575_v13  ;;  %4892 = vperm.xlu0 %6891, %v7480_v37   ;;  %v19680_v2 = vld [vmem:[#allocation487_spill] sm:$0xff]  ;;  %v19682_v52 = vld [vmem:[#allocation490_spill] sm:$0xff] }
 0x72a   :  { %v6069_v60 = vadd.f32 %v10909_v38, %v5439_v51  ;;  %v6070_v7 = vadd.f32 %v10911_v5, %v5440_v40  ;;  %v3580_v62 = vsel %vm10887_vm2, %v19681_v43, %v19680_v2  ;;  %v3581_v6 = vsel %vm10891_vm3, %v19681_v43, %v19680_v2  ;;  %v19683_v13 = vld [vmem:[#allocation207_spill] sm:$0xff] }
 0x72b   :  { %6682 = vst [vmem:[%s18139_s3 + $0xd50] sm:$0xff] %v6063_v42  ;;  %6683 = vst.msk [vmem:[%s18139_s3 + $0xd58] sm:$0xff] %vm6256_vm6, %v6064_v59  ;;  %v4633_v16 = vpop.permute.xlu1 %4632  ;;  %v3586_v28 = vsel %vm10887_vm2, %v19683_v13, %v19682_v52  ;;  %v3587_v61 = vsel %vm10891_vm3, %v19683_v13, %v19682_v52  ;;  %v7485_v59 = vld [vmem:[%s18136_s0 + $0x8d8] sm:$0xff] }
 0x72c   :  { %6688 = vst [vmem:[%s18139_s3 + $0xd80] sm:$0xff] %v6069_v60  ;;  %6689 = vst.msk [vmem:[%s18139_s3 + $0xd88] sm:$0xff] %vm6256_vm6, %v6070_v7  ;;  %v5437_v35 = vsel %vm10901_vm4, %v4633_v16, %v3572_v54  ;;  %v5438_v26 = vsel %vm10905_vm5, %v4633_v16, %v3573_v3  ;;  %v4645_v15 = vpop.permute.xlu0 %4644  ;;  %4888 = vperm.xlu1 %6890, %v7481_v32   ;;  %v7486_v7 = vld [vmem:[%s18136_s0 + $0x8f0] sm:$0xff]  ;;  %v19685_v3 = vld [vmem:[#allocation204_spill] sm:$0xff] }
 0x72d   :  { %v6067_v44 = vadd.f32 %v10909_v38, %v5437_v35  ;;  %v6068_v29 = vadd.f32 %v10911_v5, %v5438_v26  ;;  %v5443_v53 = vsel %vm10901_vm4, %v4645_v15, %v3578_v50  ;;  %v5444_v57 = vsel %vm10905_vm5, %v4645_v15, %v3579_v47  ;;  %4900 = vperm.xlu0 %6891, %v7482_v33   ;;  %v19684_v54 = vld [vmem:[#allocation489_spill] sm:$0xff]  ;;  %v19686_v50 = vld [vmem:[#allocation492_spill] sm:$0xff] }
 0x72e   :  { %v6073_v0 = vadd.f32 %v10909_v38, %v5443_v53  ;;  %v6074_v24 = vadd.f32 %v10911_v5, %v5444_v57  ;;  %v3584_v16 = vsel %vm10887_vm2, %v19685_v3, %v19684_v54  ;;  %v3585_v41 = vsel %vm10891_vm3, %v19685_v3, %v19684_v54  ;;  %v19687_v47 = vld [vmem:[#allocation209_spill] sm:$0xff] }
 0x72f   :  { %6686 = vst [vmem:[%s18139_s3 + $0xd70] sm:$0xff] %v6067_v44  ;;  %6687 = vst.msk [vmem:[%s18139_s3 + $0xd78] sm:$0xff] %vm6256_vm6, %v6068_v29  ;;  %v4641_v1 = vpop.permute.xlu1 %4640  ;;  %v3590_v35 = vsel %vm10887_vm2, %v19687_v47, %v19686_v50  ;;  %v3591_v26 = vsel %vm10891_vm3, %v19687_v47, %v19686_v50  ;;  %v7487_v29 = vld [vmem:[%s18136_s0 + $0x8e8] sm:$0xff] }
 0x730   :  { %6692 = vst [vmem:[%s18139_s3 + $0xda0] sm:$0xff] %v6073_v0  ;;  %6693 = vst.msk [vmem:[%s18139_s3 + $0xda8] sm:$0xff] %vm6256_vm6, %v6074_v24  ;;  %v5441_v48 = vsel %vm10901_vm4, %v4641_v1, %v3576_v49  ;;  %v5442_v21 = vsel %vm10905_vm5, %v4641_v1, %v3577_v4  ;;  %v4653_v58 = vpop.permute.xlu0 %4652  ;;  %4896 = vperm.xlu1 %6890, %v7483_v34   ;;  %v7488_v24 = vld [vmem:[%s18136_s0 + $0x900] sm:$0xff]  ;;  %v19689_v4 = vld [vmem:[#allocation206_spill] sm:$0xff] }
 0x731   :  { %v6071_v46 = vadd.f32 %v10909_v38, %v5441_v48  ;;  %v6072_v36 = vadd.f32 %v10911_v5, %v5442_v21  ;;  %v5447_v45 = vsel %vm10901_vm4, %v4653_v58, %v3582_v8  ;;  %v5448_v11 = vsel %vm10905_vm5, %v4653_v58, %v3583_v27  ;;  %4908 = vperm.xlu0 %6891, %v7484_v17   ;;  %v19688_v49 = vld [vmem:[#allocation491_spill] sm:$0xff]  ;;  %v19690_v8 = vld [vmem:[#allocation494_spill] sm:$0xff] }
 0x732   :  { %v6077_v56 = vadd.f32 %v10909_v38, %v5447_v45  ;;  %v6078_v19 = vadd.f32 %v10911_v5, %v5448_v11  ;;  %v3588_v1 = vsel %vm10887_vm2, %v19689_v4, %v19688_v49  ;;  %v3589_v39 = vsel %vm10891_vm3, %v19689_v4, %v19688_v49  ;;  %v19691_v27 = vld [vmem:[#allocation211_spill] sm:$0xff] }
 0x733   :  { %6690 = vst [vmem:[%s18139_s3 + $0xd90] sm:$0xff] %v6071_v46  ;;  %6691 = vst.msk [vmem:[%s18139_s3 + $0xd98] sm:$0xff] %vm6256_vm6, %v6072_v36  ;;  %v4649_v20 = vpop.permute.xlu1 %4648  ;;  %v3594_v48 = vsel %vm10887_vm2, %v19691_v27, %v19690_v8  ;;  %v3595_v21 = vsel %vm10891_vm3, %v19691_v27, %v19690_v8  ;;  %v7489_v36 = vld [vmem:[%s18136_s0 + $0x8f8] sm:$0xff] }
 0x734   :  { %6696 = vst [vmem:[%s18139_s3 + $0xdc0] sm:$0xff] %v6077_v56  ;;  %6697 = vst.msk [vmem:[%s18139_s3 + $0xdc8] sm:$0xff] %vm6256_vm6, %v6078_v19  ;;  %v5445_v25 = vsel %vm10901_vm4, %v4649_v20, %v3580_v62  ;;  %v5446_v31 = vsel %vm10905_vm5, %v4649_v20, %v3581_v6  ;;  %v4661_v42 = vpop.permute.xlu0 %4660  ;;  %4904 = vperm.xlu1 %6890, %v7485_v59   ;;  %v7490_v19 = vld [vmem:[%s18136_s0 + $0x910] sm:$0xff]  ;;  %v19693_v6 = vld [vmem:[#allocation208_spill] sm:$0xff] }
 0x735   :  { %v6075_v51 = vadd.f32 %v10909_v38, %v5445_v25  ;;  %v6076_v40 = vadd.f32 %v10911_v5, %v5446_v31  ;;  %v5451_v37 = vsel %vm10901_vm4, %v4661_v42, %v3586_v28  ;;  %v5452_v60 = vsel %vm10905_vm5, %v4661_v42, %v3587_v61  ;;  %4916 = vperm.xlu0 %6891, %v7486_v7   ;;  %v19692_v62 = vld [vmem:[#allocation493_spill] sm:$0xff]  ;;  %v19694_v28 = vld [vmem:[#allocation496_spill] sm:$0xff] }
 0x736   :  { %v6081_v18 = vadd.f32 %v10909_v38, %v5451_v37  ;;  %v6082_v63 = vadd.f32 %v10911_v5, %v5452_v60  ;;  %v3592_v20 = vsel %vm10887_vm2, %v19693_v6, %v19692_v62  ;;  %v3593_v52 = vsel %vm10891_vm3, %v19693_v6, %v19692_v62  ;;  %v19695_v61 = vld [vmem:[#allocation213_spill] sm:$0xff] }
 0x737   :  { %6694 = vst [vmem:[%s18139_s3 + $0xdb0] sm:$0xff] %v6075_v51  ;;  %6695 = vst.msk [vmem:[%s18139_s3 + $0xdb8] sm:$0xff] %vm6256_vm6, %v6076_v40  ;;  %v4657_v23 = vpop.permute.xlu1 %4656  ;;  %v3598_v25 = vsel %vm10887_vm2, %v19695_v61, %v19694_v28  ;;  %v3599_v31 = vsel %vm10891_vm3, %v19695_v61, %v19694_v28  ;;  %v7491_v40 = vld [vmem:[%s18136_s0 + $0x908] sm:$0xff] }
 0x738   :  { %6700 = vst [vmem:[%s18139_s3 + $0xde0] sm:$0xff] %v6081_v18  ;;  %6701 = vst.msk [vmem:[%s18139_s3 + $0xde8] sm:$0xff] %vm6256_vm6, %v6082_v63  ;;  %v5449_v15 = vsel %vm10901_vm4, %v4657_v23, %v3584_v16  ;;  %v5450_v32 = vsel %vm10905_vm5, %v4657_v23, %v3585_v41  ;;  %v4669_v44 = vpop.permute.xlu0 %4668  ;;  %4912 = vperm.xlu1 %6890, %v7487_v29   ;;  %v7492_v63 = vld [vmem:[%s18136_s0 + $0x920] sm:$0xff]  ;;  %v19697_v41 = vld [vmem:[#allocation210_spill] sm:$0xff] }
 0x739   :  { %v6079_v53 = vadd.f32 %v10909_v38, %v5449_v15  ;;  %v6080_v57 = vadd.f32 %v10911_v5, %v5450_v32  ;;  %v5455_v33 = vsel %vm10901_vm4, %v4669_v44, %v3590_v35  ;;  %v5456_v0 = vsel %vm10905_vm5, %v4669_v44, %v3591_v26  ;;  %4924 = vperm.xlu0 %6891, %v7488_v24   ;;  %v19696_v16 = vld [vmem:[#allocation495_spill] sm:$0xff]  ;;  %v19698_v35 = vld [vmem:[#allocation498_spill] sm:$0xff] }
 0x73a   :  { %v6085_v9 = vadd.f32 %v10909_v38, %v5455_v33  ;;  %v6086_v12 = vadd.f32 %v10911_v5, %v5456_v0  ;;  %v3596_v23 = vsel %vm10887_vm2, %v19697_v41, %v19696_v16  ;;  %v3597_v50 = vsel %vm10891_vm3, %v19697_v41, %v19696_v16  ;;  %v19699_v26 = vld [vmem:[#allocation215_spill] sm:$0xff] }
 0x73b   :  { %6698 = vst [vmem:[%s18139_s3 + $0xdd0] sm:$0xff] %v6079_v53  ;;  %6699 = vst.msk [vmem:[%s18139_s3 + $0xdd8] sm:$0xff] %vm6256_vm6, %v6080_v57  ;;  %v4665_v10 = vpop.permute.xlu1 %4664  ;;  %v3602_v15 = vsel %vm10887_vm2, %v19699_v26, %v19698_v35  ;;  %v3603_v32 = vsel %vm10891_vm3, %v19699_v26, %v19698_v35  ;;  %v7493_v57 = vld [vmem:[%s18136_s0 + $0x918] sm:$0xff] }
 0x73c   :  { %6704 = vst [vmem:[%s18139_s3 + $0xe00] sm:$0xff] %v6085_v9  ;;  %6705 = vst.msk [vmem:[%s18139_s3 + $0xe08] sm:$0xff] %vm6256_vm6, %v6086_v12  ;;  %v5453_v58 = vsel %vm10901_vm4, %v4665_v10, %v3588_v1  ;;  %v5454_v34 = vsel %vm10905_vm5, %v4665_v10, %v3589_v39  ;;  %v4677_v46 = vpop.permute.xlu0 %4676  ;;  %4920 = vperm.xlu1 %6890, %v7489_v36   ;;  %v7494_v12 = vld [vmem:[%s18136_s0 + $0x930] sm:$0xff]  ;;  %v19701_v39 = vld [vmem:[#allocation212_spill] sm:$0xff] }
 0x73d   :  { %v6083_v45 = vadd.f32 %v10909_v38, %v5453_v58  ;;  %v6084_v11 = vadd.f32 %v10911_v5, %v5454_v34  ;;  %v5459_v17 = vsel %vm10901_vm4, %v4677_v46, %v3594_v48  ;;  %v5460_v56 = vsel %vm10905_vm5, %v4677_v46, %v3595_v21  ;;  %4932 = vperm.xlu0 %6891, %v7490_v19   ;;  %v19700_v1 = vld [vmem:[#allocation497_spill] sm:$0xff]  ;;  %v19702_v48 = vld [vmem:[#allocation500_spill] sm:$0xff] }
 0x73e   :  { %v6089_v2 = vadd.f32 %v10909_v38, %v5459_v17  ;;  %v6090_v43 = vadd.f32 %v10911_v5, %v5460_v56  ;;  %v3600_v10 = vsel %vm10887_vm2, %v19701_v39, %v19700_v1  ;;  %v3601_v8 = vsel %vm10891_vm3, %v19701_v39, %v19700_v1  ;;  %v19703_v21 = vld [vmem:[#allocation217_spill] sm:$0xff] }
 0x73f   :  { %6702 = vst [vmem:[%s18139_s3 + $0xdf0] sm:$0xff] %v6083_v45  ;;  %6703 = vst.msk [vmem:[%s18139_s3 + $0xdf8] sm:$0xff] %vm6256_vm6, %v6084_v11  ;;  %v4673_v13 = vpop.permute.xlu1 %4672  ;;  %v3606_v58 = vsel %vm10887_vm2, %v19703_v21, %v19702_v48  ;;  %v3607_v34 = vsel %vm10891_vm3, %v19703_v21, %v19702_v48  ;;  %v7495_v11 = vld [vmem:[%s18136_s0 + $0x928] sm:$0xff] }
 0x740   :  { %6708 = vst [vmem:[%s18139_s3 + $0xe20] sm:$0xff] %v6089_v2  ;;  %6709 = vst.msk [vmem:[%s18139_s3 + $0xe28] sm:$0xff] %vm6256_vm6, %v6090_v43  ;;  %v5457_v42 = vsel %vm10901_vm4, %v4673_v13, %v3592_v20  ;;  %v5458_v59 = vsel %vm10905_vm5, %v4673_v13, %v3593_v52  ;;  %v4685_v51 = vpop.permute.xlu0 %4684  ;;  %4928 = vperm.xlu1 %6890, %v7491_v40   ;;  %v7496_v43 = vld [vmem:[%s18136_s0 + $0x940] sm:$0xff]  ;;  %v19705_v52 = vld [vmem:[#allocation214_spill] sm:$0xff] }
 0x741   :  { %v6087_v37 = vadd.f32 %v10909_v38, %v5457_v42  ;;  %v6088_v60 = vadd.f32 %v10911_v5, %v5458_v59  ;;  %v5463_v7 = vsel %vm10901_vm4, %v4685_v51, %v3598_v25  ;;  %v5464_v18 = vsel %vm10905_vm5, %v4685_v51, %v3599_v31  ;;  %4940 = vperm.xlu0 %6891, %v7492_v63   ;;  %v19704_v20 = vld [vmem:[#allocation499_spill] sm:$0xff]  ;;  %v19706_v25 = vld [vmem:[#allocation502_spill] sm:$0xff] }
 0x742   :  { %v6093_v54 = vadd.f32 %v10909_v38, %v5463_v7  ;;  %v6094_v3 = vadd.f32 %v10911_v5, %v5464_v18  ;;  %v3604_v13 = vsel %vm10887_vm2, %v19705_v52, %v19704_v20  ;;  %v3605_v28 = vsel %vm10891_vm3, %v19705_v52, %v19704_v20  ;;  %v19707_v31 = vld [vmem:[#allocation219_spill] sm:$0xff] }
 0x743   :  { %6706 = vst [vmem:[%s18139_s3 + $0xe10] sm:$0xff] %v6087_v37  ;;  %6707 = vst.msk [vmem:[%s18139_s3 + $0xe18] sm:$0xff] %vm6256_vm6, %v6088_v60  ;;  %v4681_v47 = vpop.permute.xlu1 %4680  ;;  %v3610_v42 = vsel %vm10887_vm2, %v19707_v31, %v19706_v25  ;;  %v3611_v59 = vsel %vm10891_vm3, %v19707_v31, %v19706_v25  ;;  %v7497_v60 = vld [vmem:[%s18136_s0 + $0x938] sm:$0xff] }
 0x744   :  { %6712 = vst [vmem:[%s18139_s3 + $0xe40] sm:$0xff] %v6093_v54  ;;  %6713 = vst.msk [vmem:[%s18139_s3 + $0xe48] sm:$0xff] %vm6256_vm6, %v6094_v3  ;;  %v5461_v44 = vsel %vm10901_vm4, %v4681_v47, %v3596_v23  ;;  %v5462_v29 = vsel %vm10905_vm5, %v4681_v47, %v3597_v50  ;;  %v4693_v53 = vpop.permute.xlu0 %4692  ;;  %4936 = vperm.xlu1 %6890, %v7493_v57   ;;  %v7498_v3 = vld [vmem:[%s18136_s0 + $0x950] sm:$0xff]  ;;  %v19709_v50 = vld [vmem:[#allocation216_spill] sm:$0xff] }
 0x745   :  { %v6091_v33 = vadd.f32 %v10909_v38, %v5461_v44  ;;  %v6092_v0 = vadd.f32 %v10911_v5, %v5462_v29  ;;  %v5467_v24 = vsel %vm10901_vm4, %v4693_v53, %v3602_v15  ;;  %v5468_v9 = vsel %vm10905_vm5, %v4693_v53, %v3603_v32  ;;  %4948 = vperm.xlu0 %6891, %v7494_v12   ;;  %v19708_v23 = vld [vmem:[#allocation501_spill] sm:$0xff]  ;;  %v19710_v15 = vld [vmem:[#allocation504_spill] sm:$0xff] }
 0x746   :  { %v6097_v49 = vadd.f32 %v10909_v38, %v5467_v24  ;;  %v6098_v4 = vadd.f32 %v10911_v5, %v5468_v9  ;;  %v3608_v47 = vsel %vm10887_vm2, %v19709_v50, %v19708_v23  ;;  %v3609_v35 = vsel %vm10891_vm3, %v19709_v50, %v19708_v23  ;;  %v19711_v32 = vld [vmem:[#allocation221_spill] sm:$0xff] }
 0x747   :  { %6710 = vst [vmem:[%s18139_s3 + $0xe30] sm:$0xff] %v6091_v33  ;;  %6711 = vst.msk [vmem:[%s18139_s3 + $0xe38] sm:$0xff] %vm6256_vm6, %v6092_v0  ;;  %v4689_v27 = vpop.permute.xlu1 %4688  ;;  %v3614_v44 = vsel %vm10887_vm2, %v19711_v32, %v19710_v15  ;;  %v3615_v29 = vsel %vm10891_vm3, %v19711_v32, %v19710_v15  ;;  %v7499_v0 = vld [vmem:[%s18136_s0 + $0x948] sm:$0xff] }
 0x748   :  { %6716 = vst [vmem:[%s18139_s3 + $0xe60] sm:$0xff] %v6097_v49  ;;  %6717 = vst.msk [vmem:[%s18139_s3 + $0xe68] sm:$0xff] %vm6256_vm6, %v6098_v4  ;;  %v5465_v46 = vsel %vm10901_vm4, %v4689_v27, %v3600_v10  ;;  %v5466_v36 = vsel %vm10905_vm5, %v4689_v27, %v3601_v8  ;;  %v4701_v45 = vpop.permute.xlu0 %4700  ;;  %4944 = vperm.xlu1 %6890, %v7495_v11   ;;  %v7500_v4 = vld [vmem:[%s18136_s0 + $0x960] sm:$0xff]  ;;  %v19713_v8 = vld [vmem:[#allocation218_spill] sm:$0xff] }
 0x749   :  { %v6095_v17 = vadd.f32 %v10909_v38, %v5465_v46  ;;  %v6096_v56 = vadd.f32 %v10911_v5, %v5466_v36  ;;  %v5471_v19 = vsel %vm10901_vm4, %v4701_v45, %v3606_v58  ;;  %v5472_v2 = vsel %vm10905_vm5, %v4701_v45, %v3607_v34  ;;  %4956 = vperm.xlu0 %6891, %v7496_v43   ;;  %v19712_v10 = vld [vmem:[#allocation503_spill] sm:$0xff]  ;;  %v19714_v58 = vld [vmem:[#allocation506_spill] sm:$0xff] }
 0x74a   :  { %v6101_v62 = vadd.f32 %v10909_v38, %v5471_v19  ;;  %v6102_v6 = vadd.f32 %v10911_v5, %v5472_v2  ;;  %v3612_v27 = vsel %vm10887_vm2, %v19713_v8, %v19712_v10  ;;  %v3613_v48 = vsel %vm10891_vm3, %v19713_v8, %v19712_v10  ;;  %v19715_v34 = vld [vmem:[#allocation223_spill] sm:$0xff] }
 0x74b   :  { %6714 = vst [vmem:[%s18139_s3 + $0xe50] sm:$0xff] %v6095_v17  ;;  %6715 = vst.msk [vmem:[%s18139_s3 + $0xe58] sm:$0xff] %vm6256_vm6, %v6096_v56  ;;  %v4697_v61 = vpop.permute.xlu1 %4696  ;;  %v3618_v46 = vsel %vm10887_vm2, %v19715_v34, %v19714_v58  ;;  %v3619_v36 = vsel %vm10891_vm3, %v19715_v34, %v19714_v58  ;;  %v7501_v56 = vld [vmem:[%s18136_s0 + $0x958] sm:$0xff] }
 0x74c   :  { %6720 = vst [vmem:[%s18139_s3 + $0xe80] sm:$0xff] %v6101_v62  ;;  %6721 = vst.msk [vmem:[%s18139_s3 + $0xe88] sm:$0xff] %vm6256_vm6, %v6102_v6  ;;  %v5469_v51 = vsel %vm10901_vm4, %v4697_v61, %v3604_v13  ;;  %v5470_v40 = vsel %vm10905_vm5, %v4697_v61, %v3605_v28  ;;  %v4709_v37 = vpop.permute.xlu0 %4708  ;;  %4952 = vperm.xlu1 %6890, %v7497_v60   ;;  %v7502_v6 = vld [vmem:[%s18136_s0 + $0x970] sm:$0xff]  ;;  %v19717_v28 = vld [vmem:[#allocation220_spill] sm:$0xff] }
 0x74d   :  { %v6099_v7 = vadd.f32 %v10909_v38, %v5469_v51  ;;  %v6100_v18 = vadd.f32 %v10911_v5, %v5470_v40  ;;  %v5475_v63 = vsel %vm10901_vm4, %v4709_v37, %v3610_v42  ;;  %v5476_v54 = vsel %vm10905_vm5, %v4709_v37, %v3611_v59  ;;  %4964 = vperm.xlu0 %6891, %v7498_v3   ;;  %v19716_v13 = vld [vmem:[#allocation505_spill] sm:$0xff]  ;;  %v19718_v42 = vld [vmem:[#allocation508_spill] sm:$0xff] }
 0x74e   :  { %v6105_v16 = vadd.f32 %v10909_v38, %v5475_v63  ;;  %v6106_v41 = vadd.f32 %v10911_v5, %v5476_v54  ;;  %v3616_v61 = vsel %vm10887_vm2, %v19717_v28, %v19716_v13  ;;  %v3617_v25 = vsel %vm10891_vm3, %v19717_v28, %v19716_v13  ;;  %v19719_v59 = vld [vmem:[#allocation225_spill] sm:$0xff] }
 0x74f   :  { %6718 = vst [vmem:[%s18139_s3 + $0xe70] sm:$0xff] %v6099_v7  ;;  %6719 = vst.msk [vmem:[%s18139_s3 + $0xe78] sm:$0xff] %vm6256_vm6, %v6100_v18  ;;  %v4705_v26 = vpop.permute.xlu1 %4704  ;;  %v3622_v51 = vsel %vm10887_vm2, %v19719_v59, %v19718_v42  ;;  %v3623_v40 = vsel %vm10891_vm3, %v19719_v59, %v19718_v42  ;;  %v7503_v18 = vld [vmem:[%s18136_s0 + $0x968] sm:$0xff] }
 0x750   :  { %6724 = vst [vmem:[%s18139_s3 + $0xea0] sm:$0xff] %v6105_v16  ;;  %6725 = vst.msk [vmem:[%s18139_s3 + $0xea8] sm:$0xff] %vm6256_vm6, %v6106_v41  ;;  %v5473_v53 = vsel %vm10901_vm4, %v4705_v26, %v3608_v47  ;;  %v5474_v57 = vsel %vm10905_vm5, %v4705_v26, %v3609_v35  ;;  %v4717_v33 = vpop.permute.xlu0 %4716  ;;  %4960 = vperm.xlu1 %6890, %v7499_v0   ;;  %v7504_v41 = vld [vmem:[%s18136_s0 + $0x980] sm:$0xff]  ;;  %v19721_v35 = vld [vmem:[#allocation222_spill] sm:$0xff] }
 0x751   :  { %v6103_v24 = vadd.f32 %v10909_v38, %v5473_v53  ;;  %v6104_v9 = vadd.f32 %v10911_v5, %v5474_v57  ;;  %v5479_v12 = vsel %vm10901_vm4, %v4717_v33, %v3614_v44  ;;  %v5480_v49 = vsel %vm10905_vm5, %v4717_v33, %v3615_v29  ;;  %4972 = vperm.xlu0 %6891, %v7500_v4   ;;  %v19720_v47 = vld [vmem:[#allocation507_spill] sm:$0xff]  ;;  %v19722_v44 = vld [vmem:[#allocation510_spill] sm:$0xff] }
 0x752   :  { %v6109_v1 = vadd.f32 %v10909_v38, %v5479_v12  ;;  %v6110_v39 = vadd.f32 %v10911_v5, %v5480_v49  ;;  %v3620_v26 = vsel %vm10887_vm2, %v19721_v35, %v19720_v47  ;;  %v3621_v15 = vsel %vm10891_vm3, %v19721_v35, %v19720_v47  ;;  %v19723_v29 = vld [vmem:[#allocation227_spill] sm:$0xff]  ;;  %v19732_v35 = vld [vmem:[#allocation513_spill] sm:$0xff] }
 0x753   :  { %6722 = vst [vmem:[%s18139_s3 + $0xe90] sm:$0xff] %v6103_v24  ;;  %6723 = vst.msk [vmem:[%s18139_s3 + $0xe98] sm:$0xff] %vm6256_vm6, %v6104_v9  ;;  %v4713_v21 = vpop.permute.xlu1 %4712  ;;  %v3626_v53 = vsel %vm10887_vm2, %v19723_v29, %v19722_v44  ;;  %v3627_v57 = vsel %vm10891_vm3, %v19723_v29, %v19722_v44  ;;  %v7505_v9 = vld [vmem:[%s18136_s0 + $0x978] sm:$0xff]  ;;  %v19734_v29 = vld [vmem:[#allocation516_spill] sm:$0xff] }
 0x754   :  { %6728 = vst [vmem:[%s18139_s3 + $0xec0] sm:$0xff] %v6109_v1  ;;  %6729 = vst.msk [vmem:[%s18139_s3 + $0xec8] sm:$0xff] %vm6256_vm6, %v6110_v39  ;;  %v5477_v45 = vsel %vm10901_vm4, %v4713_v21, %v3612_v27  ;;  %v5478_v11 = vsel %vm10905_vm5, %v4713_v21, %v3613_v48  ;;  %v4725_v17 = vpop.permute.xlu0 %4724  ;;  %4968 = vperm.xlu1 %6890, %v7501_v56   ;;  %v7506_v39 = vld [vmem:[%s18136_s0 + $0x990] sm:$0xff]  ;;  %v19725_v48 = vld [vmem:[#allocation224_spill] sm:$0xff] }
 0x755   :  { %v6107_v19 = vadd.f32 %v10909_v38, %v5477_v45  ;;  %v6108_v2 = vadd.f32 %v10911_v5, %v5478_v11  ;;  %v5483_v43 = vsel %vm10901_vm4, %v4725_v17, %v3618_v46  ;;  %v5484_v62 = vsel %vm10905_vm5, %v4725_v17, %v3619_v36  ;;  %4980 = vperm.xlu0 %6891, %v7502_v6   ;;  %v19724_v27 = vld [vmem:[#allocation509_spill] sm:$0xff]  ;;  %v19726_v46 = vld [vmem:[#allocation512_spill] sm:$0xff] }
 0x756   :  { %v6113_v20 = vadd.f32 %v10909_v38, %v5483_v43  ;;  %v6114_v52 = vadd.f32 %v10911_v5, %v5484_v62  ;;  %v3624_v21 = vsel %vm10887_vm2, %v19725_v48, %v19724_v27  ;;  %v3625_v58 = vsel %vm10891_vm3, %v19725_v48, %v19724_v27  ;;  %v19727_v36 = vld [vmem:[#allocation229_spill] sm:$0xff]  ;;  %v19737_v27 = vld [vmem:[#allocation230_spill] sm:$0xff] }
 0x757   :  { %6726 = vst [vmem:[%s18139_s3 + $0xeb0] sm:$0xff] %v6107_v19  ;;  %6727 = vst.msk [vmem:[%s18139_s3 + $0xeb8] sm:$0xff] %vm6256_vm6, %v6108_v2  ;;  %v4721_v31 = vpop.permute.xlu1 %4720  ;;  %v3630_v45 = vsel %vm10887_vm2, %v19727_v36, %v19726_v46  ;;  %v3631_v11 = vsel %vm10891_vm3, %v19727_v36, %v19726_v46  ;;  %v7507_v2 = vld [vmem:[%s18136_s0 + $0x988] sm:$0xff]  ;;  %v19739_v46 = vld [vmem:[#allocation235_spill] sm:$0xff] }
 0x758   :  { %6732 = vst [vmem:[%s18139_s3 + $0xee0] sm:$0xff] %v6113_v20  ;;  %6733 = vst.msk [vmem:[%s18139_s3 + $0xee8] sm:$0xff] %vm6256_vm6, %v6114_v52  ;;  %v5481_v37 = vsel %vm10901_vm4, %v4721_v31, %v3616_v61  ;;  %v5482_v60 = vsel %vm10905_vm5, %v4721_v31, %v3617_v25  ;;  %v4733_v7 = vpop.permute.xlu0 %4732  ;;  %4976 = vperm.xlu1 %6890, %v7503_v18   ;;  %v7508_v52 = vld [vmem:[%s18136_s0 + $0x9a0] sm:$0x3]  ;;  %v19729_v25 = vld [vmem:[#allocation226_spill] sm:$0xff] }
 0x759   :  { %v6111_v63 = vadd.f32 %v10909_v38, %v5481_v37  ;;  %v6112_v54 = vadd.f32 %v10911_v5, %v5482_v60  ;;  %v5487_v3 = vsel %vm10901_vm4, %v4733_v7, %v3622_v51  ;;  %v5488_v16 = vsel %vm10905_vm5, %v4733_v7, %v3623_v40  ;;  %4988 = vperm.xlu0 %6891, %v7504_v41   ;;  %v19728_v61 = vld [vmem:[#allocation511_spill] sm:$0xff]  ;;  %v19730_v51 = vld [vmem:[#allocation514_spill] sm:$0xff] }
 0x75a   :  { %v6117_v23 = vadd.f32 %v10909_v38, %v5487_v3  ;;  %v6118_v50 = vadd.f32 %v10911_v5, %v5488_v16  ;;  %v3628_v31 = vsel %vm10887_vm2, %v19729_v25, %v19728_v61  ;;  %v3629_v42 = vsel %vm10891_vm3, %v19729_v25, %v19728_v61  ;;  %v19731_v40 = vld [vmem:[#allocation231_spill] sm:$0xff] }
 0x75b   :  { %6730 = vst [vmem:[%s18139_s3 + $0xed0] sm:$0xff] %v6111_v63  ;;  %6731 = vst.msk [vmem:[%s18139_s3 + $0xed8] sm:$0xff] %vm6256_vm6, %v6112_v54  ;;  %v4729_v32 = vpop.permute.xlu1 %4728  ;;  %v3634_v37 = vsel %vm10887_vm2, %v19731_v40, %v19730_v51  ;;  %v3635_v60 = vsel %vm10891_vm3, %v19731_v40, %v19730_v51  ;;  %v7509_v54 = vld [vmem:[%s18136_s0 + $0x998] sm:$0xff] }
 0x75c   :  { %6736 = vst [vmem:[%s18139_s3 + $0xf00] sm:$0xff] %v6117_v23  ;;  %6737 = vst.msk [vmem:[%s18139_s3 + $0xf08] sm:$0xff] %vm6256_vm6, %v6118_v50  ;;  %v5485_v33 = vsel %vm10901_vm4, %v4729_v32, %v3620_v26  ;;  %v5486_v0 = vsel %vm10905_vm5, %v4729_v32, %v3621_v15  ;;  %v4741_v24 = vpop.permute.xlu0 %4740  ;;  %4984 = vperm.xlu1 %6890, %v7505_v9   ;;  %v19733_v26 = vld [vmem:[#allocation228_spill] sm:$0xff] }
 0x75d   :  { %v6115_v12 = vadd.f32 %v10909_v38, %v5485_v33  ;;  %v6116_v49 = vadd.f32 %v10911_v5, %v5486_v0  ;;  %v5491_v4 = vsel %vm10901_vm4, %v4741_v24, %v3626_v53  ;;  %v5492_v1 = vsel %vm10905_vm5, %v4741_v24, %v3627_v57  ;;  %4996 = vperm.xlu0 %6891, %v7506_v39   ;;  %v19735_v53 = vld [vmem:[#allocation233_spill] sm:$0xff] }
 0x75e   :  { %v6121_v10 = vadd.f32 %v10909_v38, %v5491_v4  ;;  %v6122_v8 = vadd.f32 %v10911_v5, %v5492_v1  ;;  %v3632_v15 = vsel %vm10887_vm2, %v19733_v26, %v19732_v35  ;;  %v3633_v32 = vsel %vm10891_vm3, %v19733_v26, %v19732_v35  ;;  %v19746_v26 = vld [vmem:[#allocation522_spill] sm:$0xff] }
 0x75f   :  { %6734 = vst [vmem:[%s18139_s3 + $0xef0] sm:$0xff] %v6115_v12  ;;  %6735 = vst.msk [vmem:[%s18139_s3 + $0xef8] sm:$0xff] %vm6256_vm6, %v6116_v49  ;;  %v4737_v34 = vpop.permute.xlu1 %4736  ;;  %v3638_v57 = vsel %vm10887_vm2, %v19735_v53, %v19734_v29  ;;  %v3639_v33 = vsel %vm10891_vm3, %v19735_v53, %v19734_v29 }
 0x760   :  { %6740 = vst [vmem:[%s18139_s3 + $0xf20] sm:$0xff] %v6121_v10  ;;  %6741 = vst.msk [vmem:[%s18139_s3 + $0xf28] sm:$0xff] %vm6256_vm6, %v6122_v8  ;;  %v5489_v17 = vsel %vm10901_vm4, %v4737_v34, %v3624_v21  ;;  %v5490_v56 = vsel %vm10905_vm5, %v4737_v34, %v3625_v58  ;;  %v4749_v19 = vpop.permute.xlu0 %4748  ;;  %4992 = vperm.xlu1 %6890, %v7507_v2   ;;  %v19736_v8 = vld [vmem:[#allocation515_spill] sm:$0xff]  ;;  %v19738_v34 = vld [vmem:[#allocation518_spill] sm:$0xff] }
 0x761   :  { %v6119_v43 = vadd.f32 %v10909_v38, %v5489_v17  ;;  %v6120_v62 = vadd.f32 %v10911_v5, %v5490_v56  ;;  %v5495_v6 = vsel %vm10901_vm4, %v4749_v19, %v3630_v45  ;;  %v5496_v20 = vsel %vm10905_vm5, %v4749_v19, %v3631_v11  ;;  %5004 = vperm.xlu0 %6891, %v7508_v52   ;;  %v19740_v52 = vld [vmem:[#allocation517_spill] sm:$0xff] }
 0x762   :  { %v6125_v13 = vadd.f32 %v10909_v38, %v5495_v6  ;;  %v6126_v28 = vadd.f32 %v10911_v5, %v5496_v20  ;;  %v3636_v48 = vsel %vm10887_vm2, %v19737_v27, %v19736_v8  ;;  %v3637_v21 = vsel %vm10891_vm3, %v19737_v27, %v19736_v8  ;;  %v19750_v27 = vld [vmem:[#allocation524_spill] sm:$0xff] }
 0x763   :  { %6738 = vst [vmem:[%s18139_s3 + $0xf10] sm:$0xff] %v6119_v43  ;;  %6739 = vst.msk [vmem:[%s18139_s3 + $0xf18] sm:$0xff] %vm6256_vm6, %v6120_v62  ;;  %v4745_v59 = vpop.permute.xlu1 %4744  ;;  %v3642_v36 = vsel %vm10887_vm2, %v19739_v46, %v19738_v34  ;;  %v3643_v45 = vsel %vm10891_vm3, %v19739_v46, %v19738_v34 }
 0x764   :  { %6744 = vst [vmem:[%s18139_s3 + $0xf40] sm:$0xff] %v6125_v13  ;;  %6745 = vst.msk [vmem:[%s18139_s3 + $0xf48] sm:$0xff] %vm6256_vm6, %v6126_v28  ;;  %v5493_v7 = vsel %vm10901_vm4, %v4745_v59, %v3628_v31  ;;  %v5494_v18 = vsel %vm10905_vm5, %v4745_v59, %v3629_v42  ;;  %v4757_v63 = vpop.permute.xlu0 %4756  ;;  %5000 = vperm.xlu1 %6890, %v7509_v54   ;;  %v19741_v13 = vld [vmem:[#allocation232_spill] sm:$0xff]  ;;  %v19743_v42 = vld [vmem:[#allocation237_spill] sm:$0xff] }
 0x765   :  { %v6123_v3 = vadd.f32 %v10909_v38, %v5493_v7  ;;  %v6124_v16 = vadd.f32 %v10911_v5, %v5494_v18  ;;  %v5499_v41 = vsel %vm10901_vm4, %v4757_v63, %v3634_v37  ;;  %v5500_v23 = vsel %vm10905_vm5, %v4757_v63, %v3635_v60  ;;  %v19742_v31 = vld [vmem:[#allocation520_spill] sm:$0xff] }
 0x766   :  { %v6129_v50 = vadd.f32 %v10909_v38, %v5499_v41  ;;  %v6130_v47 = vadd.f32 %v10911_v5, %v5500_v23  ;;  %v3640_v28 = vsel %vm10887_vm2, %v19741_v13, %v19740_v52  ;;  %v3641_v61 = vsel %vm10891_vm3, %v19741_v13, %v19740_v52  ;;  %v19744_v41 = vld [vmem:[#allocation519_spill] sm:$0xff]  ;;  %v19745_v23 = vld [vmem:[#allocation234_spill] sm:$0xff] }
 0x767   :  { %6742 = vst [vmem:[%s18139_s3 + $0xf30] sm:$0xff] %v6123_v3  ;;  %6743 = vst.msk [vmem:[%s18139_s3 + $0xf38] sm:$0xff] %vm6256_vm6, %v6124_v16  ;;  %v4753_v44 = vpop.permute.xlu1 %4752  ;;  %v3646_v59 = vsel %vm10887_vm2, %v19743_v42, %v19742_v31  ;;  %v3647_v51 = vsel %vm10891_vm3, %v19743_v42, %v19742_v31  ;;  %v19754_v13 = vld [vmem:[#allocation526_spill] sm:$0xff] }
 0x768   :  { %6748 = vst [vmem:[%s18139_s3 + $0xf60] sm:$0xff] %v6129_v50  ;;  %6749 = vst.msk [vmem:[%s18139_s3 + $0xf68] sm:$0xff] %vm6256_vm6, %v6130_v47  ;;  %v5497_v0 = vsel %vm10901_vm4, %v4753_v44, %v3632_v15  ;;  %v5498_v24 = vsel %vm10905_vm5, %v4753_v44, %v3633_v32  ;;  %v4765_v9 = vpop.permute.xlu0 %4764  ;;  %v3644_v50 = vsel %vm10887_vm2, %v19745_v23, %v19744_v41  ;;  %v19747_v15 = vld [vmem:[#allocation239_spill] sm:$0xff] }
 0x769   :  { %v6127_v12 = vadd.f32 %v10909_v38, %v5497_v0  ;;  %v6128_v49 = vadd.f32 %v10911_v5, %v5498_v24  ;;  %v5503_v4 = vsel %vm10901_vm4, %v4765_v9, %v3638_v57  ;;  %v5504_v1 = vsel %vm10905_vm5, %v4765_v9, %v3639_v33 }
 0x76a   :  { %v6133_v39 = vadd.f32 %v10909_v38, %v5503_v4  ;;  %v6134_v10 = vadd.f32 %v10911_v5, %v5504_v1  ;;  %v3645_v47 = vsel %vm10891_vm3, %v19745_v23, %v19744_v41  ;;  %v3650_v32 = vsel %vm10887_vm2, %v19747_v15, %v19746_v26  ;;  %v19748_v4 = vld [vmem:[#allocation521_spill] sm:$0xff]  ;;  %v19749_v1 = vld [vmem:[#allocation236_spill] sm:$0xff] }
 0x76b   :  { %6746 = vst [vmem:[%s18139_s3 + $0xf50] sm:$0xff] %v6127_v12  ;;  %6747 = vst.msk [vmem:[%s18139_s3 + $0xf58] sm:$0xff] %vm6256_vm6, %v6128_v49  ;;  %v4761_v58 = vpop.permute.xlu1 %4760  ;;  %v3651_v44 = vsel %vm10891_vm3, %v19747_v15, %v19746_v26  ;;  %v19758_v23 = vld [vmem:[#allocation528_spill] sm:$0xff] }
 0x76c   :  { %6752 = vst [vmem:[%s18139_s3 + $0xf80] sm:$0xff] %v6133_v39  ;;  %6753 = vst.msk [vmem:[%s18139_s3 + $0xf88] sm:$0xff] %vm6256_vm6, %v6134_v10  ;;  %v5501_v11 = vsel %vm10901_vm4, %v4761_v58, %v3636_v48  ;;  %v5502_v17 = vsel %vm10905_vm5, %v4761_v58, %v3637_v21  ;;  %v4773_v56 = vpop.permute.xlu0 %4772  ;;  %v3648_v39 = vsel %vm10887_vm2, %v19749_v1, %v19748_v4  ;;  %v19751_v48 = vld [vmem:[#allocation241_spill] sm:$0xff] }
 0x76d   :  { %v6131_v19 = vadd.f32 %v10909_v38, %v5501_v11  ;;  %v6132_v2 = vadd.f32 %v10911_v5, %v5502_v17  ;;  %v5507_v43 = vsel %vm10901_vm4, %v4773_v56, %v3642_v36  ;;  %v5508_v62 = vsel %vm10905_vm5, %v4773_v56, %v3643_v45 }
 0x76e   :  { %v6137_v6 = vadd.f32 %v10909_v38, %v5507_v43  ;;  %v6138_v20 = vadd.f32 %v10911_v5, %v5508_v62  ;;  %v3649_v10 = vsel %vm10891_vm3, %v19749_v1, %v19748_v4  ;;  %v3654_v21 = vsel %vm10887_vm2, %v19751_v48, %v19750_v27  ;;  %v19752_v43 = vld [vmem:[#allocation523_spill] sm:$0xff]  ;;  %v19753_v62 = vld [vmem:[#allocation238_spill] sm:$0xff] }
 0x76f   :  { %6750 = vst [vmem:[%s18139_s3 + $0xf70] sm:$0xff] %v6131_v19  ;;  %6751 = vst.msk [vmem:[%s18139_s3 + $0xf78] sm:$0xff] %vm6256_vm6, %v6132_v2  ;;  %v4769_v25 = vpop.permute.xlu1 %4768  ;;  %v3655_v58 = vsel %vm10891_vm3, %v19751_v48, %v19750_v27  ;;  %v19762_v1 = vld [vmem:[#allocation530_spill] sm:$0xff] }
 0x770   :  { %6756 = vst [vmem:[%s18139_s3 + $0xfa0] sm:$0xff] %v6137_v6  ;;  %6757 = vst.msk [vmem:[%s18139_s3 + $0xfa8] sm:$0xff] %vm6256_vm6, %v6138_v20  ;;  %v5505_v40 = vsel %vm10901_vm4, %v4769_v25, %v3640_v28  ;;  %v5506_v37 = vsel %vm10905_vm5, %v4769_v25, %v3641_v61  ;;  %v4781_v60 = vpop.permute.xlu0 %4780  ;;  %v3652_v6 = vsel %vm10887_vm2, %v19753_v62, %v19752_v43  ;;  %v19755_v28 = vld [vmem:[#allocation243_spill] sm:$0xff] }
 0x771   :  { %v6135_v7 = vadd.f32 %v10909_v38, %v5505_v40  ;;  %v6136_v18 = vadd.f32 %v10911_v5, %v5506_v37  ;;  %v5511_v63 = vsel %vm10901_vm4, %v4781_v60, %v3646_v59  ;;  %v5512_v54 = vsel %vm10905_vm5, %v4781_v60, %v3647_v51 }
 0x772   :  { %v6141_v3 = vadd.f32 %v10909_v38, %v5511_v63  ;;  %v6142_v16 = vadd.f32 %v10911_v5, %v5512_v54  ;;  %v3653_v20 = vsel %vm10891_vm3, %v19753_v62, %v19752_v43  ;;  %v3658_v61 = vsel %vm10887_vm2, %v19755_v28, %v19754_v13  ;;  %v19756_v63 = vld [vmem:[#allocation525_spill] sm:$0xff]  ;;  %v19757_v54 = vld [vmem:[#allocation240_spill] sm:$0xff] }
 0x773   :  { %6754 = vst [vmem:[%s18139_s3 + $0xf90] sm:$0xff] %v6135_v7  ;;  %6755 = vst.msk [vmem:[%s18139_s3 + $0xf98] sm:$0xff] %vm6256_vm6, %v6136_v18  ;;  %v4777_v35 = vpop.permute.xlu1 %4776  ;;  %v3659_v25 = vsel %vm10891_vm3, %v19755_v28, %v19754_v13  ;;  %v19766_v62 = vld [vmem:[#allocation532_spill] sm:$0xff] }
 0x774   :  { %6760 = vst [vmem:[%s18139_s3 + $0xfc0] sm:$0xff] %v6141_v3  ;;  %6761 = vst.msk [vmem:[%s18139_s3 + $0xfc8] sm:$0xff] %vm6256_vm6, %v6142_v16  ;;  %v5509_v29 = vsel %vm10901_vm4, %v4777_v35, %v3644_v50  ;;  %v5510_v53 = vsel %vm10905_vm5, %v4777_v35, %v3645_v47  ;;  %v4789_v57 = vpop.permute.xlu0 %4788  ;;  %v3656_v3 = vsel %vm10887_vm2, %v19757_v54, %v19756_v63  ;;  %v19759_v50 = vld [vmem:[#allocation245_spill] sm:$0xff] }
 0x775   :  { %v6139_v33 = vadd.f32 %v10909_v38, %v5509_v29  ;;  %v6140_v0 = vadd.f32 %v10911_v5, %v5510_v53  ;;  %v5515_v24 = vsel %vm10901_vm4, %v4789_v57, %v3650_v32  ;;  %v5516_v9 = vsel %vm10905_vm5, %v4789_v57, %v3651_v44 }
 0x776   :  { %v6145_v12 = vadd.f32 %v10909_v38, %v5515_v24  ;;  %v6146_v49 = vadd.f32 %v10911_v5, %v5516_v9  ;;  %v3657_v16 = vsel %vm10891_vm3, %v19757_v54, %v19756_v63  ;;  %v3662_v47 = vsel %vm10887_vm2, %v19759_v50, %v19758_v23  ;;  %v19760_v24 = vld [vmem:[#allocation527_spill] sm:$0xff]  ;;  %v19761_v9 = vld [vmem:[#allocation242_spill] sm:$0xff] }
 0x777   :  { %6758 = vst [vmem:[%s18139_s3 + $0xfb0] sm:$0xff] %v6139_v33  ;;  %6759 = vst.msk [vmem:[%s18139_s3 + $0xfb8] sm:$0xff] %vm6256_vm6, %v6140_v0  ;;  %v4785_v8 = vpop.permute.xlu1 %4784  ;;  %v3663_v35 = vsel %vm10891_vm3, %v19759_v50, %v19758_v23  ;;  %v19770_v54 = vld [vmem:[#allocation534_spill] sm:$0xff] }
 0x778   :  { %6764 = vst [vmem:[%s18139_s3 + $0xfe0] sm:$0xff] %v6145_v12  ;;  %6765 = vst.msk [vmem:[%s18139_s3 + $0xfe8] sm:$0xff] %vm6256_vm6, %v6146_v49  ;;  %v5513_v34 = vsel %vm10901_vm4, %v4785_v8, %v3648_v39  ;;  %v5514_v46 = vsel %vm10905_vm5, %v4785_v8, %v3649_v10  ;;  %v4797_v36 = vpop.permute.xlu0 %4796  ;;  %v3660_v12 = vsel %vm10887_vm2, %v19761_v9, %v19760_v24  ;;  %v19763_v39 = vld [vmem:[#allocation247_spill] sm:$0xff] }
 0x779   :  { %v6143_v45 = vadd.f32 %v10909_v38, %v5513_v34  ;;  %v6144_v11 = vadd.f32 %v10911_v5, %v5514_v46  ;;  %v5519_v17 = vsel %vm10901_vm4, %v4797_v36, %v3654_v21  ;;  %v5520_v56 = vsel %vm10905_vm5, %v4797_v36, %v3655_v58 }
 0x77a   :  { %v6149_v19 = vadd.f32 %v10909_v38, %v5519_v17  ;;  %v6150_v2 = vadd.f32 %v10911_v5, %v5520_v56  ;;  %v3661_v49 = vsel %vm10891_vm3, %v19761_v9, %v19760_v24  ;;  %v3666_v10 = vsel %vm10887_vm2, %v19763_v39, %v19762_v1  ;;  %v19764_v17 = vld [vmem:[#allocation529_spill] sm:$0xff]  ;;  %v19765_v56 = vld [vmem:[#allocation244_spill] sm:$0xff] }
 0x77b   :  { %6762 = vst [vmem:[%s18139_s3 + $0xfd0] sm:$0xff] %v6143_v45  ;;  %6763 = vst.msk [vmem:[%s18139_s3 + $0xfd8] sm:$0xff] %vm6256_vm6, %v6144_v11  ;;  %v4793_v52 = vpop.permute.xlu1 %4792  ;;  %v3667_v8 = vsel %vm10891_vm3, %v19763_v39, %v19762_v1  ;;  %v19774_v9 = vld [vmem:[#allocation536_spill] sm:$0xff] }
 0x77c   :  { %6768 = vst [vmem:[%s18139_s3 + $0x1000] sm:$0xff] %v6149_v19  ;;  %6769 = vst.msk [vmem:[%s18139_s3 + $0x1008] sm:$0xff] %vm6256_vm6, %v6150_v2  ;;  %v5517_v31 = vsel %vm10901_vm4, %v4793_v52, %v3652_v6  ;;  %v5518_v42 = vsel %vm10905_vm5, %v4793_v52, %v3653_v20  ;;  %v4805_v59 = vpop.permute.xlu0 %4804  ;;  %v3664_v19 = vsel %vm10887_vm2, %v19765_v56, %v19764_v17  ;;  %v19767_v6 = vld [vmem:[#allocation249_spill] sm:$0xff] }
 0x77d   :  { %v6147_v51 = vadd.f32 %v10909_v38, %v5517_v31  ;;  %v6148_v40 = vadd.f32 %v10911_v5, %v5518_v42  ;;  %v5523_v37 = vsel %vm10901_vm4, %v4805_v59, %v3658_v61  ;;  %v5524_v60 = vsel %vm10905_vm5, %v4805_v59, %v3659_v25 }
 0x77e   :  { %v6153_v7 = vadd.f32 %v10909_v38, %v5523_v37  ;;  %v6154_v18 = vadd.f32 %v10911_v5, %v5524_v60  ;;  %v3665_v2 = vsel %vm10891_vm3, %v19765_v56, %v19764_v17  ;;  %v3670_v20 = vsel %vm10887_vm2, %v19767_v6, %v19766_v62  ;;  %v19768_v37 = vld [vmem:[#allocation531_spill] sm:$0xff]  ;;  %v19769_v60 = vld [vmem:[#allocation246_spill] sm:$0xff] }
 0x77f   :  { %6766 = vst [vmem:[%s18139_s3 + $0xff0] sm:$0xff] %v6147_v51  ;;  %6767 = vst.msk [vmem:[%s18139_s3 + $0xff8] sm:$0xff] %vm6256_vm6, %v6148_v40  ;;  %v4801_v41 = vpop.permute.xlu1 %4800  ;;  %v3671_v52 = vsel %vm10891_vm3, %v19767_v6, %v19766_v62  ;;  %v19778_v56 = vld [vmem:[#allocation538_spill] sm:$0xff] }
 0x780   :  { %6772 = vst [vmem:[%s18139_s3 + $0x1020] sm:$0xff] %v6153_v7  ;;  %6773 = vst.msk [vmem:[%s18139_s3 + $0x1028] sm:$0xff] %vm6256_vm6, %v6154_v18  ;;  %v5521_v26 = vsel %vm10901_vm4, %v4801_v41, %v3656_v3  ;;  %v5522_v15 = vsel %vm10905_vm5, %v4801_v41, %v3657_v16  ;;  %v4813_v32 = vpop.permute.xlu0 %4812  ;;  %v3668_v7 = vsel %vm10887_vm2, %v19769_v60, %v19768_v37  ;;  %v19771_v3 = vld [vmem:[#allocation251_spill] sm:$0xff] }
 0x781   :  { %v6151_v44 = vadd.f32 %v10909_v38, %v5521_v26  ;;  %v6152_v29 = vadd.f32 %v10911_v5, %v5522_v15  ;;  %v5527_v53 = vsel %vm10901_vm4, %v4813_v32, %v3662_v47  ;;  %v5528_v57 = vsel %vm10905_vm5, %v4813_v32, %v3663_v35 }
 0x782   :  { %v6157_v33 = vadd.f32 %v10909_v38, %v5527_v53  ;;  %v6158_v0 = vadd.f32 %v10911_v5, %v5528_v57  ;;  %v3669_v18 = vsel %vm10891_vm3, %v19769_v60, %v19768_v37  ;;  %v3674_v16 = vsel %vm10887_vm2, %v19771_v3, %v19770_v54  ;;  %v19772_v53 = vld [vmem:[#allocation533_spill] sm:$0xff]  ;;  %v19773_v57 = vld [vmem:[#allocation248_spill] sm:$0xff] }
 0x783   :  { %6770 = vst [vmem:[%s18139_s3 + $0x1010] sm:$0xff] %v6151_v44  ;;  %6771 = vst.msk [vmem:[%s18139_s3 + $0x1018] sm:$0xff] %vm6256_vm6, %v6152_v29  ;;  %v4809_v4 = vpop.permute.xlu1 %4808  ;;  %v3675_v41 = vsel %vm10891_vm3, %v19771_v3, %v19770_v54  ;;  %v19782_v60 = vld [vmem:[#allocation540_spill] sm:$0xff] }
 0x784   :  { %6776 = vst [vmem:[%s18139_s3 + $0x1040] sm:$0xff] %v6157_v33  ;;  %6777 = vst.msk [vmem:[%s18139_s3 + $0x1048] sm:$0xff] %vm6256_vm6, %v6158_v0  ;;  %v5525_v27 = vsel %vm10901_vm4, %v4809_v4, %v3660_v12  ;;  %v5526_v48 = vsel %vm10905_vm5, %v4809_v4, %v3661_v49  ;;  %v4821_v21 = vpop.permute.xlu0 %4820  ;;  %v3672_v33 = vsel %vm10887_vm2, %v19773_v57, %v19772_v53  ;;  %v19775_v12 = vld [vmem:[#allocation253_spill] sm:$0xff] }
 0x785   :  { %v6155_v58 = vadd.f32 %v10909_v38, %v5525_v27  ;;  %v6156_v34 = vadd.f32 %v10911_v5, %v5526_v48  ;;  %v5531_v46 = vsel %vm10901_vm4, %v4821_v21, %v3666_v10  ;;  %v5532_v36 = vsel %vm10905_vm5, %v4821_v21, %v3667_v8 }
 0x786   :  { %v6161_v45 = vadd.f32 %v10909_v38, %v5531_v46  ;;  %v6162_v11 = vadd.f32 %v10911_v5, %v5532_v36  ;;  %v3673_v0 = vsel %vm10891_vm3, %v19773_v57, %v19772_v53  ;;  %v3678_v49 = vsel %vm10887_vm2, %v19775_v12, %v19774_v9  ;;  %v19776_v46 = vld [vmem:[#allocation535_spill] sm:$0xff]  ;;  %v19777_v36 = vld [vmem:[#allocation250_spill] sm:$0xff] }
 0x787   :  { %6774 = vst [vmem:[%s18139_s3 + $0x1030] sm:$0xff] %v6155_v58  ;;  %6775 = vst.msk [vmem:[%s18139_s3 + $0x1038] sm:$0xff] %vm6256_vm6, %v6156_v34  ;;  %v4817_v43 = vpop.permute.xlu1 %4816  ;;  %v3679_v4 = vsel %vm10891_vm3, %v19775_v12, %v19774_v9  ;;  %v19786_v57 = vld [vmem:[#allocation542_spill] sm:$0xff] }
 0x788   :  { %6780 = vst [vmem:[%s18139_s3 + $0x1060] sm:$0xff] %v6161_v45  ;;  %6781 = vst.msk [vmem:[%s18139_s3 + $0x1068] sm:$0xff] %vm6256_vm6, %v6162_v11  ;;  %v5529_v13 = vsel %vm10901_vm4, %v4817_v43, %v3664_v19  ;;  %v5530_v28 = vsel %vm10905_vm5, %v4817_v43, %v3665_v2  ;;  %v4829_v61 = vpop.permute.xlu0 %4828  ;;  %v3676_v45 = vsel %vm10887_vm2, %v19777_v36, %v19776_v46  ;;  %v19779_v19 = vld [vmem:[#allocation255_spill] sm:$0xff] }
 0x789   :  { %v6159_v25 = vadd.f32 %v10909_v38, %v5529_v13  ;;  %v6160_v31 = vadd.f32 %v10911_v5, %v5530_v28  ;;  %v5535_v42 = vsel %vm10901_vm4, %v4829_v61, %v3670_v20  ;;  %v5536_v59 = vsel %vm10905_vm5, %v4829_v61, %v3671_v52 }
 0x78a   :  { %v6165_v51 = vadd.f32 %v10909_v38, %v5535_v42  ;;  %v6166_v40 = vadd.f32 %v10911_v5, %v5536_v59  ;;  %v3677_v11 = vsel %vm10891_vm3, %v19777_v36, %v19776_v46  ;;  %v3682_v2 = vsel %vm10887_vm2, %v19779_v19, %v19778_v56  ;;  %v19780_v42 = vld [vmem:[#allocation537_spill] sm:$0xff]  ;;  %v19781_v59 = vld [vmem:[#allocation252_spill] sm:$0xff] }
 0x78b   :  { %6778 = vst [vmem:[%s18139_s3 + $0x1050] sm:$0xff] %v6159_v25  ;;  %6779 = vst.msk [vmem:[%s18139_s3 + $0x1058] sm:$0xff] %vm6256_vm6, %v6160_v31  ;;  %v4825_v63 = vpop.permute.xlu1 %4824  ;;  %v3683_v43 = vsel %vm10891_vm3, %v19779_v19, %v19778_v56  ;;  %v19790_v36 = vld [vmem:[#allocation544_spill] sm:$0xff] }
 0x78c   :  { %6784 = vst [vmem:[%s18139_s3 + $0x1080] sm:$0xff] %v6165_v51  ;;  %6785 = vst.msk [vmem:[%s18139_s3 + $0x1088] sm:$0xff] %vm6256_vm6, %v6166_v40  ;;  %v5533_v23 = vsel %vm10901_vm4, %v4825_v63, %v3668_v7  ;;  %v5534_v50 = vsel %vm10905_vm5, %v4825_v63, %v3669_v18  ;;  %v4837_v47 = vpop.permute.xlu0 %4836  ;;  %v3680_v51 = vsel %vm10887_vm2, %v19781_v59, %v19780_v42  ;;  %v19783_v7 = vld [vmem:[#allocation257_spill] sm:$0xff] }
 0x78d   :  { %v6163_v35 = vadd.f32 %v10909_v38, %v5533_v23  ;;  %v6164_v26 = vadd.f32 %v10911_v5, %v5534_v50  ;;  %v5539_v15 = vsel %vm10901_vm4, %v4837_v47, %v3674_v16  ;;  %v5540_v32 = vsel %vm10905_vm5, %v4837_v47, %v3675_v41 }
 0x78e   :  { %v6169_v44 = vadd.f32 %v10909_v38, %v5539_v15  ;;  %v6170_v29 = vadd.f32 %v10911_v5, %v5540_v32  ;;  %v3681_v40 = vsel %vm10891_vm3, %v19781_v59, %v19780_v42  ;;  %v3686_v18 = vsel %vm10887_vm2, %v19783_v7, %v19782_v60  ;;  %v19784_v15 = vld [vmem:[#allocation539_spill] sm:$0xff]  ;;  %v19785_v32 = vld [vmem:[#allocation254_spill] sm:$0xff] }
 0x78f   :  { %6782 = vst [vmem:[%s18139_s3 + $0x1070] sm:$0xff] %v6163_v35  ;;  %6783 = vst.msk [vmem:[%s18139_s3 + $0x1078] sm:$0xff] %vm6256_vm6, %v6164_v26  ;;  %v4833_v24 = vpop.permute.xlu1 %4832  ;;  %v3687_v63 = vsel %vm10891_vm3, %v19783_v7, %v19782_v60  ;;  %v19794_v59 = vld [vmem:[#allocation546_spill] sm:$0xff] }
 0x790   :  { %6788 = vst [vmem:[%s18139_s3 + $0x10a0] sm:$0xff] %v6169_v44  ;;  %6789 = vst.msk [vmem:[%s18139_s3 + $0x10a8] sm:$0xff] %vm6256_vm6, %v6170_v29  ;;  %v5537_v1 = vsel %vm10901_vm4, %v4833_v24, %v3672_v33  ;;  %v5538_v39 = vsel %vm10905_vm5, %v4833_v24, %v3673_v0  ;;  %v4845_v10 = vpop.permute.xlu0 %4844  ;;  %v3684_v44 = vsel %vm10887_vm2, %v19785_v32, %v19784_v15  ;;  %v19787_v33 = vld [vmem:[#allocation259_spill] sm:$0xff] }
 0x791   :  { %v6167_v8 = vadd.f32 %v10909_v38, %v5537_v1  ;;  %v6168_v27 = vadd.f32 %v10911_v5, %v5538_v39  ;;  %v5543_v48 = vsel %vm10901_vm4, %v4845_v10, %v3678_v49  ;;  %v5544_v21 = vsel %vm10905_vm5, %v4845_v10, %v3679_v4 }
 0x792   :  { %v6173_v58 = vadd.f32 %v10909_v38, %v5543_v48  ;;  %v6174_v34 = vadd.f32 %v10911_v5, %v5544_v21  ;;  %v3685_v29 = vsel %vm10891_vm3, %v19785_v32, %v19784_v15  ;;  %v3690_v0 = vsel %vm10887_vm2, %v19787_v33, %v19786_v57  ;;  %v19788_v48 = vld [vmem:[#allocation541_spill] sm:$0xff]  ;;  %v19789_v21 = vld [vmem:[#allocation256_spill] sm:$0xff] }
 0x793   :  { %6786 = vst [vmem:[%s18139_s3 + $0x1090] sm:$0xff] %v6167_v8  ;;  %6787 = vst.msk [vmem:[%s18139_s3 + $0x1098] sm:$0xff] %vm6256_vm6, %v6168_v27  ;;  %v4841_v17 = vpop.permute.xlu1 %4840  ;;  %v3691_v24 = vsel %vm10891_vm3, %v19787_v33, %v19786_v57  ;;  %v19798_v32 = vld [vmem:[#allocation548_spill] sm:$0xff] }
 0x794   :  { %6792 = vst [vmem:[%s18139_s3 + $0x10c0] sm:$0xff] %v6173_v58  ;;  %6793 = vst.msk [vmem:[%s18139_s3 + $0x10c8] sm:$0xff] %vm6256_vm6, %v6174_v34  ;;  %v5541_v62 = vsel %vm10901_vm4, %v4841_v17, %v3676_v45  ;;  %v5542_v6 = vsel %vm10905_vm5, %v4841_v17, %v3677_v11  ;;  %v4853_v20 = vpop.permute.xlu0 %4852  ;;  %v3688_v58 = vsel %vm10887_vm2, %v19789_v21, %v19788_v48  ;;  %v19791_v45 = vld [vmem:[#allocation261_spill] sm:$0xff] }
 0x795   :  { %v6171_v52 = vadd.f32 %v10909_v38, %v5541_v62  ;;  %v6172_v13 = vadd.f32 %v10911_v5, %v5542_v6  ;;  %v5547_v28 = vsel %vm10901_vm4, %v4853_v20, %v3682_v2  ;;  %v5548_v61 = vsel %vm10905_vm5, %v4853_v20, %v3683_v43 }
 0x796   :  { %v6177_v25 = vadd.f32 %v10909_v38, %v5547_v28  ;;  %v6178_v31 = vadd.f32 %v10911_v5, %v5548_v61  ;;  %v3689_v34 = vsel %vm10891_vm3, %v19789_v21, %v19788_v48  ;;  %v3694_v11 = vsel %vm10887_vm2, %v19791_v45, %v19790_v36  ;;  %v19792_v28 = vld [vmem:[#allocation543_spill] sm:$0xff]  ;;  %v19793_v61 = vld [vmem:[#allocation258_spill] sm:$0xff] }
 0x797   :  { %6790 = vst [vmem:[%s18139_s3 + $0x10b0] sm:$0xff] %v6171_v52  ;;  %6791 = vst.msk [vmem:[%s18139_s3 + $0x10b8] sm:$0xff] %vm6256_vm6, %v6172_v13  ;;  %v4849_v37 = vpop.permute.xlu1 %4848  ;;  %v3695_v17 = vsel %vm10891_vm3, %v19791_v45, %v19790_v36  ;;  %v19802_v21 = vld [vmem:[#allocation550_spill] sm:$0xff] }
 0x798   :  { %6796 = vst [vmem:[%s18139_s3 + $0x10e0] sm:$0xff] %v6177_v25  ;;  %6797 = vst.msk [vmem:[%s18139_s3 + $0x10e8] sm:$0xff] %vm6256_vm6, %v6178_v31  ;;  %v5545_v54 = vsel %vm10901_vm4, %v4849_v37, %v3680_v51  ;;  %v5546_v3 = vsel %vm10905_vm5, %v4849_v37, %v3681_v40  ;;  %v4861_v16 = vpop.permute.xlu0 %4860  ;;  %v3692_v25 = vsel %vm10887_vm2, %v19793_v61, %v19792_v28  ;;  %v19795_v51 = vld [vmem:[#allocation263_spill] sm:$0xff] }
 0x799   :  { %v6175_v41 = vadd.f32 %v10909_v38, %v5545_v54  ;;  %v6176_v23 = vadd.f32 %v10911_v5, %v5546_v3  ;;  %v5551_v50 = vsel %vm10901_vm4, %v4861_v16, %v3686_v18  ;;  %v5552_v47 = vsel %vm10905_vm5, %v4861_v16, %v3687_v63 }
 0x79a   :  { %v6181_v35 = vadd.f32 %v10909_v38, %v5551_v50  ;;  %v6182_v26 = vadd.f32 %v10911_v5, %v5552_v47  ;;  %v3693_v31 = vsel %vm10891_vm3, %v19793_v61, %v19792_v28  ;;  %v3698_v40 = vsel %vm10887_vm2, %v19795_v51, %v19794_v59  ;;  %v19796_v50 = vld [vmem:[#allocation545_spill] sm:$0xff]  ;;  %v19797_v47 = vld [vmem:[#allocation260_spill] sm:$0xff] }
 0x79b   :  { %6794 = vst [vmem:[%s18139_s3 + $0x10d0] sm:$0xff] %v6175_v41  ;;  %6795 = vst.msk [vmem:[%s18139_s3 + $0x10d8] sm:$0xff] %vm6256_vm6, %v6176_v23  ;;  %v4857_v53 = vpop.permute.xlu1 %4856  ;;  %v3699_v37 = vsel %vm10891_vm3, %v19795_v51, %v19794_v59  ;;  %v19806_v61 = vld [vmem:[#allocation552_spill] sm:$0xff] }
 0x79c   :  { %6800 = vst [vmem:[%s18139_s3 + $0x1100] sm:$0xff] %v6181_v35  ;;  %6801 = vst.msk [vmem:[%s18139_s3 + $0x1108] sm:$0xff] %vm6256_vm6, %v6182_v26  ;;  %v5549_v9 = vsel %vm10901_vm4, %v4857_v53, %v3684_v44  ;;  %v5550_v12 = vsel %vm10905_vm5, %v4857_v53, %v3685_v29  ;;  %v4869_v49 = vpop.permute.xlu0 %4868  ;;  %v3696_v35 = vsel %vm10887_vm2, %v19797_v47, %v19796_v50  ;;  %v19799_v44 = vld [vmem:[#allocation265_spill] sm:$0xff] }
 0x79d   :  { %v6179_v4 = vadd.f32 %v10909_v38, %v5549_v9  ;;  %v6180_v1 = vadd.f32 %v10911_v5, %v5550_v12  ;;  %v5555_v39 = vsel %vm10901_vm4, %v4869_v49, %v3690_v0  ;;  %v5556_v10 = vsel %vm10905_vm5, %v4869_v49, %v3691_v24 }
 0x79e   :  { %v6185_v8 = vadd.f32 %v10909_v38, %v5555_v39  ;;  %v6186_v27 = vadd.f32 %v10911_v5, %v5556_v10  ;;  %v3697_v26 = vsel %vm10891_vm3, %v19797_v47, %v19796_v50  ;;  %v3702_v29 = vsel %vm10887_vm2, %v19799_v44, %v19798_v32  ;;  %v19800_v39 = vld [vmem:[#allocation547_spill] sm:$0xff]  ;;  %v19801_v10 = vld [vmem:[#allocation262_spill] sm:$0xff] }
 0x79f   :  { %6798 = vst [vmem:[%s18139_s3 + $0x10f0] sm:$0xff] %v6179_v4  ;;  %6799 = vst.msk [vmem:[%s18139_s3 + $0x10f8] sm:$0xff] %vm6256_vm6, %v6180_v1  ;;  %v4865_v46 = vpop.permute.xlu1 %4864  ;;  %v3703_v53 = vsel %vm10891_vm3, %v19799_v44, %v19798_v32  ;;  %v19810_v47 = vld [vmem:[#allocation554_spill] sm:$0xff] }
 0x7a0   :  { %6804 = vst [vmem:[%s18139_s3 + $0x1120] sm:$0xff] %v6185_v8  ;;  %6805 = vst.msk [vmem:[%s18139_s3 + $0x1128] sm:$0xff] %vm6256_vm6, %v6186_v27  ;;  %v5553_v56 = vsel %vm10901_vm4, %v4865_v46, %v3688_v58  ;;  %v5554_v19 = vsel %vm10905_vm5, %v4865_v46, %v3689_v34  ;;  %v4877_v2 = vpop.permute.xlu0 %4876  ;;  %v3700_v8 = vsel %vm10887_vm2, %v19801_v10, %v19800_v39  ;;  %v19803_v58 = vld [vmem:[#allocation267_spill] sm:$0xff] }
 0x7a1   :  { %v6183_v43 = vadd.f32 %v10909_v38, %v5553_v56  ;;  %v6184_v62 = vadd.f32 %v10911_v5, %v5554_v19  ;;  %v5559_v6 = vsel %vm10901_vm4, %v4877_v2, %v3694_v11  ;;  %v5560_v20 = vsel %vm10905_vm5, %v4877_v2, %v3695_v17 }
 0x7a2   :  { %v6189_v52 = vadd.f32 %v10909_v38, %v5559_v6  ;;  %v6190_v13 = vadd.f32 %v10911_v5, %v5560_v20  ;;  %v3701_v27 = vsel %vm10891_vm3, %v19801_v10, %v19800_v39  ;;  %v3706_v34 = vsel %vm10887_vm2, %v19803_v58, %v19802_v21  ;;  %v19804_v6 = vld [vmem:[#allocation549_spill] sm:$0xff]  ;;  %v19805_v20 = vld [vmem:[#allocation264_spill] sm:$0xff] }
 0x7a3   :  { %6802 = vst [vmem:[%s18139_s3 + $0x1110] sm:$0xff] %v6183_v43  ;;  %6803 = vst.msk [vmem:[%s18139_s3 + $0x1118] sm:$0xff] %vm6256_vm6, %v6184_v62  ;;  %v4873_v42 = vpop.permute.xlu1 %4872  ;;  %v3707_v46 = vsel %vm10891_vm3, %v19803_v58, %v19802_v21  ;;  %v19814_v10 = vld [vmem:[#allocation556_spill] sm:$0xff] }
 0x7a4   :  { %6808 = vst [vmem:[%s18139_s3 + $0x1140] sm:$0xff] %v6189_v52  ;;  %6809 = vst.msk [vmem:[%s18139_s3 + $0x1148] sm:$0xff] %vm6256_vm6, %v6190_v13  ;;  %v5557_v60 = vsel %vm10901_vm4, %v4873_v42, %v3692_v25  ;;  %v5558_v7 = vsel %vm10905_vm5, %v4873_v42, %v3693_v31  ;;  %v4885_v18 = vpop.permute.xlu0 %4884  ;;  %v3704_v52 = vsel %vm10887_vm2, %v19805_v20, %v19804_v6  ;;  %v19807_v25 = vld [vmem:[#allocation269_spill] sm:$0xff] }
 0x7a5   :  { %v6187_v63 = vadd.f32 %v10909_v38, %v5557_v60  ;;  %v6188_v54 = vadd.f32 %v10911_v5, %v5558_v7  ;;  %v5563_v3 = vsel %vm10901_vm4, %v4885_v18, %v3698_v40  ;;  %v5564_v16 = vsel %vm10905_vm5, %v4885_v18, %v3699_v37 }
 0x7a6   :  { %v6193_v41 = vadd.f32 %v10909_v38, %v5563_v3  ;;  %v6194_v23 = vadd.f32 %v10911_v5, %v5564_v16  ;;  %v3705_v13 = vsel %vm10891_vm3, %v19805_v20, %v19804_v6  ;;  %v3710_v31 = vsel %vm10887_vm2, %v19807_v25, %v19806_v61  ;;  %v19808_v3 = vld [vmem:[#allocation551_spill] sm:$0xff]  ;;  %v19809_v16 = vld [vmem:[#allocation266_spill] sm:$0xff] }
 0x7a7   :  { %6806 = vst [vmem:[%s18139_s3 + $0x1130] sm:$0xff] %v6187_v63  ;;  %6807 = vst.msk [vmem:[%s18139_s3 + $0x1138] sm:$0xff] %vm6256_vm6, %v6188_v54  ;;  %v4881_v15 = vpop.permute.xlu1 %4880  ;;  %v3711_v42 = vsel %vm10891_vm3, %v19807_v25, %v19806_v61  ;;  %v19818_v20 = vld [vmem:[#allocation558_spill] sm:$0xff] }
 0x7a8   :  { %6812 = vst [vmem:[%s18139_s3 + $0x1160] sm:$0xff] %v6193_v41  ;;  %6813 = vst.msk [vmem:[%s18139_s3 + $0x1168] sm:$0xff] %vm6256_vm6, %v6194_v23  ;;  %v5561_v57 = vsel %vm10901_vm4, %v4881_v15, %v3696_v35  ;;  %v5562_v33 = vsel %vm10905_vm5, %v4881_v15, %v3697_v26  ;;  %v4893_v0 = vpop.permute.xlu0 %4892  ;;  %v3708_v41 = vsel %vm10887_vm2, %v19809_v16, %v19808_v3  ;;  %v19811_v35 = vld [vmem:[#allocation271_spill] sm:$0xff] }
 0x7a9   :  { %v6191_v24 = vadd.f32 %v10909_v38, %v5561_v57  ;;  %v6192_v9 = vadd.f32 %v10911_v5, %v5562_v33  ;;  %v5567_v12 = vsel %vm10901_vm4, %v4893_v0, %v3702_v29  ;;  %v5568_v49 = vsel %vm10905_vm5, %v4893_v0, %v3703_v53 }
 0x7aa   :  { %v6197_v4 = vadd.f32 %v10909_v38, %v5567_v12  ;;  %v6198_v1 = vadd.f32 %v10911_v5, %v5568_v49  ;;  %v3709_v23 = vsel %vm10891_vm3, %v19809_v16, %v19808_v3  ;;  %v3714_v26 = vsel %vm10887_vm2, %v19811_v35, %v19810_v47  ;;  %v19812_v12 = vld [vmem:[#allocation553_spill] sm:$0xff]  ;;  %v19813_v49 = vld [vmem:[#allocation268_spill] sm:$0xff] }
 0x7ab   :  { %6810 = vst [vmem:[%s18139_s3 + $0x1150] sm:$0xff] %v6191_v24  ;;  %6811 = vst.msk [vmem:[%s18139_s3 + $0x1158] sm:$0xff] %vm6256_vm6, %v6192_v9  ;;  %v4889_v48 = vpop.permute.xlu1 %4888  ;;  %v3715_v15 = vsel %vm10891_vm3, %v19811_v35, %v19810_v47  ;;  %v19822_v16 = vld [vmem:[#allocation560_spill] sm:$0xff] }
 0x7ac   :  { %6816 = vst [vmem:[%s18139_s3 + $0x1180] sm:$0xff] %v6197_v4  ;;  %6817 = vst.msk [vmem:[%s18139_s3 + $0x1188] sm:$0xff] %vm6256_vm6, %v6198_v1  ;;  %v5565_v36 = vsel %vm10901_vm4, %v4889_v48, %v3700_v8  ;;  %v5566_v45 = vsel %vm10905_vm5, %v4889_v48, %v3701_v27  ;;  %v4901_v11 = vpop.permute.xlu0 %4900  ;;  %v3712_v4 = vsel %vm10887_vm2, %v19813_v49, %v19812_v12  ;;  %v19815_v8 = vld [vmem:[#allocation273_spill] sm:$0xff] }
 0x7ad   :  { %v6195_v17 = vadd.f32 %v10909_v38, %v5565_v36  ;;  %v6196_v56 = vadd.f32 %v10911_v5, %v5566_v45  ;;  %v5571_v19 = vsel %vm10901_vm4, %v4901_v11, %v3706_v34  ;;  %v5572_v2 = vsel %vm10905_vm5, %v4901_v11, %v3707_v46 }
 0x7ae   :  { %v6201_v43 = vadd.f32 %v10909_v38, %v5571_v19  ;;  %v6202_v62 = vadd.f32 %v10911_v5, %v5572_v2  ;;  %v3713_v1 = vsel %vm10891_vm3, %v19813_v49, %v19812_v12  ;;  %v3718_v27 = vsel %vm10887_vm2, %v19815_v8, %v19814_v10  ;;  %v19816_v19 = vld [vmem:[#allocation555_spill] sm:$0xff]  ;;  %v19817_v2 = vld [vmem:[#allocation270_spill] sm:$0xff] }
 0x7af   :  { %6814 = vst [vmem:[%s18139_s3 + $0x1170] sm:$0xff] %v6195_v17  ;;  %6815 = vst.msk [vmem:[%s18139_s3 + $0x1178] sm:$0xff] %vm6256_vm6, %v6196_v56  ;;  %v4897_v28 = vpop.permute.xlu1 %4896  ;;  %v3719_v48 = vsel %vm10891_vm3, %v19815_v8, %v19814_v10  ;;  %v19826_v49 = vld [vmem:[#allocation562_spill] sm:$0xff] }
 0x7b0   :  { %6820 = vst [vmem:[%s18139_s3 + $0x11a0] sm:$0xff] %v6201_v43  ;;  %6821 = vst.msk [vmem:[%s18139_s3 + $0x11a8] sm:$0xff] %vm6256_vm6, %v6202_v62  ;;  %v5569_v59 = vsel %vm10901_vm4, %v4897_v28, %v3704_v52  ;;  %v5570_v51 = vsel %vm10905_vm5, %v4897_v28, %v3705_v13  ;;  %v4909_v40 = vpop.permute.xlu0 %4908  ;;  %v3716_v43 = vsel %vm10887_vm2, %v19817_v2, %v19816_v19  ;;  %v19819_v52 = vld [vmem:[#allocation275_spill] sm:$0xff] }
 0x7b1   :  { %v6199_v37 = vadd.f32 %v10909_v38, %v5569_v59  ;;  %v6200_v60 = vadd.f32 %v10911_v5, %v5570_v51  ;;  %v5575_v7 = vsel %vm10901_vm4, %v4909_v40, %v3710_v31  ;;  %v5576_v18 = vsel %vm10905_vm5, %v4909_v40, %v3711_v42 }
 0x7b2   :  { %v6205_v63 = vadd.f32 %v10909_v38, %v5575_v7  ;;  %v6206_v54 = vadd.f32 %v10911_v5, %v5576_v18  ;;  %v3717_v62 = vsel %vm10891_vm3, %v19817_v2, %v19816_v19  ;;  %v3722_v13 = vsel %vm10887_vm2, %v19819_v52, %v19818_v20  ;;  %v19820_v7 = vld [vmem:[#allocation557_spill] sm:$0xff]  ;;  %v19821_v18 = vld [vmem:[#allocation272_spill] sm:$0xff] }
 0x7b3   :  { %6818 = vst [vmem:[%s18139_s3 + $0x1190] sm:$0xff] %v6199_v37  ;;  %6819 = vst.msk [vmem:[%s18139_s3 + $0x1198] sm:$0xff] %vm6256_vm6, %v6200_v60  ;;  %v4905_v50 = vpop.permute.xlu1 %4904  ;;  %v3723_v28 = vsel %vm10891_vm3, %v19819_v52, %v19818_v20  ;;  %v19830_v2 = vld [vmem:[#allocation564_spill] sm:$0xff] }
 0x7b4   :  { %6824 = vst [vmem:[%s18139_s3 + $0x11c0] sm:$0xff] %v6205_v63  ;;  %6825 = vst.msk [vmem:[%s18139_s3 + $0x11c8] sm:$0xff] %vm6256_vm6, %v6206_v54  ;;  %v5573_v32 = vsel %vm10901_vm4, %v4905_v50, %v3708_v41  ;;  %v5574_v44 = vsel %vm10905_vm5, %v4905_v50, %v3709_v23  ;;  %v4917_v29 = vpop.permute.xlu0 %4916  ;;  %v3720_v63 = vsel %vm10887_vm2, %v19821_v18, %v19820_v7  ;;  %v19823_v41 = vld [vmem:[#allocation277_spill] sm:$0xff] }
 0x7b5   :  { %v6203_v53 = vadd.f32 %v10909_v38, %v5573_v32  ;;  %v6204_v57 = vadd.f32 %v10911_v5, %v5574_v44  ;;  %v5579_v33 = vsel %vm10901_vm4, %v4917_v29, %v3714_v26  ;;  %v5580_v0 = vsel %vm10905_vm5, %v4917_v29, %v3715_v15 }
 0x7b6   :  { %v6209_v24 = vadd.f32 %v10909_v38, %v5579_v33  ;;  %v6210_v9 = vadd.f32 %v10911_v5, %v5580_v0  ;;  %v3721_v54 = vsel %vm10891_vm3, %v19821_v18, %v19820_v7  ;;  %v3726_v23 = vsel %vm10887_vm2, %v19823_v41, %v19822_v16  ;;  %v19824_v33 = vld [vmem:[#allocation559_spill] sm:$0xff]  ;;  %v19825_v0 = vld [vmem:[#allocation274_spill] sm:$0xff] }
 0x7b7   :  { %6822 = vst [vmem:[%s18139_s3 + $0x11b0] sm:$0xff] %v6203_v53  ;;  %6823 = vst.msk [vmem:[%s18139_s3 + $0x11b8] sm:$0xff] %vm6256_vm6, %v6204_v57  ;;  %v4913_v39 = vpop.permute.xlu1 %4912  ;;  %v3727_v50 = vsel %vm10891_vm3, %v19823_v41, %v19822_v16  ;;  %v19834_v18 = vld [vmem:[#allocation566_spill] sm:$0xff] }
 0x7b8   :  { %6828 = vst [vmem:[%s18139_s3 + $0x11e0] sm:$0xff] %v6209_v24  ;;  %6829 = vst.msk [vmem:[%s18139_s3 + $0x11e8] sm:$0xff] %vm6256_vm6, %v6210_v9  ;;  %v5577_v21 = vsel %vm10901_vm4, %v4913_v39, %v3712_v4  ;;  %v5578_v58 = vsel %vm10905_vm5, %v4913_v39, %v3713_v1  ;;  %v4925_v34 = vpop.permute.xlu0 %4924  ;;  %v3724_v24 = vsel %vm10887_vm2, %v19825_v0, %v19824_v33  ;;  %v19827_v4 = vld [vmem:[#allocation279_spill] sm:$0xff] }
 0x7b9   :  { %v6207_v46 = vadd.f32 %v10909_v38, %v5577_v21  ;;  %v6208_v36 = vadd.f32 %v10911_v5, %v5578_v58  ;;  %v5583_v45 = vsel %vm10901_vm4, %v4925_v34, %v3718_v27  ;;  %v5584_v11 = vsel %vm10905_vm5, %v4925_v34, %v3719_v48 }
 0x7ba   :  { %v6213_v17 = vadd.f32 %v10909_v38, %v5583_v45  ;;  %v6214_v56 = vadd.f32 %v10911_v5, %v5584_v11  ;;  %v3725_v9 = vsel %vm10891_vm3, %v19825_v0, %v19824_v33  ;;  %v3730_v1 = vsel %vm10887_vm2, %v19827_v4, %v19826_v49  ;;  %v19828_v45 = vld [vmem:[#allocation561_spill] sm:$0xff]  ;;  %v19829_v11 = vld [vmem:[#allocation276_spill] sm:$0xff] }
 0x7bb   :  { %6826 = vst [vmem:[%s18139_s3 + $0x11d0] sm:$0xff] %v6207_v46  ;;  %6827 = vst.msk [vmem:[%s18139_s3 + $0x11d8] sm:$0xff] %vm6256_vm6, %v6208_v36  ;;  %v4921_v6 = vpop.permute.xlu1 %4920  ;;  %v3731_v39 = vsel %vm10891_vm3, %v19827_v4, %v19826_v49  ;;  %v19838_v0 = vld [vmem:[#allocation568_spill] sm:$0xff] }
 0x7bc   :  { %6832 = vst [vmem:[%s18139_s3 + $0x1200] sm:$0xff] %v6213_v17  ;;  %6833 = vst.msk [vmem:[%s18139_s3 + $0x1208] sm:$0xff] %vm6256_vm6, %v6214_v56  ;;  %v5581_v61 = vsel %vm10901_vm4, %v4921_v6, %v3716_v43  ;;  %v5582_v25 = vsel %vm10905_vm5, %v4921_v6, %v3717_v62  ;;  %v4933_v31 = vpop.permute.xlu0 %4932  ;;  %v3728_v17 = vsel %vm10887_vm2, %v19829_v11, %v19828_v45  ;;  %v19831_v43 = vld [vmem:[#allocation281_spill] sm:$0xff] }
 0x7bd   :  { %v6211_v42 = vadd.f32 %v10909_v38, %v5581_v61  ;;  %v6212_v59 = vadd.f32 %v10911_v5, %v5582_v25  ;;  %v5587_v51 = vsel %vm10901_vm4, %v4933_v31, %v3722_v13  ;;  %v5588_v40 = vsel %vm10905_vm5, %v4933_v31, %v3723_v28 }
 0x7be   :  { %v6217_v37 = vadd.f32 %v10909_v38, %v5587_v51  ;;  %v6218_v60 = vadd.f32 %v10911_v5, %v5588_v40  ;;  %v3729_v56 = vsel %vm10891_vm3, %v19829_v11, %v19828_v45  ;;  %v3734_v62 = vsel %vm10887_vm2, %v19831_v43, %v19830_v2  ;;  %v19832_v51 = vld [vmem:[#allocation563_spill] sm:$0xff]  ;;  %v19833_v40 = vld [vmem:[#allocation278_spill] sm:$0xff] }
 0x7bf   :  { %6830 = vst [vmem:[%s18139_s3 + $0x11f0] sm:$0xff] %v6211_v42  ;;  %6831 = vst.msk [vmem:[%s18139_s3 + $0x11f8] sm:$0xff] %vm6256_vm6, %v6212_v59  ;;  %v4929_v3 = vpop.permute.xlu1 %4928  ;;  %v3735_v6 = vsel %vm10891_vm3, %v19831_v43, %v19830_v2  ;;  %v19842_v11 = vld [vmem:[#allocation570_spill] sm:$0xff] }
 0x7c0   :  { %6836 = vst [vmem:[%s18139_s3 + $0x1220] sm:$0xff] %v6217_v37  ;;  %6837 = vst.msk [vmem:[%s18139_s3 + $0x1228] sm:$0xff] %vm6256_vm6, %v6218_v60  ;;  %v5585_v47 = vsel %vm10901_vm4, %v4929_v3, %v3720_v63  ;;  %v5586_v35 = vsel %vm10905_vm5, %v4929_v3, %v3721_v54  ;;  %v4941_v26 = vpop.permute.xlu0 %4940  ;;  %v3732_v37 = vsel %vm10887_vm2, %v19833_v40, %v19832_v51  ;;  %v19835_v63 = vld [vmem:[#allocation283_spill] sm:$0xff] }
 0x7c1   :  { %v6215_v15 = vadd.f32 %v10909_v38, %v5585_v47  ;;  %v6216_v32 = vadd.f32 %v10911_v5, %v5586_v35  ;;  %v5591_v44 = vsel %vm10901_vm4, %v4941_v26, %v3726_v23  ;;  %v5592_v29 = vsel %vm10905_vm5, %v4941_v26, %v3727_v50 }
 0x7c2   :  { %v6221_v53 = vadd.f32 %v10909_v38, %v5591_v44  ;;  %v6222_v57 = vadd.f32 %v10911_v5, %v5592_v29  ;;  %v3733_v60 = vsel %vm10891_vm3, %v19833_v40, %v19832_v51  ;;  %v3738_v54 = vsel %vm10887_vm2, %v19835_v63, %v19834_v18  ;;  %v19836_v44 = vld [vmem:[#allocation565_spill] sm:$0xff]  ;;  %v19837_v29 = vld [vmem:[#allocation280_spill] sm:$0xff] }
 0x7c3   :  { %6834 = vst [vmem:[%s18139_s3 + $0x1210] sm:$0xff] %v6215_v15  ;;  %6835 = vst.msk [vmem:[%s18139_s3 + $0x1218] sm:$0xff] %vm6256_vm6, %v6216_v32  ;;  %v4937_v12 = vpop.permute.xlu1 %4936  ;;  %v3739_v3 = vsel %vm10891_vm3, %v19835_v63, %v19834_v18  ;;  %v19846_v40 = vld [vmem:[#allocation572_spill] sm:$0xff] }
 0x7c4   :  { %6840 = vst [vmem:[%s18139_s3 + $0x1240] sm:$0xff] %v6221_v53  ;;  %6841 = vst.msk [vmem:[%s18139_s3 + $0x1248] sm:$0xff] %vm6256_vm6, %v6222_v57  ;;  %v5589_v10 = vsel %vm10901_vm4, %v4937_v12, %v3724_v24  ;;  %v5590_v8 = vsel %vm10905_vm5, %v4937_v12, %v3725_v9  ;;  %v4949_v27 = vpop.permute.xlu0 %4948  ;;  %v3736_v53 = vsel %vm10887_vm2, %v19837_v29, %v19836_v44  ;;  %v19839_v24 = vld [vmem:[#allocation285_spill] sm:$0xff] }
 0x7c5   :  { %v6219_v48 = vadd.f32 %v10909_v38, %v5589_v10  ;;  %v6220_v21 = vadd.f32 %v10911_v5, %v5590_v8  ;;  %v5595_v58 = vsel %vm10901_vm4, %v4949_v27, %v3730_v1  ;;  %v5596_v34 = vsel %vm10905_vm5, %v4949_v27, %v3731_v39 }
 0x7c6   :  { %v6225_v46 = vadd.f32 %v10909_v38, %v5595_v58  ;;  %v6226_v36 = vadd.f32 %v10911_v5, %v5596_v34  ;;  %v3737_v57 = vsel %vm10891_vm3, %v19837_v29, %v19836_v44  ;;  %v3742_v9 = vsel %vm10887_vm2, %v19839_v24, %v19838_v0  ;;  %v19840_v58 = vld [vmem:[#allocation567_spill] sm:$0xff]  ;;  %v19841_v34 = vld [vmem:[#allocation282_spill] sm:$0xff] }
 0x7c7   :  { %6838 = vst [vmem:[%s18139_s3 + $0x1230] sm:$0xff] %v6219_v48  ;;  %6839 = vst.msk [vmem:[%s18139_s3 + $0x1238] sm:$0xff] %vm6256_vm6, %v6220_v21  ;;  %v4945_v19 = vpop.permute.xlu1 %4944  ;;  %v3743_v12 = vsel %vm10891_vm3, %v19839_v24, %v19838_v0  ;;  %v19850_v29 = vld [vmem:[#allocation574_spill] sm:$0xff] }
 0x7c8   :  { %6844 = vst [vmem:[%s18139_s3 + $0x1260] sm:$0xff] %v6225_v46  ;;  %6845 = vst.msk [vmem:[%s18139_s3 + $0x1268] sm:$0xff] %vm6256_vm6, %v6226_v36  ;;  %v5593_v20 = vsel %vm10901_vm4, %v4945_v19, %v3728_v17  ;;  %v5594_v52 = vsel %vm10905_vm5, %v4945_v19, %v3729_v56  ;;  %v4957_v13 = vpop.permute.xlu0 %4956  ;;  %v3740_v46 = vsel %vm10887_vm2, %v19841_v34, %v19840_v58  ;;  %v19843_v17 = vld [vmem:[#allocation287_spill] sm:$0xff] }
 0x7c9   :  { %v6223_v28 = vadd.f32 %v10909_v38, %v5593_v20  ;;  %v6224_v61 = vadd.f32 %v10911_v5, %v5594_v52  ;;  %v5599_v25 = vsel %vm10901_vm4, %v4957_v13, %v3734_v62  ;;  %v5600_v31 = vsel %vm10905_vm5, %v4957_v13, %v3735_v6 }
 0x7ca   :  { %v6229_v42 = vadd.f32 %v10909_v38, %v5599_v25  ;;  %v6230_v59 = vadd.f32 %v10911_v5, %v5600_v31  ;;  %v3741_v36 = vsel %vm10891_vm3, %v19841_v34, %v19840_v58  ;;  %v3746_v56 = vsel %vm10887_vm2, %v19843_v17, %v19842_v11  ;;  %v19844_v25 = vld [vmem:[#allocation569_spill] sm:$0xff]  ;;  %v19845_v31 = vld [vmem:[#allocation284_spill] sm:$0xff] }
 0x7cb   :  { %6842 = vst [vmem:[%s18139_s3 + $0x1250] sm:$0xff] %v6223_v28  ;;  %6843 = vst.msk [vmem:[%s18139_s3 + $0x1258] sm:$0xff] %vm6256_vm6, %v6224_v61  ;;  %v4953_v7 = vpop.permute.xlu1 %4952  ;;  %v3747_v19 = vsel %vm10891_vm3, %v19843_v17, %v19842_v11  ;;  %v19854_v58 = vld [vmem:[#allocation576_spill] sm:$0xff] }
 0x7cc   :  { %6848 = vst [vmem:[%s18139_s3 + $0x1280] sm:$0xff] %v6229_v42  ;;  %6849 = vst.msk [vmem:[%s18139_s3 + $0x1288] sm:$0xff] %vm6256_vm6, %v6230_v59  ;;  %v5597_v16 = vsel %vm10901_vm4, %v4953_v7, %v3732_v37  ;;  %v5598_v41 = vsel %vm10905_vm5, %v4953_v7, %v3733_v60  ;;  %v4965_v23 = vpop.permute.xlu0 %4964  ;;  %v3744_v42 = vsel %vm10887_vm2, %v19845_v31, %v19844_v25  ;;  %v19847_v37 = vld [vmem:[#allocation289_spill] sm:$0xff]  ;;  %v19855_v34 = vld [vmem:[#allocation292_spill] sm:$0xff] }
 0x7cd   :  { %v6227_v50 = vadd.f32 %v10909_v38, %v5597_v16  ;;  %v6228_v47 = vadd.f32 %v10911_v5, %v5598_v41  ;;  %v5603_v35 = vsel %vm10901_vm4, %v4965_v23, %v3738_v54  ;;  %v5604_v26 = vsel %vm10905_vm5, %v4965_v23, %v3739_v3 }
 0x7ce   :  { %v6233_v15 = vadd.f32 %v10909_v38, %v5603_v35  ;;  %v6234_v32 = vadd.f32 %v10911_v5, %v5604_v26  ;;  %v3745_v59 = vsel %vm10891_vm3, %v19845_v31, %v19844_v25  ;;  %v3750_v60 = vsel %vm10887_vm2, %v19847_v37, %v19846_v40  ;;  %v19848_v35 = vld [vmem:[#allocation571_spill] sm:$0xff]  ;;  %v19849_v26 = vld [vmem:[#allocation286_spill] sm:$0xff] }
 0x7cf   :  { %6846 = vst [vmem:[%s18139_s3 + $0x1270] sm:$0xff] %v6227_v50  ;;  %6847 = vst.msk [vmem:[%s18139_s3 + $0x1278] sm:$0xff] %vm6256_vm6, %v6228_v47  ;;  %v4961_v33 = vpop.permute.xlu1 %4960  ;;  %v3751_v7 = vsel %vm10891_vm3, %v19847_v37, %v19846_v40 }
 0x7d0   :  { %6852 = vst [vmem:[%s18139_s3 + $0x12a0] sm:$0xff] %v6233_v15  ;;  %6853 = vst.msk [vmem:[%s18139_s3 + $0x12a8] sm:$0xff] %vm6256_vm6, %v6234_v32  ;;  %v5601_v49 = vsel %vm10901_vm4, %v4961_v33, %v3736_v53  ;;  %v5602_v4 = vsel %vm10905_vm5, %v4961_v33, %v3737_v57  ;;  %v4973_v1 = vpop.permute.xlu0 %4972  ;;  %v3748_v15 = vsel %vm10887_vm2, %v19849_v26, %v19848_v35  ;;  %v19851_v53 = vld [vmem:[#allocation291_spill] sm:$0xff] }
 0x7d1   :  { %v6231_v39 = vadd.f32 %v10909_v38, %v5601_v49  ;;  %v6232_v10 = vadd.f32 %v10911_v5, %v5602_v4  ;;  %v5607_v8 = vsel %vm10901_vm4, %v4973_v1, %v3742_v9  ;;  %v5608_v27 = vsel %vm10905_vm5, %v4973_v1, %v3743_v12 }
 0x7d2   :  { %v6237_v48 = vadd.f32 %v10909_v38, %v5607_v8  ;;  %v6238_v21 = vadd.f32 %v10911_v5, %v5608_v27  ;;  %v3749_v32 = vsel %vm10891_vm3, %v19849_v26, %v19848_v35  ;;  %v3754_v57 = vsel %vm10887_vm2, %v19851_v53, %v19850_v29  ;;  %v19852_v8 = vld [vmem:[#allocation573_spill] sm:$0xff]  ;;  %v19853_v27 = vld [vmem:[#allocation288_spill] sm:$0xff] }
 0x7d3   :  { %6850 = vst [vmem:[%s18139_s3 + $0x1290] sm:$0xff] %v6231_v39  ;;  %6851 = vst.msk [vmem:[%s18139_s3 + $0x1298] sm:$0xff] %vm6256_vm6, %v6232_v10  ;;  %v4969_v45 = vpop.permute.xlu1 %4968  ;;  %v3755_v33 = vsel %vm10891_vm3, %v19851_v53, %v19850_v29 }
 0x7d4   :  { %6856 = vst [vmem:[%s18139_s3 + $0x12c0] sm:$0xff] %v6237_v48  ;;  %6857 = vst.msk [vmem:[%s18139_s3 + $0x12c8] sm:$0xff] %vm6256_vm6, %v6238_v21  ;;  %v5605_v2 = vsel %vm10901_vm4, %v4969_v45, %v3740_v46  ;;  %v5606_v43 = vsel %vm10905_vm5, %v4969_v45, %v3741_v36  ;;  %v4981_v62 = vpop.permute.xlu0 %4980  ;;  %v3752_v48 = vsel %vm10887_vm2, %v19853_v27, %v19852_v8 }
 0x7d5   :  { %v6235_v6 = vadd.f32 %v10909_v38, %v5605_v2  ;;  %v6236_v20 = vadd.f32 %v10911_v5, %v5606_v43  ;;  %v5611_v52 = vsel %vm10901_vm4, %v4981_v62, %v3746_v56  ;;  %v5612_v13 = vsel %vm10905_vm5, %v4981_v62, %v3747_v19 }
 0x7d6   :  { %v6241_v28 = vadd.f32 %v10909_v38, %v5611_v52  ;;  %v6242_v61 = vadd.f32 %v10911_v5, %v5612_v13  ;;  %v3753_v21 = vsel %vm10891_vm3, %v19853_v27, %v19852_v8  ;;  %v3758_v46 = vsel %vm10887_vm2, %v19855_v34, %v19854_v58  ;;  %v19856_v52 = vld [vmem:[#allocation575_spill] sm:$0xff]  ;;  %v19857_v13 = vld [vmem:[#allocation290_spill] sm:$0xff] }
 0x7d7   :  { %6854 = vst [vmem:[%s18139_s3 + $0x12b0] sm:$0xff] %v6235_v6  ;;  %6855 = vst.msk [vmem:[%s18139_s3 + $0x12b8] sm:$0xff] %vm6256_vm6, %v6236_v20  ;;  %v4977_v51 = vpop.permute.xlu1 %4976  ;;  %v3759_v45 = vsel %vm10891_vm3, %v19855_v34, %v19854_v58 }
 0x7d8   :  { %6860 = vst [vmem:[%s18139_s3 + $0x12e0] sm:$0xff] %v6241_v28  ;;  %6861 = vst.msk [vmem:[%s18139_s3 + $0x12e8] sm:$0xff] %vm6256_vm6, %v6242_v61  ;;  %v5609_v18 = vsel %vm10901_vm4, %v4977_v51, %v3744_v42  ;;  %v5610_v63 = vsel %vm10905_vm5, %v4977_v51, %v3745_v59  ;;  %v4989_v54 = vpop.permute.xlu0 %4988  ;;  %v3756_v28 = vsel %vm10887_vm2, %v19857_v13, %v19856_v52 }
 0x7d9   :  { %v6239_v3 = vadd.f32 %v10909_v38, %v5609_v18  ;;  %v6240_v16 = vadd.f32 %v10911_v5, %v5610_v63  ;;  %v5615_v41 = vsel %vm10901_vm4, %v4989_v54, %v3750_v60  ;;  %v5616_v23 = vsel %vm10905_vm5, %v4989_v54, %v3751_v7 }
 0x7da   :  { %v6245_v50 = vadd.f32 %v10909_v38, %v5615_v41  ;;  %v6246_v47 = vadd.f32 %v10911_v5, %v5616_v23  ;;  %v3757_v61 = vsel %vm10891_vm3, %v19857_v13, %v19856_v52 }
 0x7db   :  { %6858 = vst [vmem:[%s18139_s3 + $0x12d0] sm:$0xff] %v6239_v3  ;;  %6859 = vst.msk [vmem:[%s18139_s3 + $0x12d8] sm:$0xff] %vm6256_vm6, %v6240_v16  ;;  %v4985_v44 = vpop.permute.xlu1 %4984 }
 0x7dc   :  { %6864 = vst [vmem:[%s18139_s3 + $0x1300] sm:$0xff] %v6245_v50  ;;  %6865 = vst.msk [vmem:[%s18139_s3 + $0x1308] sm:$0xff] %vm6256_vm6, %v6246_v47  ;;  %v5613_v0 = vsel %vm10901_vm4, %v4985_v44, %v3748_v15  ;;  %v5614_v24 = vsel %vm10905_vm5, %v4985_v44, %v3749_v32  ;;  %v4997_v9 = vpop.permute.xlu0 %4996 }
 0x7dd   :  { %v6243_v12 = vadd.f32 %v10909_v38, %v5613_v0  ;;  %v6244_v49 = vadd.f32 %v10911_v5, %v5614_v24  ;;  %v5619_v4 = vsel %vm10901_vm4, %v4997_v9, %v3754_v57  ;;  %v5620_v1 = vsel %vm10905_vm5, %v4997_v9, %v3755_v33 }
 0x7de   :  { %v6249_v39 = vadd.f32 %v10909_v38, %v5619_v4  ;;  %v6250_v10 = vadd.f32 %v10911_v5, %v5620_v1 }
 0x7df   :  { %6862 = vst [vmem:[%s18139_s3 + $0x12f0] sm:$0xff] %v6243_v12  ;;  %6863 = vst.msk [vmem:[%s18139_s3 + $0x12f8] sm:$0xff] %vm6256_vm6, %v6244_v49  ;;  %v4993_v36 = vpop.permute.xlu1 %4992 }
 0x7e0   :  { %6868 = vst [vmem:[%s18139_s3 + $0x1320] sm:$0xff] %v6249_v39  ;;  %6869 = vst.msk [vmem:[%s18139_s3 + $0x1328] sm:$0xff] %vm6256_vm6, %v6250_v10  ;;  %v5617_v11 = vsel %vm10901_vm4, %v4993_v36, %v3752_v48  ;;  %v5618_v17 = vsel %vm10905_vm5, %v4993_v36, %v3753_v21  ;;  %v5005_v56 = vpop.permute.xlu0 %5004 }
 0x7e1   :  { %v6247_v19 = vadd.f32 %v10909_v38, %v5617_v11  ;;  %v6248_v2 = vadd.f32 %v10911_v5, %v5618_v17  ;;  %v5623_v43 = vsel %vm10901_vm4, %v5005_v56, %v3758_v46  ;;  %v5624_v62 = vsel %vm10905_vm5, %v5005_v56, %v3759_v45 }
 0x7e2   :  { %v6253_v6 = vadd.f32 %v10909_v38, %v5623_v43  ;;  %v6254_v20 = vadd.f32 %v10911_v5, %v5624_v62 }
 0x7e3   :  { %6866 = vst [vmem:[%s18139_s3 + $0x1310] sm:$0xff] %v6247_v19  ;;  %6867 = vst.msk [vmem:[%s18139_s3 + $0x1318] sm:$0xff] %vm6256_vm6, %v6248_v2  ;;  %v5001_v25 = vpop.permute.xlu1 %5000 }
 0x7e4   :  { %6872 = vst [vmem:[%s18139_s3 + $0x1340] sm:$0x3] %v6253_v6  ;;  %6874 = vst.msk [vmem:[%s18139_s3 + $0x1348] sm:$0x3] %vm6873_vm7, %v6254_v20  ;;  %v5621_v22 = vsel %vm10901_vm4, %v5001_v25, %v3756_v28  ;;  %v5622_v30 = vsel %vm10905_vm5, %v5001_v25, %v3757_v61 }
 0x7e5   :  { %v6251_v31 = vadd.f32 %v10909_v38, %v5621_v22  ;;  %v6252_v42 = vadd.f32 %v10911_v5, %v5622_v30 }
 0x7e7   :  { %6870 = vst [vmem:[%s18139_s3 + $0x1330] sm:$0xff] %v6251_v31  ;;  %6871 = vst.msk [vmem:[%s18139_s3 + $0x1338] sm:$0xff] %vm6256_vm6, %v6252_v42 }
 0x7e8   :  { %6879 = vsyncpa [#allocation3], 1 }
 0x7e9   :  { %6880 = vsyncpa [#allocation5], 1 }

</bundles_post_ra>
